<compile_context>
chip_gen: v7x
topology: tpu7x:2x2x1
jax: 0.10.0
libtpu: 0.0.40
codegen_flags: <defaults>
</compile_context>

<pallas_src>
import functools
import math

import jax
import jax.numpy as jnp
import numpy as np
from jax import lax
from jax.experimental import pallas as pl
from jax.experimental.pallas import tpu as pltpu

SQRT_HALF = math.sqrt(0.5)


def _round_up(n, m):
    return ((n + m - 1) // m) * m


# --------------------------------------------------------------------------
# Fused kernel: one batch element per grid step, whole layer stack in VMEM.
# --------------------------------------------------------------------------
def converter_kernel(x_ref, fc1_w_ref, fc1_b_ref,
                     dcv_w_ref, dcv_b_ref, cv_w_ref, cv_b_ref,
                     fc2_w_ref, fc2_b_ref, o_ref, halo_ref, ilv_ref,
                     *, n_conv, n_deconv, K, Cp, T_in, strided_interleave):
    pad = (K - 1) // 2

    # Zero ONLY the halo edge rows of the "same"-padding scratch: the leading
    # `pad` rows plus the trailing `pad` rows of each distinct stage length.
    # (The middle is always overwritten; correctness relies on deconvs preceding
    # convs so the stage length T never shrinks -- asserted in the wrapper.)
    zeros_pad = jnp.zeros((pad, Cp), dtype=halo_ref.dtype)
    halo_ref[0:pad, :] = zeros_pad
    t_stage, seen = T_in, set()
    for idx in range(n_conv):
        if idx < n_deconv:
            t_stage *= 2
        if t_stage not in seen:
            seen.add(t_stage)
            halo_ref[pad + t_stage:pad + t_stage + pad, :] = zeros_pad

    # ---- fc1 (Linear): (T, in_dim) @ (in_dim, Cp) ----
    h = (jnp.dot(x_ref[0].astype(jnp.bfloat16), fc1_w_ref[...],
                 preferred_element_type=jnp.float32) + fc1_b_ref[...])

    for idx in range(n_conv):
        if idx < n_deconv:
            # ---- ConvTranspose1d(kernel=2, stride=2): out[2t+k] = h[t] @ w[k] + b
            T = h.shape[0]
            # Fused even/odd matmul: weights pre-concatenated along the output
            # dim -> one (T, Cp) @ (Cp, 2*Cp) MXU push (256 output lanes).
            ph = jnp.dot(h.astype(jnp.bfloat16), dcv_w_ref[idx],
                         preferred_element_type=jnp.float32)
            bias = dcv_b_ref[idx]
            even = ph[:, :Cp] + bias          # phase 0 -> rows 2t
            odd = ph[:, Cp:] + bias           # phase 1 -> rows 2t+1
            if strided_interleave:
                # Linear-cost interleave: two strided sublane stores (f32) into
                # the interleave scratch, then one contiguous load.  Residual h
                # stays exact f32 in registers.
                ilv_ref[pl.ds(0, T, stride=2), :] = even
                ilv_ref[pl.ds(1, T, stride=2), :] = odd
                h = ilv_ref[0:2 * T, :]
            else:
                # Compatibility fallback only: exact 0/1 selection matmuls
                # (O(T^2) f32 -- the old stopgap path).
                r = lax.broadcasted_iota(jnp.int32, (2 * T, T), 0)
                c = lax.broadcasted_iota(jnp.int32, (2 * T, T), 1)
                h = (jnp.dot((r == 2 * c).astype(jnp.float32), even,
                             preferred_element_type=jnp.float32)
                     + jnp.dot((r == 2 * c + 1).astype(jnp.float32), odd,
                               preferred_element_type=jnp.float32))

        # ---- dropout(eval) = identity; Conv1d("same",K) + GLU + residual*sqrt(.5)
        T = h.shape[0]
        # Store the activation once as bf16; the K im2col windows read bf16.
        halo_ref[pad:pad + T, :] = h.astype(jnp.bfloat16)
        cols = jnp.concatenate([halo_ref[k:k + T, :] for k in range(K)], axis=-1)
        acc = (jnp.dot(cols, cv_w_ref[idx], preferred_element_type=jnp.float32)
               + cv_b_ref[idx])                          # (T, 2*Cp)
        a = acc[:, :Cp]                                  # value half (lane tile)
        g = acc[:, Cp:]                                  # gate half
        h = (a * jax.nn.sigmoid(g) + h) * SQRT_HALF      # residual stays f32

    # ---- fc2 + sigmoid ----
    y = (jnp.dot(h.astype(jnp.bfloat16), fc2_w_ref[...],
                 preferred_element_type=jnp.float32) + fc2_b_ref[...])
    o_ref[0] = jax.nn.sigmoid(y).astype(o_ref.dtype)


# --------------------------------------------------------------------------
# Wrapper: a single pallas_call for the whole Converter forward (eval mode).
# --------------------------------------------------------------------------
def converter_forward(x, params, *, fast=True, slice_output=True):
    B, T, in_dim = x.shape
    n_conv, n_deconv = params["n_conv"], params["n_deconv"]
    K, Cp, Dp = params["K"], params["Cp"], params["Dp"]
    pad = (K - 1) // 2
    # Halo-scratch reuse + edge-only zeroing require deconvs to precede convs
    # (stage length T is monotone nondecreasing).
    assert n_deconv <= n_conv
    T_out = T * (2 ** n_deconv)
    halo_rows = _round_up(T_out + 2 * pad, 16)   # bf16 scratch: 16-row packing
    ilv_rows = _round_up(T_out, 8)               # f32 interleave staging

    kernel = functools.partial(
        converter_kernel, n_conv=n_conv, n_deconv=n_deconv, K=K, Cp=Cp,
        T_in=T, strided_interleave=fast)

    # Weight blocks never change across the batch grid -> single-buffer them
    # (halves resident weight VMEM; matters on v7x's 64 MiB VMEM).
    wkw = {"pipeline_mode": pl.Buffered(1)} if fast else {}

    def wspec(shape):
        return pl.BlockSpec(shape, lambda i, _r=len(shape): (0,) * _r, **wkw)

    out = pl.pallas_call(
        kernel,
        out_shape=jax.ShapeDtypeStruct((B, T_out, Dp), jnp.float32),
        grid=(B,),
        in_specs=[
            pl.BlockSpec((1, T, in_dim), lambda i: (i, 0, 0)),
            wspec((in_dim, Cp)),
            wspec((1, Cp)),
            wspec((n_deconv, Cp, 2 * Cp)),
            wspec((n_deconv, 1, Cp)),
            wspec((n_conv, K * Cp, 2 * Cp)),
            wspec((n_conv, 1, 2 * Cp)),
            wspec((Cp, Dp)),
            wspec((1, Dp)),
        ],
        out_specs=pl.BlockSpec((1, T_out, Dp), lambda i: (i, 0, 0)),
        scratch_shapes=[pltpu.VMEM((halo_rows, Cp), jnp.bfloat16),
                        pltpu.VMEM((ilv_rows, Cp), jnp.float32)],
        compiler_params=pltpu.CompilerParams(
            dimension_semantics=("parallel",),          # both v7x TCs get work
            vmem_limit_bytes=48 * 1024 * 1024),         # > v5e/v6e defaults, < v7x phys
    )(x, params["fc1_w"], params["fc1_b"],
      params["deconv_w"], params["deconv_b"],
      params["conv_w"], params["conv_b"],
      params["fc2_w"], params["fc2_b"])
    if slice_output:
        # Optional: consumers that accept the 128-lane-padded output can skip this
        # extra HBM pass (review item 9).
        out = out[:, :, :params["out_dim"]]
    return out


# --------------------------------------------------------------------------
# Pure-jnp reference mirroring the kernel math (same bf16 weights / casts).
# --------------------------------------------------------------------------
def converter_reference(x, params):
    Cp, K = params["Cp"], params["K"]
    n_conv, n_deconv = params["n_conv"], params["n_deconv"]
    pad = (K - 1) // 2
    bf16, f32 = jnp.bfloat16, jnp.float32

    def mm(a, w):
        return jnp.einsum("btc,cd->btd", a.astype(bf16), w,
                          preferred_element_type=f32)

    h = mm(x, params["fc1_w"]) + params["fc1_b"]
    for idx in range(n_conv):
        if idx < n_deconv:
            B, T, _ = h.shape
            even = mm(h, params["deconv_w"][idx][:, :Cp])
            odd = mm(h, params["deconv_w"][idx][:, Cp:])
            h = (jnp.stack([even, odd], axis=2).reshape(B, 2 * T, Cp)
                 + params["deconv_b"][idx])
        B, T, _ = h.shape
        hp = jnp.pad(h, ((0, 0), (pad, pad), (0, 0)))
        cols = jnp.concatenate([hp[:, k:k + T, :] for k in range(K)], axis=-1)
        acc = (jnp.einsum("btk,kd->btd", cols.astype(bf16),
                          params["conv_w"][idx], preferred_element_type=f32)
               + params["conv_b"][idx])
        a, g = acc[..., :Cp], acc[..., Cp:]
        h = (a * jax.nn.sigmoid(g) + h) * SQRT_HALF
    y = jax.nn.sigmoid(mm(h, params["fc2_w"]) + params["fc2_b"])
    return y[..., :params["out_dim"]]


# --------------------------------------------------------------------------
# Deterministic synthetic parameters (weight_norm identity at init; biases zero).
# Channel dims are embedded into 128-lane-padded, bf16 MXU-ready layouts.
# --------------------------------------------------------------------------
def init_params(key, in_dim, out_dim, channels, kernel_size, n_conv, n_deconv,
                dropout=0.1):
    C, K = channels, kernel_size
    Cp = _round_up(max(C, 128), 128)
    Dp = _round_up(max(out_dim, 128), 128)
    keys = jax.random.split(key, 2 + n_conv + n_deconv)

    def embed(w, shape):
        out = jnp.zeros(shape, jnp.float32)
        return out.at[tuple(slice(0, s) for s in w.shape)].set(w)

    p = {"C": C, "Cp": Cp, "K": K, "out_dim": out_dim, "Dp": Dp,
         "n_conv": n_conv, "n_deconv": n_deconv}

    # fc1 / fc2 (Linear)
    w = jax.random.normal(keys[0], (in_dim, C), jnp.float32) * math.sqrt(
        (1.0 - dropout) / in_dim)
    p["fc1_w"] = embed(w, (in_dim, Cp)).astype(jnp.bfloat16)
    p["fc1_b"] = jnp.zeros((1, Cp), jnp.float32)

    w = jax.random.normal(keys[1], (C, out_dim), jnp.float32) * math.sqrt(
        (1.0 - dropout) / C)
    p["fc2_w"] = embed(w, (Cp, Dp)).astype(jnp.bfloat16)
    p["fc2_b"] = jnp.zeros((1, Dp), jnp.float32)

    # ConvTranspose1d(k=2, s=2): even/odd phase weights fused along the output
    # dim -> (layer, Cp, 2*Cp): lanes [0:Cp)=phase 0 (even), [Cp:2Cp)=phase 1.
    dws = []
    for i in range(n_deconv):
        std = math.sqrt(4.0 * (1.0 - dropout) / (2 * C))
        w = jax.random.normal(keys[2 + i], (2, C, C), jnp.float32) * std
        wp = jnp.zeros((Cp, 2 * Cp), jnp.float32)
        wp = wp.at[:C, :C].set(w[0])
        wp = wp.at[:C, Cp:Cp + C].set(w[1])
        dws.append(wp)
    p["deconv_w"] = jnp.stack(dws, 0).astype(jnp.bfloat16)
    p["deconv_b"] = jnp.zeros((n_deconv, 1, Cp), jnp.float32)

    # Conv1d(k=K, "same") -> GLU: im2col weight (layer, K*Cp, 2*Cp) with the
    # value half in lanes [0:Cp) and the gate half in lanes [Cp:2Cp).
    cws = []
    for i in range(n_conv):
        std = math.sqrt(4.0 * (1.0 - dropout) / (K * C))
        w = jax.random.normal(keys[2 + n_deconv + i], (K, C, 2 * C),
                              jnp.float32) * std
        wp = jnp.zeros((K, Cp, 2 * Cp), jnp.float32)
        wp = wp.at[:, :C, :C].set(w[:, :, :C])            # value half
        wp = wp.at[:, :C, Cp:Cp + C].set(w[:, :, C:])     # gate half
        cws.append(wp.reshape(K * Cp, 2 * Cp))
    p["conv_w"] = jnp.stack(cws, 0).astype(jnp.bfloat16)
    p["conv_b"] = jnp.zeros((n_conv, 1, 2 * Cp), jnp.float32)
    return p


if __name__ == "__main__":
    B, T, in_dim, out_dim = 2, 8, 16, 24
    channels, kernel_size = 32, 5
    n_conv, n_deconv = 6, 2

    key = jax.random.PRNGKey(0)
    k_param, k_x = jax.random.split(key)
    params = init_params(k_param, in_dim, out_dim, channels, kernel_size,
                         n_conv, n_deconv)
    x = jax.random.normal(k_x, (B, T, in_dim), jnp.float32)

    try:
        y = jax.block_until_ready(converter_forward(x, params, fast=True))
    except Exception:
        # Compatibility fallback (older Mosaic without strided-store /
        # single-buffer support): exact selection-matmul interleave, default
        # double buffering.  Same math, known-good lowering path.
        y = jax.block_until_ready(converter_forward(x, params, fast=False))
    y_ref = jax.block_until_ready(converter_reference(x, params))

    expected_T = T * (2 ** n_deconv)          # two stride-2 deconvs -> 4x upsample
    assert y.shape == (B, expected_T, out_dim), y.shape
    assert bool(jnp.all(jnp.isfinite(y)))
    assert bool(jnp.all((y >= 0.0) & (y <= 1.0)))   # final sigmoid range
    np.testing.assert_allclose(np.asarray(y), np.asarray(y_ref),
                               rtol=2e-2, atol=2e-2)
    print("KERNEL_OK")
</pallas_src>

<mosaic_0001>
module attributes {stable_mosaic.version = 11 : i64} {
  func.func @converter_kernel(%arg0: i32, %arg1: memref<1x8x16xf32, #tpu.memory_space<vmem>>, %arg2: memref<16x128xbf16, #tpu.memory_space<vmem>>, %arg3: memref<1x128xf32, #tpu.memory_space<vmem>>, %arg4: memref<2x128x256xbf16, #tpu.memory_space<vmem>>, %arg5: memref<2x1x128xf32, #tpu.memory_space<vmem>>, %arg6: memref<6x640x256xbf16, #tpu.memory_space<vmem>>, %arg7: memref<6x1x256xf32, #tpu.memory_space<vmem>>, %arg8: memref<128x128xbf16, #tpu.memory_space<vmem>>, %arg9: memref<1x128xf32, #tpu.memory_space<vmem>>, %arg10: memref<1x32x128xf32, #tpu.memory_space<vmem>>, %arg11: memref<48x128xbf16, #tpu.memory_space<vmem>>, %arg12: memref<32x128xf32, #tpu.memory_space<vmem>>) attributes {dimension_semantics = [#tpu.dimension_semantics<parallel>], iteration_bounds = array<i64: 2>, scalar_prefetch = 0 : i64, scratch_operands = 2 : i64, tpu.core_type = #tpu.core_type<tc>, window_params = [{transform_indices = @transform_0, window_bounds = array<i64: 1, 8, 16>}, {pipeline_mode = #tpu.pipeline_mode<synchronous>, transform_indices = @transform_1, window_bounds = array<i64: 16, 128>}, {pipeline_mode = #tpu.pipeline_mode<synchronous>, transform_indices = @transform_2, window_bounds = array<i64: 1, 128>}, {pipeline_mode = #tpu.pipeline_mode<synchronous>, transform_indices = @transform_3, window_bounds = array<i64: 2, 128, 256>}, {pipeline_mode = #tpu.pipeline_mode<synchronous>, transform_indices = @transform_4, window_bounds = array<i64: 2, 1, 128>}, {pipeline_mode = #tpu.pipeline_mode<synchronous>, transform_indices = @transform_5, window_bounds = array<i64: 6, 640, 256>}, {pipeline_mode = #tpu.pipeline_mode<synchronous>, transform_indices = @transform_6, window_bounds = array<i64: 6, 1, 256>}, {pipeline_mode = #tpu.pipeline_mode<synchronous>, transform_indices = @transform_7, window_bounds = array<i64: 128, 128>}, {pipeline_mode = #tpu.pipeline_mode<synchronous>, transform_indices = @transform_8, window_bounds = array<i64: 1, 128>}, {transform_indices = @transform_9, window_bounds = array<i64: 1, 32, 128>}]} {
    %cst = arith.constant 0.000000e+00 : bf16
    %0 = vector.broadcast %cst : bf16 to vector<2x128xbf16>
    %c0 = arith.constant 0 : index
    %c0_0 = arith.constant 0 : index
    %1 = vector.load %arg11[%c0, %c0_0] : memref<48x128xbf16, #tpu.memory_space<vmem>>, vector<2x128xbf16>
    tpu.vector_store %arg11[%c0, %c0_0], %0 {strides = array<i32>} : memref<48x128xbf16, #tpu.memory_space<vmem>>, vector<2x128xbf16>,
    %c18 = arith.constant 18 : index
    %c0_1 = arith.constant 0 : index
    %2 = vector.load %arg11[%c18, %c0_1] : memref<48x128xbf16, #tpu.memory_space<vmem>>, vector<2x128xbf16>
    tpu.vector_store %arg11[%c18, %c0_1], %0 {strides = array<i32>} : memref<48x128xbf16, #tpu.memory_space<vmem>>, vector<2x128xbf16>,
    %c34 = arith.constant 34 : index
    %c0_2 = arith.constant 0 : index
    %3 = vector.load %arg11[%c34, %c0_2] : memref<48x128xbf16, #tpu.memory_space<vmem>>, vector<2x128xbf16>
    tpu.vector_store %arg11[%c34, %c0_2], %0 {strides = array<i32>} : memref<48x128xbf16, #tpu.memory_space<vmem>>, vector<2x128xbf16>,
    %c0_3 = arith.constant 0 : index
    %c0_4 = arith.constant 0 : index
    %c0_5 = arith.constant 0 : index
    %4 = vector.load %arg1[%c0_3, %c0_4, %c0_5] : memref<1x8x16xf32, #tpu.memory_space<vmem>>, vector<1x8x16xf32>
    %5 = vector.shape_cast %4 : vector<1x8x16xf32> to vector<8x16xf32>
    %6 = arith.truncf %5 : vector<8x16xf32> to vector<8x16xbf16>
    %c0_6 = arith.constant 0 : index
    %c0_7 = arith.constant 0 : index
    %7 = vector.load %arg2[%c0_6, %c0_7] : memref<16x128xbf16, #tpu.memory_space<vmem>>, vector<16x128xbf16>
    %cst_8 = arith.constant dense<0.000000e+00> : vector<8x128xf32>
    %8 = tpu.matmul %6, %7, %cst_8 {dimension_numbers = #tpu.dot_dimension_numbers<[1], [0], [0], [1], [0, 0, 1, 1], [], []>} : vector<8x16xbf16>, vector<16x128xbf16>, vector<8x128xf32> -> vector<8x128xf32>
    %c0_9 = arith.constant 0 : index
    %c0_10 = arith.constant 0 : index
    %9 = vector.load %arg3[%c0_9, %c0_10] : memref<1x128xf32, #tpu.memory_space<vmem>>, vector<1x128xf32>
    %10 = vector.broadcast %9 : vector<1x128xf32> to vector<8x128xf32>
    %11 = arith.addf %8, %10 : vector<8x128xf32>
    %12 = arith.truncf %11 : vector<8x128xf32> to vector<8x128xbf16>
    %c0_11 = arith.constant 0 : index
    %c0_12 = arith.constant 0 : index
    %c0_13 = arith.constant 0 : index
    %13 = vector.load %arg4[%c0_11, %c0_12, %c0_13] : memref<2x128x256xbf16, #tpu.memory_space<vmem>>, vector<1x128x256xbf16>
    %14 = vector.shape_cast %13 : vector<1x128x256xbf16> to vector<128x256xbf16>
    %cst_14 = arith.constant dense<0.000000e+00> : vector<8x256xf32>
    %15 = tpu.matmul %12, %14, %cst_14 {dimension_numbers = #tpu.dot_dimension_numbers<[1], [0], [0], [1], [0, 0, 1, 1], [], []>} : vector<8x128xbf16>, vector<128x256xbf16>, vector<8x256xf32> -> vector<8x256xf32>
    %c0_15 = arith.constant 0 : index
    %c0_16 = arith.constant 0 : index
    %c0_17 = arith.constant 0 : index
    %16 = vector.load %arg5[%c0_15, %c0_16, %c0_17] : memref<2x1x128xf32, #tpu.memory_space<vmem>>, vector<1x1x128xf32>
    %17 = vector.shape_cast %16 : vector<1x1x128xf32> to vector<1x128xf32>
    %18 = vector.extract_strided_slice %15 {offsets = [0, 0], sizes = [8, 128], strides = [1, 1]} : vector<8x256xf32> to vector<8x128xf32>
    %19 = vector.broadcast %17 : vector<1x128xf32> to vector<8x128xf32>
    %20 = arith.addf %18, %19 : vector<8x128xf32>
    %21 = vector.extract_strided_slice %15 {offsets = [0, 128], sizes = [8, 128], strides = [1, 1]} : vector<8x256xf32> to vector<8x128xf32>
    %22 = vector.broadcast %17 : vector<1x128xf32> to vector<8x128xf32>
    %23 = arith.addf %21, %22 : vector<8x128xf32>
    %c0_18 = arith.constant 0 : index
    %c0_19 = arith.constant 0 : index
    %24 = tpu.strided_load %arg12[%c0_18, %c0_19] {strides = array<i32: 2, 1>} : memref<32x128xf32, #tpu.memory_space<vmem>>, vector<8x128xf32>
    tpu.strided_store %arg12[%c0_18, %c0_19], %20 {strides = array<i32: 2, 1>} : memref<32x128xf32, #tpu.memory_space<vmem>>, vector<8x128xf32>
    %c1 = arith.constant 1 : index
    %c0_20 = arith.constant 0 : index
    %25 = tpu.strided_load %arg12[%c1, %c0_20] {strides = array<i32: 2, 1>} : memref<32x128xf32, #tpu.memory_space<vmem>>, vector<8x128xf32>
    tpu.strided_store %arg12[%c1, %c0_20], %23 {strides = array<i32: 2, 1>} : memref<32x128xf32, #tpu.memory_space<vmem>>, vector<8x128xf32>
    %c0_21 = arith.constant 0 : index
    %c0_22 = arith.constant 0 : index
    %26 = vector.load %arg12[%c0_21, %c0_22] : memref<32x128xf32, #tpu.memory_space<vmem>>, vector<16x128xf32>
    %27 = arith.truncf %26 : vector<16x128xf32> to vector<16x128xbf16>
    %c2 = arith.constant 2 : index
    %c0_23 = arith.constant 0 : index
    %28 = vector.load %arg11[%c2, %c0_23] : memref<48x128xbf16, #tpu.memory_space<vmem>>, vector<16x128xbf16>
    tpu.vector_store %arg11[%c2, %c0_23], %27 {strides = array<i32>} : memref<48x128xbf16, #tpu.memory_space<vmem>>, vector<16x128xbf16>,
    %c0_24 = arith.constant 0 : index
    %c0_25 = arith.constant 0 : index
    %29 = vector.load %arg11[%c0_24, %c0_25] : memref<48x128xbf16, #tpu.memory_space<vmem>>, vector<16x128xbf16>
    %c1_26 = arith.constant 1 : index
    %c0_27 = arith.constant 0 : index
    %30 = vector.load %arg11[%c1_26, %c0_27] : memref<48x128xbf16, #tpu.memory_space<vmem>>, vector<16x128xbf16>
    %c2_28 = arith.constant 2 : index
    %c0_29 = arith.constant 0 : index
    %31 = vector.load %arg11[%c2_28, %c0_29] : memref<48x128xbf16, #tpu.memory_space<vmem>>, vector<16x128xbf16>
    %c3 = arith.constant 3 : index
    %c0_30 = arith.constant 0 : index
    %32 = vector.load %arg11[%c3, %c0_30] : memref<48x128xbf16, #tpu.memory_space<vmem>>, vector<16x128xbf16>
    %c4 = arith.constant 4 : index
    %c0_31 = arith.constant 0 : index
    %33 = vector.load %arg11[%c4, %c0_31] : memref<48x128xbf16, #tpu.memory_space<vmem>>, vector<16x128xbf16>
    %34 = tpu.concatenate %29, %30, %31, %32, %33 in 1 : vector<16x128xbf16>, vector<16x128xbf16>, vector<16x128xbf16>, vector<16x128xbf16>, vector<16x128xbf16> -> vector<16x640xbf16>
    %c0_32 = arith.constant 0 : index
    %c0_33 = arith.constant 0 : index
    %c0_34 = arith.constant 0 : index
    %35 = vector.load %arg6[%c0_32, %c0_33, %c0_34] : memref<6x640x256xbf16, #tpu.memory_space<vmem>>, vector<1x640x256xbf16>
    %36 = vector.shape_cast %35 : vector<1x640x256xbf16> to vector<640x256xbf16>
    %cst_35 = arith.constant dense<0.000000e+00> : vector<16x256xf32>
    %37 = tpu.matmul %34, %36, %cst_35 {dimension_numbers = #tpu.dot_dimension_numbers<[1], [0], [0], [1], [0, 0, 1, 1], [], []>} : vector<16x640xbf16>, vector<640x256xbf16>, vector<16x256xf32> -> vector<16x256xf32>
    %c0_36 = arith.constant 0 : index
    %c0_37 = arith.constant 0 : index
    %c0_38 = arith.constant 0 : index
    %38 = vector.load %arg7[%c0_36, %c0_37, %c0_38] : memref<6x1x256xf32, #tpu.memory_space<vmem>>, vector<1x1x256xf32>
    %39 = vector.shape_cast %38 : vector<1x1x256xf32> to vector<1x256xf32>
    %40 = vector.broadcast %39 : vector<1x256xf32> to vector<16x256xf32>
    %41 = arith.addf %37, %40 : vector<16x256xf32>
    %42 = vector.extract_strided_slice %41 {offsets = [0, 0], sizes = [16, 128], strides = [1, 1]} : vector<16x256xf32> to vector<16x128xf32>
    %43 = vector.extract_strided_slice %41 {offsets = [0, 128], sizes = [16, 128], strides = [1, 1]} : vector<16x256xf32> to vector<16x128xf32>
    %44 = arith.negf %43 : vector<16x128xf32>
    %45 = math.exp %44 : vector<16x128xf32>
    %cst_39 = arith.constant 1.000000e+00 : f32
    %46 = vector.broadcast %cst_39 : f32 to vector<16x128xf32>
    %47 = arith.addf %46, %45 : vector<16x128xf32>
    %48 = arith.divf %46, %47 : vector<16x128xf32>
    %49 = arith.mulf %42, %48 : vector<16x128xf32>
    %50 = arith.addf %49, %26 : vector<16x128xf32>
    %cst_40 = arith.constant 0.707106769 : f32
    %51 = vector.broadcast %cst_40 : f32 to vector<16x128xf32>
    %52 = arith.mulf %50, %51 : vector<16x128xf32>
    %53 = arith.truncf %52 : vector<16x128xf32> to vector<16x128xbf16>
    %c1_41 = arith.constant 1 : index
    %c0_42 = arith.constant 0 : index
    %c0_43 = arith.constant 0 : index
    %54 = vector.load %arg4[%c1_41, %c0_42, %c0_43] : memref<2x128x256xbf16, #tpu.memory_space<vmem>>, vector<1x128x256xbf16>
    %55 = vector.shape_cast %54 : vector<1x128x256xbf16> to vector<128x256xbf16>
    %cst_44 = arith.constant dense<0.000000e+00> : vector<16x256xf32>
    %56 = tpu.matmul %53, %55, %cst_44 {dimension_numbers = #tpu.dot_dimension_numbers<[1], [0], [0], [1], [0, 0, 1, 1], [], []>} : vector<16x128xbf16>, vector<128x256xbf16>, vector<16x256xf32> -> vector<16x256xf32>
    %c1_45 = arith.constant 1 : index
    %c0_46 = arith.constant 0 : index
    %c0_47 = arith.constant 0 : index
    %57 = vector.load %arg5[%c1_45, %c0_46, %c0_47] : memref<2x1x128xf32, #tpu.memory_space<vmem>>, vector<1x1x128xf32>
    %58 = vector.shape_cast %57 : vector<1x1x128xf32> to vector<1x128xf32>
    %59 = vector.extract_strided_slice %56 {offsets = [0, 0], sizes = [16, 128], strides = [1, 1]} : vector<16x256xf32> to vector<16x128xf32>
    %60 = vector.broadcast %58 : vector<1x128xf32> to vector<16x128xf32>
    %61 = arith.addf %59, %60 : vector<16x128xf32>
    %62 = vector.extract_strided_slice %56 {offsets = [0, 128], sizes = [16, 128], strides = [1, 1]} : vector<16x256xf32> to vector<16x128xf32>
    %63 = vector.broadcast %58 : vector<1x128xf32> to vector<16x128xf32>
    %64 = arith.addf %62, %63 : vector<16x128xf32>
    %c0_48 = arith.constant 0 : index
    %c0_49 = arith.constant 0 : index
    %65 = tpu.strided_load %arg12[%c0_48, %c0_49] {strides = array<i32: 2, 1>} : memref<32x128xf32, #tpu.memory_space<vmem>>, vector<16x128xf32>
    tpu.strided_store %arg12[%c0_48, %c0_49], %61 {strides = array<i32: 2, 1>} : memref<32x128xf32, #tpu.memory_space<vmem>>, vector<16x128xf32>
    %c1_50 = arith.constant 1 : index
    %c0_51 = arith.constant 0 : index
    %66 = tpu.strided_load %arg12[%c1_50, %c0_51] {strides = array<i32: 2, 1>} : memref<32x128xf32, #tpu.memory_space<vmem>>, vector<16x128xf32>
    tpu.strided_store %arg12[%c1_50, %c0_51], %64 {strides = array<i32: 2, 1>} : memref<32x128xf32, #tpu.memory_space<vmem>>, vector<16x128xf32>
    %c0_52 = arith.constant 0 : index
    %c0_53 = arith.constant 0 : index
    %67 = vector.load %arg12[%c0_52, %c0_53] : memref<32x128xf32, #tpu.memory_space<vmem>>, vector<32x128xf32>
    %68 = arith.truncf %67 : vector<32x128xf32> to vector<32x128xbf16>
    %c2_54 = arith.constant 2 : index
    %c0_55 = arith.constant 0 : index
    %69 = vector.load %arg11[%c2_54, %c0_55] : memref<48x128xbf16, #tpu.memory_space<vmem>>, vector<32x128xbf16>
    tpu.vector_store %arg11[%c2_54, %c0_55], %68 {strides = array<i32>} : memref<48x128xbf16, #tpu.memory_space<vmem>>, vector<32x128xbf16>,
    %c0_56 = arith.constant 0 : index
    %c0_57 = arith.constant 0 : index
    %70 = vector.load %arg11[%c0_56, %c0_57] : memref<48x128xbf16, #tpu.memory_space<vmem>>, vector<32x128xbf16>
    %c1_58 = arith.constant 1 : index
    %c0_59 = arith.constant 0 : index
    %71 = vector.load %arg11[%c1_58, %c0_59] : memref<48x128xbf16, #tpu.memory_space<vmem>>, vector<32x128xbf16>
    %c2_60 = arith.constant 2 : index
    %c0_61 = arith.constant 0 : index
    %72 = vector.load %arg11[%c2_60, %c0_61] : memref<48x128xbf16, #tpu.memory_space<vmem>>, vector<32x128xbf16>
    %c3_62 = arith.constant 3 : index
    %c0_63 = arith.constant 0 : index
    %73 = vector.load %arg11[%c3_62, %c0_63] : memref<48x128xbf16, #tpu.memory_space<vmem>>, vector<32x128xbf16>
    %c4_64 = arith.constant 4 : index
    %c0_65 = arith.constant 0 : index
    %74 = vector.load %arg11[%c4_64, %c0_65] : memref<48x128xbf16, #tpu.memory_space<vmem>>, vector<32x128xbf16>
    %75 = tpu.concatenate %70, %71, %72, %73, %74 in 1 : vector<32x128xbf16>, vector<32x128xbf16>, vector<32x128xbf16>, vector<32x128xbf16>, vector<32x128xbf16> -> vector<32x640xbf16>
    %c1_66 = arith.constant 1 : index
    %c0_67 = arith.constant 0 : index
    %c0_68 = arith.constant 0 : index
    %76 = vector.load %arg6[%c1_66, %c0_67, %c0_68] : memref<6x640x256xbf16, #tpu.memory_space<vmem>>, vector<1x640x256xbf16>
    %77 = vector.shape_cast %76 : vector<1x640x256xbf16> to vector<640x256xbf16>
    %cst_69 = arith.constant dense<0.000000e+00> : vector<32x256xf32>
    %78 = tpu.matmul %75, %77, %cst_69 {dimension_numbers = #tpu.dot_dimension_numbers<[1], [0], [0], [1], [0, 0, 1, 1], [], []>} : vector<32x640xbf16>, vector<640x256xbf16>, vector<32x256xf32> -> vector<32x256xf32>
    %c1_70 = arith.constant 1 : index
    %c0_71 = arith.constant 0 : index
    %c0_72 = arith.constant 0 : index
    %79 = vector.load %arg7[%c1_70, %c0_71, %c0_72] : memref<6x1x256xf32, #tpu.memory_space<vmem>>, vector<1x1x256xf32>
    %80 = vector.shape_cast %79 : vector<1x1x256xf32> to vector<1x256xf32>
    %81 = vector.broadcast %80 : vector<1x256xf32> to vector<32x256xf32>
    %82 = arith.addf %78, %81 : vector<32x256xf32>
    %83 = vector.extract_strided_slice %82 {offsets = [0, 0], sizes = [32, 128], strides = [1, 1]} : vector<32x256xf32> to vector<32x128xf32>
    %84 = vector.extract_strided_slice %82 {offsets = [0, 128], sizes = [32, 128], strides = [1, 1]} : vector<32x256xf32> to vector<32x128xf32>
    %85 = arith.negf %84 : vector<32x128xf32>
    %86 = math.exp %85 : vector<32x128xf32>
    %cst_73 = arith.constant 1.000000e+00 : f32
    %87 = vector.broadcast %cst_73 : f32 to vector<32x128xf32>
    %88 = arith.addf %87, %86 : vector<32x128xf32>
    %89 = arith.divf %87, %88 : vector<32x128xf32>
    %90 = arith.mulf %83, %89 : vector<32x128xf32>
    %91 = arith.addf %90, %67 : vector<32x128xf32>
    %cst_74 = arith.constant 0.707106769 : f32
    %92 = vector.broadcast %cst_74 : f32 to vector<32x128xf32>
    %93 = arith.mulf %91, %92 : vector<32x128xf32>
    %94 = arith.truncf %93 : vector<32x128xf32> to vector<32x128xbf16>
    %c2_75 = arith.constant 2 : index
    %c0_76 = arith.constant 0 : index
    %95 = vector.load %arg11[%c2_75, %c0_76] : memref<48x128xbf16, #tpu.memory_space<vmem>>, vector<32x128xbf16>
    tpu.vector_store %arg11[%c2_75, %c0_76], %94 {strides = array<i32>} : memref<48x128xbf16, #tpu.memory_space<vmem>>, vector<32x128xbf16>,
    %c0_77 = arith.constant 0 : index
    %c0_78 = arith.constant 0 : index
    %96 = vector.load %arg11[%c0_77, %c0_78] : memref<48x128xbf16, #tpu.memory_space<vmem>>, vector<32x128xbf16>
    %c1_79 = arith.constant 1 : index
    %c0_80 = arith.constant 0 : index
    %97 = vector.load %arg11[%c1_79, %c0_80] : memref<48x128xbf16, #tpu.memory_space<vmem>>, vector<32x128xbf16>
    %c2_81 = arith.constant 2 : index
    %c0_82 = arith.constant 0 : index
    %98 = vector.load %arg11[%c2_81, %c0_82] : memref<48x128xbf16, #tpu.memory_space<vmem>>, vector<32x128xbf16>
    %c3_83 = arith.constant 3 : index
    %c0_84 = arith.constant 0 : index
    %99 = vector.load %arg11[%c3_83, %c0_84] : memref<48x128xbf16, #tpu.memory_space<vmem>>, vector<32x128xbf16>
    %c4_85 = arith.constant 4 : index
    %c0_86 = arith.constant 0 : index
    %100 = vector.load %arg11[%c4_85, %c0_86] : memref<48x128xbf16, #tpu.memory_space<vmem>>, vector<32x128xbf16>
    %101 = tpu.concatenate %96, %97, %98, %99, %100 in 1 : vector<32x128xbf16>, vector<32x128xbf16>, vector<32x128xbf16>, vector<32x128xbf16>, vector<32x128xbf16> -> vector<32x640xbf16>
    %c2_87 = arith.constant 2 : index
    %c0_88 = arith.constant 0 : index
    %c0_89 = arith.constant 0 : index
    %102 = vector.load %arg6[%c2_87, %c0_88, %c0_89] : memref<6x640x256xbf16, #tpu.memory_space<vmem>>, vector<1x640x256xbf16>
    %103 = vector.shape_cast %102 : vector<1x640x256xbf16> to vector<640x256xbf16>
    %cst_90 = arith.constant dense<0.000000e+00> : vector<32x256xf32>
    %104 = tpu.matmul %101, %103, %cst_90 {dimension_numbers = #tpu.dot_dimension_numbers<[1], [0], [0], [1], [0, 0, 1, 1], [], []>} : vector<32x640xbf16>, vector<640x256xbf16>, vector<32x256xf32> -> vector<32x256xf32>
    %c2_91 = arith.constant 2 : index
    %c0_92 = arith.constant 0 : index
    %c0_93 = arith.constant 0 : index
    %105 = vector.load %arg7[%c2_91, %c0_92, %c0_93] : memref<6x1x256xf32, #tpu.memory_space<vmem>>, vector<1x1x256xf32>
    %106 = vector.shape_cast %105 : vector<1x1x256xf32> to vector<1x256xf32>
    %107 = vector.broadcast %106 : vector<1x256xf32> to vector<32x256xf32>
    %108 = arith.addf %104, %107 : vector<32x256xf32>
    %109 = vector.extract_strided_slice %108 {offsets = [0, 0], sizes = [32, 128], strides = [1, 1]} : vector<32x256xf32> to vector<32x128xf32>
    %110 = vector.extract_strided_slice %108 {offsets = [0, 128], sizes = [32, 128], strides = [1, 1]} : vector<32x256xf32> to vector<32x128xf32>
    %111 = arith.negf %110 : vector<32x128xf32>
    %112 = math.exp %111 : vector<32x128xf32>
    %cst_94 = arith.constant 1.000000e+00 : f32
    %113 = vector.broadcast %cst_94 : f32 to vector<32x128xf32>
    %114 = arith.addf %113, %112 : vector<32x128xf32>
    %115 = arith.divf %113, %114 : vector<32x128xf32>
    %116 = arith.mulf %109, %115 : vector<32x128xf32>
    %117 = arith.addf %116, %93 : vector<32x128xf32>
    %cst_95 = arith.constant 0.707106769 : f32
    %118 = vector.broadcast %cst_95 : f32 to vector<32x128xf32>
    %119 = arith.mulf %117, %118 : vector<32x128xf32>
    %120 = arith.truncf %119 : vector<32x128xf32> to vector<32x128xbf16>
    %c2_96 = arith.constant 2 : index
    %c0_97 = arith.constant 0 : index
    %121 = vector.load %arg11[%c2_96, %c0_97] : memref<48x128xbf16, #tpu.memory_space<vmem>>, vector<32x128xbf16>
    tpu.vector_store %arg11[%c2_96, %c0_97], %120 {strides = array<i32>} : memref<48x128xbf16, #tpu.memory_space<vmem>>, vector<32x128xbf16>,
    %c0_98 = arith.constant 0 : index
    %c0_99 = arith.constant 0 : index
    %122 = vector.load %arg11[%c0_98, %c0_99] : memref<48x128xbf16, #tpu.memory_space<vmem>>, vector<32x128xbf16>
    %c1_100 = arith.constant 1 : index
    %c0_101 = arith.constant 0 : index
    %123 = vector.load %arg11[%c1_100, %c0_101] : memref<48x128xbf16, #tpu.memory_space<vmem>>, vector<32x128xbf16>
    %c2_102 = arith.constant 2 : index
    %c0_103 = arith.constant 0 : index
    %124 = vector.load %arg11[%c2_102, %c0_103] : memref<48x128xbf16, #tpu.memory_space<vmem>>, vector<32x128xbf16>
    %c3_104 = arith.constant 3 : index
    %c0_105 = arith.constant 0 : index
    %125 = vector.load %arg11[%c3_104, %c0_105] : memref<48x128xbf16, #tpu.memory_space<vmem>>, vector<32x128xbf16>
    %c4_106 = arith.constant 4 : index
    %c0_107 = arith.constant 0 : index
    %126 = vector.load %arg11[%c4_106, %c0_107] : memref<48x128xbf16, #tpu.memory_space<vmem>>, vector<32x128xbf16>
    %127 = tpu.concatenate %122, %123, %124, %125, %126 in 1 : vector<32x128xbf16>, vector<32x128xbf16>, vector<32x128xbf16>, vector<32x128xbf16>, vector<32x128xbf16> -> vector<32x640xbf16>
    %c3_108 = arith.constant 3 : index
    %c0_109 = arith.constant 0 : index
    %c0_110 = arith.constant 0 : index
    %128 = vector.load %arg6[%c3_108, %c0_109, %c0_110] : memref<6x640x256xbf16, #tpu.memory_space<vmem>>, vector<1x640x256xbf16>
    %129 = vector.shape_cast %128 : vector<1x640x256xbf16> to vector<640x256xbf16>
    %cst_111 = arith.constant dense<0.000000e+00> : vector<32x256xf32>
    %130 = tpu.matmul %127, %129, %cst_111 {dimension_numbers = #tpu.dot_dimension_numbers<[1], [0], [0], [1], [0, 0, 1, 1], [], []>} : vector<32x640xbf16>, vector<640x256xbf16>, vector<32x256xf32> -> vector<32x256xf32>
    %c3_112 = arith.constant 3 : index
    %c0_113 = arith.constant 0 : index
    %c0_114 = arith.constant 0 : index
    %131 = vector.load %arg7[%c3_112, %c0_113, %c0_114] : memref<6x1x256xf32, #tpu.memory_space<vmem>>, vector<1x1x256xf32>
    %132 = vector.shape_cast %131 : vector<1x1x256xf32> to vector<1x256xf32>
    %133 = vector.broadcast %132 : vector<1x256xf32> to vector<32x256xf32>
    %134 = arith.addf %130, %133 : vector<32x256xf32>
    %135 = vector.extract_strided_slice %134 {offsets = [0, 0], sizes = [32, 128], strides = [1, 1]} : vector<32x256xf32> to vector<32x128xf32>
    %136 = vector.extract_strided_slice %134 {offsets = [0, 128], sizes = [32, 128], strides = [1, 1]} : vector<32x256xf32> to vector<32x128xf32>
    %137 = arith.negf %136 : vector<32x128xf32>
    %138 = math.exp %137 : vector<32x128xf32>
    %cst_115 = arith.constant 1.000000e+00 : f32
    %139 = vector.broadcast %cst_115 : f32 to vector<32x128xf32>
    %140 = arith.addf %139, %138 : vector<32x128xf32>
    %141 = arith.divf %139, %140 : vector<32x128xf32>
    %142 = arith.mulf %135, %141 : vector<32x128xf32>
    %143 = arith.addf %142, %119 : vector<32x128xf32>
    %cst_116 = arith.constant 0.707106769 : f32
    %144 = vector.broadcast %cst_116 : f32 to vector<32x128xf32>
    %145 = arith.mulf %143, %144 : vector<32x128xf32>
    %146 = arith.truncf %145 : vector<32x128xf32> to vector<32x128xbf16>
    %c2_117 = arith.constant 2 : index
    %c0_118 = arith.constant 0 : index
    %147 = vector.load %arg11[%c2_117, %c0_118] : memref<48x128xbf16, #tpu.memory_space<vmem>>, vector<32x128xbf16>
    tpu.vector_store %arg11[%c2_117, %c0_118], %146 {strides = array<i32>} : memref<48x128xbf16, #tpu.memory_space<vmem>>, vector<32x128xbf16>,
    %c0_119 = arith.constant 0 : index
    %c0_120 = arith.constant 0 : index
    %148 = vector.load %arg11[%c0_119, %c0_120] : memref<48x128xbf16, #tpu.memory_space<vmem>>, vector<32x128xbf16>
    %c1_121 = arith.constant 1 : index
    %c0_122 = arith.constant 0 : index
    %149 = vector.load %arg11[%c1_121, %c0_122] : memref<48x128xbf16, #tpu.memory_space<vmem>>, vector<32x128xbf16>
    %c2_123 = arith.constant 2 : index
    %c0_124 = arith.constant 0 : index
    %150 = vector.load %arg11[%c2_123, %c0_124] : memref<48x128xbf16, #tpu.memory_space<vmem>>, vector<32x128xbf16>
    %c3_125 = arith.constant 3 : index
    %c0_126 = arith.constant 0 : index
    %151 = vector.load %arg11[%c3_125, %c0_126] : memref<48x128xbf16, #tpu.memory_space<vmem>>, vector<32x128xbf16>
    %c4_127 = arith.constant 4 : index
    %c0_128 = arith.constant 0 : index
    %152 = vector.load %arg11[%c4_127, %c0_128] : memref<48x128xbf16, #tpu.memory_space<vmem>>, vector<32x128xbf16>
    %153 = tpu.concatenate %148, %149, %150, %151, %152 in 1 : vector<32x128xbf16>, vector<32x128xbf16>, vector<32x128xbf16>, vector<32x128xbf16>, vector<32x128xbf16> -> vector<32x640xbf16>
    %c4_129 = arith.constant 4 : index
    %c0_130 = arith.constant 0 : index
    %c0_131 = arith.constant 0 : index
    %154 = vector.load %arg6[%c4_129, %c0_130, %c0_131] : memref<6x640x256xbf16, #tpu.memory_space<vmem>>, vector<1x640x256xbf16>
    %155 = vector.shape_cast %154 : vector<1x640x256xbf16> to vector<640x256xbf16>
    %cst_132 = arith.constant dense<0.000000e+00> : vector<32x256xf32>
    %156 = tpu.matmul %153, %155, %cst_132 {dimension_numbers = #tpu.dot_dimension_numbers<[1], [0], [0], [1], [0, 0, 1, 1], [], []>} : vector<32x640xbf16>, vector<640x256xbf16>, vector<32x256xf32> -> vector<32x256xf32>
    %c4_133 = arith.constant 4 : index
    %c0_134 = arith.constant 0 : index
    %c0_135 = arith.constant 0 : index
    %157 = vector.load %arg7[%c4_133, %c0_134, %c0_135] : memref<6x1x256xf32, #tpu.memory_space<vmem>>, vector<1x1x256xf32>
    %158 = vector.shape_cast %157 : vector<1x1x256xf32> to vector<1x256xf32>
    %159 = vector.broadcast %158 : vector<1x256xf32> to vector<32x256xf32>
    %160 = arith.addf %156, %159 : vector<32x256xf32>
    %161 = vector.extract_strided_slice %160 {offsets = [0, 0], sizes = [32, 128], strides = [1, 1]} : vector<32x256xf32> to vector<32x128xf32>
    %162 = vector.extract_strided_slice %160 {offsets = [0, 128], sizes = [32, 128], strides = [1, 1]} : vector<32x256xf32> to vector<32x128xf32>
    %163 = arith.negf %162 : vector<32x128xf32>
    %164 = math.exp %163 : vector<32x128xf32>
    %cst_136 = arith.constant 1.000000e+00 : f32
    %165 = vector.broadcast %cst_136 : f32 to vector<32x128xf32>
    %166 = arith.addf %165, %164 : vector<32x128xf32>
    %167 = arith.divf %165, %166 : vector<32x128xf32>
    %168 = arith.mulf %161, %167 : vector<32x128xf32>
    %169 = arith.addf %168, %145 : vector<32x128xf32>
    %cst_137 = arith.constant 0.707106769 : f32
    %170 = vector.broadcast %cst_137 : f32 to vector<32x128xf32>
    %171 = arith.mulf %169, %170 : vector<32x128xf32>
    %172 = arith.truncf %171 : vector<32x128xf32> to vector<32x128xbf16>
    %c2_138 = arith.constant 2 : index
    %c0_139 = arith.constant 0 : index
    %173 = vector.load %arg11[%c2_138, %c0_139] : memref<48x128xbf16, #tpu.memory_space<vmem>>, vector<32x128xbf16>
    tpu.vector_store %arg11[%c2_138, %c0_139], %172 {strides = array<i32>} : memref<48x128xbf16, #tpu.memory_space<vmem>>, vector<32x128xbf16>,
    %c0_140 = arith.constant 0 : index
    %c0_141 = arith.constant 0 : index
    %174 = vector.load %arg11[%c0_140, %c0_141] : memref<48x128xbf16, #tpu.memory_space<vmem>>, vector<32x128xbf16>
    %c1_142 = arith.constant 1 : index
    %c0_143 = arith.constant 0 : index
    %175 = vector.load %arg11[%c1_142, %c0_143] : memref<48x128xbf16, #tpu.memory_space<vmem>>, vector<32x128xbf16>
    %c2_144 = arith.constant 2 : index
    %c0_145 = arith.constant 0 : index
    %176 = vector.load %arg11[%c2_144, %c0_145] : memref<48x128xbf16, #tpu.memory_space<vmem>>, vector<32x128xbf16>
    %c3_146 = arith.constant 3 : index
    %c0_147 = arith.constant 0 : index
    %177 = vector.load %arg11[%c3_146, %c0_147] : memref<48x128xbf16, #tpu.memory_space<vmem>>, vector<32x128xbf16>
    %c4_148 = arith.constant 4 : index
    %c0_149 = arith.constant 0 : index
    %178 = vector.load %arg11[%c4_148, %c0_149] : memref<48x128xbf16, #tpu.memory_space<vmem>>, vector<32x128xbf16>
    %179 = tpu.concatenate %174, %175, %176, %177, %178 in 1 : vector<32x128xbf16>, vector<32x128xbf16>, vector<32x128xbf16>, vector<32x128xbf16>, vector<32x128xbf16> -> vector<32x640xbf16>
    %c5 = arith.constant 5 : index
    %c0_150 = arith.constant 0 : index
    %c0_151 = arith.constant 0 : index
    %180 = vector.load %arg6[%c5, %c0_150, %c0_151] : memref<6x640x256xbf16, #tpu.memory_space<vmem>>, vector<1x640x256xbf16>
    %181 = vector.shape_cast %180 : vector<1x640x256xbf16> to vector<640x256xbf16>
    %cst_152 = arith.constant dense<0.000000e+00> : vector<32x256xf32>
    %182 = tpu.matmul %179, %181, %cst_152 {dimension_numbers = #tpu.dot_dimension_numbers<[1], [0], [0], [1], [0, 0, 1, 1], [], []>} : vector<32x640xbf16>, vector<640x256xbf16>, vector<32x256xf32> -> vector<32x256xf32>
    %c5_153 = arith.constant 5 : index
    %c0_154 = arith.constant 0 : index
    %c0_155 = arith.constant 0 : index
    %183 = vector.load %arg7[%c5_153, %c0_154, %c0_155] : memref<6x1x256xf32, #tpu.memory_space<vmem>>, vector<1x1x256xf32>
    %184 = vector.shape_cast %183 : vector<1x1x256xf32> to vector<1x256xf32>
    %185 = vector.broadcast %184 : vector<1x256xf32> to vector<32x256xf32>
    %186 = arith.addf %182, %185 : vector<32x256xf32>
    %187 = vector.extract_strided_slice %186 {offsets = [0, 0], sizes = [32, 128], strides = [1, 1]} : vector<32x256xf32> to vector<32x128xf32>
    %188 = vector.extract_strided_slice %186 {offsets = [0, 128], sizes = [32, 128], strides = [1, 1]} : vector<32x256xf32> to vector<32x128xf32>
    %189 = arith.negf %188 : vector<32x128xf32>
    %190 = math.exp %189 : vector<32x128xf32>
    %cst_156 = arith.constant 1.000000e+00 : f32
    %191 = vector.broadcast %cst_156 : f32 to vector<32x128xf32>
    %192 = arith.addf %191, %190 : vector<32x128xf32>
    %193 = arith.divf %191, %192 : vector<32x128xf32>
    %194 = arith.mulf %187, %193 : vector<32x128xf32>
    %195 = arith.addf %194, %171 : vector<32x128xf32>
    %cst_157 = arith.constant 0.707106769 : f32
    %196 = vector.broadcast %cst_157 : f32 to vector<32x128xf32>
    %197 = arith.mulf %195, %196 : vector<32x128xf32>
    %198 = arith.truncf %197 : vector<32x128xf32> to vector<32x128xbf16>
    %c0_158 = arith.constant 0 : index
    %c0_159 = arith.constant 0 : index
    %199 = vector.load %arg8[%c0_158, %c0_159] : memref<128x128xbf16, #tpu.memory_space<vmem>>, vector<128x128xbf16>
    %cst_160 = arith.constant dense<0.000000e+00> : vector<32x128xf32>
    %200 = tpu.matmul %198, %199, %cst_160 {dimension_numbers = #tpu.dot_dimension_numbers<[1], [0], [0], [1], [0, 0, 1, 1], [], []>} : vector<32x128xbf16>, vector<128x128xbf16>, vector<32x128xf32> -> vector<32x128xf32>
    %c0_161 = arith.constant 0 : index
    %c0_162 = arith.constant 0 : index
    %201 = vector.load %arg9[%c0_161, %c0_162] : memref<1x128xf32, #tpu.memory_space<vmem>>, vector<1x128xf32>
    %202 = vector.broadcast %201 : vector<1x128xf32> to vector<32x128xf32>
    %203 = arith.addf %200, %202 : vector<32x128xf32>
    %204 = arith.negf %203 : vector<32x128xf32>
    %205 = math.exp %204 : vector<32x128xf32>
    %cst_163 = arith.constant 1.000000e+00 : f32
    %206 = vector.broadcast %cst_163 : f32 to vector<32x128xf32>
    %207 = arith.addf %206, %205 : vector<32x128xf32>
    %208 = arith.divf %206, %207 : vector<32x128xf32>
    %c0_164 = arith.constant 0 : index
    %c0_165 = arith.constant 0 : index
    %c0_166 = arith.constant 0 : index
    %209 = vector.load %arg10[%c0_164, %c0_165, %c0_166] : memref<1x32x128xf32, #tpu.memory_space<vmem>>, vector<1x32x128xf32>
    %210 = vector.shape_cast %209 : vector<1x32x128xf32> to vector<32x128xf32>
    %211 = vector.shape_cast %208 : vector<32x128xf32> to vector<1x32x128xf32>
    tpu.vector_store %arg10[%c0_164, %c0_165, %c0_166], %211 {strides = array<i32>} : memref<1x32x128xf32, #tpu.memory_space<vmem>>, vector<1x32x128xf32>,
    return
  }
  func.func @transform_0(%arg0: i32) -> (i32, i32, i32) {
    %c0_i32 = arith.constant 0 : i32
    %c0_i32_0 = arith.constant 0 : i32
    %c0_i32_1 = arith.constant 0 : i32
    return %arg0, %c0_i32, %c0_i32_0 : i32, i32, i32
  }
  func.func @transform_1(%arg0: i32) -> (i32, i32) {
    %c0_i32 = arith.constant 0 : i32
    %c0_i32_0 = arith.constant 0 : i32
    %c0_i32_1 = arith.constant 0 : i32
    return %c0_i32, %c0_i32_0 : i32, i32
  }
  func.func @transform_2(%arg0: i32) -> (i32, i32) {
    %c0_i32 = arith.constant 0 : i32
    %c0_i32_0 = arith.constant 0 : i32
    %c0_i32_1 = arith.constant 0 : i32
    return %c0_i32, %c0_i32_0 : i32, i32
  }
  func.func @transform_3(%arg0: i32) -> (i32, i32, i32) {
    %c0_i32 = arith.constant 0 : i32
    %c0_i32_0 = arith.constant 0 : i32
    %c0_i32_1 = arith.constant 0 : i32
    %c0_i32_2 = arith.constant 0 : i32
    return %c0_i32, %c0_i32_0, %c0_i32_1 : i32, i32, i32
  }
  func.func @transform_4(%arg0: i32) -> (i32, i32, i32) {
    %c0_i32 = arith.constant 0 : i32
    %c0_i32_0 = arith.constant 0 : i32
    %c0_i32_1 = arith.constant 0 : i32
    %c0_i32_2 = arith.constant 0 : i32
    return %c0_i32, %c0_i32_0, %c0_i32_1 : i32, i32, i32
  }
  func.func @transform_5(%arg0: i32) -> (i32, i32, i32) {
    %c0_i32 = arith.constant 0 : i32
    %c0_i32_0 = arith.constant 0 : i32
    %c0_i32_1 = arith.constant 0 : i32
    %c0_i32_2 = arith.constant 0 : i32
    return %c0_i32, %c0_i32_0, %c0_i32_1 : i32, i32, i32
  }
  func.func @transform_6(%arg0: i32) -> (i32, i32, i32) {
    %c0_i32 = arith.constant 0 : i32
    %c0_i32_0 = arith.constant 0 : i32
    %c0_i32_1 = arith.constant 0 : i32
    %c0_i32_2 = arith.constant 0 : i32
    return %c0_i32, %c0_i32_0, %c0_i32_1 : i32, i32, i32
  }
  func.func @transform_7(%arg0: i32) -> (i32, i32) {
    %c0_i32 = arith.constant 0 : i32
    %c0_i32_0 = arith.constant 0 : i32
    %c0_i32_1 = arith.constant 0 : i32
    return %c0_i32, %c0_i32_0 : i32, i32
  }
  func.func @transform_8(%arg0: i32) -> (i32, i32) {
    %c0_i32 = arith.constant 0 : i32
    %c0_i32_0 = arith.constant 0 : i32
    %c0_i32_1 = arith.constant 0 : i32
    return %c0_i32, %c0_i32_0 : i32, i32
  }
  func.func @transform_9(%arg0: i32) -> (i32, i32, i32) {
    %c0_i32 = arith.constant 0 : i32
    %c0_i32_0 = arith.constant 0 : i32
    %c0_i32_1 = arith.constant 0 : i32
    return %arg0, %c0_i32, %c0_i32_0 : i32, i32, i32
  }
}

module attributes {stable_mosaic.version = 11 : i64} {
  func.func @converter_kernel(%arg0: i32, %arg1: memref<1x8x16xf32, #tpu.memory_space<vmem>>, %arg2: memref<16x128xbf16, #tpu.memory_space<vmem>>, %arg3: memref<1x128xf32, #tpu.memory_space<vmem>>, %arg4: memref<2x128x256xbf16, #tpu.memory_space<vmem>>, %arg5: memref<2x1x128xf32, #tpu.memory_space<vmem>>, %arg6: memref<6x640x256xbf16, #tpu.memory_space<vmem>>, %arg7: memref<6x1x256xf32, #tpu.memory_space<vmem>>, %arg8: memref<128x128xbf16, #tpu.memory_space<vmem>>, %arg9: memref<1x128xf32, #tpu.memory_space<vmem>>, %arg10: memref<1x32x128xf32, #tpu.memory_space<vmem>>, %arg11: memref<48x128xbf16, #tpu.memory_space<vmem>>, %arg12: memref<32x128xf32, #tpu.memory_space<vmem>>) attributes {dimension_semantics = [#tpu.dimension_semantics<parallel>], iteration_bounds = array<i64: 2>, scalar_prefetch = 0 : i64, scratch_operands = 2 : i64, tpu.core_type = #tpu.core_type<tc>, window_params = [{transform_indices = @transform_0, window_bounds = array<i64: 1, 8, 16>}, {pipeline_mode = #tpu.pipeline_mode<synchronous>, transform_indices = @transform_1, window_bounds = array<i64: 16, 128>}, {pipeline_mode = #tpu.pipeline_mode<synchronous>, transform_indices = @transform_2, window_bounds = array<i64: 1, 128>}, {pipeline_mode = #tpu.pipeline_mode<synchronous>, transform_indices = @transform_3, window_bounds = array<i64: 2, 128, 256>}, {pipeline_mode = #tpu.pipeline_mode<synchronous>, transform_indices = @transform_4, window_bounds = array<i64: 2, 1, 128>}, {pipeline_mode = #tpu.pipeline_mode<synchronous>, transform_indices = @transform_5, window_bounds = array<i64: 6, 640, 256>}, {pipeline_mode = #tpu.pipeline_mode<synchronous>, transform_indices = @transform_6, window_bounds = array<i64: 6, 1, 256>}, {pipeline_mode = #tpu.pipeline_mode<synchronous>, transform_indices = @transform_7, window_bounds = array<i64: 128, 128>}, {pipeline_mode = #tpu.pipeline_mode<synchronous>, transform_indices = @transform_8, window_bounds = array<i64: 1, 128>}, {transform_indices = @transform_9, window_bounds = array<i64: 1, 32, 128>}]} {
    %cst = arith.constant 0.000000e+00 : bf16
    %0 = vector.broadcast %cst : bf16 to vector<2x128xbf16>
    %c0 = arith.constant 0 : index
    %c0_0 = arith.constant 0 : index
    %1 = vector.load %arg11[%c0, %c0_0] : memref<48x128xbf16, #tpu.memory_space<vmem>>, vector<2x128xbf16>
    tpu.vector_store %arg11[%c0, %c0_0], %0 {strides = array<i32>} : memref<48x128xbf16, #tpu.memory_space<vmem>>, vector<2x128xbf16>,
    %c18 = arith.constant 18 : index
    %c0_1 = arith.constant 0 : index
    %2 = vector.load %arg11[%c18, %c0_1] : memref<48x128xbf16, #tpu.memory_space<vmem>>, vector<2x128xbf16>
    tpu.vector_store %arg11[%c18, %c0_1], %0 {strides = array<i32>} : memref<48x128xbf16, #tpu.memory_space<vmem>>, vector<2x128xbf16>,
    %c34 = arith.constant 34 : index
    %c0_2 = arith.constant 0 : index
    %3 = vector.load %arg11[%c34, %c0_2] : memref<48x128xbf16, #tpu.memory_space<vmem>>, vector<2x128xbf16>
    tpu.vector_store %arg11[%c34, %c0_2], %0 {strides = array<i32>} : memref<48x128xbf16, #tpu.memory_space<vmem>>, vector<2x128xbf16>,
    %c0_3 = arith.constant 0 : index
    %c0_4 = arith.constant 0 : index
    %c0_5 = arith.constant 0 : index
    %4 = vector.load %arg1[%c0_3, %c0_4, %c0_5] : memref<1x8x16xf32, #tpu.memory_space<vmem>>, vector<1x8x16xf32>
    %5 = vector.shape_cast %4 : vector<1x8x16xf32> to vector<8x16xf32>
    %6 = arith.truncf %5 : vector<8x16xf32> to vector<8x16xbf16>
    %c0_6 = arith.constant 0 : index
    %c0_7 = arith.constant 0 : index
    %7 = vector.load %arg2[%c0_6, %c0_7] : memref<16x128xbf16, #tpu.memory_space<vmem>>, vector<16x128xbf16>
    %cst_8 = arith.constant dense<0.000000e+00> : vector<8x128xf32>
    %8 = tpu.matmul %6, %7, %cst_8 {dimension_numbers = #tpu.dot_dimension_numbers<[1], [0], [0], [1], [0, 0, 1, 1], [], []>} : vector<8x16xbf16>, vector<16x128xbf16>, vector<8x128xf32> -> vector<8x128xf32>
    %c0_9 = arith.constant 0 : index
    %c0_10 = arith.constant 0 : index
    %9 = vector.load %arg3[%c0_9, %c0_10] : memref<1x128xf32, #tpu.memory_space<vmem>>, vector<1x128xf32>
    %10 = vector.broadcast %9 : vector<1x128xf32> to vector<8x128xf32>
    %11 = arith.addf %8, %10 : vector<8x128xf32>
    %12 = arith.truncf %11 : vector<8x128xf32> to vector<8x128xbf16>
    %c0_11 = arith.constant 0 : index
    %c0_12 = arith.constant 0 : index
    %c0_13 = arith.constant 0 : index
    %13 = vector.load %arg4[%c0_11, %c0_12, %c0_13] : memref<2x128x256xbf16, #tpu.memory_space<vmem>>, vector<1x128x256xbf16>
    %14 = vector.shape_cast %13 : vector<1x128x256xbf16> to vector<128x256xbf16>
    %cst_14 = arith.constant dense<0.000000e+00> : vector<8x256xf32>
    %15 = tpu.matmul %12, %14, %cst_14 {dimension_numbers = #tpu.dot_dimension_numbers<[1], [0], [0], [1], [0, 0, 1, 1], [], []>} : vector<8x128xbf16>, vector<128x256xbf16>, vector<8x256xf32> -> vector<8x256xf32>
    %c0_15 = arith.constant 0 : index
    %c0_16 = arith.constant 0 : index
    %c0_17 = arith.constant 0 : index
    %16 = vector.load %arg5[%c0_15, %c0_16, %c0_17] : memref<2x1x128xf32, #tpu.memory_space<vmem>>, vector<1x1x128xf32>
    %17 = vector.shape_cast %16 : vector<1x1x128xf32> to vector<1x128xf32>
    %18 = vector.extract_strided_slice %15 {offsets = [0, 0], sizes = [8, 128], strides = [1, 1]} : vector<8x256xf32> to vector<8x128xf32>
    %19 = vector.broadcast %17 : vector<1x128xf32> to vector<8x128xf32>
    %20 = arith.addf %18, %19 : vector<8x128xf32>
    %21 = vector.extract_strided_slice %15 {offsets = [0, 128], sizes = [8, 128], strides = [1, 1]} : vector<8x256xf32> to vector<8x128xf32>
    %22 = vector.broadcast %17 : vector<1x128xf32> to vector<8x128xf32>
    %23 = arith.addf %21, %22 : vector<8x128xf32>
    %24 = tpu.iota {dimensions = array<i32: 0>} : vector<16x8xi32>
    %25 = tpu.iota {dimensions = array<i32: 1>} : vector<16x8xi32>
    %c2_i32 = arith.constant 2 : i32
    %26 = vector.broadcast %c2_i32 : i32 to vector<16x8xi32>
    %27 = arith.muli %26, %25 : vector<16x8xi32>
    %28 = arith.cmpi eq, %24, %27 : vector<16x8xi32>
    %29 = arith.extui %28 : vector<16x8xi1> to vector<16x8xi32>
    %30 = arith.sitofp %29 : vector<16x8xi32> to vector<16x8xf32>
    %cst_18 = arith.constant dense<0.000000e+00> : vector<16x128xf32>
    %31 = tpu.matmul %30, %20, %cst_18 {dimension_numbers = #tpu.dot_dimension_numbers<[1], [0], [0], [1], [0, 0, 1, 1], [], []>} : vector<16x8xf32>, vector<8x128xf32>, vector<16x128xf32> -> vector<16x128xf32>
    %c2_i32_19 = arith.constant 2 : i32
    %32 = vector.broadcast %c2_i32_19 : i32 to vector<16x8xi32>
    %33 = arith.muli %32, %25 : vector<16x8xi32>
    %c1_i32 = arith.constant 1 : i32
    %34 = vector.broadcast %c1_i32 : i32 to vector<16x8xi32>
    %35 = arith.addi %33, %34 : vector<16x8xi32>
    %36 = arith.cmpi eq, %24, %35 : vector<16x8xi32>
    %37 = arith.extui %36 : vector<16x8xi1> to vector<16x8xi32>
    %38 = arith.sitofp %37 : vector<16x8xi32> to vector<16x8xf32>
    %cst_20 = arith.constant dense<0.000000e+00> : vector<16x128xf32>
    %39 = tpu.matmul %38, %23, %cst_20 {dimension_numbers = #tpu.dot_dimension_numbers<[1], [0], [0], [1], [0, 0, 1, 1], [], []>} : vector<16x8xf32>, vector<8x128xf32>, vector<16x128xf32> -> vector<16x128xf32>
    %40 = arith.addf %31, %39 : vector<16x128xf32>
    %41 = arith.truncf %40 : vector<16x128xf32> to vector<16x128xbf16>
    %c2 = arith.constant 2 : index
    %c0_21 = arith.constant 0 : index
    %42 = vector.load %arg11[%c2, %c0_21] : memref<48x128xbf16, #tpu.memory_space<vmem>>, vector<16x128xbf16>
    tpu.vector_store %arg11[%c2, %c0_21], %41 {strides = array<i32>} : memref<48x128xbf16, #tpu.memory_space<vmem>>, vector<16x128xbf16>,
    %c0_22 = arith.constant 0 : index
    %c0_23 = arith.constant 0 : index
    %43 = vector.load %arg11[%c0_22, %c0_23] : memref<48x128xbf16, #tpu.memory_space<vmem>>, vector<16x128xbf16>
    %c1 = arith.constant 1 : index
    %c0_24 = arith.constant 0 : index
    %44 = vector.load %arg11[%c1, %c0_24] : memref<48x128xbf16, #tpu.memory_space<vmem>>, vector<16x128xbf16>
    %c2_25 = arith.constant 2 : index
    %c0_26 = arith.constant 0 : index
    %45 = vector.load %arg11[%c2_25, %c0_26] : memref<48x128xbf16, #tpu.memory_space<vmem>>, vector<16x128xbf16>
    %c3 = arith.constant 3 : index
    %c0_27 = arith.constant 0 : index
    %46 = vector.load %arg11[%c3, %c0_27] : memref<48x128xbf16, #tpu.memory_space<vmem>>, vector<16x128xbf16>
    %c4 = arith.constant 4 : index
    %c0_28 = arith.constant 0 : index
    %47 = vector.load %arg11[%c4, %c0_28] : memref<48x128xbf16, #tpu.memory_space<vmem>>, vector<16x128xbf16>
    %48 = tpu.concatenate %43, %44, %45, %46, %47 in 1 : vector<16x128xbf16>, vector<16x128xbf16>, vector<16x128xbf16>, vector<16x128xbf16>, vector<16x128xbf16> -> vector<16x640xbf16>
    %c0_29 = arith.constant 0 : index
    %c0_30 = arith.constant 0 : index
    %c0_31 = arith.constant 0 : index
    %49 = vector.load %arg6[%c0_29, %c0_30, %c0_31] : memref<6x640x256xbf16, #tpu.memory_space<vmem>>, vector<1x640x256xbf16>
    %50 = vector.shape_cast %49 : vector<1x640x256xbf16> to vector<640x256xbf16>
    %cst_32 = arith.constant dense<0.000000e+00> : vector<16x256xf32>
    %51 = tpu.matmul %48, %50, %cst_32 {dimension_numbers = #tpu.dot_dimension_numbers<[1], [0], [0], [1], [0, 0, 1, 1], [], []>} : vector<16x640xbf16>, vector<640x256xbf16>, vector<16x256xf32> -> vector<16x256xf32>
    %c0_33 = arith.constant 0 : index
    %c0_34 = arith.constant 0 : index
    %c0_35 = arith.constant 0 : index
    %52 = vector.load %arg7[%c0_33, %c0_34, %c0_35] : memref<6x1x256xf32, #tpu.memory_space<vmem>>, vector<1x1x256xf32>
    %53 = vector.shape_cast %52 : vector<1x1x256xf32> to vector<1x256xf32>
    %54 = vector.broadcast %53 : vector<1x256xf32> to vector<16x256xf32>
    %55 = arith.addf %51, %54 : vector<16x256xf32>
    %56 = vector.extract_strided_slice %55 {offsets = [0, 0], sizes = [16, 128], strides = [1, 1]} : vector<16x256xf32> to vector<16x128xf32>
    %57 = vector.extract_strided_slice %55 {offsets = [0, 128], sizes = [16, 128], strides = [1, 1]} : vector<16x256xf32> to vector<16x128xf32>
    %58 = arith.negf %57 : vector<16x128xf32>
    %59 = math.exp %58 : vector<16x128xf32>
    %cst_36 = arith.constant 1.000000e+00 : f32
    %60 = vector.broadcast %cst_36 : f32 to vector<16x128xf32>
    %61 = arith.addf %60, %59 : vector<16x128xf32>
    %62 = arith.divf %60, %61 : vector<16x128xf32>
    %63 = arith.mulf %56, %62 : vector<16x128xf32>
    %64 = arith.addf %63, %40 : vector<16x128xf32>
    %cst_37 = arith.constant 0.707106769 : f32
    %65 = vector.broadcast %cst_37 : f32 to vector<16x128xf32>
    %66 = arith.mulf %64, %65 : vector<16x128xf32>
    %67 = arith.truncf %66 : vector<16x128xf32> to vector<16x128xbf16>
    %c1_38 = arith.constant 1 : index
    %c0_39 = arith.constant 0 : index
    %c0_40 = arith.constant 0 : index
    %68 = vector.load %arg4[%c1_38, %c0_39, %c0_40] : memref<2x128x256xbf16, #tpu.memory_space<vmem>>, vector<1x128x256xbf16>
    %69 = vector.shape_cast %68 : vector<1x128x256xbf16> to vector<128x256xbf16>
    %cst_41 = arith.constant dense<0.000000e+00> : vector<16x256xf32>
    %70 = tpu.matmul %67, %69, %cst_41 {dimension_numbers = #tpu.dot_dimension_numbers<[1], [0], [0], [1], [0, 0, 1, 1], [], []>} : vector<16x128xbf16>, vector<128x256xbf16>, vector<16x256xf32> -> vector<16x256xf32>
    %c1_42 = arith.constant 1 : index
    %c0_43 = arith.constant 0 : index
    %c0_44 = arith.constant 0 : index
    %71 = vector.load %arg5[%c1_42, %c0_43, %c0_44] : memref<2x1x128xf32, #tpu.memory_space<vmem>>, vector<1x1x128xf32>
    %72 = vector.shape_cast %71 : vector<1x1x128xf32> to vector<1x128xf32>
    %73 = vector.extract_strided_slice %70 {offsets = [0, 0], sizes = [16, 128], strides = [1, 1]} : vector<16x256xf32> to vector<16x128xf32>
    %74 = vector.broadcast %72 : vector<1x128xf32> to vector<16x128xf32>
    %75 = arith.addf %73, %74 : vector<16x128xf32>
    %76 = vector.extract_strided_slice %70 {offsets = [0, 128], sizes = [16, 128], strides = [1, 1]} : vector<16x256xf32> to vector<16x128xf32>
    %77 = vector.broadcast %72 : vector<1x128xf32> to vector<16x128xf32>
    %78 = arith.addf %76, %77 : vector<16x128xf32>
    %79 = tpu.iota {dimensions = array<i32: 0>} : vector<32x16xi32>
    %80 = tpu.iota {dimensions = array<i32: 1>} : vector<32x16xi32>
    %c2_i32_45 = arith.constant 2 : i32
    %81 = vector.broadcast %c2_i32_45 : i32 to vector<32x16xi32>
    %82 = arith.muli %81, %80 : vector<32x16xi32>
    %83 = arith.cmpi eq, %79, %82 : vector<32x16xi32>
    %84 = arith.extui %83 : vector<32x16xi1> to vector<32x16xi32>
    %85 = arith.sitofp %84 : vector<32x16xi32> to vector<32x16xf32>
    %cst_46 = arith.constant dense<0.000000e+00> : vector<32x128xf32>
    %86 = tpu.matmul %85, %75, %cst_46 {dimension_numbers = #tpu.dot_dimension_numbers<[1], [0], [0], [1], [0, 0, 1, 1], [], []>} : vector<32x16xf32>, vector<16x128xf32>, vector<32x128xf32> -> vector<32x128xf32>
    %c2_i32_47 = arith.constant 2 : i32
    %87 = vector.broadcast %c2_i32_47 : i32 to vector<32x16xi32>
    %88 = arith.muli %87, %80 : vector<32x16xi32>
    %c1_i32_48 = arith.constant 1 : i32
    %89 = vector.broadcast %c1_i32_48 : i32 to vector<32x16xi32>
    %90 = arith.addi %88, %89 : vector<32x16xi32>
    %91 = arith.cmpi eq, %79, %90 : vector<32x16xi32>
    %92 = arith.extui %91 : vector<32x16xi1> to vector<32x16xi32>
    %93 = arith.sitofp %92 : vector<32x16xi32> to vector<32x16xf32>
    %cst_49 = arith.constant dense<0.000000e+00> : vector<32x128xf32>
    %94 = tpu.matmul %93, %78, %cst_49 {dimension_numbers = #tpu.dot_dimension_numbers<[1], [0], [0], [1], [0, 0, 1, 1], [], []>} : vector<32x16xf32>, vector<16x128xf32>, vector<32x128xf32> -> vector<32x128xf32>
    %95 = arith.addf %86, %94 : vector<32x128xf32>
    %96 = arith.truncf %95 : vector<32x128xf32> to vector<32x128xbf16>
    %c2_50 = arith.constant 2 : index
    %c0_51 = arith.constant 0 : index
    %97 = vector.load %arg11[%c2_50, %c0_51] : memref<48x128xbf16, #tpu.memory_space<vmem>>, vector<32x128xbf16>
    tpu.vector_store %arg11[%c2_50, %c0_51], %96 {strides = array<i32>} : memref<48x128xbf16, #tpu.memory_space<vmem>>, vector<32x128xbf16>,
    %c0_52 = arith.constant 0 : index
    %c0_53 = arith.constant 0 : index
    %98 = vector.load %arg11[%c0_52, %c0_53] : memref<48x128xbf16, #tpu.memory_space<vmem>>, vector<32x128xbf16>
    %c1_54 = arith.constant 1 : index
    %c0_55 = arith.constant 0 : index
    %99 = vector.load %arg11[%c1_54, %c0_55] : memref<48x128xbf16, #tpu.memory_space<vmem>>, vector<32x128xbf16>
    %c2_56 = arith.constant 2 : index
    %c0_57 = arith.constant 0 : index
    %100 = vector.load %arg11[%c2_56, %c0_57] : memref<48x128xbf16, #tpu.memory_space<vmem>>, vector<32x128xbf16>
    %c3_58 = arith.constant 3 : index
    %c0_59 = arith.constant 0 : index
    %101 = vector.load %arg11[%c3_58, %c0_59] : memref<48x128xbf16, #tpu.memory_space<vmem>>, vector<32x128xbf16>
    %c4_60 = arith.constant 4 : index
    %c0_61 = arith.constant 0 : index
    %102 = vector.load %arg11[%c4_60, %c0_61] : memref<48x128xbf16, #tpu.memory_space<vmem>>, vector<32x128xbf16>
    %103 = tpu.concatenate %98, %99, %100, %101, %102 in 1 : vector<32x128xbf16>, vector<32x128xbf16>, vector<32x128xbf16>, vector<32x128xbf16>, vector<32x128xbf16> -> vector<32x640xbf16>
    %c1_62 = arith.constant 1 : index
    %c0_63 = arith.constant 0 : index
    %c0_64 = arith.constant 0 : index
    %104 = vector.load %arg6[%c1_62, %c0_63, %c0_64] : memref<6x640x256xbf16, #tpu.memory_space<vmem>>, vector<1x640x256xbf16>
    %105 = vector.shape_cast %104 : vector<1x640x256xbf16> to vector<640x256xbf16>
    %cst_65 = arith.constant dense<0.000000e+00> : vector<32x256xf32>
    %106 = tpu.matmul %103, %105, %cst_65 {dimension_numbers = #tpu.dot_dimension_numbers<[1], [0], [0], [1], [0, 0, 1, 1], [], []>} : vector<32x640xbf16>, vector<640x256xbf16>, vector<32x256xf32> -> vector<32x256xf32>
    %c1_66 = arith.constant 1 : index
    %c0_67 = arith.constant 0 : index
    %c0_68 = arith.constant 0 : index
    %107 = vector.load %arg7[%c1_66, %c0_67, %c0_68] : memref<6x1x256xf32, #tpu.memory_space<vmem>>, vector<1x1x256xf32>
    %108 = vector.shape_cast %107 : vector<1x1x256xf32> to vector<1x256xf32>
    %109 = vector.broadcast %108 : vector<1x256xf32> to vector<32x256xf32>
    %110 = arith.addf %106, %109 : vector<32x256xf32>
    %111 = vector.extract_strided_slice %110 {offsets = [0, 0], sizes = [32, 128], strides = [1, 1]} : vector<32x256xf32> to vector<32x128xf32>
    %112 = vector.extract_strided_slice %110 {offsets = [0, 128], sizes = [32, 128], strides = [1, 1]} : vector<32x256xf32> to vector<32x128xf32>
    %113 = arith.negf %112 : vector<32x128xf32>
    %114 = math.exp %113 : vector<32x128xf32>
    %cst_69 = arith.constant 1.000000e+00 : f32
    %115 = vector.broadcast %cst_69 : f32 to vector<32x128xf32>
    %116 = arith.addf %115, %114 : vector<32x128xf32>
    %117 = arith.divf %115, %116 : vector<32x128xf32>
    %118 = arith.mulf %111, %117 : vector<32x128xf32>
    %119 = arith.addf %118, %95 : vector<32x128xf32>
    %cst_70 = arith.constant 0.707106769 : f32
    %120 = vector.broadcast %cst_70 : f32 to vector<32x128xf32>
    %121 = arith.mulf %119, %120 : vector<32x128xf32>
    %122 = arith.truncf %121 : vector<32x128xf32> to vector<32x128xbf16>
    %c2_71 = arith.constant 2 : index
    %c0_72 = arith.constant 0 : index
    %123 = vector.load %arg11[%c2_71, %c0_72] : memref<48x128xbf16, #tpu.memory_space<vmem>>, vector<32x128xbf16>
    tpu.vector_store %arg11[%c2_71, %c0_72], %122 {strides = array<i32>} : memref<48x128xbf16, #tpu.memory_space<vmem>>, vector<32x128xbf16>,
    %c0_73 = arith.constant 0 : index
    %c0_74 = arith.constant 0 : index
    %124 = vector.load %arg11[%c0_73, %c0_74] : memref<48x128xbf16, #tpu.memory_space<vmem>>, vector<32x128xbf16>
    %c1_75 = arith.constant 1 : index
    %c0_76 = arith.constant 0 : index
    %125 = vector.load %arg11[%c1_75, %c0_76] : memref<48x128xbf16, #tpu.memory_space<vmem>>, vector<32x128xbf16>
    %c2_77 = arith.constant 2 : index
    %c0_78 = arith.constant 0 : index
    %126 = vector.load %arg11[%c2_77, %c0_78] : memref<48x128xbf16, #tpu.memory_space<vmem>>, vector<32x128xbf16>
    %c3_79 = arith.constant 3 : index
    %c0_80 = arith.constant 0 : index
    %127 = vector.load %arg11[%c3_79, %c0_80] : memref<48x128xbf16, #tpu.memory_space<vmem>>, vector<32x128xbf16>
    %c4_81 = arith.constant 4 : index
    %c0_82 = arith.constant 0 : index
    %128 = vector.load %arg11[%c4_81, %c0_82] : memref<48x128xbf16, #tpu.memory_space<vmem>>, vector<32x128xbf16>
    %129 = tpu.concatenate %124, %125, %126, %127, %128 in 1 : vector<32x128xbf16>, vector<32x128xbf16>, vector<32x128xbf16>, vector<32x128xbf16>, vector<32x128xbf16> -> vector<32x640xbf16>
    %c2_83 = arith.constant 2 : index
    %c0_84 = arith.constant 0 : index
    %c0_85 = arith.constant 0 : index
    %130 = vector.load %arg6[%c2_83, %c0_84, %c0_85] : memref<6x640x256xbf16, #tpu.memory_space<vmem>>, vector<1x640x256xbf16>
    %131 = vector.shape_cast %130 : vector<1x640x256xbf16> to vector<640x256xbf16>
    %cst_86 = arith.constant dense<0.000000e+00> : vector<32x256xf32>
    %132 = tpu.matmul %129, %131, %cst_86 {dimension_numbers = #tpu.dot_dimension_numbers<[1], [0], [0], [1], [0, 0, 1, 1], [], []>} : vector<32x640xbf16>, vector<640x256xbf16>, vector<32x256xf32> -> vector<32x256xf32>
    %c2_87 = arith.constant 2 : index
    %c0_88 = arith.constant 0 : index
    %c0_89 = arith.constant 0 : index
    %133 = vector.load %arg7[%c2_87, %c0_88, %c0_89] : memref<6x1x256xf32, #tpu.memory_space<vmem>>, vector<1x1x256xf32>
    %134 = vector.shape_cast %133 : vector<1x1x256xf32> to vector<1x256xf32>
    %135 = vector.broadcast %134 : vector<1x256xf32> to vector<32x256xf32>
    %136 = arith.addf %132, %135 : vector<32x256xf32>
    %137 = vector.extract_strided_slice %136 {offsets = [0, 0], sizes = [32, 128], strides = [1, 1]} : vector<32x256xf32> to vector<32x128xf32>
    %138 = vector.extract_strided_slice %136 {offsets = [0, 128], sizes = [32, 128], strides = [1, 1]} : vector<32x256xf32> to vector<32x128xf32>
    %139 = arith.negf %138 : vector<32x128xf32>
    %140 = math.exp %139 : vector<32x128xf32>
    %cst_90 = arith.constant 1.000000e+00 : f32
    %141 = vector.broadcast %cst_90 : f32 to vector<32x128xf32>
    %142 = arith.addf %141, %140 : vector<32x128xf32>
    %143 = arith.divf %141, %142 : vector<32x128xf32>
    %144 = arith.mulf %137, %143 : vector<32x128xf32>
    %145 = arith.addf %144, %121 : vector<32x128xf32>
    %cst_91 = arith.constant 0.707106769 : f32
    %146 = vector.broadcast %cst_91 : f32 to vector<32x128xf32>
    %147 = arith.mulf %145, %146 : vector<32x128xf32>
    %148 = arith.truncf %147 : vector<32x128xf32> to vector<32x128xbf16>
    %c2_92 = arith.constant 2 : index
    %c0_93 = arith.constant 0 : index
    %149 = vector.load %arg11[%c2_92, %c0_93] : memref<48x128xbf16, #tpu.memory_space<vmem>>, vector<32x128xbf16>
    tpu.vector_store %arg11[%c2_92, %c0_93], %148 {strides = array<i32>} : memref<48x128xbf16, #tpu.memory_space<vmem>>, vector<32x128xbf16>,
    %c0_94 = arith.constant 0 : index
    %c0_95 = arith.constant 0 : index
    %150 = vector.load %arg11[%c0_94, %c0_95] : memref<48x128xbf16, #tpu.memory_space<vmem>>, vector<32x128xbf16>
    %c1_96 = arith.constant 1 : index
    %c0_97 = arith.constant 0 : index
    %151 = vector.load %arg11[%c1_96, %c0_97] : memref<48x128xbf16, #tpu.memory_space<vmem>>, vector<32x128xbf16>
    %c2_98 = arith.constant 2 : index
    %c0_99 = arith.constant 0 : index
    %152 = vector.load %arg11[%c2_98, %c0_99] : memref<48x128xbf16, #tpu.memory_space<vmem>>, vector<32x128xbf16>
    %c3_100 = arith.constant 3 : index
    %c0_101 = arith.constant 0 : index
    %153 = vector.load %arg11[%c3_100, %c0_101] : memref<48x128xbf16, #tpu.memory_space<vmem>>, vector<32x128xbf16>
    %c4_102 = arith.constant 4 : index
    %c0_103 = arith.constant 0 : index
    %154 = vector.load %arg11[%c4_102, %c0_103] : memref<48x128xbf16, #tpu.memory_space<vmem>>, vector<32x128xbf16>
    %155 = tpu.concatenate %150, %151, %152, %153, %154 in 1 : vector<32x128xbf16>, vector<32x128xbf16>, vector<32x128xbf16>, vector<32x128xbf16>, vector<32x128xbf16> -> vector<32x640xbf16>
    %c3_104 = arith.constant 3 : index
    %c0_105 = arith.constant 0 : index
    %c0_106 = arith.constant 0 : index
    %156 = vector.load %arg6[%c3_104, %c0_105, %c0_106] : memref<6x640x256xbf16, #tpu.memory_space<vmem>>, vector<1x640x256xbf16>
    %157 = vector.shape_cast %156 : vector<1x640x256xbf16> to vector<640x256xbf16>
    %cst_107 = arith.constant dense<0.000000e+00> : vector<32x256xf32>
    %158 = tpu.matmul %155, %157, %cst_107 {dimension_numbers = #tpu.dot_dimension_numbers<[1], [0], [0], [1], [0, 0, 1, 1], [], []>} : vector<32x640xbf16>, vector<640x256xbf16>, vector<32x256xf32> -> vector<32x256xf32>
    %c3_108 = arith.constant 3 : index
    %c0_109 = arith.constant 0 : index
    %c0_110 = arith.constant 0 : index
    %159 = vector.load %arg7[%c3_108, %c0_109, %c0_110] : memref<6x1x256xf32, #tpu.memory_space<vmem>>, vector<1x1x256xf32>
    %160 = vector.shape_cast %159 : vector<1x1x256xf32> to vector<1x256xf32>
    %161 = vector.broadcast %160 : vector<1x256xf32> to vector<32x256xf32>
    %162 = arith.addf %158, %161 : vector<32x256xf32>
    %163 = vector.extract_strided_slice %162 {offsets = [0, 0], sizes = [32, 128], strides = [1, 1]} : vector<32x256xf32> to vector<32x128xf32>
    %164 = vector.extract_strided_slice %162 {offsets = [0, 128], sizes = [32, 128], strides = [1, 1]} : vector<32x256xf32> to vector<32x128xf32>
    %165 = arith.negf %164 : vector<32x128xf32>
    %166 = math.exp %165 : vector<32x128xf32>
    %cst_111 = arith.constant 1.000000e+00 : f32
    %167 = vector.broadcast %cst_111 : f32 to vector<32x128xf32>
    %168 = arith.addf %167, %166 : vector<32x128xf32>
    %169 = arith.divf %167, %168 : vector<32x128xf32>
    %170 = arith.mulf %163, %169 : vector<32x128xf32>
    %171 = arith.addf %170, %147 : vector<32x128xf32>
    %cst_112 = arith.constant 0.707106769 : f32
    %172 = vector.broadcast %cst_112 : f32 to vector<32x128xf32>
    %173 = arith.mulf %171, %172 : vector<32x128xf32>
    %174 = arith.truncf %173 : vector<32x128xf32> to vector<32x128xbf16>
    %c2_113 = arith.constant 2 : index
    %c0_114 = arith.constant 0 : index
    %175 = vector.load %arg11[%c2_113, %c0_114] : memref<48x128xbf16, #tpu.memory_space<vmem>>, vector<32x128xbf16>
    tpu.vector_store %arg11[%c2_113, %c0_114], %174 {strides = array<i32>} : memref<48x128xbf16, #tpu.memory_space<vmem>>, vector<32x128xbf16>,
    %c0_115 = arith.constant 0 : index
    %c0_116 = arith.constant 0 : index
    %176 = vector.load %arg11[%c0_115, %c0_116] : memref<48x128xbf16, #tpu.memory_space<vmem>>, vector<32x128xbf16>
    %c1_117 = arith.constant 1 : index
    %c0_118 = arith.constant 0 : index
    %177 = vector.load %arg11[%c1_117, %c0_118] : memref<48x128xbf16, #tpu.memory_space<vmem>>, vector<32x128xbf16>
    %c2_119 = arith.constant 2 : index
    %c0_120 = arith.constant 0 : index
    %178 = vector.load %arg11[%c2_119, %c0_120] : memref<48x128xbf16, #tpu.memory_space<vmem>>, vector<32x128xbf16>
    %c3_121 = arith.constant 3 : index
    %c0_122 = arith.constant 0 : index
    %179 = vector.load %arg11[%c3_121, %c0_122] : memref<48x128xbf16, #tpu.memory_space<vmem>>, vector<32x128xbf16>
    %c4_123 = arith.constant 4 : index
    %c0_124 = arith.constant 0 : index
    %180 = vector.load %arg11[%c4_123, %c0_124] : memref<48x128xbf16, #tpu.memory_space<vmem>>, vector<32x128xbf16>
    %181 = tpu.concatenate %176, %177, %178, %179, %180 in 1 : vector<32x128xbf16>, vector<32x128xbf16>, vector<32x128xbf16>, vector<32x128xbf16>, vector<32x128xbf16> -> vector<32x640xbf16>
    %c4_125 = arith.constant 4 : index
    %c0_126 = arith.constant 0 : index
    %c0_127 = arith.constant 0 : index
    %182 = vector.load %arg6[%c4_125, %c0_126, %c0_127] : memref<6x640x256xbf16, #tpu.memory_space<vmem>>, vector<1x640x256xbf16>
    %183 = vector.shape_cast %182 : vector<1x640x256xbf16> to vector<640x256xbf16>
    %cst_128 = arith.constant dense<0.000000e+00> : vector<32x256xf32>
    %184 = tpu.matmul %181, %183, %cst_128 {dimension_numbers = #tpu.dot_dimension_numbers<[1], [0], [0], [1], [0, 0, 1, 1], [], []>} : vector<32x640xbf16>, vector<640x256xbf16>, vector<32x256xf32> -> vector<32x256xf32>
    %c4_129 = arith.constant 4 : index
    %c0_130 = arith.constant 0 : index
    %c0_131 = arith.constant 0 : index
    %185 = vector.load %arg7[%c4_129, %c0_130, %c0_131] : memref<6x1x256xf32, #tpu.memory_space<vmem>>, vector<1x1x256xf32>
    %186 = vector.shape_cast %185 : vector<1x1x256xf32> to vector<1x256xf32>
    %187 = vector.broadcast %186 : vector<1x256xf32> to vector<32x256xf32>
    %188 = arith.addf %184, %187 : vector<32x256xf32>
    %189 = vector.extract_strided_slice %188 {offsets = [0, 0], sizes = [32, 128], strides = [1, 1]} : vector<32x256xf32> to vector<32x128xf32>
    %190 = vector.extract_strided_slice %188 {offsets = [0, 128], sizes = [32, 128], strides = [1, 1]} : vector<32x256xf32> to vector<32x128xf32>
    %191 = arith.negf %190 : vector<32x128xf32>
    %192 = math.exp %191 : vector<32x128xf32>
    %cst_132 = arith.constant 1.000000e+00 : f32
    %193 = vector.broadcast %cst_132 : f32 to vector<32x128xf32>
    %194 = arith.addf %193, %192 : vector<32x128xf32>
    %195 = arith.divf %193, %194 : vector<32x128xf32>
    %196 = arith.mulf %189, %195 : vector<32x128xf32>
    %197 = arith.addf %196, %173 : vector<32x128xf32>
    %cst_133 = arith.constant 0.707106769 : f32
    %198 = vector.broadcast %cst_133 : f32 to vector<32x128xf32>
    %199 = arith.mulf %197, %198 : vector<32x128xf32>
    %200 = arith.truncf %199 : vector<32x128xf32> to vector<32x128xbf16>
    %c2_134 = arith.constant 2 : index
    %c0_135 = arith.constant 0 : index
    %201 = vector.load %arg11[%c2_134, %c0_135] : memref<48x128xbf16, #tpu.memory_space<vmem>>, vector<32x128xbf16>
    tpu.vector_store %arg11[%c2_134, %c0_135], %200 {strides = array<i32>} : memref<48x128xbf16, #tpu.memory_space<vmem>>, vector<32x128xbf16>,
    %c0_136 = arith.constant 0 : index
    %c0_137 = arith.constant 0 : index
    %202 = vector.load %arg11[%c0_136, %c0_137] : memref<48x128xbf16, #tpu.memory_space<vmem>>, vector<32x128xbf16>
    %c1_138 = arith.constant 1 : index
    %c0_139 = arith.constant 0 : index
    %203 = vector.load %arg11[%c1_138, %c0_139] : memref<48x128xbf16, #tpu.memory_space<vmem>>, vector<32x128xbf16>
    %c2_140 = arith.constant 2 : index
    %c0_141 = arith.constant 0 : index
    %204 = vector.load %arg11[%c2_140, %c0_141] : memref<48x128xbf16, #tpu.memory_space<vmem>>, vector<32x128xbf16>
    %c3_142 = arith.constant 3 : index
    %c0_143 = arith.constant 0 : index
    %205 = vector.load %arg11[%c3_142, %c0_143] : memref<48x128xbf16, #tpu.memory_space<vmem>>, vector<32x128xbf16>
    %c4_144 = arith.constant 4 : index
    %c0_145 = arith.constant 0 : index
    %206 = vector.load %arg11[%c4_144, %c0_145] : memref<48x128xbf16, #tpu.memory_space<vmem>>, vector<32x128xbf16>
    %207 = tpu.concatenate %202, %203, %204, %205, %206 in 1 : vector<32x128xbf16>, vector<32x128xbf16>, vector<32x128xbf16>, vector<32x128xbf16>, vector<32x128xbf16> -> vector<32x640xbf16>
    %c5 = arith.constant 5 : index
    %c0_146 = arith.constant 0 : index
    %c0_147 = arith.constant 0 : index
    %208 = vector.load %arg6[%c5, %c0_146, %c0_147] : memref<6x640x256xbf16, #tpu.memory_space<vmem>>, vector<1x640x256xbf16>
    %209 = vector.shape_cast %208 : vector<1x640x256xbf16> to vector<640x256xbf16>
    %cst_148 = arith.constant dense<0.000000e+00> : vector<32x256xf32>
    %210 = tpu.matmul %207, %209, %cst_148 {dimension_numbers = #tpu.dot_dimension_numbers<[1], [0], [0], [1], [0, 0, 1, 1], [], []>} : vector<32x640xbf16>, vector<640x256xbf16>, vector<32x256xf32> -> vector<32x256xf32>
    %c5_149 = arith.constant 5 : index
    %c0_150 = arith.constant 0 : index
    %c0_151 = arith.constant 0 : index
    %211 = vector.load %arg7[%c5_149, %c0_150, %c0_151] : memref<6x1x256xf32, #tpu.memory_space<vmem>>, vector<1x1x256xf32>
    %212 = vector.shape_cast %211 : vector<1x1x256xf32> to vector<1x256xf32>
    %213 = vector.broadcast %212 : vector<1x256xf32> to vector<32x256xf32>
    %214 = arith.addf %210, %213 : vector<32x256xf32>
    %215 = vector.extract_strided_slice %214 {offsets = [0, 0], sizes = [32, 128], strides = [1, 1]} : vector<32x256xf32> to vector<32x128xf32>
    %216 = vector.extract_strided_slice %214 {offsets = [0, 128], sizes = [32, 128], strides = [1, 1]} : vector<32x256xf32> to vector<32x128xf32>
    %217 = arith.negf %216 : vector<32x128xf32>
    %218 = math.exp %217 : vector<32x128xf32>
    %cst_152 = arith.constant 1.000000e+00 : f32
    %219 = vector.broadcast %cst_152 : f32 to vector<32x128xf32>
    %220 = arith.addf %219, %218 : vector<32x128xf32>
    %221 = arith.divf %219, %220 : vector<32x128xf32>
    %222 = arith.mulf %215, %221 : vector<32x128xf32>
    %223 = arith.addf %222, %199 : vector<32x128xf32>
    %cst_153 = arith.constant 0.707106769 : f32
    %224 = vector.broadcast %cst_153 : f32 to vector<32x128xf32>
    %225 = arith.mulf %223, %224 : vector<32x128xf32>
    %226 = arith.truncf %225 : vector<32x128xf32> to vector<32x128xbf16>
    %c0_154 = arith.constant 0 : index
    %c0_155 = arith.constant 0 : index
    %227 = vector.load %arg8[%c0_154, %c0_155] : memref<128x128xbf16, #tpu.memory_space<vmem>>, vector<128x128xbf16>
    %cst_156 = arith.constant dense<0.000000e+00> : vector<32x128xf32>
    %228 = tpu.matmul %226, %227, %cst_156 {dimension_numbers = #tpu.dot_dimension_numbers<[1], [0], [0], [1], [0, 0, 1, 1], [], []>} : vector<32x128xbf16>, vector<128x128xbf16>, vector<32x128xf32> -> vector<32x128xf32>
    %c0_157 = arith.constant 0 : index
    %c0_158 = arith.constant 0 : index
    %229 = vector.load %arg9[%c0_157, %c0_158] : memref<1x128xf32, #tpu.memory_space<vmem>>, vector<1x128xf32>
    %230 = vector.broadcast %229 : vector<1x128xf32> to vector<32x128xf32>
    %231 = arith.addf %228, %230 : vector<32x128xf32>
    %232 = arith.negf %231 : vector<32x128xf32>
    %233 = math.exp %232 : vector<32x128xf32>
    %cst_159 = arith.constant 1.000000e+00 : f32
    %234 = vector.broadcast %cst_159 : f32 to vector<32x128xf32>
    %235 = arith.addf %234, %233 : vector<32x128xf32>
    %236 = arith.divf %234, %235 : vector<32x128xf32>
    %c0_160 = arith.constant 0 : index
    %c0_161 = arith.constant 0 : index
    %c0_162 = arith.constant 0 : index
    %237 = vector.load %arg10[%c0_160, %c0_161, %c0_162] : memref<1x32x128xf32, #tpu.memory_space<vmem>>, vector<1x32x128xf32>
    %238 = vector.shape_cast %237 : vector<1x32x128xf32> to vector<32x128xf32>
    %239 = vector.shape_cast %236 : vector<32x128xf32> to vector<1x32x128xf32>
    tpu.vector_store %arg10[%c0_160, %c0_161, %c0_162], %239 {strides = array<i32>} : memref<1x32x128xf32, #tpu.memory_space<vmem>>, vector<1x32x128xf32>,
    return
  }
  func.func @transform_0(%arg0: i32) -> (i32, i32, i32) {
    %c0_i32 = arith.constant 0 : i32
    %c0_i32_0 = arith.constant 0 : i32
    %c0_i32_1 = arith.constant 0 : i32
    return %arg0, %c0_i32, %c0_i32_0 : i32, i32, i32
  }
  func.func @transform_1(%arg0: i32) -> (i32, i32) {
    %c0_i32 = arith.constant 0 : i32
    %c0_i32_0 = arith.constant 0 : i32
    %c0_i32_1 = arith.constant 0 : i32
    return %c0_i32, %c0_i32_0 : i32, i32
  }
  func.func @transform_2(%arg0: i32) -> (i32, i32) {
    %c0_i32 = arith.constant 0 : i32
    %c0_i32_0 = arith.constant 0 : i32
    %c0_i32_1 = arith.constant 0 : i32
    return %c0_i32, %c0_i32_0 : i32, i32
  }
  func.func @transform_3(%arg0: i32) -> (i32, i32, i32) {
    %c0_i32 = arith.constant 0 : i32
    %c0_i32_0 = arith.constant 0 : i32
    %c0_i32_1 = arith.constant 0 : i32
    %c0_i32_2 = arith.constant 0 : i32
    return %c0_i32, %c0_i32_0, %c0_i32_1 : i32, i32, i32
  }
  func.func @transform_4(%arg0: i32) -> (i32, i32, i32) {
    %c0_i32 = arith.constant 0 : i32
    %c0_i32_0 = arith.constant 0 : i32
    %c0_i32_1 = arith.constant 0 : i32
    %c0_i32_2 = arith.constant 0 : i32
    return %c0_i32, %c0_i32_0, %c0_i32_1 : i32, i32, i32
  }
  func.func @transform_5(%arg0: i32) -> (i32, i32, i32) {
    %c0_i32 = arith.constant 0 : i32
    %c0_i32_0 = arith.constant 0 : i32
    %c0_i32_1 = arith.constant 0 : i32
    %c0_i32_2 = arith.constant 0 : i32
    return %c0_i32, %c0_i32_0, %c0_i32_1 : i32, i32, i32
  }
  func.func @transform_6(%arg0: i32) -> (i32, i32, i32) {
    %c0_i32 = arith.constant 0 : i32
    %c0_i32_0 = arith.constant 0 : i32
    %c0_i32_1 = arith.constant 0 : i32
    %c0_i32_2 = arith.constant 0 : i32
    return %c0_i32, %c0_i32_0, %c0_i32_1 : i32, i32, i32
  }
  func.func @transform_7(%arg0: i32) -> (i32, i32) {
    %c0_i32 = arith.constant 0 : i32
    %c0_i32_0 = arith.constant 0 : i32
    %c0_i32_1 = arith.constant 0 : i32
    return %c0_i32, %c0_i32_0 : i32, i32
  }
  func.func @transform_8(%arg0: i32) -> (i32, i32) {
    %c0_i32 = arith.constant 0 : i32
    %c0_i32_0 = arith.constant 0 : i32
    %c0_i32_1 = arith.constant 0 : i32
    return %c0_i32, %c0_i32_0 : i32, i32
  }
  func.func @transform_9(%arg0: i32) -> (i32, i32, i32) {
    %c0_i32 = arith.constant 0 : i32
    %c0_i32_0 = arith.constant 0 : i32
    %c0_i32_1 = arith.constant 0 : i32
    return %arg0, %c0_i32, %c0_i32_0 : i32, i32, i32
  }
}

</mosaic_0001>

<bundles_post_ra>
// kernel: tpu_custom_call.1
= control target key start
LH: loop header
LB: loop body
LE: loop exit
PB: predicated region body
PF: predicated region fallthrough
CT: control target
= control target key end

     0   :  { %s8582_s0 = inlined_call_operand.hbm [shape: f32[2,8,16], index: 0, kind: input, shape index: {}]   ;;  %s8583_s1 = inlined_call_operand.hbm [shape: bf16[16,128], index: 1, kind: input, shape index: {}]   ;;  %s8584_s2 = inlined_call_operand.hbm [shape: f32[1,128], index: 2, kind: input, shape index: {}]   ;;  %s8585_s3 = inlined_call_operand.hbm [shape: bf16[2,128,256], index: 3, kind: input, shape index: {}]   ;;  %s8586_s4 = inlined_call_operand.hbm [shape: f32[2,1,128], index: 4, kind: input, shape index: {}]   ;;  %s8587_s5 = inlined_call_operand.hbm [shape: bf16[6,640,256], index: 5, kind: input, shape index: {}]   ;;  %s8588_s6 = inlined_call_operand.hbm [shape: f32[6,1,256], index: 6, kind: input, shape index: {}]   ;;  %s8589_s7 = inlined_call_operand.hbm [shape: bf16[128,128], index: 7, kind: input, shape index: {}]   ;;  %s8590_s8 = inlined_call_operand.hbm [shape: f32[1,128], index: 8, kind: input, shape index: {}]   ;;  %s8591_s9 = inlined_call_operand.hbm [shape: f32[2,32,128], index: 9, kind: output, shape index: {}]  }
   0x1   :  { %8598 = sst [smem:[#allocation26_spill]] %s8583_s1 }
   0x2   :  { %8599 = sst [smem:[#allocation27_spill]] %s8591_s9 }
   0x3   :  { %14 = vsyncpa [#allocation5], 0 }
   0x4   :  { %16 = vsyncpa [#allocation5 + $0x1], 0 }
   0x5   :  { %17 = vsyncpa [#allocation8], 0 }
   0x6   :  { %18 = vsyncpa [#allocation11], 0 }
   0x7   :  { %19 = vsyncpa [#allocation14], 0 }
   0x8   :  { %20 = vsyncpa [#allocation17], 0 }
   0x9   :  { %21 = vsyncpa [#allocation6], 0 }
   0xa   :  { %23 = vsyncpa [#allocation6 + $0x1], 0  ;;  %s7905_s30 = smov 0   ;;  %s7907_s10 = smov 0  }
   0xb   :  { %s7909_s11 = smov 0   ;;  %s7911_s12 = smov 0  }
   0xc LB: > { %s7832_s13 = smov [#allocation7]   ;;  %s7926_s15 = sadd.s32 4294967295, %s7830_s12   ;;  %s7830_s12 = sphi %s7911_s12, %s8628_s12   ;;  %s7826_s11 = sphi %s7909_s11, %s8627_s11   ;;  %s7822_s10 = sphi %s7907_s10, %s8626_s10   ;;  %s7818_s30 = sphi %s7905_s30, %s8625_s30  }
   0xd   : > { %s266_s14 = sshll.u32 %s7832_s13, 4  ;;  %p5722_p0 = scmp.ge.s32.totalorder %s7830_s12, 1  ;;  %s7931_s14 = int_to_ptr.vmem [resolvable:$true] %s266_s14 }
   0xe   : > { %p8594_p1 = scmp.eq.s32.totalorder %s7926_s15, 0  ;;  %p254_p2 = scmp.lt.s32.totalorder %s7830_s12, 3 }
   0xf   : > { %s7833_s17 = smov [#allocation10]   ;;  %s7834_s20 = smov [#allocation13]  }
  0x10   : > { %p7933_p3 = pnand %p5722_p0, %p254_p2  ;;  %s290_s18 = sshll.u32 %s7833_s17, 4  ;;  %s7946_s18 = int_to_ptr.vmem [resolvable:$true] %s290_s18 }
  0x11   : > { %s7948_s21 = sshll.u32 %s7834_s20, 4  ;;  %s8602_s1 = sld [smem:[#allocation26_spill]]  ;;  %s317_s21 = int_to_ptr.vmem [resolvable:$true] %s7948_s21 }
  0x12   : > { %s8600_s16 = scalar_select %p7933_p3, 1, 0 }
  0x13   : > { %p6509_p5 = pneg %p7933_p3 }
  0x15   : > { %p7942_p6 = pnand %p6509_p5, %p8594_p1 }
  0x17   : > { %s7494_s24 = scalar_lea.hbm %s8602_s1, 128  ;;  %p7958_p8 = pneg %p7942_p6 }
  0x18   : > { %p7495_p7 = scmp.ne.s32.totalorder %s8602_s1, %s7494_s24  ;;  %p7501_p11 = scmp.lt.u32.totalorder %s7494_s24, %s8602_s1 }
  0x1a   : > { %p7497_p9 = pnand %p7958_p8, %p7495_p7 }
  0x1c   : > { %p7498_p10 = pneg %p7497_p9 }
  0x1e   : > { %p7503_p12 = pnand %p7501_p11, %p7498_p10 }
  0x20   : > { %7506 = shalt.err (!%p7503_p12)
}
  0x21   : > { %s7507_s13 = scalar_lea.vmem %s7931_s14, 128  ;;  %p7515_p5 = scmp.lt.s32.totalorder %s7931_s14, %s7931_s14 }
  0x22   : > { %p7508_p13 = scmp.ne.s32.totalorder %s7931_s14, %s7507_s13  ;;  %p7516_p4 = scmp.lt.s32.totalorder %s7507_s13, %s7507_s13 }
  0x24   : > { %p7510_p0 = pnand %p7508_p13, %p7958_p8  ;;  %p7517_p7 = por %p7516_p4, %p7515_p5 }
  0x26   : > { %p7511_p2 = pneg %p7510_p0 }
  0x28   : > { %p7518_p9 = pnand %p7517_p7, %p7511_p2 }
  0x2a   : > { %7521 = shalt.err (!%p7518_p9)
}
  0x2b   : > { %s8593_s17 = smov 64   ;;  %s8596_s20 = smov 4  }
  0x2c   : > { %6512 = dma.hbm_to_vmem [thread:$0]  (!%p7942_p6), %s8602_s1, 128, %s7931_s14, [#allocation8], %s8593_s17, %s8593_s17, %s8596_s20  }
  0x2d   : > { %s7522_s26 = scalar_lea.hbm %s8585_s3, 4096 }
  0x2e   : > { %p7523_p4 = scmp.ne.s32.totalorder %s8585_s3, %s7522_s26  ;;  %p7529_p12 = scmp.lt.u32.totalorder %s7522_s26, %s8585_s3 }
  0x30   : > { %p7525_p10 = pnand %p7523_p4, %p7958_p8 }
  0x32   : > { %p7526_p11 = pneg %p7525_p10 }
  0x34   : > { %p7531_p13 = pnand %p7529_p12, %p7526_p11 }
  0x36   : > { %7534 = shalt.err (!%p7531_p13)
}
  0x37   : > { %s7535_s14 = scalar_lea.vmem %s7946_s18, 4096  ;;  %p7543_p7 = scmp.lt.s32.totalorder %s7946_s18, %s7946_s18 }
  0x38   : > { %p7536_p0 = scmp.ne.s32.totalorder %s7946_s18, %s7535_s14  ;;  %p7544_p9 = scmp.lt.s32.totalorder %s7535_s14, %s7535_s14 }
  0x3a   : > { %p7538_p2 = pnand %p7536_p0, %p7958_p8  ;;  %p7545_p4 = por %p7544_p9, %p7543_p7 }
  0x3c   : > { %p7539_p5 = pneg %p7538_p2 }
  0x3e   : > { %p7546_p10 = pnand %p7545_p4, %p7539_p5 }
  0x40   : > { %7549 = shalt.err (!%p7546_p10)
}
  0x41   : > { %s7837_s22 = smov 128   ;;  %s7838_s9 = smov 8  }
  0x42   : > { %6518 = dma.hbm_to_vmem [thread:$0]  (!%p7942_p6), %s8585_s3, 4096, %s7946_s18, [#allocation11], %s7837_s22, %s7837_s22, %s7838_s9  }
  0x43   : > { %s7550_s28 = scalar_lea.hbm %s8587_s5, 61440 }
  0x44   : > { %p7551_p11 = scmp.ne.s32.totalorder %s8587_s5, %s7550_s28  ;;  %p7557_p0 = scmp.lt.u32.totalorder %s7550_s28, %s8587_s5 }
  0x46   : > { %p7553_p12 = pnand %p7551_p11, %p7958_p8 }
  0x48   : > { %p7554_p13 = pneg %p7553_p12 }
  0x4a   : > { %p7559_p2 = pnand %p7557_p0, %p7554_p13 }
  0x4c   : > { %7562 = shalt.err (!%p7559_p2)
}
  0x4d   : > { %s7563_s23 = scalar_lea.vmem %s317_s21, 61440  ;;  %p7571_p4 = scmp.lt.s32.totalorder %s317_s21, %s317_s21 }
  0x4e   : > { %p7564_p5 = scmp.ne.s32.totalorder %s317_s21, %s7563_s23  ;;  %p7572_p10 = scmp.lt.s32.totalorder %s7563_s23, %s7563_s23 }
  0x50   : > { %p7566_p7 = pnand %p7564_p5, %p7958_p8  ;;  %p7573_p1 = por %p7572_p10, %p7571_p4 }
  0x52   : > { %p7567_p9 = pneg %p7566_p7 }
  0x54   : > { %p7574_p3 = pnand %p7573_p1, %p7567_p9 }
  0x56   : > { %7577 = shalt.err (!%p7574_p3)
}
  0x57   : > { %6524 = dma.hbm_to_vmem [thread:$0]  (!%p7942_p6), %s8587_s5, 61440, %s317_s21, [#allocation14], %s7837_s22, %s7837_s22, %s7838_s9  }
  0x58   : > { %s7839_s17 = smov [#allocation16]   ;;  %s7840_s26 = smov [#allocation9]  }
  0x59   : > { %s342_s25 = sshll.u32 %s7839_s17, 4  ;;  %s280_s28 = sshll.u32 %s7840_s26, 4  ;;  %s343_s25 = int_to_ptr.vmem [resolvable:$true] %s342_s25  ;;  %s281_s28 = int_to_ptr.vmem [resolvable:$true] %s280_s28 }
  0x5a   : > { %s7578_s14 = scalar_lea.hbm %s8589_s7, 1024 }
  0x5b   : > { %p7579_p1 = scmp.ne.s32.totalorder %s8589_s7, %s7578_s14  ;;  %p7585_p12 = scmp.lt.u32.totalorder %s7578_s14, %s8589_s7 }
  0x5d   : > { %p7581_p3 = pnand %p7579_p1, %p7958_p8 }
  0x5f   : > { %p7582_p11 = pneg %p7581_p3 }
  0x61   : > { %p7587_p13 = pnand %p7585_p12, %p7582_p11 }
  0x63   : > { %7590 = shalt.err (!%p7587_p13)
}
  0x64   : > { %s7591_s21 = scalar_lea.vmem %s343_s25, 1024  ;;  %p7599_p7 = scmp.lt.s32.totalorder %s343_s25, %s343_s25 }
  0x65   : > { %p7592_p0 = scmp.ne.s32.totalorder %s343_s25, %s7591_s21  ;;  %p7600_p9 = scmp.lt.s32.totalorder %s7591_s21, %s7591_s21 }
  0x67   : > { %p7594_p2 = pnand %p7592_p0, %p7958_p8  ;;  %p7601_p4 = por %p7600_p9, %p7599_p7 }
  0x69   : > { %p7595_p5 = pneg %p7594_p2 }
  0x6b   : > { %p7602_p10 = pnand %p7601_p4, %p7595_p5 }
  0x6d   : > { %7605 = shalt.err (!%p7602_p10)
}
  0x6e   : > { %s8604_s20 = smov 4   ;;  %s8605_s22 = smov 64  }
  0x6f   : > { %6530 = dma.hbm_to_vmem [thread:$0]  (!%p7942_p6), %s8589_s7, 1024, %s343_s25, [#allocation17], %s8605_s22, %s8605_s22, %s8604_s20  }
  0x70   : > { %s7606_s26 = scalar_lea.hbm %s8584_s2, 16 }
  0x71   : > { %p7607_p1 = scmp.ne.s32.totalorder %s8584_s2, %s7606_s26  ;;  %p7613_p12 = scmp.lt.u32.totalorder %s7606_s26, %s8584_s2 }
  0x73   : > { %p7609_p3 = pnand %p7607_p1, %p7958_p8 }
  0x75   : > { %p7610_p11 = pneg %p7609_p3 }
  0x77   : > { %p7615_p13 = pnand %p7613_p12, %p7610_p11 }
  0x79   : > { %7618 = shalt.err (!%p7615_p13)
}
  0x7a   : > { %s7619_s18 = scalar_lea.vmem %s281_s28, 16  ;;  %s7626_s25 = scalar_lea.vmem %s281_s28, 32 }
  0x7b   : > { %p7620_p0 = scmp.ne.s32.totalorder %s281_s28, %s7619_s18  ;;  %p7627_p7 = scmp.lt.s32.totalorder %s281_s28, %s281_s28 }
  0x7c   : > { %p7628_p9 = scmp.lt.s32.totalorder %s7626_s25, %s7619_s18 }
  0x7d   : > { %p7622_p2 = pnand %p7620_p0, %p7958_p8 }
  0x7e   : > { %p7629_p4 = por %p7628_p9, %p7627_p7 }
  0x7f   : > { %p7623_p5 = pneg %p7622_p2 }
  0x81   : > { %p7630_p10 = pnand %p7629_p4, %p7623_p5 }
  0x83   : > { %7633 = shalt.err (!%p7630_p10)
}
  0x84   : > { %6515 = dma.hbm_to_vmem [thread:$0]  (!%p7942_p6), %s8584_s2, 16, %s281_s28, [#allocation8]  }
  0x85   : > { %s7841_s22 = smov [#allocation12]   ;;  %s7634_s17 = scalar_lea.hbm %s8586_s4, 32 }
  0x86   : > { %s303_s1 = sshll.u32 %s7841_s22, 4  ;;  %p7635_p1 = scmp.ne.s32.totalorder %s8586_s4, %s7634_s17  ;;  %s304_s1 = int_to_ptr.vmem [resolvable:$true] %s303_s1 }
  0x87   : > { %p7641_p12 = scmp.lt.u32.totalorder %s7634_s17, %s8586_s4 }
  0x88   : > { %p7637_p3 = pnand %p7635_p1, %p7958_p8 }
  0x8a   : > { %p7638_p11 = pneg %p7637_p3 }
  0x8c   : > { %p7643_p13 = pnand %p7641_p12, %p7638_p11 }
  0x8e   : > { %7646 = shalt.err (!%p7643_p13)
}
  0x8f   : > { %s7647_s28 = scalar_lea.vmem %s304_s1, 32  ;;  %p7655_p7 = scmp.lt.s32.totalorder %s304_s1, %s304_s1 }
  0x90   : > { %p7648_p0 = scmp.ne.s32.totalorder %s304_s1, %s7647_s28  ;;  %p7656_p9 = scmp.lt.s32.totalorder %s7647_s28, %s7647_s28 }
  0x92   : > { %p7650_p2 = pnand %p7648_p0, %p7958_p8  ;;  %p7657_p4 = por %p7656_p9, %p7655_p7 }
  0x94   : > { %p7651_p5 = pneg %p7650_p2 }
  0x96   : > { %p7658_p10 = pnand %p7657_p4, %p7651_p5 }
  0x98   : > { %7661 = shalt.err (!%p7658_p10)
}
  0x99   : > { %s7842_s23 = smov 16   ;;  %s7843_s18 = smov 1  }
  0x9a   : > { %6521 = dma.hbm_to_vmem [thread:$0]  (!%p7942_p6), %s8586_s4, 32, %s304_s1, [#allocation11], %s7842_s23, %s7842_s23, %s7843_s18  }
  0x9b   : > { %s7844_s20 = smov [#allocation15]   ;;  %s7662_s17 = scalar_lea.hbm %s8588_s6, 192 }
  0x9c   : > { %s329_s22 = sshll.u32 %s7844_s20, 4  ;;  %p7663_p1 = scmp.ne.s32.totalorder %s8588_s6, %s7662_s17  ;;  %s330_s22 = int_to_ptr.vmem [resolvable:$true] %s329_s22 }
  0x9d   : > { %p7669_p12 = scmp.lt.u32.totalorder %s7662_s17, %s8588_s6 }
  0x9e   : > { %p7665_p3 = pnand %p7663_p1, %p7958_p8 }
  0xa0   : > { %p7666_p11 = pneg %p7665_p3 }
  0xa2   : > { %p7671_p13 = pnand %p7669_p12, %p7666_p11 }
  0xa4   : > { %7674 = shalt.err (!%p7671_p13)
}
  0xa5   : > { %s7675_s1 = scalar_lea.vmem %s330_s22, 192  ;;  %p7683_p7 = scmp.lt.s32.totalorder %s330_s22, %s330_s22 }
  0xa6   : > { %p7676_p0 = scmp.ne.s32.totalorder %s330_s22, %s7675_s1  ;;  %p7684_p9 = scmp.lt.s32.totalorder %s7675_s1, %s7675_s1 }
  0xa8   : > { %p7678_p2 = pnand %p7676_p0, %p7958_p8  ;;  %p7685_p4 = por %p7684_p9, %p7683_p7 }
  0xaa   : > { %p7679_p5 = pneg %p7678_p2 }
  0xac   : > { %p7686_p10 = pnand %p7685_p4, %p7679_p5 }
  0xae   : > { %7689 = shalt.err (!%p7686_p10)
}
  0xaf   : > { %s7845_s28 = smov 32   ;;  %s7846_s23 = smov 2  }
  0xb0   : > { %6527 = dma.hbm_to_vmem [thread:$0]  (!%p7942_p6), %s8588_s6, 192, %s330_s22, [#allocation14], %s7845_s28, %s7845_s28, %s7846_s23  }
  0xb1   : > { %s7847_s21 = smov [#allocation18]   ;;  %s7690_s17 = scalar_lea.hbm %s8590_s8, 16 }
  0xb2   : > { %s356_s20 = sshll.u32 %s7847_s21, 4  ;;  %p7691_p1 = scmp.ne.s32.totalorder %s8590_s8, %s7690_s17  ;;  %s357_s20 = int_to_ptr.vmem [resolvable:$true] %s356_s20 }
  0xb3   : > { %p7697_p12 = scmp.lt.u32.totalorder %s7690_s17, %s8590_s8 }
  0xb4   : > { %p7693_p3 = pnand %p7691_p1, %p7958_p8 }
  0xb6   : > { %p7694_p11 = pneg %p7693_p3 }
  0xb8   : > { %p7699_p13 = pnand %p7697_p12, %p7694_p11 }
  0xba   : > { %7702 = shalt.err (!%p7699_p13)
}
  0xbb   : > { %s7703_s22 = scalar_lea.vmem %s357_s20, 16  ;;  %s7710_s1 = scalar_lea.vmem %s357_s20, 32 }
  0xbc   : > { %p7704_p0 = scmp.ne.s32.totalorder %s357_s20, %s7703_s22  ;;  %p7711_p7 = scmp.lt.s32.totalorder %s357_s20, %s357_s20 }
  0xbd   : > { %p7712_p9 = scmp.lt.s32.totalorder %s7710_s1, %s7703_s22 }
  0xbe   : > { %p7706_p2 = pnand %p7704_p0, %p7958_p8 }
  0xbf   : > { %p7713_p4 = por %p7712_p9, %p7711_p7 }
  0xc0   : > { %p7707_p5 = pneg %p7706_p2 }
  0xc2   : > { %p7714_p10 = pnand %p7713_p4, %p7707_p5 }
  0xc4   : > { %7717 = shalt.err (!%p7714_p10)
}
  0xc5   : > { %6533 = dma.hbm_to_vmem [thread:$0]  (!%p7942_p6), %s8590_s8, 16, %s357_s20, [#allocation17]  }
  0xc6   : > { %s5721_s27 = sadd.s32 4294967294, %s7830_s12   ;;  %s8119_s19 = sadd.s32 1, %s7830_s12  }
  0xc7   : > { %s33_s18 = ssub.s32 %s7830_s12, %s8119_s19  ;;  %s36_s25 = sadd.s32 1, %s7826_s11 }
  0xc8   : > { %p34_p8 = scmp.eq.s32.totalorder %s33_s18, 0  ;;  %p43_p1 = scmp.ne.s32.totalorder %s7826_s11, %s7822_s10 }
  0xc9   : > { %p44_p3 = scmp.eq.s32.totalorder %s7830_s12, 0  ;;  %p49_p11 = scmp.ne.s32.totalorder %s7822_s10, %s7818_s30 }
  0xca   : > { %s8130_s21 = scalar_select %p34_p8, %s7826_s11, %s36_s25  }
  0xcb   : > { %p8132_p12 = por %p44_p3, %p43_p1  ;;  %p8607_p13 = scmp.eq.s32.totalorder %s7926_s15, 0 }
  0xcc   : > { %p241_p0 = scmp.eq.s32.totalorder %s7926_s15, 1  ;;  %p247_p2 = scmp.eq.s32.totalorder %s5721_s27, 1 }
  0xcd   : > { %p8138_p6 = por %p8607_p13, %p49_p11  ;;  %p6550_p5 = scmp.lt.s32.totalorder %s7830_s12, 2 }
  0xce   : > { %s367_s24 = sand.u32 1, %s7826_s11   ;;  %p8145_p7 = por %p241_p0, %p43_p1 }
  0xcf   : > { %p8149_p9 = por %p247_p2, %p49_p11  ;;  %s5732_s29 = sshll.u32 %s367_s24, 3 }
  0xd0   : > { %s8609_s17 = scalar_select %p8145_p7, 1, 0 }
  0xd1   : > { %s8610_s26 = scalar_select %p8149_p9, 1, 0 }
  0xd2   : > { %s5733_s13 = sshll.u32 %s7830_s12, 7  ;;  %s371_s28 = scalar_lea.vmem [#allocation4], %s5732_s29 }
  0xd3   : > { %s8157_s1 = scalar_lea.hbm %s8582_s0, %s5733_s13  ;;  %s378_s23 = sshll.u32 %s371_s28, 4  ;;  %s8159_s23 = int_to_ptr.vmem [resolvable:$true] %s378_s23 }
  0xd4   : > { %p8163_p4 = pnand %p6550_p5, %p8132_p12  ;;  %s368_s18 = scalar_lea.sflag [#allocation5], %s367_s24 }
  0xd5   : > { %s7718_s25 = scalar_lea.hbm %s8157_s1, 128  ;;  %s7723_s14 = scalar_lea.hbm %s8582_s0, 256 }
  0xd6   : > { %p7719_p10 = scmp.ne.s32.totalorder %s8157_s1, %s7718_s25  ;;  %p7720_p8 = pneg %p8163_p4 }
  0xd7   : > { %p7724_p11 = scmp.lt.u32.totalorder %s8157_s1, %s8582_s0  ;;  %p7725_p12 = scmp.lt.u32.totalorder %s7723_s14, %s7718_s25 }
  0xd8   : > { %p7721_p1 = pnand %p7720_p8, %p7719_p10  ;;  %p7727_p0 = scmp.lt.u32.totalorder %s7718_s25, %s8157_s1 }
  0xd9   : > { %p7726_p13 = por %p7725_p12, %p7724_p11 }
  0xda   : > { %p7722_p3 = pneg %p7721_p1 }
  0xdb   : > { %p7728_p2 = por %p7727_p0, %p7726_p13 }
  0xdd   : > { %p7729_p5 = pnand %p7728_p2, %p7722_p3 }
  0xdf   : > { %7732 = shalt.err (!%p7729_p5)
}
  0xe0   : > { %s7733_s24 = scalar_lea.vmem %s8159_s23, 128  ;;  %s7848_s28 = smov [#allocation4]  }
  0xe1   : > { %p7734_p10 = scmp.ne.s32.totalorder %s8159_s23, %s7733_s24  ;;  %s7738_s29 = sshll.u32 %s7848_s28, 4  ;;  %s7739_s29 = int_to_ptr.vmem [resolvable:$false] %s7738_s29 }
  0xe2   : > { %s7740_s13 = scalar_lea.vmem %s7739_s29, 256  ;;  %p7741_p7 = scmp.lt.s32.totalorder %s8159_s23, %s7739_s29 }
  0xe3   : > { %p7736_p1 = pnand %p7734_p10, %p7720_p8  ;;  %p7742_p11 = scmp.lt.s32.totalorder %s7740_s13, %s7733_s24 }
  0xe5   : > { %p7737_p9 = pneg %p7736_p1  ;;  %p7743_p12 = por %p7742_p11, %p7741_p7 }
  0xe7   : > { %p7744_p13 = pnand %p7743_p12, %p7737_p9 }
  0xe9   : > { %7747 = shalt.err (!%p7744_p13)
}
  0xea   : > { %6537 = dma.hbm_to_vmem [thread:$0]  (!%p8163_p4), %s8157_s1, 128, %s8159_s23, %s368_s18  }
  0xeb   : > { %p8612_p3 = scmp.ne.s32.totalorder %s8600_s16, 0 }
  0xec   : > { %s8195_s25 = sand.u32 (!%p8612_p3), 1, %s7822_s10  }
  0xed   : > { %387 = sbr.rel (%p8612_p3) target bundleno = 3384 (0xd38), region = 56  ;;  %s5735_s14 = sshll.u32 (!%p8612_p3), %s8195_s25, 3 }
  0xee   : > { %s390_s9 = scalar_lea.sflag (!%p8612_p3), [#allocation5], %s8195_s25  ;;  %s393_s22 = scalar_lea.vmem (!%p8612_p3), [#allocation4], %s5735_s14 }
  0xf4   : > { %7793 = dma.done.wait (%p8138_p6), %s390_s9, 128  }
  0xf5   : > { %7795 = vsyncadd (%p8138_p6), %s390_s9, 4294967168  ;;  %p8613_p7 = scmp.eq.s32.totalorder %s7926_s15, 0 }
  0xf7   : > { %7797 = dma.done.wait (%p8613_p7), [#allocation8], 144   ;;  %p8614_p9 = pmov %p8613_p7 }
  0xf8   : > { %p8615_p4 = pmov %p8613_p7 }
  0xf9   : > { %7799 = vsyncadd (%p8614_p9), [#allocation8], 4294967152 }
  0xfa   : > { %7801 = dma.done.wait (%p8615_p4), [#allocation11], 4128   ;;  %p8616_p8 = pmov %p8615_p4 }
  0xfb   : > { %p8617_p0 = pmov %p8615_p4 }
  0xfc   : > { %7803 = vsyncadd (%p8616_p8), [#allocation11], 4294963168 }
  0xfd   : > { %7805 = dma.done.wait (%p8617_p0), [#allocation14], 61632   ;;  %p8618_p2 = pmov %p8617_p0 }
  0xfe   : > { %p8619_p6 = pmov %p8617_p0 }
  0xff   : > { %7807 = vsyncadd (%p8618_p2), [#allocation14], 4294905664 }
 0x100   : > { %7809 = dma.done.wait (%p8619_p6), [#allocation17], 1040   ;;  %p8620_p5 = pmov %p8617_p0 }
 0x101   : > { %v7849_v0 = vmov 0.0   ;;  %vm7850_vm0 = vmmov 0   ;;  %v6613_v1 = vld [vmem:[#allocation7] sm:$0xff]   ;;  %v464_v2 = vld [vmem:[%s393_s22] sm:$0xff]  ;;  %vm481_vm1 = vcmask 130048   ;;  %v7851_v20 = vmov 0  }
 0x102   : > { %7811 = vsyncadd (%p8620_p5), [#allocation17], 4294966256  ;;  %6315 = vmatprep.subr.bf16.mxu1 %v7849_v0  ;;  %6317 = vmatprep.mubr.msk.bf16.mxu1 %vm7850_vm0, %v7849_v0  ;;  %v465_v3 = vpack.c.bf16 %v464_v2, %v464_v2  ;;  %v6614_v4 = vld [vmem:[#allocation10 + $0x4] ss:$8 sps:$4 sm:$0xff]   ;;  %v6616_v5 = vld [vmem:[#allocation10] ss:$8 sps:$4 sm:$0xff]  }
 0x103   : > { %6316 = vmatpush3.bf16.msra.mxu1 %v6613_v1  ;;  %v6617_v6 = vld [vmem:[#allocation10 + $0x14] ss:$8 sps:$4 sm:$0xff]   ;;  %622 = vmatprep.subr.bf16.mxu0 %v6614_v4  ;;  %v6619_v7 = vld [vmem:[#allocation10 + $0x10] ss:$8 sps:$4 sm:$0xff]   ;;  %v6620_v8 = vld [vmem:[#allocation10 + $0x24] ss:$8 sps:$4 sm:$0xff]  }
 0x104   : > { %623 = vmatpush1.bf16.msra.mxu0 %v6616_v5  ;;  %v6622_v9 = vld [vmem:[#allocation10 + $0x20] ss:$8 sps:$4 sm:$0xff]   ;;  %v6623_v10 = vld [vmem:[#allocation10 + $0x34] ss:$8 sps:$4 sm:$0xff]   ;;  %v6625_v11 = vld [vmem:[#allocation10 + $0x30] ss:$8 sps:$4 sm:$0xff]   ;;  %654 = vmatprep.mubr.bf16.mxu0 %v7851_v20 }
 0x105   : > { %624 = vmatprep.subr.bf16.mxu0 %v6617_v6  ;;  %v6626_v12 = vld [vmem:[#allocation10 + $0x44] ss:$8 sps:$4 sm:$0xff]   ;;  %v6628_v13 = vld [vmem:[#allocation10 + $0x40] ss:$8 sps:$4 sm:$0xff]   ;;  %v6629_v14 = vld [vmem:[#allocation10 + $0x54] ss:$8 sps:$4 sm:$0xff]  }
 0x106   : > { %6318 = vmatmul.mubr.msk.bf16.vlgmr.msra.gmra.mrb[0].mxu1 %vm481_vm1, %v465_v3  ;;  %v6631_v15 = vld [vmem:[#allocation10 + $0x50] ss:$8 sps:$4 sm:$0xff]   ;;  %v6632_v16 = vld [vmem:[#allocation10 + $0x64] ss:$8 sps:$4 sm:$0xff]   ;;  %v6634_v17 = vld [vmem:[#allocation10 + $0x60] ss:$8 sps:$4 sm:$0xff]  }
 0x107   : > { %v6635_v18 = vld [vmem:[#allocation10 + $0x74] ss:$8 sps:$4 sm:$0xff]   ;;  %v6637_v19 = vld [vmem:[#allocation10 + $0x70] ss:$8 sps:$4 sm:$0xff]   ;;  %461 = vst [vmem:[#allocation2] sm:$0x1] %v7851_v20  ;;  %1504 = vmatprep.mubr.bf16.mxu1 %v7851_v20 }
 0x108   : > { %625 = vmatpush1.bf16.msra.mxu0 %v6619_v7  ;;  %462 = vst [vmem:[#allocation2 + $0x8] sm:$0x2] %v7851_v20  ;;  %463 = vst [vmem:[#allocation2 + $0x10] sm:$0x2] %v7851_v20  ;;  %v6640_v21 = vld [vmem:[#allocation13 + $0x4] ss:$8 sps:$4 sm:$0xff]  }
 0x109   : > { %626 = vmatprep.subr.bf16.mxu0 %v6620_v8  ;;  %v5745_v22 = vld [vmem:[#allocation9] ss:$0 sm:$0xff]  ;;  %v6638_v27 = vld [vmem:[#allocation13] ss:$8 sps:$4 sm:$0xff]   ;;  %v6641_v31 = vld [vmem:[#allocation13 + $0x10] ss:$8 sps:$4 sm:$0xff]  }
 0x10a   : > { %v6643_v30 = vld [vmem:[#allocation13 + $0x14] ss:$8 sps:$4 sm:$0xff]   ;;  %v6646_v32 = vld [vmem:[#allocation13 + $0x24] ss:$8 sps:$4 sm:$0xff]   ;;  %v6644_v33 = vld [vmem:[#allocation13 + $0x20] ss:$8 sps:$4 sm:$0xff]  }
 0x10b   : > { %v6649_v34 = vld [vmem:[#allocation13 + $0x34] ss:$8 sps:$4 sm:$0xff]   ;;  %v6647_v35 = vld [vmem:[#allocation13 + $0x30] ss:$8 sps:$4 sm:$0xff]   ;;  %v6652_v36 = vld [vmem:[#allocation13 + $0x44] ss:$8 sps:$4 sm:$0xff]  }
 0x10c   : > { %627 = vmatpush1.bf16.msra.mxu0 %v6622_v9  ;;  %v6650_v37 = vld [vmem:[#allocation13 + $0x40] ss:$8 sps:$4 sm:$0xff]   ;;  %v6655_v38 = vld [vmem:[#allocation13 + $0x54] ss:$8 sps:$4 sm:$0xff]   ;;  %v6653_v39 = vld [vmem:[#allocation13 + $0x50] ss:$8 sps:$4 sm:$0xff]  }
 0x10d   : > { %628 = vmatprep.subr.bf16.mxu0 %v6623_v10  ;;  %v6658_v40 = vld [vmem:[#allocation13 + $0x64] ss:$8 sps:$4 sm:$0xff]   ;;  %v6656_v41 = vld [vmem:[#allocation13 + $0x60] ss:$8 sps:$4 sm:$0xff]   ;;  %v6661_v42 = vld [vmem:[#allocation13 + $0x74] ss:$8 sps:$4 sm:$0xff]  }
 0x10e   : > { %v6659_v43 = vld [vmem:[#allocation13 + $0x70] ss:$8 sps:$4 sm:$0xff]   ;;  %v6664_v44 = vld [vmem:[#allocation13 + $0x84] ss:$8 sps:$4 sm:$0xff]   ;;  %v6662_v45 = vld [vmem:[#allocation13 + $0x80] ss:$8 sps:$4 sm:$0xff]  }
 0x10f   : > { %v6667_v46 = vld [vmem:[#allocation13 + $0x94] ss:$8 sps:$4 sm:$0xff]   ;;  %v6665_v47 = vld [vmem:[#allocation13 + $0x90] ss:$8 sps:$4 sm:$0xff]   ;;  %v6670_v48 = vld [vmem:[#allocation13 + $0xa4] ss:$8 sps:$4 sm:$0xff]  }
 0x110   : > { %629 = vmatpush1.bf16.msra.mxu0 %v6625_v11  ;;  %v6668_v49 = vld [vmem:[#allocation13 + $0xa0] ss:$8 sps:$4 sm:$0xff]   ;;  %v6673_v50 = vld [vmem:[#allocation13 + $0xb4] ss:$8 sps:$4 sm:$0xff]   ;;  %v6671_v51 = vld [vmem:[#allocation13 + $0xb0] ss:$8 sps:$4 sm:$0xff]  }
 0x111   : > { %630 = vmatprep.subr.bf16.mxu0 %v6626_v12  ;;  %v6676_v52 = vld [vmem:[#allocation13 + $0xc4] ss:$8 sps:$4 sm:$0xff]   ;;  %v6674_v53 = vld [vmem:[#allocation13 + $0xc0] ss:$8 sps:$4 sm:$0xff]   ;;  %v6677_v54 = vld [vmem:[#allocation13 + $0xd0] ss:$8 sps:$4 sm:$0xff]  }
 0x112   : > { %v6679_v55 = vld [vmem:[#allocation13 + $0xd4] ss:$8 sps:$4 sm:$0xff]   ;;  %v6682_v56 = vld [vmem:[#allocation13 + $0xe4] ss:$8 sps:$4 sm:$0xff]   ;;  %v6680_v57 = vld [vmem:[#allocation13 + $0xe0] ss:$8 sps:$4 sm:$0xff]  }
 0x113   : > { %v6685_v58 = vld [vmem:[#allocation13 + $0xf4] ss:$8 sps:$4 sm:$0xff]   ;;  %v6683_v59 = vld [vmem:[#allocation13 + $0xf0] ss:$8 sps:$4 sm:$0xff]   ;;  %v6688_v60 = vld [vmem:[#allocation13 + $0x104] ss:$8 sps:$4 sm:$0xff]  }
 0x114   : > { %631 = vmatpush1.bf16.msra.mxu0 %v6628_v13  ;;  %v5764_v61 = vld [vmem:[#allocation12] ss:$0 sm:$0xff]  ;;  %vm688_vm2 = vsmask.f32 7424  ;;  %vm709_vm3 = vsmask.f32 6400 }
 0x115   : > { %632 = vmatprep.subr.bf16.mxu0 %v6629_v14  ;;  %vm704_vm4 = vcmask 1046528   ;;  %vm730_vm5 = vcmask 1045504   ;;  %vm1541_vm6 = vcmask 1040384   ;;  %s5744_s16 = sshll.u32 %s8195_s25, 5  ;;  %s6302_s20 = sshll.u32 %s7926_s15, 9 }
 0x116   : > { %s459_s1 = scalar_lea.vmem [#allocation19], %s5744_s16  ;;  %s8621_s24 = sld [smem:[#allocation27_spill]] }
 0x117   : > { %s5572_s23 = sshll.u32 %s459_s1, 4  ;;  %s5559_s15 = scalar_lea.sflag [#allocation6], %s8195_s25  ;;  %s8538_s23 = int_to_ptr.vmem [resolvable:$true] %s5572_s23 }
 0x118   : > { %633 = vmatpush1.bf16.msra.mxu0 %v6631_v15  ;;  %s7748_s29 = scalar_lea.vmem %s8538_s23, 512  ;;  %p8622_p1 = scmp.ne.s32.totalorder %s8609_s17, 0 }
 0x119   : > { %634 = vmatprep.subr.bf16.mxu0 %v6632_v16  ;;  %p7749_p10 = scmp.ne.s32.totalorder %s8538_s23, %s7748_s29  ;;  %s7852_s13 = smov [#allocation19]  }
 0x11a   : > { %s7752_s14 = sshll.u32 %s7852_s13, 4  ;;  %s7753_s14 = int_to_ptr.vmem [resolvable:$false] %s7752_s14 }
 0x11b   : > { %p7750_p11 = pnand %p7749_p10, %p8622_p1  ;;  %s7754_s9 = scalar_lea.vmem %s7753_s14, 1024 }
 0x11c   : > { %635 = vmatpush1.bf16.msra.mxu0 %v6634_v17  ;;  %s8536_s28 = scalar_lea.hbm %s8621_s24, %s6302_s20  ;;  %p7755_p13 = scmp.lt.s32.totalorder %s8538_s23, %s7753_s14 }
 0x11d   : > { %636 = vmatprep.subr.bf16.mxu0 %v6635_v18  ;;  %p7751_p12 = pneg %p7750_p11  ;;  %p7756_p3 = scmp.lt.s32.totalorder %s7754_s9, %s7748_s29 }
 0x11f   : > { %p7757_p7 = por %p7756_p3, %p7755_p13 }
 0x120   : > { %637 = vmatpush1.bf16.msra.mxu0 %v6637_v19 }
 0x121   : > { %1227 = vmatprep.subr.bf16.mxu0 %v6640_v21  ;;  %p7758_p9 = pnand %p7757_p7, %p7751_p12 }
 0x1d9   : > { %v519_v23 = vpop.f32.mrb[0].mxu1 }
 0x1da   : > { %v520_v24 = vadd.f32 %v5745_v22, %v519_v23  ;;  %v6319_v25 = vpop.f32.mrb[1].mxu1 }
 0x1db   : > { %v522_v26 = vpop.f32.mrb[2].mxu1 }
 0x1dc   : > { %v525_v28 = vpack.c.bf16 %v520_v24, %v520_v24  ;;  %v6320_v29 = vpop.f32.mrb[3].mxu1 }
 0x1de   : > { %655 = vmatmul.mubr.bf16.vlgmr.msra.gmra.mrb[0].mxu0 %v525_v28 }
 0x1df   : > { %1228 = vmatpush1.bf16.msra.mxu0 %v6638_v27  ;;  %v6686_v27 = vld [vmem:[#allocation13 + $0x100] ss:$8 sps:$4 sm:$0xff]  }
 0x1e0   : > { %1229 = vmatprep.subr.bf16.mxu0 %v6643_v30 }
 0x1e3   : > { %1230 = vmatpush1.bf16.msra.mxu0 %v6641_v31  ;;  %v6691_v31 = vld [vmem:[#allocation13 + $0x114] ss:$8 sps:$4 sm:$0xff]  }
 0x1e4   : > { %1231 = vmatprep.subr.bf16.mxu0 %v6646_v32 }
 0x1e7   : > { %1232 = vmatpush1.bf16.msra.mxu0 %v6644_v33  ;;  %v6689_v33 = vld [vmem:[#allocation13 + $0x110] ss:$8 sps:$4 sm:$0xff]  }
 0x1e8   : > { %1233 = vmatprep.subr.bf16.mxu0 %v6649_v34  ;;  %v6694_v34 = vld [vmem:[#allocation13 + $0x124] ss:$8 sps:$4 sm:$0xff]  }
 0x1eb   : > { %1234 = vmatpush1.bf16.msra.mxu0 %v6647_v35  ;;  %v6692_v35 = vld [vmem:[#allocation13 + $0x120] ss:$8 sps:$4 sm:$0xff]  }
 0x1ec   : > { %1235 = vmatprep.subr.bf16.mxu0 %v6652_v36  ;;  %v6697_v36 = vld [vmem:[#allocation13 + $0x134] ss:$8 sps:$4 sm:$0xff]  }
 0x1ef   : > { %1236 = vmatpush1.bf16.msra.mxu0 %v6650_v37  ;;  %v6695_v37 = vld [vmem:[#allocation13 + $0x130] ss:$8 sps:$4 sm:$0xff]  }
 0x1f0   : > { %1237 = vmatprep.subr.bf16.mxu0 %v6655_v38  ;;  %v6700_v38 = vld [vmem:[#allocation13 + $0x144] ss:$8 sps:$4 sm:$0xff]  }
 0x1f3   : > { %1238 = vmatpush1.bf16.msra.mxu0 %v6653_v39  ;;  %v6698_v39 = vld [vmem:[#allocation13 + $0x140] ss:$8 sps:$4 sm:$0xff]  }
 0x1f4   : > { %1239 = vmatprep.subr.bf16.mxu0 %v6658_v40  ;;  %v6703_v40 = vld [vmem:[#allocation13 + $0x154] ss:$8 sps:$4 sm:$0xff]  }
 0x1f7   : > { %1240 = vmatpush1.bf16.msra.mxu0 %v6656_v41  ;;  %v6701_v41 = vld [vmem:[#allocation13 + $0x150] ss:$8 sps:$4 sm:$0xff]  }
 0x1f8   : > { %1241 = vmatprep.subr.bf16.mxu0 %v6661_v42  ;;  %v6706_v42 = vld [vmem:[#allocation13 + $0x164] ss:$8 sps:$4 sm:$0xff]  }
 0x1fb   : > { %1242 = vmatpush1.bf16.msra.mxu0 %v6659_v43  ;;  %v6704_v43 = vld [vmem:[#allocation13 + $0x160] ss:$8 sps:$4 sm:$0xff]  }
 0x1fc   : > { %1243 = vmatprep.subr.bf16.mxu0 %v6664_v44  ;;  %v6709_v44 = vld [vmem:[#allocation13 + $0x174] ss:$8 sps:$4 sm:$0xff]  }
 0x1ff   : > { %1244 = vmatpush1.bf16.msra.mxu0 %v6662_v45  ;;  %v6707_v45 = vld [vmem:[#allocation13 + $0x170] ss:$8 sps:$4 sm:$0xff]  }
 0x200   : > { %1245 = vmatprep.subr.bf16.mxu0 %v6667_v46  ;;  %v6712_v46 = vld [vmem:[#allocation13 + $0x184] ss:$8 sps:$4 sm:$0xff]  }
 0x203   : > { %1246 = vmatpush1.bf16.msra.mxu0 %v6665_v47  ;;  %v6710_v47 = vld [vmem:[#allocation13 + $0x180] ss:$8 sps:$4 sm:$0xff]  }
 0x204   : > { %1247 = vmatprep.subr.bf16.mxu0 %v6670_v48  ;;  %v6715_v48 = vld [vmem:[#allocation13 + $0x194] ss:$8 sps:$4 sm:$0xff]  }
 0x207   : > { %1248 = vmatpush1.bf16.msra.mxu0 %v6668_v49  ;;  %v6713_v49 = vld [vmem:[#allocation13 + $0x190] ss:$8 sps:$4 sm:$0xff]  }
 0x208   : > { %1249 = vmatprep.subr.bf16.mxu0 %v6673_v50  ;;  %v6718_v50 = vld [vmem:[#allocation13 + $0x1a4] ss:$8 sps:$4 sm:$0xff]  }
 0x20b   : > { %1250 = vmatpush1.bf16.msra.mxu0 %v6671_v51  ;;  %v6716_v51 = vld [vmem:[#allocation13 + $0x1a0] ss:$8 sps:$4 sm:$0xff]  }
 0x20c   : > { %1251 = vmatprep.subr.bf16.mxu0 %v6676_v52  ;;  %v6721_v52 = vld [vmem:[#allocation13 + $0x1b4] ss:$8 sps:$4 sm:$0xff]  }
 0x20f   : > { %1252 = vmatpush1.bf16.msra.mxu0 %v6674_v53  ;;  %v6719_v53 = vld [vmem:[#allocation13 + $0x1b0] ss:$8 sps:$4 sm:$0xff]  }
 0x210   : > { %1253 = vmatprep.subr.bf16.mxu0 %v6679_v55  ;;  %v6722_v55 = vld [vmem:[#allocation13 + $0x1c0] ss:$8 sps:$4 sm:$0xff]  }
 0x213   : > { %1254 = vmatpush1.bf16.msra.mxu0 %v6677_v54  ;;  %v6724_v54 = vld [vmem:[#allocation13 + $0x1c4] ss:$8 sps:$4 sm:$0xff]  }
 0x214   : > { %1255 = vmatprep.subr.bf16.mxu0 %v6682_v56  ;;  %v6727_v56 = vld [vmem:[#allocation13 + $0x1d4] ss:$8 sps:$4 sm:$0xff]  }
 0x217   : > { %1256 = vmatpush1.bf16.msra.mxu0 %v6680_v57  ;;  %v6725_v57 = vld [vmem:[#allocation13 + $0x1d0] ss:$8 sps:$4 sm:$0xff]  }
 0x218   : > { %1257 = vmatprep.subr.bf16.mxu0 %v6685_v58  ;;  %v6730_v58 = vld [vmem:[#allocation13 + $0x1e4] ss:$8 sps:$4 sm:$0xff]  }
 0x21b   : > { %1258 = vmatpush1.bf16.msra.mxu0 %v6683_v59  ;;  %v6728_v59 = vld [vmem:[#allocation13 + $0x1e0] ss:$8 sps:$4 sm:$0xff]  }
 0x21c   : > { %1270 = vmatprep.subr.bf16.mxu0 %v6688_v60  ;;  %v6733_v60 = vld [vmem:[#allocation13 + $0x1f4] ss:$8 sps:$4 sm:$0xff]  }
 0x2b1   : > { %v656_v62 = vpop.f32.mrb[0].mxu0 }
 0x2b2   : > { %v670_v63 = vadd.f32 %v5764_v61, %v656_v62  ;;  %v658_v0 = vpop.f32.mrb[1].mxu0  ;;  %v6736_v62 = vld [vmem:[#allocation13 + $0x204] ss:$8 sps:$4 sm:$0xff]  }
 0x2b3   : > { %v671_v1 = vadd.f32 %v5764_v61, %v658_v0  ;;  %v660_v2 = vpop.f32.mrb[2].mxu0  ;;  %v6731_v61 = vld [vmem:[#allocation13 + $0x1f0] ss:$8 sps:$4 sm:$0xff]  }
 0x2b4   : > { %672 = vst [vmem:[#allocation3] ss:$2 sm:$0xff] %v670_v63  ;;  %v661_v3 = vpop.f32.mrb[3].mxu0  ;;  %v6739_v2 = vld [vmem:[#allocation13 + $0x214] ss:$8 sps:$4 sm:$0xff]  }
 0x2b5   : > { %674 = vst [vmem:[#allocation3 + $0x1] ss:$2 sm:$0xff] %v671_v1  ;;  %v6734_v1 = vld [vmem:[#allocation13 + $0x200] ss:$8 sps:$4 sm:$0xff]  }
 0x2bc   : > { %v8224_v4 = vld [vmem:[#allocation3] sm:$0xff]  ;;  %v8226_v5 = vld [vmem:[#allocation3 + $0x8] sm:$0xff] }
 0x2bd   : > { %v677_v6 = vpack.c.bf16 %v8226_v5, %v8224_v4 }
 0x2bf   : > { %v679_v7 = vrot.slane %v677_v6, 7  ;;  %v6737_v6 = vld [vmem:[#allocation13 + $0x210] ss:$8 sps:$4 sm:$0xff]  }
 0x2c1   : > { %681 = vst [vmem:[#allocation2] sm:$0xfe] %v679_v7  ;;  %682 = vst [vmem:[#allocation2 + $0x8] sm:$0x1] %v679_v7  ;;  %v6742_v7 = vld [vmem:[#allocation13 + $0x224] ss:$8 sps:$4 sm:$0xff]  }
 0x2c8   : > { %v683_v8 = vld [vmem:[#allocation2] sm:$0xff]  ;;  %v8230_v9 = vld [vmem:[#allocation2 + $0x8] sm:$0x1] }
 0x2c9   : > { %v8232_v10 = vld [vmem:[#allocation2] sm:$0xfe]  ;;  %v692_v11 = vshll.u32 %v683_v8, 16  ;;  %v697_v12 = vshll.u32 %v8230_v9, 16  ;;  %v8235_v13 = vld [vmem:[#allocation2 + $0x8] sm:$0x3] }
 0x2ca   : > { %v711_v14 = vshrl.u32 %v8232_v10, 16  ;;  %v714_v15 = vshll.u32 %v8232_v10, 16  ;;  %v719_v16 = vshrl.u32 %v8235_v13, 16  ;;  %v722_v17 = vshll.u32 %v8235_v13, 16 }
 0x2cb   : > { %v690_v18 = vshrl.u32 %v683_v8, 16  ;;  %v694_v19 = vrot.slane %v692_v11, 1  ;;  %v699_v26 = vrot.slane %v697_v12, 1  ;;  %v705_v63 = vrot.slane %v8232_v10, 1  ;;  %v6745_v10 = vld [vmem:[#allocation13 + $0x234] ss:$8 sps:$4 sm:$0xff]  }
 0x2cc   : > { %v713_v21 = vrot.slane %v711_v14, 1  ;;  %v716_v22 = vrot.slane %v714_v15, 2  ;;  %v721_v23 = vrot.slane %v719_v16, 1  ;;  %v724_v24 = vrot.slane %v722_v17, 2  ;;  %v6748_v11 = vld [vmem:[#allocation13 + $0x244] ss:$8 sps:$4 sm:$0xff]  }
 0x2cd   : > { %v695_v25 = vor.u32 %v694_v19, %v690_v18  ;;  %v706_v0 = vrot.slane %v8230_v9, 1  ;;  %v6743_v9 = vld [vmem:[#allocation13 + $0x230] ss:$8 sps:$4 sm:$0xff]   ;;  %v6746_v12 = vld [vmem:[#allocation13 + $0x240] ss:$8 sps:$4 sm:$0xff]  }
 0x2ce   : > { %v717_v28 = vor.u32 %v716_v22, %v713_v21  ;;  %v725_v29 = vor.u32 %v724_v24, %v721_v23  ;;  %v6751_v14 = vld [vmem:[#allocation13 + $0x254] ss:$8 sps:$4 sm:$0xff]   ;;  %v6749_v15 = vld [vmem:[#allocation13 + $0x250] ss:$8 sps:$4 sm:$0xff]   ;;  %v6754_v16 = vld [vmem:[#allocation13 + $0x264] ss:$8 sps:$4 sm:$0xff]  }
 0x2cf   : > { %v700_v30 = vsel %vm688_vm2, %v695_v25, %v699_v26  ;;  %v707_v3 = vsel %vm704_vm4, %v705_v63, %v706_v0  ;;  %v6752_v17 = vld [vmem:[#allocation13 + $0x260] ss:$8 sps:$4 sm:$0xff]   ;;  %v6757_v18 = vld [vmem:[#allocation13 + $0x274] ss:$8 sps:$4 sm:$0xff]   ;;  %v687_v19 = vld [vmem:[#allocation2] sm:$0xfc] }
 0x2d0   : > { %1259 = vmatprep.mubr.bf16.mxu0 %v700_v30  ;;  %v726_v32 = vsel %vm709_vm3, %v717_v28, %v725_v29  ;;  %v6755_v21 = vld [vmem:[#allocation13 + $0x270] ss:$8 sps:$4 sm:$0xff]   ;;  %v731_v22 = vrot.slane %v687_v19, 2  ;;  %v732_v23 = vrot.slane %v8235_v13, 2  ;;  %v6760_v25 = vld [vmem:[#allocation10 + $0x84] ss:$8 sps:$4 sm:$0xff]  }
 0x2d1   : > { %1260 = vmatmul.mubr.bf16.vlgmr.msra.gmra.mrb[4].mxu0 %v683_v8  ;;  %v6740_v8 = vld [vmem:[#allocation13 + $0x220] ss:$8 sps:$4 sm:$0xff]   ;;  %1472 = vmatprep.subr.bf16.mxu1 %v6760_v25  ;;  %v6761_v28 = vld [vmem:[#allocation10 + $0x90] ss:$8 sps:$4 sm:$0xff]  }
 0x2d2   : > { %1271 = vmatpush1.bf16.msra.mxu0 %v6686_v27  ;;  %1302 = vmatprep.mubr.bf16.mxu0 %v726_v32  ;;  %v733_v24 = vsel %vm730_vm5, %v731_v22, %v732_v23  ;;  %v6758_v26 = vld [vmem:[#allocation10 + $0x80] ss:$8 sps:$4 sm:$0xff]   ;;  %v6763_v27 = vld [vmem:[#allocation10 + $0x94] ss:$8 sps:$4 sm:$0xff]   ;;  %v6766_v29 = vld [vmem:[#allocation10 + $0xa4] ss:$8 sps:$4 sm:$0xff]  }
 0x2d3   : > { %1272 = vmatprep.subr.bf16.mxu0 %v6691_v31  ;;  %1473 = vmatpush1.bf16.msra.mxu1 %v6758_v26  ;;  %v6764_v30 = vld [vmem:[#allocation10 + $0xa0] ss:$8 sps:$4 sm:$0xff]   ;;  %v6767_v31 = vld [vmem:[#allocation10 + $0xb0] ss:$8 sps:$4 sm:$0xff]   ;;  %v6769_v32 = vld [vmem:[#allocation10 + $0xb4] ss:$8 sps:$4 sm:$0xff]  }
 0x2d4   : > { %1474 = vmatprep.subr.bf16.mxu1 %v6763_v27  ;;  %v6772_v13 = vld [vmem:[#allocation10 + $0xc4] ss:$8 sps:$4 sm:$0xff]   ;;  %v6805_v22 = vld [vmem:[#allocation13 + $0x2f4] ss:$8 sps:$4 sm:$0xff]   ;;  %v6803_v23 = vld [vmem:[#allocation13 + $0x2f0] ss:$8 sps:$4 sm:$0xff]  }
 0x2d5   : > { %v6802_v19 = vld [vmem:[#allocation13 + $0x2e4] ss:$8 sps:$4 sm:$0xff]   ;;  %v6806_v25 = vld [vmem:[#allocation13 + $0x300] ss:$8 sps:$4 sm:$0xff]   ;;  %v6811_v26 = vld [vmem:[#allocation13 + $0x314] ss:$8 sps:$4 sm:$0xff]  }
 0x2d6   : > { %1273 = vmatpush1.bf16.msra.mxu0 %v6689_v33  ;;  %v6770_v33 = vld [vmem:[#allocation10 + $0xc0] ss:$8 sps:$4 sm:$0xff]   ;;  %v6809_v27 = vld [vmem:[#allocation13 + $0x310] ss:$8 sps:$4 sm:$0xff]  }
 0x2d7   : > { %1274 = vmatprep.subr.bf16.mxu0 %v6694_v34  ;;  %1475 = vmatpush1.bf16.msra.mxu1 %v6761_v28  ;;  %v6775_v34 = vld [vmem:[#allocation10 + $0xd4] ss:$8 sps:$4 sm:$0xff]   ;;  %v6814_v28 = vld [vmem:[#allocation13 + $0x324] ss:$8 sps:$4 sm:$0xff]  }
 0x2d8   : > { %1476 = vmatprep.subr.bf16.mxu1 %v6766_v29  ;;  %v6812_v29 = vld [vmem:[#allocation13 + $0x320] ss:$8 sps:$4 sm:$0xff]  }
 0x2da   : > { %1275 = vmatpush1.bf16.msra.mxu0 %v6692_v35  ;;  %v6773_v35 = vld [vmem:[#allocation10 + $0xd0] ss:$8 sps:$4 sm:$0xff]  }
 0x2db   : > { %1276 = vmatprep.subr.bf16.mxu0 %v6697_v36  ;;  %1477 = vmatpush1.bf16.msra.mxu1 %v6764_v30  ;;  %v6778_v36 = vld [vmem:[#allocation10 + $0xe4] ss:$8 sps:$4 sm:$0xff]   ;;  %v6817_v30 = vld [vmem:[#allocation13 + $0x334] ss:$8 sps:$4 sm:$0xff]  }
 0x2dc   : > { %1478 = vmatprep.subr.bf16.mxu1 %v6769_v32  ;;  %v6820_v32 = vld [vmem:[#allocation13 + $0x344] ss:$8 sps:$4 sm:$0xff]  }
 0x2de   : > { %1277 = vmatpush1.bf16.msra.mxu0 %v6695_v37  ;;  %v6776_v37 = vld [vmem:[#allocation10 + $0xe0] ss:$8 sps:$4 sm:$0xff]  }
 0x2df   : > { %1278 = vmatprep.subr.bf16.mxu0 %v6700_v38  ;;  %1479 = vmatpush1.bf16.msra.mxu1 %v6767_v31  ;;  %v6781_v38 = vld [vmem:[#allocation10 + $0xf4] ss:$8 sps:$4 sm:$0xff]  }
 0x2e0   : > { %1480 = vmatprep.subr.bf16.mxu1 %v6772_v13  ;;  %v6815_v31 = vld [vmem:[#allocation13 + $0x330] ss:$8 sps:$4 sm:$0xff]   ;;  %v6818_v13 = vld [vmem:[#allocation13 + $0x340] ss:$8 sps:$4 sm:$0xff]  }
 0x2e2   : > { %1279 = vmatpush1.bf16.msra.mxu0 %v6698_v39  ;;  %v6779_v39 = vld [vmem:[#allocation10 + $0xf0] ss:$8 sps:$4 sm:$0xff]  }
 0x2e3   : > { %1280 = vmatprep.subr.bf16.mxu0 %v6703_v40  ;;  %1481 = vmatpush1.bf16.msra.mxu1 %v6770_v33  ;;  %v6784_v40 = vld [vmem:[#allocation13 + $0x284] ss:$8 sps:$4 sm:$0xff]   ;;  %v6823_v33 = vld [vmem:[#allocation13 + $0x354] ss:$8 sps:$4 sm:$0xff]  }
 0x2e4   : > { %1482 = vmatprep.subr.bf16.mxu1 %v6775_v34  ;;  %v6821_v34 = vld [vmem:[#allocation13 + $0x350] ss:$8 sps:$4 sm:$0xff]  }
 0x2e6   : > { %1281 = vmatpush1.bf16.msra.mxu0 %v6701_v41  ;;  %v817_v41 = vlaneseq }
 0x2e7   : > { %1282 = vmatprep.subr.bf16.mxu0 %v6706_v42  ;;  %1483 = vmatpush1.bf16.msra.mxu1 %v6773_v35  ;;  %v6826_v35 = vld [vmem:[#allocation13 + $0x364] ss:$8 sps:$4 sm:$0xff]  }
 0x2e8   : > { %1484 = vmatprep.subr.bf16.mxu1 %v6778_v36  ;;  %v818_v42 = vshrl.u32 %v817_v41, 7  ;;  %v6824_v36 = vld [vmem:[#allocation13 + $0x360] ss:$8 sps:$4 sm:$0xff]  }
 0x2ea   : > { %1283 = vmatpush1.bf16.msra.mxu0 %v6704_v43  ;;  %v8249_v43 = vsub.s32 1, %v818_v42 }
 0x2eb   : > { %1284 = vmatprep.subr.bf16.mxu0 %v6709_v44  ;;  %1485 = vmatpush1.bf16.msra.mxu1 %v6776_v37  ;;  %v815_v44 = vld [vmem:[#allocation15] sm:$0x3]  ;;  %v6829_v37 = vld [vmem:[#allocation13 + $0x374] ss:$8 sps:$4 sm:$0xff]  }
 0x2ec   : > { %1486 = vmatprep.subr.bf16.mxu1 %v6781_v38  ;;  %v6827_v38 = vld [vmem:[#allocation13 + $0x370] ss:$8 sps:$4 sm:$0xff]  }
 0x2ee   : > { %1285 = vmatpush1.bf16.msra.mxu0 %v6707_v45  ;;  %v824_v45 = vrot.slane %v815_v44, %v8249_v43 }
 0x2ef   : > { %1286 = vmatprep.subr.bf16.mxu0 %v6712_v46  ;;  %1487 = vmatpush1.bf16.msra.mxu1 %v6779_v39  ;;  %v6832_v39 = vld [vmem:[#allocation13 + $0x384] ss:$8 sps:$4 sm:$0xff]  }
 0x2f0   : > { %2117 = vmatprep.subr.bf16.mxu1 %v6784_v40  ;;  %v5863_v40 = vld [vmem:[#allocation12 + $0x1] ss:$0 sm:$0xff] }
 0x2f2   : > { %1287 = vmatpush1.bf16.msra.mxu0 %v6710_v47 }
 0x2f3   : > { %1288 = vmatprep.subr.bf16.mxu0 %v6715_v48 }
 0x2f6   : > { %1289 = vmatpush1.bf16.msra.mxu0 %v6713_v49 }
 0x2f7   : > { %1290 = vmatprep.subr.bf16.mxu0 %v6718_v50 }
 0x2fa   : > { %1291 = vmatpush1.bf16.msra.mxu0 %v6716_v51 }
 0x2fb   : > { %1292 = vmatprep.subr.bf16.mxu0 %v6721_v52 }
 0x2fe   : > { %1293 = vmatpush1.bf16.msra.mxu0 %v6719_v53 }
 0x2ff   : > { %1294 = vmatprep.subr.bf16.mxu0 %v6724_v54 }
 0x302   : > { %1295 = vmatpush1.bf16.msra.mxu0 %v6722_v55 }
 0x303   : > { %1296 = vmatprep.subr.bf16.mxu0 %v6727_v56 }
 0x306   : > { %1297 = vmatpush1.bf16.msra.mxu0 %v6725_v57 }
 0x307   : > { %1298 = vmatprep.subr.bf16.mxu0 %v6730_v58  ;;  %v8252_v58 = vsub.s32 0, %v818_v42 }
 0x30a   : > { %1299 = vmatpush1.bf16.msra.mxu0 %v6728_v59  ;;  %v820_v59 = vrot.slane %v815_v44, %v8252_v58 }
 0x30b   : > { %1300 = vmatprep.subr.bf16.mxu0 %v6733_v60 }
 0x30e   : > { %1301 = vmatpush1.bf16.msra.mxu0 %v6731_v61 }
 0x30f   : > { %1313 = vmatprep.subr.bf16.mxu0 %v6736_v62 }
 0x311   : > { %1303 = vmatmul.mubr.bf16.vlgmr.msra.gmra.mrb[4].mxu0 %v707_v3 }
 0x312   : > { %1314 = vmatpush1.bf16.msra.mxu0 %v6734_v1  ;;  %1345 = vmatprep.mubr.bf16.mxu0 %v7851_v20 }
 0x313   : > { %1315 = vmatprep.subr.bf16.mxu0 %v6739_v2 }
 0x316   : > { %1316 = vmatpush1.bf16.msra.mxu0 %v6737_v6 }
 0x317   : > { %1317 = vmatprep.subr.bf16.mxu0 %v6742_v7 }
 0x31a   : > { %1318 = vmatpush1.bf16.msra.mxu0 %v6740_v8  ;;  %v6782_v8 = vld [vmem:[#allocation13 + $0x280] ss:$8 sps:$4 sm:$0xff]  }
 0x31b   : > { %1319 = vmatprep.subr.bf16.mxu0 %v6745_v10 }
 0x31e   : > { %1320 = vmatpush1.bf16.msra.mxu0 %v6743_v9  ;;  %v6787_v9 = vld [vmem:[#allocation13 + $0x294] ss:$8 sps:$4 sm:$0xff]  }
 0x31f   : > { %1321 = vmatprep.subr.bf16.mxu0 %v6748_v11  ;;  %v6785_v11 = vld [vmem:[#allocation13 + $0x290] ss:$8 sps:$4 sm:$0xff]  }
 0x322   : > { %1322 = vmatpush1.bf16.msra.mxu0 %v6746_v12  ;;  %v6790_v12 = vld [vmem:[#allocation13 + $0x2a4] ss:$8 sps:$4 sm:$0xff]  }
 0x323   : > { %1323 = vmatprep.subr.bf16.mxu0 %v6751_v14  ;;  %v6788_v14 = vld [vmem:[#allocation13 + $0x2a0] ss:$8 sps:$4 sm:$0xff]  }
 0x326   : > { %1324 = vmatpush1.bf16.msra.mxu0 %v6749_v15  ;;  %v6793_v15 = vld [vmem:[#allocation13 + $0x2b4] ss:$8 sps:$4 sm:$0xff]  }
 0x327   : > { %1325 = vmatprep.subr.bf16.mxu0 %v6754_v16  ;;  %v6791_v16 = vld [vmem:[#allocation13 + $0x2b0] ss:$8 sps:$4 sm:$0xff]  }
 0x32a   : > { %1326 = vmatpush1.bf16.msra.mxu0 %v6752_v17  ;;  %v6799_v17 = vld [vmem:[#allocation13 + $0x2d4] ss:$8 sps:$4 sm:$0xff]  }
 0x32b   : > { %1327 = vmatprep.subr.bf16.mxu0 %v6757_v18  ;;  %v6797_v18 = vld [vmem:[#allocation13 + $0x2d0] ss:$8 sps:$4 sm:$0xff]  }
 0x32e   : > { %1328 = vmatpush1.bf16.msra.mxu0 %v6755_v21  ;;  %v6800_v21 = vld [vmem:[#allocation13 + $0x2e0] ss:$8 sps:$4 sm:$0xff]  }
 0x331   : > { %1346 = vmatmul.mubr.bf16.vlgmr.msra.gmra.mrb[4].mxu0 %v733_v24  ;;  %v6808_v24 = vld [vmem:[#allocation13 + $0x304] ss:$8 sps:$4 sm:$0xff]  }
 0x404   : > { %v1347_v46 = vpop.f32.mrb[4].mxu0 }
 0x405   : > { %v1349_v47 = vpop.f32.mrb[5].mxu0  ;;  %v6341_v60 = vadd.f32 %v1347_v46, %v820_v59 }
 0x406   : > { %v6342_v48 = vadd.f32 %v1349_v47, %v824_v45  ;;  %v1351_v49 = vpop.f32.mrb[6].mxu0 }
 0x407   : > { %v1353_v50 = vpop.f32.mrb[7].mxu0  ;;  %v6343_v62 = vadd.f32 %v1351_v49, %v820_v59 }
 0x408   : > { %v5845_v51 = vmul.f32 -1.442695, %v6342_v48  ;;  %v6344_v52 = vadd.f32 %v1353_v50, %v824_v45 }
 0x40a   : > { %7390 = vpow2.f32 %v5845_v51  ;;  %v5846_v53 = vmul.f32 -1.442695, %v6344_v52 }
 0x40c   : > { %7392 = vpow2.f32 %v5846_v53 }
 0x414   : > { %v7391_v54 = vpop.eup %7390 }
 0x415   : > { %v1362_v55 = vadd.f32 1.0, %v7391_v54 }
 0x416   : > { %v7393_v56 = vpop.eup %7392 }
 0x417   : > { %7394 = vrcp.f32 %v1362_v55  ;;  %v1363_v57 = vadd.f32 1.0, %v7393_v56 }
 0x419   : > { %7396 = vrcp.f32 %v1363_v57 }
 0x421   : > { %v7395_v61 = vpop.eup %7394 }
 0x422   : > { %v1368_v63 = vmul.f32 %v7395_v61, %v6341_v60 }
 0x423   : > { %v7397_v0 = vpop.eup %7396 }
 0x424   : > { %v1369_v1 = vmul.f32 %v7397_v0, %v6343_v62  ;;  %v1370_v2 = vadd.f32 %v1368_v63, %v8224_v4  ;;  %v6796_v4 = vld [vmem:[#allocation13 + $0x2c4] ss:$8 sps:$4 sm:$0xff]  }
 0x426   : > { %v1371_v3 = vadd.f32 %v1369_v1, %v8226_v5  ;;  %v1372_v6 = vmul.f32 0.70710677, %v1370_v2  ;;  %v6794_v5 = vld [vmem:[#allocation13 + $0x2c0] ss:$8 sps:$4 sm:$0xff]  }
 0x428   : > { %v1373_v7 = vmul.f32 0.70710677, %v1371_v3 }
 0x42a   : > { %v1374_v10 = vpack.c.bf16 %v1373_v7, %v1372_v6 }
 0x42c   : > { %1505 = vmatmul.mubr.bf16.vlgmr.msra.gmra.mrb[4].mxu1 %v1374_v10 }
 0x42d   : > { %2118 = vmatpush1.bf16.msra.mxu1 %v6782_v8 }
 0x42e   : > { %2119 = vmatprep.subr.bf16.mxu1 %v6787_v9 }
 0x431   : > { %2120 = vmatpush1.bf16.msra.mxu1 %v6785_v11 }
 0x432   : > { %2121 = vmatprep.subr.bf16.mxu1 %v6790_v12  ;;  %v6830_v12 = vld [vmem:[#allocation13 + $0x380] ss:$8 sps:$4 sm:$0xff]  }
 0x435   : > { %2122 = vmatpush1.bf16.msra.mxu1 %v6788_v14 }
 0x436   : > { %2123 = vmatprep.subr.bf16.mxu1 %v6793_v15 }
 0x439   : > { %2124 = vmatpush1.bf16.msra.mxu1 %v6791_v16  ;;  %v6835_v16 = vld [vmem:[#allocation13 + $0x394] ss:$8 sps:$4 sm:$0xff]  }
 0x43a   : > { %2125 = vmatprep.subr.bf16.mxu1 %v6796_v4 }
 0x43d   : > { %2126 = vmatpush1.bf16.msra.mxu1 %v6794_v5 }
 0x43e   : > { %2127 = vmatprep.subr.bf16.mxu1 %v6799_v17 }
 0x441   : > { %2128 = vmatpush1.bf16.msra.mxu1 %v6797_v18  ;;  %v6833_v18 = vld [vmem:[#allocation13 + $0x390] ss:$8 sps:$4 sm:$0xff]  }
 0x442   : > { %2129 = vmatprep.subr.bf16.mxu1 %v6802_v19  ;;  %v6838_v19 = vld [vmem:[#allocation13 + $0x3a4] ss:$8 sps:$4 sm:$0xff]  }
 0x445   : > { %2130 = vmatpush1.bf16.msra.mxu1 %v6800_v21 }
 0x446   : > { %2131 = vmatprep.subr.bf16.mxu1 %v6805_v22 }
 0x449   : > { %2132 = vmatpush1.bf16.msra.mxu1 %v6803_v23 }
 0x44a   : > { %2133 = vmatprep.subr.bf16.mxu1 %v6808_v24  ;;  %v6836_v24 = vld [vmem:[#allocation13 + $0x3a0] ss:$8 sps:$4 sm:$0xff]  }
 0x44d   : > { %2134 = vmatpush1.bf16.msra.mxu1 %v6806_v25 }
 0x44e   : > { %2135 = vmatprep.subr.bf16.mxu1 %v6811_v26  ;;  %v6841_v26 = vld [vmem:[#allocation13 + $0x3b4] ss:$8 sps:$4 sm:$0xff]  }
 0x451   : > { %2136 = vmatpush1.bf16.msra.mxu1 %v6809_v27 }
 0x452   : > { %2137 = vmatprep.subr.bf16.mxu1 %v6814_v28  ;;  %v6839_v28 = vld [vmem:[#allocation13 + $0x3b0] ss:$8 sps:$4 sm:$0xff]  }
 0x455   : > { %2138 = vmatpush1.bf16.msra.mxu1 %v6812_v29  ;;  %v6844_v29 = vld [vmem:[#allocation13 + $0x3c4] ss:$8 sps:$4 sm:$0xff]  }
 0x456   : > { %2139 = vmatprep.subr.bf16.mxu1 %v6817_v30  ;;  %v6842_v30 = vld [vmem:[#allocation13 + $0x3c0] ss:$8 sps:$4 sm:$0xff]  }
 0x459   : > { %2140 = vmatpush1.bf16.msra.mxu1 %v6815_v31  ;;  %v6847_v31 = vld [vmem:[#allocation13 + $0x3d4] ss:$8 sps:$4 sm:$0xff]  }
 0x45a   : > { %2141 = vmatprep.subr.bf16.mxu1 %v6820_v32  ;;  %v6845_v32 = vld [vmem:[#allocation13 + $0x3d0] ss:$8 sps:$4 sm:$0xff]  }
 0x45d   : > { %2142 = vmatpush1.bf16.msra.mxu1 %v6818_v13  ;;  %v6850_v13 = vld [vmem:[#allocation13 + $0x3e4] ss:$8 sps:$4 sm:$0xff]  }
 0x45e   : > { %2143 = vmatprep.subr.bf16.mxu1 %v6823_v33  ;;  %v6848_v33 = vld [vmem:[#allocation13 + $0x3e0] ss:$8 sps:$4 sm:$0xff]  }
 0x461   : > { %2144 = vmatpush1.bf16.msra.mxu1 %v6821_v34  ;;  %v6853_v34 = vld [vmem:[#allocation13 + $0x3f4] ss:$8 sps:$4 sm:$0xff]  }
 0x462   : > { %2145 = vmatprep.subr.bf16.mxu1 %v6826_v35  ;;  %v6851_v35 = vld [vmem:[#allocation13 + $0x3f0] ss:$8 sps:$4 sm:$0xff]  }
 0x465   : > { %2146 = vmatpush1.bf16.msra.mxu1 %v6824_v36  ;;  %v6856_v36 = vld [vmem:[#allocation13 + $0x404] ss:$8 sps:$4 sm:$0xff]  }
 0x466   : > { %2147 = vmatprep.subr.bf16.mxu1 %v6829_v37  ;;  %v6854_v37 = vld [vmem:[#allocation13 + $0x400] ss:$8 sps:$4 sm:$0xff]  }
 0x469   : > { %2148 = vmatpush1.bf16.msra.mxu1 %v6827_v38  ;;  %v6859_v38 = vld [vmem:[#allocation13 + $0x414] ss:$8 sps:$4 sm:$0xff]  }
 0x46a   : > { %2170 = vmatprep.subr.bf16.mxu1 %v6832_v39  ;;  %v6857_v39 = vld [vmem:[#allocation13 + $0x410] ss:$8 sps:$4 sm:$0xff]  }
 0x4ff   : > { %v1506_v41 = vpop.f32.mrb[4].mxu1 }
 0x500   : > { %v1523_v42 = vadd.f32 %v5863_v40, %v1506_v41  ;;  %v1508_v44 = vpop.f32.mrb[5].mxu1  ;;  %v6860_v41 = vld [vmem:[#allocation13 + $0x420] ss:$8 sps:$4 sm:$0xff]  }
 0x501   : > { %v1525_v45 = vadd.f32 %v5863_v40, %v1508_v44  ;;  %v1510_v46 = vpop.f32.mrb[6].mxu1  ;;  %v6863_v44 = vld [vmem:[#allocation13 + $0x430] ss:$8 sps:$4 sm:$0xff]  }
 0x502   : > { %1527 = vst [vmem:[#allocation3] ss:$2 sm:$0xff] %v1523_v42  ;;  %v1524_v47 = vadd.f32 %v5863_v40, %v1510_v46  ;;  %v1512_v48 = vpop.f32.mrb[7].mxu1  ;;  %v6865_v42 = vld [vmem:[#allocation13 + $0x434] ss:$8 sps:$4 sm:$0xff]  }
 0x503   : > { %1530 = vst [vmem:[#allocation3 + $0x1] ss:$2 sm:$0xff] %v1525_v45  ;;  %v1526_v49 = vadd.f32 %v5863_v40, %v1512_v48  ;;  %v6862_v40 = vld [vmem:[#allocation13 + $0x424] ss:$8 sps:$4 sm:$0xff]   ;;  %v6866_v46 = vld [vmem:[#allocation13 + $0x440] ss:$8 sps:$4 sm:$0xff]  }
 0x504   : > { %1529 = vst [vmem:[#allocation3 + $0x10] ss:$2 sm:$0xff] %v1524_v47  ;;  %v6868_v45 = vld [vmem:[#allocation13 + $0x444] ss:$8 sps:$4 sm:$0xff]   ;;  %v6871_v47 = vld [vmem:[#allocation13 + $0x454] ss:$8 sps:$4 sm:$0xff]  }
 0x505   : > { %1532 = vst [vmem:[#allocation3 + $0x11] ss:$2 sm:$0xff] %v1526_v49  ;;  %v6869_v48 = vld [vmem:[#allocation13 + $0x450] ss:$8 sps:$4 sm:$0xff]  }
 0x50a   : > { %v8257_v50 = vld [vmem:[#allocation3] sm:$0xff]  ;;  %v8259_v51 = vld [vmem:[#allocation3 + $0x8] sm:$0xff] }
 0x50b   : > { %v1537_v52 = vpack.c.bf16 %v8259_v51, %v8257_v50 }
 0x50c   : > { %v8263_v53 = vld [vmem:[#allocation3 + $0x10] sm:$0xff]  ;;  %v8265_v54 = vld [vmem:[#allocation3 + $0x18] sm:$0xff] }
 0x50d   : > { %v1538_v55 = vpack.c.bf16 %v8265_v54, %v8263_v53  ;;  %v1542_v56 = vrot.slane %v1537_v52, 7  ;;  %v6874_v52 = vld [vmem:[#allocation13 + $0x464] ss:$8 sps:$4 sm:$0xff]  }
 0x50f   : > { %v1543_v57 = vrot.slane %v1538_v55, 7  ;;  %1548 = vst [vmem:[#allocation2] sm:$0xfe] %v1542_v56 }
 0x511   : > { %1550 = vst [vmem:[#allocation2 + $0x10] sm:$0x1] %v1543_v57  ;;  %v8270_v59 = vsel %vm1541_vm6, %v1542_v56, %v1543_v57  ;;  %v6872_v57 = vld [vmem:[#allocation13 + $0x460] ss:$8 sps:$4 sm:$0xff]  }
 0x512   : > { %v1567_v60 = vshll.u32 %v8270_v59, 16  ;;  %v1571_v7 = vshrl.u32 %v8270_v59, 16 }
 0x514   : > { %v1569_v3 = vrot.slane %v1567_v60, 1  ;;  %v1599_v21 = vrot.slane %v1571_v7, 1  ;;  %v1600_v22 = vrot.slane %v1567_v60, 2  ;;  %v6877_v60 = vld [vmem:[#allocation13 + $0x474] ss:$8 sps:$4 sm:$0xff]  }
 0x516   : > { %v1553_v61 = vld [vmem:[#allocation2] sm:$0xff]  ;;  %v1573_v15 = vor.u32 %v1571_v7, %v1569_v3  ;;  %v8283_v25 = vor.u32 %v1600_v22, %v1599_v21  ;;  %v1585_v7 = vrot.slane %v8270_v59, 1  ;;  %v6896_v22 = vld [vmem:[#allocation13 + $0x4e0] ss:$8 sps:$4 sm:$0xff]  }
 0x517   : > { %v1562_v62 = vshll.u32 %v1553_v61, 16  ;;  %v8275_v0 = vld [vmem:[#allocation2] sm:$0xfe]  ;;  %v1560_v1 = vshrl.u32 %v1553_v61, 16 }
 0x518   : > { %v8273_v63 = vld [vmem:[#allocation2 + $0x10] sm:$0x1]  ;;  %v1592_v9 = vshrl.u32 %v8275_v0, 16  ;;  %v1595_v11 = vshll.u32 %v8275_v0, 16  ;;  %v6893_v21 = vld [vmem:[#allocation13 + $0x4d0] ss:$8 sps:$4 sm:$0xff]  }
 0x519   : > { %v1564_v2 = vrot.slane %v1562_v62, 1  ;;  %v1575_v6 = vshll.u32 %v8273_v63, 16  ;;  %v8288_v49 = vld [vmem:[#allocation2 + $0x10] sm:$0x3] }
 0x51a   : > { %v1594_v5 = vrot.slane %v1592_v9, 1  ;;  %v1597_v17 = vrot.slane %v1595_v11, 2  ;;  %v1604_v55 = vshrl.u32 %v8288_v49, 16  ;;  %v1607_v56 = vshll.u32 %v8288_v49, 16 }
 0x51b   : > { %v1565_v8 = vor.u32 %v1564_v2, %v1560_v1  ;;  %v1577_v10 = vrot.slane %v1575_v6, 1  ;;  %v6875_v1 = vld [vmem:[#allocation13 + $0x470] ss:$8 sps:$4 sm:$0xff]   ;;  %v6880_v2 = vld [vmem:[#allocation13 + $0x484] ss:$8 sps:$4 sm:$0xff]  }
 0x51c   : > { %v1598_v23 = vor.u32 %v1597_v17, %v1594_v5  ;;  %v1609_v62 = vrot.slane %v1607_v56, 2  ;;  %v6887_v5 = vld [vmem:[#allocation13 + $0x4b0] ss:$8 sps:$4 sm:$0xff]   ;;  %v6892_v17 = vld [vmem:[#allocation13 + $0x4c4] ss:$8 sps:$4 sm:$0xff]  }
 0x51d   : > { %v1570_v14 = vsel %vm688_vm2, %v1565_v8, %v1569_v3  ;;  %v1578_v4 = vsel %vm688_vm2, %v1573_v15, %v1577_v10  ;;  %v1584_v3 = vrot.slane %v8275_v0, 1  ;;  %v6878_v8 = vld [vmem:[#allocation13 + $0x480] ss:$8 sps:$4 sm:$0xff]   ;;  %v6883_v10 = vld [vmem:[#allocation13 + $0x494] ss:$8 sps:$4 sm:$0xff]   ;;  %v1587_v0 = vrot.slane %v8273_v63, 1 }
 0x51e   : > { %2149 = vmatprep.mubr.bf16.mxu1 %v1570_v14  ;;  %v1602_v27 = vsel %vm709_vm3, %v1598_v23, %v8283_v25  ;;  %v6886_v14 = vld [vmem:[#allocation13 + $0x4a4] ss:$8 sps:$4 sm:$0xff]   ;;  %v6884_v15 = vld [vmem:[#allocation13 + $0x4a0] ss:$8 sps:$4 sm:$0xff]   ;;  %v6901_v23 = vld [vmem:[#allocation13 + $0x4f4] ss:$8 sps:$4 sm:$0xff]  }
 0x51f   : > { %2150 = vmatmul.mubr.bf16.vlgmr.msra.gmra.mrb[8].mxu1 %v1553_v61  ;;  %v1606_v61 = vrot.slane %v1604_v55, 1  ;;  %v1586_v9 = vsel %vm704_vm4, %v1584_v3, %v1585_v7  ;;  %v6898_v63 = vld [vmem:[#allocation13 + $0x4e4] ss:$8 sps:$4 sm:$0xff]   ;;  %v6932_v55 = vld [vmem:[#allocation13 + $0x5a0] ss:$8 sps:$4 sm:$0xff]  }
 0x520   : > { %2171 = vmatpush1.bf16.msra.mxu1 %v6830_v12  ;;  %2159 = vmatprep.mubr.bf16.mxu1 %v1578_v4  ;;  %v6881_v12 = vld [vmem:[#allocation13 + $0x490] ss:$8 sps:$4 sm:$0xff]   ;;  %v1588_v4 = vsel %vm704_vm4, %v1585_v7, %v1587_v0  ;;  %v6937_v56 = vld [vmem:[#allocation13 + $0x5b4] ss:$8 sps:$4 sm:$0xff]   ;;  %v6944_v3 = vld [vmem:[#allocation13 + $0x5e0] ss:$8 sps:$4 sm:$0xff]  }
 0x521   : > { %2172 = vmatprep.subr.bf16.mxu1 %v6835_v16  ;;  %v1610_v6 = vor.u32 %v1609_v62, %v1606_v61  ;;  %v6889_v16 = vld [vmem:[#allocation13 + $0x4b4] ss:$8 sps:$4 sm:$0xff]   ;;  %v6938_v61 = vld [vmem:[#allocation13 + $0x5c0] ss:$8 sps:$4 sm:$0xff]   ;;  %v6947_v7 = vld [vmem:[#allocation13 + $0x5f0] ss:$8 sps:$4 sm:$0xff]  }
 0x522   : > { %v6943_v62 = vld [vmem:[#allocation13 + $0x5d4] ss:$8 sps:$4 sm:$0xff]  }
 0x523   : > { %v1611_v11 = vsel %vm709_vm3, %v8283_v25, %v1610_v6  ;;  %v6899_v25 = vld [vmem:[#allocation13 + $0x4f0] ss:$8 sps:$4 sm:$0xff]   ;;  %v6949_v6 = vld [vmem:[#allocation13 + $0x5f4] ss:$8 sps:$4 sm:$0xff]  }
 0x524   : > { %2173 = vmatpush1.bf16.msra.mxu1 %v6833_v18  ;;  %v6890_v18 = vld [vmem:[#allocation13 + $0x4c0] ss:$8 sps:$4 sm:$0xff]  }
 0x525   : > { %2174 = vmatprep.subr.bf16.mxu1 %v6838_v19  ;;  %v6895_v19 = vld [vmem:[#allocation13 + $0x4d4] ss:$8 sps:$4 sm:$0xff]  }
 0x527   : > { %2160 = vmatmul.mubr.bf16.gmra.mrb[12].mxu1 %v8270_v59 }
 0x528   : > { %2175 = vmatpush1.bf16.msra.mxu1 %v6836_v24  ;;  %2202 = vmatprep.mubr.bf16.mxu1 %v1602_v27  ;;  %v1558_v24 = vld [vmem:[#allocation2] sm:$0xfc]  ;;  %v1617_v27 = vrot.slane %v8270_v59, 2  ;;  %v6908_v59 = vld [vmem:[#allocation13 + $0x520] ss:$8 sps:$4 sm:$0xff]  }
 0x529   : > { %2176 = vmatprep.subr.bf16.mxu1 %v6841_v26  ;;  %v1616_v26 = vrot.slane %v1558_v24, 2 }
 0x52c   : > { %2177 = vmatpush1.bf16.msra.mxu1 %v6839_v28  ;;  %v1618_v28 = vsel %vm730_vm5, %v1616_v26, %v1617_v27 }
 0x52d   : > { %2178 = vmatprep.subr.bf16.mxu1 %v6844_v29  ;;  %v1619_v29 = vrot.slane %v8288_v49, 2  ;;  %v6929_v49 = vld [vmem:[#allocation13 + $0x590] ss:$8 sps:$4 sm:$0xff]  }
 0x530   : > { %2179 = vmatpush1.bf16.msra.mxu1 %v6842_v30  ;;  %v1620_v30 = vsel %vm730_vm5, %v1617_v27, %v1619_v29 }
 0x531   : > { %2180 = vmatprep.subr.bf16.mxu1 %v6847_v31  ;;  %v6904_v31 = vld [vmem:[#allocation13 + $0x504] ss:$8 sps:$4 sm:$0xff]  }
 0x532   : > { %2891 = vmatprep.subr.bf16.mxu0 %v6904_v31 }
 0x534   : > { %2181 = vmatpush1.bf16.msra.mxu1 %v6845_v32  ;;  %v6902_v32 = vld [vmem:[#allocation13 + $0x500] ss:$8 sps:$4 sm:$0xff]  }
 0x535   : > { %2182 = vmatprep.subr.bf16.mxu1 %v6850_v13  ;;  %2892 = vmatpush1.bf16.msra.mxu0 %v6902_v32  ;;  %v6907_v13 = vld [vmem:[#allocation13 + $0x514] ss:$8 sps:$4 sm:$0xff]  }
 0x536   : > { %2893 = vmatprep.subr.bf16.mxu0 %v6907_v13 }
 0x538   : > { %2183 = vmatpush1.bf16.msra.mxu1 %v6848_v33  ;;  %v6905_v33 = vld [vmem:[#allocation13 + $0x510] ss:$8 sps:$4 sm:$0xff]  }
 0x539   : > { %2184 = vmatprep.subr.bf16.mxu1 %v6853_v34  ;;  %2894 = vmatpush1.bf16.msra.mxu0 %v6905_v33  ;;  %v6910_v34 = vld [vmem:[#allocation13 + $0x524] ss:$8 sps:$4 sm:$0xff]  }
 0x53a   : > { %2895 = vmatprep.subr.bf16.mxu0 %v6910_v34 }
 0x53c   : > { %2185 = vmatpush1.bf16.msra.mxu1 %v6851_v35  ;;  %v6913_v35 = vld [vmem:[#allocation13 + $0x534] ss:$8 sps:$4 sm:$0xff]  }
 0x53d   : > { %2186 = vmatprep.subr.bf16.mxu1 %v6856_v36  ;;  %2896 = vmatpush1.bf16.msra.mxu0 %v6908_v59  ;;  %v6911_v36 = vld [vmem:[#allocation13 + $0x530] ss:$8 sps:$4 sm:$0xff]  }
 0x53e   : > { %2897 = vmatprep.subr.bf16.mxu0 %v6913_v35 }
 0x540   : > { %2187 = vmatpush1.bf16.msra.mxu1 %v6854_v37  ;;  %v6916_v37 = vld [vmem:[#allocation13 + $0x544] ss:$8 sps:$4 sm:$0xff]  }
 0x541   : > { %2188 = vmatprep.subr.bf16.mxu1 %v6859_v38  ;;  %2898 = vmatpush1.bf16.msra.mxu0 %v6911_v36  ;;  %v6914_v38 = vld [vmem:[#allocation13 + $0x540] ss:$8 sps:$4 sm:$0xff]  }
 0x542   : > { %2899 = vmatprep.subr.bf16.mxu0 %v6916_v37 }
 0x544   : > { %2189 = vmatpush1.bf16.msra.mxu1 %v6857_v39  ;;  %v6919_v39 = vld [vmem:[#allocation13 + $0x554] ss:$8 sps:$4 sm:$0xff]  }
 0x545   : > { %2190 = vmatprep.subr.bf16.mxu1 %v6862_v40  ;;  %2900 = vmatpush1.bf16.msra.mxu0 %v6914_v38  ;;  %v6917_v40 = vld [vmem:[#allocation13 + $0x550] ss:$8 sps:$4 sm:$0xff]  }
 0x546   : > { %2901 = vmatprep.subr.bf16.mxu0 %v6919_v39 }
 0x548   : > { %2191 = vmatpush1.bf16.msra.mxu1 %v6860_v41  ;;  %v6922_v41 = vld [vmem:[#allocation13 + $0x564] ss:$8 sps:$4 sm:$0xff]  }
 0x549   : > { %2192 = vmatprep.subr.bf16.mxu1 %v6865_v42  ;;  %2902 = vmatpush1.bf16.msra.mxu0 %v6917_v40  ;;  %v6920_v42 = vld [vmem:[#allocation13 + $0x560] ss:$8 sps:$4 sm:$0xff]  }
 0x54a   : > { %2903 = vmatprep.subr.bf16.mxu0 %v6922_v41 }
 0x54c   : > { %2193 = vmatpush1.bf16.msra.mxu1 %v6863_v44  ;;  %v6925_v44 = vld [vmem:[#allocation13 + $0x574] ss:$8 sps:$4 sm:$0xff]  }
 0x54d   : > { %2194 = vmatprep.subr.bf16.mxu1 %v6868_v45  ;;  %2904 = vmatpush1.bf16.msra.mxu0 %v6920_v42  ;;  %v6923_v45 = vld [vmem:[#allocation13 + $0x570] ss:$8 sps:$4 sm:$0xff]  }
 0x54e   : > { %2905 = vmatprep.subr.bf16.mxu0 %v6925_v44 }
 0x550   : > { %2195 = vmatpush1.bf16.msra.mxu1 %v6866_v46  ;;  %v6928_v46 = vld [vmem:[#allocation13 + $0x584] ss:$8 sps:$4 sm:$0xff]  }
 0x551   : > { %2196 = vmatprep.subr.bf16.mxu1 %v6871_v47  ;;  %2906 = vmatpush1.bf16.msra.mxu0 %v6923_v45  ;;  %v6926_v47 = vld [vmem:[#allocation13 + $0x580] ss:$8 sps:$4 sm:$0xff]  }
 0x552   : > { %2907 = vmatprep.subr.bf16.mxu0 %v6928_v46 }
 0x554   : > { %2197 = vmatpush1.bf16.msra.mxu1 %v6869_v48  ;;  %v6931_v48 = vld [vmem:[#allocation13 + $0x594] ss:$8 sps:$4 sm:$0xff]  }
 0x555   : > { %2198 = vmatprep.subr.bf16.mxu1 %v6874_v52  ;;  %2908 = vmatpush1.bf16.msra.mxu0 %v6926_v47  ;;  %v6934_v52 = vld [vmem:[#allocation13 + $0x5a4] ss:$8 sps:$4 sm:$0xff]  }
 0x556   : > { %2909 = vmatprep.subr.bf16.mxu0 %v6931_v48 }
 0x558   : > { %2199 = vmatpush1.bf16.msra.mxu1 %v6872_v57  ;;  %v6935_v57 = vld [vmem:[#allocation13 + $0x5b0] ss:$8 sps:$4 sm:$0xff]  }
 0x559   : > { %2200 = vmatprep.subr.bf16.mxu1 %v6877_v60  ;;  %2910 = vmatpush1.bf16.msra.mxu0 %v6929_v49  ;;  %v6940_v60 = vld [vmem:[#allocation13 + $0x5c4] ss:$8 sps:$4 sm:$0xff]  }
 0x55a   : > { %2911 = vmatprep.subr.bf16.mxu0 %v6934_v52 }
 0x55c   : > { %2201 = vmatpush1.bf16.msra.mxu1 %v6875_v1  ;;  %v6941_v1 = vld [vmem:[#allocation13 + $0x5d0] ss:$8 sps:$4 sm:$0xff]  }
 0x55d   : > { %2223 = vmatprep.subr.bf16.mxu1 %v6880_v2  ;;  %2912 = vmatpush1.bf16.msra.mxu0 %v6932_v55  ;;  %v6946_v2 = vld [vmem:[#allocation13 + $0x5e4] ss:$8 sps:$4 sm:$0xff]  }
 0x55e   : > { %2913 = vmatprep.subr.bf16.mxu0 %v6937_v56 }
 0x55f   : > { %2203 = vmatmul.mubr.bf16.vlgmr.msra.gmra.mrb[8].mxu1 %v1586_v9 }
 0x560   : > { %2212 = vmatprep.mubr.bf16.mxu1 %v1611_v11  ;;  %2224 = vmatpush1.bf16.msra.mxu1 %v6878_v8  ;;  %v6952_v8 = vld [vmem:[#allocation13 + $0x604] ss:$8 sps:$4 sm:$0xff]  }
 0x561   : > { %2225 = vmatprep.subr.bf16.mxu1 %v6883_v10  ;;  %2914 = vmatpush1.bf16.msra.mxu0 %v6935_v57  ;;  %v1705_v10 = vld [vmem:[#allocation15 + $0x2] sm:$0x3] }
 0x562   : > { %2915 = vmatprep.subr.bf16.mxu0 %v6940_v60  ;;  %v1714_v9 = vrot.slane %v1705_v10, %v8249_v43 }
 0x564   : > { %2226 = vmatpush1.bf16.msra.mxu1 %v6881_v12 }
 0x565   : > { %2227 = vmatprep.subr.bf16.mxu1 %v6886_v14  ;;  %2916 = vmatpush1.bf16.msra.mxu0 %v6938_v61 }
 0x566   : > { %2917 = vmatprep.subr.bf16.mxu0 %v6943_v62 }
 0x567   : > { %2213 = vmatmul.mubr.bf16.gmra.mrb[12].mxu1 %v1588_v4 }
 0x568   : > { %2228 = vmatpush1.bf16.msra.mxu1 %v6884_v15  ;;  %2255 = vmatprep.mubr.bf16.mxu1 %v7851_v20 }
 0x569   : > { %2229 = vmatprep.subr.bf16.mxu1 %v6889_v16  ;;  %2918 = vmatpush1.bf16.msra.mxu0 %v6941_v1 }
 0x56a   : > { %2919 = vmatprep.subr.bf16.mxu0 %v6946_v2 }
 0x56c   : > { %2230 = vmatpush1.bf16.msra.mxu1 %v6887_v5 }
 0x56d   : > { %2231 = vmatprep.subr.bf16.mxu1 %v6892_v17  ;;  %2920 = vmatpush1.bf16.msra.mxu0 %v6944_v3 }
 0x56e   : > { %2921 = vmatprep.subr.bf16.mxu0 %v6949_v6 }
 0x570   : > { %2232 = vmatpush1.bf16.msra.mxu1 %v6890_v18 }
 0x571   : > { %2233 = vmatprep.subr.bf16.mxu1 %v6895_v19  ;;  %2922 = vmatpush1.bf16.msra.mxu0 %v6947_v7 }
 0x572   : > { %2944 = vmatprep.subr.bf16.mxu0 %v6952_v8 }
 0x574   : > { %2234 = vmatpush1.bf16.msra.mxu1 %v6893_v21 }
 0x575   : > { %2235 = vmatprep.subr.bf16.mxu1 %v6898_v63 }
 0x578   : > { %2236 = vmatpush1.bf16.msra.mxu1 %v6896_v22 }
 0x579   : > { %2237 = vmatprep.subr.bf16.mxu1 %v6901_v23 }
 0x57c   : > { %2238 = vmatpush1.bf16.msra.mxu1 %v6899_v25 }
 0x57f   : > { %2256 = vmatmul.mubr.bf16.vlgmr.msra.gmra.mrb[8].mxu1 %v1618_v28 }
 0x580   : > { %2265 = vmatprep.mubr.bf16.mxu1 %v7851_v20 }
 0x587   : > { %2266 = vmatmul.mubr.bf16.gmra.mrb[12].mxu1 %v1620_v30  ;;  %v1710_v30 = vrot.slane %v1705_v10, %v8252_v58 }
 0x652   : > { %v2257_v11 = vpop.f32.mrb[8].mxu1 }
 0x653   : > { %v2259_v12 = vpop.f32.mrb[9].mxu1  ;;  %v6345_v33 = vadd.f32 %v2257_v11, %v1710_v30  ;;  %v6950_v11 = vld [vmem:[#allocation13 + $0x600] ss:$8 sps:$4 sm:$0xff]  }
 0x654   : > { %v6346_v14 = vadd.f32 %v2259_v12, %v1714_v9  ;;  %v2261_v0 = vpop.f32.mrb[10].mxu1 }
 0x655   : > { %v2263_v15 = vpop.f32.mrb[11].mxu1  ;;  %v6347_v35 = vadd.f32 %v2261_v0, %v1710_v30 }
 0x656   : > { %v5944_v16 = vmul.f32 -1.442695, %v6346_v14  ;;  %v6348_v4 = vadd.f32 %v2263_v15, %v1714_v9  ;;  %v6955_v14 = vld [vmem:[#allocation13 + $0x614] ss:$8 sps:$4 sm:$0xff]  }
 0x658   : > { %7398 = vpow2.f32 %v5944_v16  ;;  %v5945_v5 = vmul.f32 -1.442695, %v6348_v4 }
 0x65a   : > { %7400 = vpow2.f32 %v5945_v5  ;;  %v2267_v17 = vpop.f32.mrb[12].mxu1 }
 0x65b   : > { %v2269_v18 = vpop.f32.mrb[13].mxu1  ;;  %v6349_v42 = vadd.f32 %v2267_v17, %v1710_v30 }
 0x65c   : > { %v6350_v19 = vadd.f32 %v2269_v18, %v1714_v9  ;;  %v2271_v21 = vpop.f32.mrb[14].mxu1  ;;  %v6953_v18 = vld [vmem:[#allocation13 + $0x610] ss:$8 sps:$4 sm:$0xff]  }
 0x65d   : > { %v2273_v63 = vpop.f32.mrb[15].mxu1  ;;  %v6351_v47 = vadd.f32 %v2271_v21, %v1710_v30  ;;  %v6962_v30 = vld [vmem:[#allocation13 + $0x640] ss:$8 sps:$4 sm:$0xff]  }
 0x65e   : > { %v5946_v22 = vmul.f32 -1.442695, %v6350_v19  ;;  %v6352_v23 = vadd.f32 %v2273_v63, %v1714_v9  ;;  %v6958_v63 = vld [vmem:[#allocation13 + $0x624] ss:$8 sps:$4 sm:$0xff]  }
 0x660   : > { %7402 = vpow2.f32 %v5946_v22  ;;  %v5947_v24 = vmul.f32 -1.442695, %v6352_v23 }
 0x662   : > { %v7399_v25 = vpop.eup %7398  ;;  %7404 = vpow2.f32 %v5947_v24 }
 0x663   : > { %v2288_v26 = vadd.f32 1.0, %v7399_v25  ;;  %v6956_v25 = vld [vmem:[#allocation13 + $0x620] ss:$8 sps:$4 sm:$0xff]  }
 0x664   : > { %v7401_v27 = vpop.eup %7400 }
 0x665   : > { %7406 = vrcp.f32 %v2288_v26  ;;  %v2289_v28 = vadd.f32 1.0, %v7401_v27  ;;  %v6961_v26 = vld [vmem:[#allocation13 + $0x634] ss:$8 sps:$4 sm:$0xff]  }
 0x667   : > { %7408 = vrcp.f32 %v2289_v28  ;;  %v6959_v28 = vld [vmem:[#allocation13 + $0x630] ss:$8 sps:$4 sm:$0xff]  }
 0x66a   : > { %v7403_v29 = vpop.eup %7402 }
 0x66b   : > { %v2290_v31 = vadd.f32 1.0, %v7403_v29  ;;  %v6964_v29 = vld [vmem:[#allocation13 + $0x644] ss:$8 sps:$4 sm:$0xff]  }
 0x66c   : > { %v7405_v32 = vpop.eup %7404 }
 0x66d   : > { %7410 = vrcp.f32 %v2290_v31  ;;  %v2291_v13 = vadd.f32 1.0, %v7405_v32  ;;  %v6967_v31 = vld [vmem:[#allocation13 + $0x654] ss:$8 sps:$4 sm:$0xff]   ;;  %v6965_v32 = vld [vmem:[#allocation13 + $0x650] ss:$8 sps:$4 sm:$0xff]  }
 0x66f   : > { %v7407_v34 = vpop.eup %7406  ;;  %7412 = vrcp.f32 %v2291_v13  ;;  %v6970_v13 = vld [vmem:[#allocation13 + $0x664] ss:$8 sps:$4 sm:$0xff]  }
 0x670   : > { %v2300_v59 = vmul.f32 %v7407_v34, %v6345_v33  ;;  %v6968_v33 = vld [vmem:[#allocation13 + $0x660] ss:$8 sps:$4 sm:$0xff]   ;;  %v6973_v34 = vld [vmem:[#allocation13 + $0x674] ss:$8 sps:$4 sm:$0xff]  }
 0x671   : > { %v7409_v36 = vpop.eup %7408 }
 0x672   : > { %v2304_v37 = vadd.f32 %v2300_v59, %v8257_v50  ;;  %v2301_v38 = vmul.f32 %v7409_v36, %v6347_v35  ;;  %v6971_v59 = vld [vmem:[#allocation13 + $0x670] ss:$8 sps:$4 sm:$0xff]   ;;  %v6976_v35 = vld [vmem:[#allocation13 + $0x684] ss:$8 sps:$4 sm:$0xff]   ;;  %v6974_v36 = vld [vmem:[#allocation13 + $0x680] ss:$8 sps:$4 sm:$0xff]  }
 0x674   : > { %v2305_v39 = vadd.f32 %v2301_v38, %v8259_v51  ;;  %v8309_v40 = vmul.f32 0.70710677, %v2304_v37  ;;  %v6979_v37 = vld [vmem:[#allocation13 + $0x694] ss:$8 sps:$4 sm:$0xff]   ;;  %v6977_v38 = vld [vmem:[#allocation13 + $0x690] ss:$8 sps:$4 sm:$0xff]  }
 0x676   : > { %v8311_v41 = vmul.f32 0.70710677, %v2305_v39  ;;  %v6982_v39 = vld [vmem:[#allocation13 + $0x6a4] ss:$8 sps:$4 sm:$0xff]  }
 0x677   : > { %v7411_v44 = vpop.eup %7410 }
 0x678   : > { %v2312_v45 = vpack.c.bf16 %v8311_v41, %v8309_v40  ;;  %v2302_v46 = vmul.f32 %v7411_v44, %v6349_v42  ;;  %v6980_v42 = vld [vmem:[#allocation13 + $0x6a0] ss:$8 sps:$4 sm:$0xff]   ;;  %v6985_v44 = vld [vmem:[#allocation13 + $0x6b4] ss:$8 sps:$4 sm:$0xff]  }
 0x679   : > { %v7413_v48 = vpop.eup %7412 }
 0x67a   : > { %v2316_v49 = vrot.slane %v2312_v45, 7  ;;  %v2306_v52 = vadd.f32 %v2302_v46, %v8263_v53  ;;  %v2303_v55 = vmul.f32 %v7413_v48, %v6351_v47  ;;  %v6983_v45 = vld [vmem:[#allocation13 + $0x6b0] ss:$8 sps:$4 sm:$0xff]   ;;  %v6988_v46 = vld [vmem:[#allocation13 + $0x6c4] ss:$8 sps:$4 sm:$0xff]  }
 0x67b   : > { %v6986_v47 = vld [vmem:[#allocation13 + $0x6c0] ss:$8 sps:$4 sm:$0xff]   ;;  %v6991_v48 = vld [vmem:[#allocation13 + $0x6d4] ss:$8 sps:$4 sm:$0xff]  }
 0x67c   : > { %2322 = vst [vmem:[#allocation2] sm:$0xfe] %v2316_v49  ;;  %v2307_v50 = vadd.f32 %v2303_v55, %v8265_v54  ;;  %v8317_v51 = vmul.f32 0.70710677, %v2306_v52  ;;  %v6994_v55 = vld [vmem:[#allocation13 + $0x6e4] ss:$8 sps:$4 sm:$0xff]  }
 0x67e   : > { %v8319_v56 = vmul.f32 0.70710677, %v2307_v50 }
 0x680   : > { %v2313_v57 = vpack.c.bf16 %v8319_v56, %v8317_v51 }
 0x682   : > { %v2317_v60 = vrot.slane %v2313_v57, 7 }
 0x683   : > { %v2327_v61 = vld [vmem:[#allocation2] sm:$0xff] }
 0x684   : > { %v8324_v62 = vsel %vm1541_vm6, %v2316_v49, %v2317_v60  ;;  %2324 = vst [vmem:[#allocation2 + $0x10] sm:$0x1] %v2317_v60  ;;  %v2336_v1 = vshll.u32 %v2327_v61, 16  ;;  %v8326_v2 = vld [vmem:[#allocation2] sm:$0xfe]  ;;  %v2334_v3 = vshrl.u32 %v2327_v61, 16 }
 0x685   : > { %v2341_v53 = vshll.u32 %v8324_v62, 16  ;;  %v2366_v7 = vshrl.u32 %v8326_v2, 16  ;;  %v2345_v10 = vshrl.u32 %v8324_v62, 16  ;;  %v2369_v9 = vshll.u32 %v8326_v2, 16  ;;  %v6989_v49 = vld [vmem:[#allocation13 + $0x6d0] ss:$8 sps:$4 sm:$0xff]  }
 0x686   : > { %v2338_v54 = vrot.slane %v2336_v1, 1  ;;  %v6992_v60 = vld [vmem:[#allocation13 + $0x6e0] ss:$8 sps:$4 sm:$0xff]  }
 0x687   : > { %v2343_v6 = vrot.slane %v2341_v53, 1  ;;  %v2368_v15 = vrot.slane %v2366_v7, 1  ;;  %v2371_v4 = vrot.slane %v2369_v9, 2  ;;  %v2373_v5 = vrot.slane %v2345_v10, 1  ;;  %v7003_v9 = vld [vmem:[#allocation13 + $0x714] ss:$8 sps:$4 sm:$0xff]  }
 0x688   : > { %v2339_v8 = vor.u32 %v2338_v54, %v2334_v3  ;;  %v2374_v17 = vrot.slane %v2341_v53, 2  ;;  %v6995_v3 = vld [vmem:[#allocation13 + $0x6f0] ss:$8 sps:$4 sm:$0xff]   ;;  %v7000_v54 = vld [vmem:[#allocation13 + $0x704] ss:$8 sps:$4 sm:$0xff]   ;;  %v2359_v7 = vrot.slane %v8324_v62, 1 }
 0x689   : > { %v2347_v19 = vor.u32 %v2345_v10, %v2343_v6  ;;  %v2372_v23 = vor.u32 %v2371_v4, %v2368_v15  ;;  %v6998_v10 = vld [vmem:[#allocation13 + $0x700] ss:$8 sps:$4 sm:$0xff]   ;;  %v7006_v15 = vld [vmem:[#allocation13 + $0x724] ss:$8 sps:$4 sm:$0xff]   ;;  %v7009_v4 = vld [vmem:[#allocation13 + $0x734] ss:$8 sps:$4 sm:$0xff]  }
 0x68a   : > { %v2344_v12 = vsel %vm688_vm2, %v2339_v8, %v2343_v6  ;;  %v8337_v24 = vor.u32 %v2374_v17, %v2373_v5  ;;  %v2358_v6 = vrot.slane %v8326_v2, 1  ;;  %v7007_v17 = vld [vmem:[#allocation13 + $0x730] ss:$8 sps:$4 sm:$0xff]  }
 0x68b   : > { %2923 = vmatprep.mubr.bf16.mxu0 %v2344_v12  ;;  %v8333_v0 = vld [vmem:[#allocation2 + $0x10] sm:$0x1] }
 0x68c   : > { %2924 = vmatmul.mubr.bf16.vlgmr.msra.gmra.mrb[8].mxu0 %v2327_v61  ;;  %v2349_v16 = vshll.u32 %v8333_v0, 16  ;;  %v2376_v27 = vsel %vm709_vm3, %v2372_v23, %v8337_v24  ;;  %v8342_v52 = vld [vmem:[#allocation2 + $0x10] sm:$0x3]  ;;  %v2361_v2 = vrot.slane %v8333_v0, 1  ;;  %v7018_v0 = vld [vmem:[#allocation13 + $0x764] ss:$8 sps:$4 sm:$0xff]  }
 0x68d   : > { %2945 = vmatpush1.bf16.msra.mxu0 %v6950_v11  ;;  %v2378_v50 = vshrl.u32 %v8342_v52, 16  ;;  %v2381_v57 = vshll.u32 %v8342_v52, 16  ;;  %v6997_v61 = vld [vmem:[#allocation13 + $0x6f4] ss:$8 sps:$4 sm:$0xff]   ;;  %v2360_v11 = vsel %vm704_vm4, %v2358_v6, %v2359_v7  ;;  %v7064_v6 = vld [vmem:[#allocation13 + $0x860] ss:$8 sps:$4 sm:$0xff]  }
 0x68e   : > { %v2351_v21 = vrot.slane %v2349_v16, 1  ;;  %2946 = vmatprep.subr.bf16.mxu0 %v6955_v14  ;;  %v7001_v14 = vld [vmem:[#allocation13 + $0x710] ss:$8 sps:$4 sm:$0xff]   ;;  %v7004_v16 = vld [vmem:[#allocation13 + $0x720] ss:$8 sps:$4 sm:$0xff]   ;;  %v2362_v5 = vsel %vm704_vm4, %v2359_v7, %v2361_v2 }
 0x68f   : > { %v2380_v1 = vrot.slane %v2378_v50, 1  ;;  %v2383_v53 = vrot.slane %v2381_v57, 2  ;;  %v7021_v23 = vld [vmem:[#allocation13 + $0x774] ss:$8 sps:$4 sm:$0xff]   ;;  %v7052_v50 = vld [vmem:[#allocation13 + $0x820] ss:$8 sps:$4 sm:$0xff]  }
 0x690   : > { %v2352_v22 = vsel %vm688_vm2, %v2347_v19, %v2351_v21  ;;  %v7010_v19 = vld [vmem:[#allocation13 + $0x740] ss:$8 sps:$4 sm:$0xff]   ;;  %v7015_v21 = vld [vmem:[#allocation13 + $0x754] ss:$8 sps:$4 sm:$0xff]  }
 0x691   : > { %2933 = vmatprep.mubr.bf16.mxu0 %v2352_v22  ;;  %2947 = vmatpush1.bf16.msra.mxu0 %v6953_v18  ;;  %v2384_v8 = vor.u32 %v2383_v53, %v2380_v1  ;;  %v7012_v18 = vld [vmem:[#allocation13 + $0x744] ss:$8 sps:$4 sm:$0xff]   ;;  %v7016_v22 = vld [vmem:[#allocation13 + $0x760] ss:$8 sps:$4 sm:$0xff]   ;;  %v7057_v57 = vld [vmem:[#allocation13 + $0x834] ss:$8 sps:$4 sm:$0xff]  }
 0x692   : > { %2948 = vmatprep.subr.bf16.mxu0 %v6958_v63  ;;  %v7013_v63 = vld [vmem:[#allocation13 + $0x750] ss:$8 sps:$4 sm:$0xff]   ;;  %v7058_v1 = vld [vmem:[#allocation13 + $0x840] ss:$8 sps:$4 sm:$0xff]   ;;  %v7063_v53 = vld [vmem:[#allocation13 + $0x854] ss:$8 sps:$4 sm:$0xff]  }
 0x693   : > { %v2385_v12 = vsel %vm709_vm3, %v8337_v24, %v2384_v8  ;;  %v2332_v24 = vld [vmem:[#allocation2] sm:$0xfc]  ;;  %v7069_v7 = vld [vmem:[#allocation13 + $0x874] ss:$8 sps:$4 sm:$0xff]  }
 0x694   : > { %2934 = vmatmul.mubr.bf16.gmra.mrb[12].mxu0 %v8324_v62  ;;  %v7067_v8 = vld [vmem:[#allocation13 + $0x870] ss:$8 sps:$4 sm:$0xff]  }
 0x695   : > { %2949 = vmatpush1.bf16.msra.mxu0 %v6956_v25  ;;  %2976 = vmatprep.mubr.bf16.mxu0 %v2376_v27  ;;  %v7019_v25 = vld [vmem:[#allocation13 + $0x770] ss:$8 sps:$4 sm:$0xff]   ;;  %v2391_v27 = vrot.slane %v8324_v62, 2  ;;  %v7030_v62 = vld [vmem:[#allocation13 + $0x7a4] ss:$8 sps:$4 sm:$0xff]  }
 0x696   : > { %2950 = vmatprep.subr.bf16.mxu0 %v6961_v26  ;;  %v2390_v26 = vrot.slane %v2332_v24, 2 }
 0x699   : > { %2951 = vmatpush1.bf16.msra.mxu0 %v6959_v28  ;;  %v2392_v28 = vsel %vm730_vm5, %v2390_v26, %v2391_v27 }
 0x69a   : > { %2952 = vmatprep.subr.bf16.mxu0 %v6964_v29  ;;  %v2393_v29 = vrot.slane %v8342_v52, 2  ;;  %v7049_v52 = vld [vmem:[#allocation13 + $0x810] ss:$8 sps:$4 sm:$0xff]  }
 0x69d   : > { %2953 = vmatpush1.bf16.msra.mxu0 %v6962_v30  ;;  %v2394_v30 = vsel %vm730_vm5, %v2391_v27, %v2393_v29 }
 0x69e   : > { %2954 = vmatprep.subr.bf16.mxu0 %v6967_v31  ;;  %v7024_v31 = vld [vmem:[#allocation13 + $0x784] ss:$8 sps:$4 sm:$0xff]  }
 0x69f   : > { %3665 = vmatprep.subr.bf16.mxu1 %v7024_v31 }
 0x6a1   : > { %2955 = vmatpush1.bf16.msra.mxu0 %v6965_v32  ;;  %v7022_v32 = vld [vmem:[#allocation13 + $0x780] ss:$8 sps:$4 sm:$0xff]  }
 0x6a2   : > { %2956 = vmatprep.subr.bf16.mxu0 %v6970_v13  ;;  %3666 = vmatpush1.bf16.msra.mxu1 %v7022_v32  ;;  %v7027_v13 = vld [vmem:[#allocation13 + $0x794] ss:$8 sps:$4 sm:$0xff]  }
 0x6a3   : > { %3667 = vmatprep.subr.bf16.mxu1 %v7027_v13 }
 0x6a5   : > { %2957 = vmatpush1.bf16.msra.mxu0 %v6968_v33  ;;  %v7025_v33 = vld [vmem:[#allocation13 + $0x790] ss:$8 sps:$4 sm:$0xff]  }
 0x6a6   : > { %2958 = vmatprep.subr.bf16.mxu0 %v6973_v34  ;;  %3668 = vmatpush1.bf16.msra.mxu1 %v7025_v33  ;;  %v7028_v34 = vld [vmem:[#allocation13 + $0x7a0] ss:$8 sps:$4 sm:$0xff]  }
 0x6a7   : > { %3669 = vmatprep.subr.bf16.mxu1 %v7030_v62 }
 0x6a9   : > { %2959 = vmatpush1.bf16.msra.mxu0 %v6971_v59  ;;  %v7033_v59 = vld [vmem:[#allocation13 + $0x7b4] ss:$8 sps:$4 sm:$0xff]  }
 0x6aa   : > { %2960 = vmatprep.subr.bf16.mxu0 %v6976_v35  ;;  %3670 = vmatpush1.bf16.msra.mxu1 %v7028_v34  ;;  %v7031_v35 = vld [vmem:[#allocation13 + $0x7b0] ss:$8 sps:$4 sm:$0xff]  }
 0x6ab   : > { %3671 = vmatprep.subr.bf16.mxu1 %v7033_v59 }
 0x6ad   : > { %2961 = vmatpush1.bf16.msra.mxu0 %v6974_v36  ;;  %v7036_v36 = vld [vmem:[#allocation13 + $0x7c4] ss:$8 sps:$4 sm:$0xff]  }
 0x6ae   : > { %2962 = vmatprep.subr.bf16.mxu0 %v6979_v37  ;;  %3672 = vmatpush1.bf16.msra.mxu1 %v7031_v35  ;;  %v7034_v37 = vld [vmem:[#allocation13 + $0x7c0] ss:$8 sps:$4 sm:$0xff]  }
 0x6af   : > { %3673 = vmatprep.subr.bf16.mxu1 %v7036_v36 }
 0x6b1   : > { %2963 = vmatpush1.bf16.msra.mxu0 %v6977_v38  ;;  %v7039_v38 = vld [vmem:[#allocation13 + $0x7d4] ss:$8 sps:$4 sm:$0xff]  }
 0x6b2   : > { %2964 = vmatprep.subr.bf16.mxu0 %v6982_v39  ;;  %3674 = vmatpush1.bf16.msra.mxu1 %v7034_v37  ;;  %v7037_v39 = vld [vmem:[#allocation13 + $0x7d0] ss:$8 sps:$4 sm:$0xff]  }
 0x6b3   : > { %3675 = vmatprep.subr.bf16.mxu1 %v7039_v38 }
 0x6b5   : > { %2965 = vmatpush1.bf16.msra.mxu0 %v6980_v42  ;;  %v7042_v42 = vld [vmem:[#allocation13 + $0x7e4] ss:$8 sps:$4 sm:$0xff]  }
 0x6b6   : > { %2966 = vmatprep.subr.bf16.mxu0 %v6985_v44  ;;  %3676 = vmatpush1.bf16.msra.mxu1 %v7037_v39  ;;  %v7040_v44 = vld [vmem:[#allocation13 + $0x7e0] ss:$8 sps:$4 sm:$0xff]  }
 0x6b7   : > { %3677 = vmatprep.subr.bf16.mxu1 %v7042_v42 }
 0x6b9   : > { %2967 = vmatpush1.bf16.msra.mxu0 %v6983_v45  ;;  %v7045_v45 = vld [vmem:[#allocation13 + $0x7f4] ss:$8 sps:$4 sm:$0xff]  }
 0x6ba   : > { %2968 = vmatprep.subr.bf16.mxu0 %v6988_v46  ;;  %3678 = vmatpush1.bf16.msra.mxu1 %v7040_v44  ;;  %v7043_v46 = vld [vmem:[#allocation13 + $0x7f0] ss:$8 sps:$4 sm:$0xff]  }
 0x6bb   : > { %3679 = vmatprep.subr.bf16.mxu1 %v7045_v45 }
 0x6bd   : > { %2969 = vmatpush1.bf16.msra.mxu0 %v6986_v47  ;;  %v7048_v47 = vld [vmem:[#allocation13 + $0x804] ss:$8 sps:$4 sm:$0xff]  }
 0x6be   : > { %2970 = vmatprep.subr.bf16.mxu0 %v6991_v48  ;;  %3680 = vmatpush1.bf16.msra.mxu1 %v7043_v46  ;;  %v7046_v48 = vld [vmem:[#allocation13 + $0x800] ss:$8 sps:$4 sm:$0xff]  }
 0x6bf   : > { %3681 = vmatprep.subr.bf16.mxu1 %v7048_v47 }
 0x6c1   : > { %2971 = vmatpush1.bf16.msra.mxu0 %v6989_v49  ;;  %v7051_v49 = vld [vmem:[#allocation13 + $0x814] ss:$8 sps:$4 sm:$0xff]  }
 0x6c2   : > { %2972 = vmatprep.subr.bf16.mxu0 %v6994_v55  ;;  %3682 = vmatpush1.bf16.msra.mxu1 %v7046_v48  ;;  %v7054_v55 = vld [vmem:[#allocation13 + $0x824] ss:$8 sps:$4 sm:$0xff]  }
 0x6c3   : > { %3683 = vmatprep.subr.bf16.mxu1 %v7051_v49 }
 0x6c5   : > { %2973 = vmatpush1.bf16.msra.mxu0 %v6992_v60  ;;  %v7055_v60 = vld [vmem:[#allocation13 + $0x830] ss:$8 sps:$4 sm:$0xff]  }
 0x6c6   : > { %2974 = vmatprep.subr.bf16.mxu0 %v6997_v61  ;;  %3684 = vmatpush1.bf16.msra.mxu1 %v7049_v52  ;;  %v7060_v61 = vld [vmem:[#allocation13 + $0x844] ss:$8 sps:$4 sm:$0xff]  }
 0x6c7   : > { %3685 = vmatprep.subr.bf16.mxu1 %v7054_v55 }
 0x6c9   : > { %2975 = vmatpush1.bf16.msra.mxu0 %v6995_v3  ;;  %v7061_v3 = vld [vmem:[#allocation13 + $0x850] ss:$8 sps:$4 sm:$0xff]  }
 0x6ca   : > { %2997 = vmatprep.subr.bf16.mxu0 %v7000_v54  ;;  %3686 = vmatpush1.bf16.msra.mxu1 %v7052_v50  ;;  %v7066_v54 = vld [vmem:[#allocation13 + $0x864] ss:$8 sps:$4 sm:$0xff]  }
 0x6cb   : > { %3687 = vmatprep.subr.bf16.mxu1 %v7057_v57 }
 0x6cc   : > { %2977 = vmatmul.mubr.bf16.vlgmr.msra.gmra.mrb[8].mxu0 %v2360_v11 }
 0x6cd   : > { %2986 = vmatprep.mubr.bf16.mxu0 %v2385_v12  ;;  %2998 = vmatpush1.bf16.msra.mxu0 %v6998_v10  ;;  %v7072_v10 = vld [vmem:[#allocation13 + $0x884] ss:$8 sps:$4 sm:$0xff]  }
 0x6ce   : > { %2999 = vmatprep.subr.bf16.mxu0 %v7003_v9  ;;  %3688 = vmatpush1.bf16.msra.mxu1 %v7055_v60  ;;  %v2479_v9 = vld [vmem:[#allocation15 + $0x4] sm:$0x3] }
 0x6cf   : > { %3689 = vmatprep.subr.bf16.mxu1 %v7060_v61  ;;  %v2488_v11 = vrot.slane %v2479_v9, %v8249_v43 }
 0x6d1   : > { %3000 = vmatpush1.bf16.msra.mxu0 %v7001_v14 }
 0x6d2   : > { %3001 = vmatprep.subr.bf16.mxu0 %v7006_v15  ;;  %3690 = vmatpush1.bf16.msra.mxu1 %v7058_v1 }
 0x6d3   : > { %3691 = vmatprep.subr.bf16.mxu1 %v7063_v53 }
 0x6d4   : > { %2987 = vmatmul.mubr.bf16.gmra.mrb[12].mxu0 %v2362_v5 }
 0x6d5   : > { %3002 = vmatpush1.bf16.msra.mxu0 %v7004_v16  ;;  %3029 = vmatprep.mubr.bf16.mxu0 %v7851_v20 }
 0x6d6   : > { %3003 = vmatprep.subr.bf16.mxu0 %v7009_v4  ;;  %3692 = vmatpush1.bf16.msra.mxu1 %v7061_v3 }
 0x6d7   : > { %3693 = vmatprep.subr.bf16.mxu1 %v7066_v54 }
 0x6d9   : > { %3004 = vmatpush1.bf16.msra.mxu0 %v7007_v17 }
 0x6da   : > { %3005 = vmatprep.subr.bf16.mxu0 %v7012_v18  ;;  %3694 = vmatpush1.bf16.msra.mxu1 %v7064_v6 }
 0x6db   : > { %3695 = vmatprep.subr.bf16.mxu1 %v7069_v7 }
 0x6dd   : > { %3006 = vmatpush1.bf16.msra.mxu0 %v7010_v19 }
 0x6de   : > { %3007 = vmatprep.subr.bf16.mxu0 %v7015_v21  ;;  %3696 = vmatpush1.bf16.msra.mxu1 %v7067_v8 }
 0x6df   : > { %3718 = vmatprep.subr.bf16.mxu1 %v7072_v10 }
 0x6e1   : > { %3008 = vmatpush1.bf16.msra.mxu0 %v7013_v63 }
 0x6e2   : > { %3009 = vmatprep.subr.bf16.mxu0 %v7018_v0 }
 0x6e5   : > { %3010 = vmatpush1.bf16.msra.mxu0 %v7016_v22 }
 0x6e6   : > { %3011 = vmatprep.subr.bf16.mxu0 %v7021_v23 }
 0x6e9   : > { %3012 = vmatpush1.bf16.msra.mxu0 %v7019_v25 }
 0x6ec   : > { %3030 = vmatmul.mubr.bf16.vlgmr.msra.gmra.mrb[8].mxu0 %v2392_v28 }
 0x6ed   : > { %3039 = vmatprep.mubr.bf16.mxu0 %v7851_v20 }
 0x6f4   : > { %3040 = vmatmul.mubr.bf16.gmra.mrb[12].mxu0 %v2394_v30  ;;  %v2484_v30 = vrot.slane %v2479_v9, %v8252_v58 }
 0x7bf   : > { %v3031_v12 = vpop.f32.mrb[8].mxu0 }
 0x7c0   : > { %v3033_v14 = vpop.f32.mrb[9].mxu0  ;;  %v6353_v33 = vadd.f32 %v3031_v12, %v2484_v30  ;;  %v7070_v12 = vld [vmem:[#allocation13 + $0x880] ss:$8 sps:$4 sm:$0xff]  }
 0x7c1   : > { %v6354_v15 = vadd.f32 %v3033_v14, %v2488_v11  ;;  %v3035_v2 = vpop.f32.mrb[10].mxu0 }
 0x7c2   : > { %v3037_v16 = vpop.f32.mrb[11].mxu0  ;;  %v6355_v59 = vadd.f32 %v3035_v2, %v2484_v30 }
 0x7c3   : > { %v6028_v4 = vmul.f32 -1.442695, %v6354_v15  ;;  %v6356_v5 = vadd.f32 %v3037_v16, %v2488_v11  ;;  %v7075_v15 = vld [vmem:[#allocation13 + $0x894] ss:$8 sps:$4 sm:$0xff]  }
 0x7c5   : > { %7414 = vpow2.f32 %v6028_v4  ;;  %v6029_v17 = vmul.f32 -1.442695, %v6356_v5 }
 0x7c7   : > { %7416 = vpow2.f32 %v6029_v17  ;;  %v3041_v18 = vpop.f32.mrb[12].mxu0 }
 0x7c8   : > { %v3043_v19 = vpop.f32.mrb[13].mxu0  ;;  %v6357_v44 = vadd.f32 %v3041_v18, %v2484_v30 }
 0x7c9   : > { %v6358_v21 = vadd.f32 %v3043_v19, %v2488_v11  ;;  %v3045_v63 = vpop.f32.mrb[14].mxu0  ;;  %v7073_v19 = vld [vmem:[#allocation13 + $0x890] ss:$8 sps:$4 sm:$0xff]  }
 0x7ca   : > { %v3047_v0 = vpop.f32.mrb[15].mxu0  ;;  %v6359_v48 = vadd.f32 %v3045_v63, %v2484_v30  ;;  %v7082_v30 = vld [vmem:[#allocation13 + $0x8c0] ss:$8 sps:$4 sm:$0xff]  }
 0x7cb   : > { %v6030_v22 = vmul.f32 -1.442695, %v6358_v21  ;;  %v6360_v23 = vadd.f32 %v3047_v0, %v2488_v11  ;;  %v7078_v0 = vld [vmem:[#allocation13 + $0x8a4] ss:$8 sps:$4 sm:$0xff]  }
 0x7cd   : > { %7418 = vpow2.f32 %v6030_v22  ;;  %v6031_v24 = vmul.f32 -1.442695, %v6360_v23 }
 0x7cf   : > { %v7415_v25 = vpop.eup %7414  ;;  %7420 = vpow2.f32 %v6031_v24 }
 0x7d0   : > { %v3062_v26 = vadd.f32 1.0, %v7415_v25  ;;  %v7076_v25 = vld [vmem:[#allocation13 + $0x8a0] ss:$8 sps:$4 sm:$0xff]  }
 0x7d1   : > { %v7417_v27 = vpop.eup %7416 }
 0x7d2   : > { %7422 = vrcp.f32 %v3062_v26  ;;  %v3063_v28 = vadd.f32 1.0, %v7417_v27  ;;  %v7081_v26 = vld [vmem:[#allocation13 + $0x8b4] ss:$8 sps:$4 sm:$0xff]  }
 0x7d4   : > { %7424 = vrcp.f32 %v3063_v28  ;;  %v7079_v28 = vld [vmem:[#allocation13 + $0x8b0] ss:$8 sps:$4 sm:$0xff]  }
 0x7d7   : > { %v7419_v29 = vpop.eup %7418 }
 0x7d8   : > { %v3064_v31 = vadd.f32 1.0, %v7419_v29  ;;  %v7084_v29 = vld [vmem:[#allocation13 + $0x8c4] ss:$8 sps:$4 sm:$0xff]  }
 0x7d9   : > { %v7421_v32 = vpop.eup %7420 }
 0x7da   : > { %7426 = vrcp.f32 %v3064_v31  ;;  %v3065_v13 = vadd.f32 1.0, %v7421_v32  ;;  %v7087_v31 = vld [vmem:[#allocation13 + $0x8d4] ss:$8 sps:$4 sm:$0xff]   ;;  %v7085_v32 = vld [vmem:[#allocation13 + $0x8d0] ss:$8 sps:$4 sm:$0xff]  }
 0x7dc   : > { %v7423_v62 = vpop.eup %7422  ;;  %7428 = vrcp.f32 %v3065_v13  ;;  %v7090_v13 = vld [vmem:[#allocation13 + $0x8e4] ss:$8 sps:$4 sm:$0xff]  }
 0x7dd   : > { %v3074_v34 = vmul.f32 %v7423_v62, %v6353_v33  ;;  %v7088_v33 = vld [vmem:[#allocation13 + $0x8e0] ss:$8 sps:$4 sm:$0xff]   ;;  %v7093_v62 = vld [vmem:[#allocation13 + $0x8f4] ss:$8 sps:$4 sm:$0xff]  }
 0x7de   : > { %v7425_v35 = vpop.eup %7424 }
 0x7df   : > { %v3078_v36 = vadd.f32 %v3074_v34, %v8309_v40  ;;  %v3075_v37 = vmul.f32 %v7425_v35, %v6355_v59  ;;  %v7091_v34 = vld [vmem:[#allocation13 + $0x8f0] ss:$8 sps:$4 sm:$0xff]   ;;  %v7096_v59 = vld [vmem:[#allocation13 + $0x904] ss:$8 sps:$4 sm:$0xff]   ;;  %v7094_v35 = vld [vmem:[#allocation13 + $0x900] ss:$8 sps:$4 sm:$0xff]  }
 0x7e1   : > { %v3079_v38 = vadd.f32 %v3075_v37, %v8311_v41  ;;  %v8363_v39 = vmul.f32 0.70710677, %v3078_v36  ;;  %v7099_v36 = vld [vmem:[#allocation13 + $0x914] ss:$8 sps:$4 sm:$0xff]   ;;  %v7097_v37 = vld [vmem:[#allocation13 + $0x910] ss:$8 sps:$4 sm:$0xff]  }
 0x7e3   : > { %v8365_v42 = vmul.f32 0.70710677, %v3079_v38  ;;  %v7102_v38 = vld [vmem:[#allocation13 + $0x924] ss:$8 sps:$4 sm:$0xff]  }
 0x7e4   : > { %v7427_v45 = vpop.eup %7426 }
 0x7e5   : > { %v3086_v46 = vpack.c.bf16 %v8365_v42, %v8363_v39  ;;  %v3076_v47 = vmul.f32 %v7427_v45, %v6357_v44  ;;  %v7100_v44 = vld [vmem:[#allocation13 + $0x920] ss:$8 sps:$4 sm:$0xff]   ;;  %v7105_v45 = vld [vmem:[#allocation13 + $0x934] ss:$8 sps:$4 sm:$0xff]  }
 0x7e6   : > { %v7429_v49 = vpop.eup %7428 }
 0x7e7   : > { %v3090_v52 = vrot.slane %v3086_v46, 7  ;;  %v3080_v55 = vadd.f32 %v3076_v47, %v8317_v51  ;;  %v3077_v50 = vmul.f32 %v7429_v49, %v6359_v48  ;;  %v7103_v46 = vld [vmem:[#allocation13 + $0x930] ss:$8 sps:$4 sm:$0xff]   ;;  %v7108_v47 = vld [vmem:[#allocation13 + $0x944] ss:$8 sps:$4 sm:$0xff]  }
 0x7e8   : > { %v7106_v48 = vld [vmem:[#allocation13 + $0x940] ss:$8 sps:$4 sm:$0xff]   ;;  %v7111_v49 = vld [vmem:[#allocation13 + $0x954] ss:$8 sps:$4 sm:$0xff]  }
 0x7e9   : > { %3096 = vst [vmem:[#allocation2] sm:$0xfe] %v3090_v52  ;;  %v3081_v40 = vadd.f32 %v3077_v50, %v8319_v56  ;;  %v8371_v41 = vmul.f32 0.70710677, %v3080_v55  ;;  %v7114_v50 = vld [vmem:[#allocation13 + $0x964] ss:$8 sps:$4 sm:$0xff]  }
 0x7eb   : > { %v8373_v57 = vmul.f32 0.70710677, %v3081_v40 }
 0x7ed   : > { %v3087_v60 = vpack.c.bf16 %v8373_v57, %v8371_v41 }
 0x7ef   : > { %v3091_v61 = vrot.slane %v3087_v60, 7 }
 0x7f0   : > { %v3101_v1 = vld [vmem:[#allocation2] sm:$0xff] }
 0x7f1   : > { %v8378_v53 = vsel %vm1541_vm6, %v3090_v52, %v3091_v61  ;;  %3098 = vst [vmem:[#allocation2 + $0x10] sm:$0x1] %v3091_v61  ;;  %v3110_v3 = vshll.u32 %v3101_v1, 16  ;;  %v8380_v54 = vld [vmem:[#allocation2] sm:$0xfe]  ;;  %v3108_v6 = vshrl.u32 %v3101_v1, 16 }
 0x7f2   : > { %v3115_v51 = vshll.u32 %v8378_v53, 16  ;;  %v3140_v8 = vshrl.u32 %v8380_v54, 16  ;;  %v3119_v9 = vshrl.u32 %v8378_v53, 16  ;;  %v3143_v11 = vshll.u32 %v8380_v54, 16  ;;  %v7109_v52 = vld [vmem:[#allocation13 + $0x950] ss:$8 sps:$4 sm:$0xff]  }
 0x7f3   : > { %v3112_v56 = vrot.slane %v3110_v3, 1  ;;  %v7112_v61 = vld [vmem:[#allocation13 + $0x960] ss:$8 sps:$4 sm:$0xff]  }
 0x7f4   : > { %v3117_v7 = vrot.slane %v3115_v51, 1  ;;  %v3142_v16 = vrot.slane %v3140_v8, 1  ;;  %v3145_v5 = vrot.slane %v3143_v11, 2  ;;  %v3147_v17 = vrot.slane %v3119_v9, 1  ;;  %v7123_v11 = vld [vmem:[#allocation13 + $0x994] ss:$8 sps:$4 sm:$0xff]  }
 0x7f5   : > { %v3113_v10 = vor.u32 %v3112_v56, %v3108_v6  ;;  %v3148_v18 = vrot.slane %v3115_v51, 2  ;;  %v7115_v6 = vld [vmem:[#allocation13 + $0x970] ss:$8 sps:$4 sm:$0xff]   ;;  %v7120_v56 = vld [vmem:[#allocation13 + $0x984] ss:$8 sps:$4 sm:$0xff]   ;;  %v3133_v8 = vrot.slane %v8378_v53, 1 }
 0x7f6   : > { %v3121_v21 = vor.u32 %v3119_v9, %v3117_v7  ;;  %v3146_v23 = vor.u32 %v3145_v5, %v3142_v16  ;;  %v7118_v9 = vld [vmem:[#allocation13 + $0x980] ss:$8 sps:$4 sm:$0xff]   ;;  %v7126_v16 = vld [vmem:[#allocation13 + $0x9a4] ss:$8 sps:$4 sm:$0xff]   ;;  %v7129_v5 = vld [vmem:[#allocation13 + $0x9b4] ss:$8 sps:$4 sm:$0xff]  }
 0x7f7   : > { %v3118_v14 = vsel %vm688_vm2, %v3113_v10, %v3117_v7  ;;  %v8391_v24 = vor.u32 %v3148_v18, %v3147_v17  ;;  %v3132_v7 = vrot.slane %v8380_v54, 1  ;;  %v7127_v18 = vld [vmem:[#allocation13 + $0x9b0] ss:$8 sps:$4 sm:$0xff]  }
 0x7f8   : > { %3697 = vmatprep.mubr.bf16.mxu1 %v3118_v14  ;;  %v8387_v2 = vld [vmem:[#allocation2 + $0x10] sm:$0x1] }
 0x7f9   : > { %3698 = vmatmul.mubr.bf16.vlgmr.msra.gmra.mrb[16].mxu1 %v3101_v1  ;;  %v3123_v4 = vshll.u32 %v8387_v2, 16  ;;  %v3150_v27 = vsel %vm709_vm3, %v3146_v23, %v8391_v24  ;;  %v8396_v55 = vld [vmem:[#allocation2 + $0x10] sm:$0x3]  ;;  %v3135_v54 = vrot.slane %v8387_v2, 1  ;;  %v7138_v2 = vld [vmem:[#allocation13 + $0x9e4] ss:$8 sps:$4 sm:$0xff]  }
 0x7fa   : > { %3719 = vmatpush1.bf16.msra.mxu1 %v7070_v12  ;;  %v3152_v40 = vshrl.u32 %v8396_v55, 16  ;;  %v3155_v60 = vshll.u32 %v8396_v55, 16  ;;  %v7117_v1 = vld [vmem:[#allocation13 + $0x974] ss:$8 sps:$4 sm:$0xff]   ;;  %v3134_v12 = vsel %vm704_vm4, %v3132_v7, %v3133_v8  ;;  %v7184_v7 = vld [vmem:[#allocation13 + $0xae0] ss:$8 sps:$4 sm:$0xff]  }
 0x7fb   : > { %v3125_v63 = vrot.slane %v3123_v4, 1  ;;  %3720 = vmatprep.subr.bf16.mxu1 %v7075_v15  ;;  %v7121_v15 = vld [vmem:[#allocation13 + $0x990] ss:$8 sps:$4 sm:$0xff]   ;;  %v7124_v4 = vld [vmem:[#allocation13 + $0x9a0] ss:$8 sps:$4 sm:$0xff]   ;;  %v3136_v17 = vsel %vm704_vm4, %v3133_v8, %v3135_v54 }
 0x7fc   : > { %v3154_v3 = vrot.slane %v3152_v40, 1  ;;  %v3157_v51 = vrot.slane %v3155_v60, 2  ;;  %v7141_v23 = vld [vmem:[#allocation13 + $0x9f4] ss:$8 sps:$4 sm:$0xff]   ;;  %v7172_v40 = vld [vmem:[#allocation13 + $0xaa0] ss:$8 sps:$4 sm:$0xff]  }
 0x7fd   : > { %v3126_v22 = vsel %vm688_vm2, %v3121_v21, %v3125_v63  ;;  %v7130_v21 = vld [vmem:[#allocation13 + $0x9c0] ss:$8 sps:$4 sm:$0xff]   ;;  %v7135_v63 = vld [vmem:[#allocation13 + $0x9d4] ss:$8 sps:$4 sm:$0xff]  }
 0x7fe   : > { %3707 = vmatprep.mubr.bf16.mxu1 %v3126_v22  ;;  %3721 = vmatpush1.bf16.msra.mxu1 %v7073_v19  ;;  %v3158_v10 = vor.u32 %v3157_v51, %v3154_v3  ;;  %v7132_v19 = vld [vmem:[#allocation13 + $0x9c4] ss:$8 sps:$4 sm:$0xff]   ;;  %v7136_v22 = vld [vmem:[#allocation13 + $0x9e0] ss:$8 sps:$4 sm:$0xff]   ;;  %v7177_v60 = vld [vmem:[#allocation13 + $0xab4] ss:$8 sps:$4 sm:$0xff]  }
 0x7ff   : > { %3722 = vmatprep.subr.bf16.mxu1 %v7078_v0  ;;  %v7133_v0 = vld [vmem:[#allocation13 + $0x9d0] ss:$8 sps:$4 sm:$0xff]   ;;  %v7178_v3 = vld [vmem:[#allocation13 + $0xac0] ss:$8 sps:$4 sm:$0xff]   ;;  %v7183_v51 = vld [vmem:[#allocation13 + $0xad4] ss:$8 sps:$4 sm:$0xff]  }
 0x800   : > { %v3159_v14 = vsel %vm709_vm3, %v8391_v24, %v3158_v10  ;;  %v3106_v24 = vld [vmem:[#allocation2] sm:$0xfc]  ;;  %v7189_v8 = vld [vmem:[#allocation13 + $0xaf4] ss:$8 sps:$4 sm:$0xff]  }
 0x801   : > { %3708 = vmatmul.mubr.bf16.gmra.mrb[20].mxu1 %v8378_v53  ;;  %v7187_v10 = vld [vmem:[#allocation13 + $0xaf0] ss:$8 sps:$4 sm:$0xff]  }
 0x802   : > { %3723 = vmatpush1.bf16.msra.mxu1 %v7076_v25  ;;  %3750 = vmatprep.mubr.bf16.mxu1 %v3150_v27  ;;  %v7139_v25 = vld [vmem:[#allocation13 + $0x9f0] ss:$8 sps:$4 sm:$0xff]   ;;  %v3165_v27 = vrot.slane %v8378_v53, 2  ;;  %v7150_v53 = vld [vmem:[#allocation13 + $0xa24] ss:$8 sps:$4 sm:$0xff]  }
 0x803   : > { %3724 = vmatprep.subr.bf16.mxu1 %v7081_v26  ;;  %v3164_v26 = vrot.slane %v3106_v24, 2 }
 0x806   : > { %3725 = vmatpush1.bf16.msra.mxu1 %v7079_v28  ;;  %v3166_v28 = vsel %vm730_vm5, %v3164_v26, %v3165_v27 }
 0x807   : > { %3726 = vmatprep.subr.bf16.mxu1 %v7084_v29  ;;  %v3167_v29 = vrot.slane %v8396_v55, 2  ;;  %v7169_v55 = vld [vmem:[#allocation13 + $0xa90] ss:$8 sps:$4 sm:$0xff]  }
 0x80a   : > { %3727 = vmatpush1.bf16.msra.mxu1 %v7082_v30  ;;  %v3168_v30 = vsel %vm730_vm5, %v3165_v27, %v3167_v29 }
 0x80b   : > { %3728 = vmatprep.subr.bf16.mxu1 %v7087_v31  ;;  %v7144_v31 = vld [vmem:[#allocation13 + $0xa04] ss:$8 sps:$4 sm:$0xff]  }
 0x80c   : > { %4439 = vmatprep.subr.bf16.mxu0 %v7144_v31 }
 0x80e   : > { %3729 = vmatpush1.bf16.msra.mxu1 %v7085_v32  ;;  %v7142_v32 = vld [vmem:[#allocation13 + $0xa00] ss:$8 sps:$4 sm:$0xff]  }
 0x80f   : > { %3730 = vmatprep.subr.bf16.mxu1 %v7090_v13  ;;  %4440 = vmatpush1.bf16.msra.mxu0 %v7142_v32  ;;  %v7147_v13 = vld [vmem:[#allocation13 + $0xa14] ss:$8 sps:$4 sm:$0xff]  }
 0x810   : > { %4441 = vmatprep.subr.bf16.mxu0 %v7147_v13 }
 0x812   : > { %3731 = vmatpush1.bf16.msra.mxu1 %v7088_v33  ;;  %v7145_v33 = vld [vmem:[#allocation13 + $0xa10] ss:$8 sps:$4 sm:$0xff]  }
 0x813   : > { %3732 = vmatprep.subr.bf16.mxu1 %v7093_v62  ;;  %4442 = vmatpush1.bf16.msra.mxu0 %v7145_v33  ;;  %v7148_v62 = vld [vmem:[#allocation13 + $0xa20] ss:$8 sps:$4 sm:$0xff]  }
 0x814   : > { %4443 = vmatprep.subr.bf16.mxu0 %v7150_v53 }
 0x816   : > { %3733 = vmatpush1.bf16.msra.mxu1 %v7091_v34  ;;  %v7153_v34 = vld [vmem:[#allocation13 + $0xa34] ss:$8 sps:$4 sm:$0xff]  }
 0x817   : > { %3734 = vmatprep.subr.bf16.mxu1 %v7096_v59  ;;  %4444 = vmatpush1.bf16.msra.mxu0 %v7148_v62  ;;  %v7151_v59 = vld [vmem:[#allocation13 + $0xa30] ss:$8 sps:$4 sm:$0xff]  }
 0x818   : > { %4445 = vmatprep.subr.bf16.mxu0 %v7153_v34 }
 0x81a   : > { %3735 = vmatpush1.bf16.msra.mxu1 %v7094_v35  ;;  %v7156_v35 = vld [vmem:[#allocation13 + $0xa44] ss:$8 sps:$4 sm:$0xff]  }
 0x81b   : > { %3736 = vmatprep.subr.bf16.mxu1 %v7099_v36  ;;  %4446 = vmatpush1.bf16.msra.mxu0 %v7151_v59  ;;  %v7154_v36 = vld [vmem:[#allocation13 + $0xa40] ss:$8 sps:$4 sm:$0xff]  }
 0x81c   : > { %4447 = vmatprep.subr.bf16.mxu0 %v7156_v35 }
 0x81e   : > { %3737 = vmatpush1.bf16.msra.mxu1 %v7097_v37  ;;  %v7159_v37 = vld [vmem:[#allocation13 + $0xa54] ss:$8 sps:$4 sm:$0xff]  }
 0x81f   : > { %3738 = vmatprep.subr.bf16.mxu1 %v7102_v38  ;;  %4448 = vmatpush1.bf16.msra.mxu0 %v7154_v36  ;;  %v7157_v38 = vld [vmem:[#allocation13 + $0xa50] ss:$8 sps:$4 sm:$0xff]  }
 0x820   : > { %4449 = vmatprep.subr.bf16.mxu0 %v7159_v37 }
 0x822   : > { %3739 = vmatpush1.bf16.msra.mxu1 %v7100_v44  ;;  %v7162_v44 = vld [vmem:[#allocation13 + $0xa64] ss:$8 sps:$4 sm:$0xff]  }
 0x823   : > { %3740 = vmatprep.subr.bf16.mxu1 %v7105_v45  ;;  %4450 = vmatpush1.bf16.msra.mxu0 %v7157_v38  ;;  %v7160_v45 = vld [vmem:[#allocation13 + $0xa60] ss:$8 sps:$4 sm:$0xff]  }
 0x824   : > { %4451 = vmatprep.subr.bf16.mxu0 %v7162_v44 }
 0x826   : > { %3741 = vmatpush1.bf16.msra.mxu1 %v7103_v46  ;;  %v7165_v46 = vld [vmem:[#allocation13 + $0xa74] ss:$8 sps:$4 sm:$0xff]  }
 0x827   : > { %3742 = vmatprep.subr.bf16.mxu1 %v7108_v47  ;;  %4452 = vmatpush1.bf16.msra.mxu0 %v7160_v45  ;;  %v7163_v47 = vld [vmem:[#allocation13 + $0xa70] ss:$8 sps:$4 sm:$0xff]  }
 0x828   : > { %4453 = vmatprep.subr.bf16.mxu0 %v7165_v46 }
 0x82a   : > { %3743 = vmatpush1.bf16.msra.mxu1 %v7106_v48  ;;  %v7168_v48 = vld [vmem:[#allocation13 + $0xa84] ss:$8 sps:$4 sm:$0xff]  }
 0x82b   : > { %3744 = vmatprep.subr.bf16.mxu1 %v7111_v49  ;;  %4454 = vmatpush1.bf16.msra.mxu0 %v7163_v47  ;;  %v7166_v49 = vld [vmem:[#allocation13 + $0xa80] ss:$8 sps:$4 sm:$0xff]  }
 0x82c   : > { %4455 = vmatprep.subr.bf16.mxu0 %v7168_v48 }
 0x82e   : > { %3745 = vmatpush1.bf16.msra.mxu1 %v7109_v52  ;;  %v7171_v52 = vld [vmem:[#allocation13 + $0xa94] ss:$8 sps:$4 sm:$0xff]  }
 0x82f   : > { %3746 = vmatprep.subr.bf16.mxu1 %v7114_v50  ;;  %4456 = vmatpush1.bf16.msra.mxu0 %v7166_v49  ;;  %v7174_v50 = vld [vmem:[#allocation13 + $0xaa4] ss:$8 sps:$4 sm:$0xff]  }
 0x830   : > { %4457 = vmatprep.subr.bf16.mxu0 %v7171_v52 }
 0x832   : > { %3747 = vmatpush1.bf16.msra.mxu1 %v7112_v61  ;;  %v7175_v61 = vld [vmem:[#allocation13 + $0xab0] ss:$8 sps:$4 sm:$0xff]  }
 0x833   : > { %3748 = vmatprep.subr.bf16.mxu1 %v7117_v1  ;;  %4458 = vmatpush1.bf16.msra.mxu0 %v7169_v55  ;;  %v7180_v1 = vld [vmem:[#allocation13 + $0xac4] ss:$8 sps:$4 sm:$0xff]  }
 0x834   : > { %4459 = vmatprep.subr.bf16.mxu0 %v7174_v50 }
 0x836   : > { %3749 = vmatpush1.bf16.msra.mxu1 %v7115_v6  ;;  %v7181_v6 = vld [vmem:[#allocation13 + $0xad0] ss:$8 sps:$4 sm:$0xff]  }
 0x837   : > { %3771 = vmatprep.subr.bf16.mxu1 %v7120_v56  ;;  %4460 = vmatpush1.bf16.msra.mxu0 %v7172_v40  ;;  %v7186_v56 = vld [vmem:[#allocation13 + $0xae4] ss:$8 sps:$4 sm:$0xff]  }
 0x838   : > { %4461 = vmatprep.subr.bf16.mxu0 %v7177_v60 }
 0x839   : > { %3751 = vmatmul.mubr.bf16.vlgmr.msra.gmra.mrb[16].mxu1 %v3134_v12 }
 0x83a   : > { %3760 = vmatprep.mubr.bf16.mxu1 %v3159_v14  ;;  %3772 = vmatpush1.bf16.msra.mxu1 %v7118_v9  ;;  %v7192_v9 = vld [vmem:[#allocation13 + $0xb04] ss:$8 sps:$4 sm:$0xff]  }
 0x83b   : > { %3773 = vmatprep.subr.bf16.mxu1 %v7123_v11  ;;  %4462 = vmatpush1.bf16.msra.mxu0 %v7175_v61  ;;  %v3253_v11 = vld [vmem:[#allocation15 + $0x6] sm:$0x3] }
 0x83c   : > { %4463 = vmatprep.subr.bf16.mxu0 %v7180_v1  ;;  %v3262_v12 = vrot.slane %v3253_v11, %v8249_v43 }
 0x83e   : > { %3774 = vmatpush1.bf16.msra.mxu1 %v7121_v15 }
 0x83f   : > { %3775 = vmatprep.subr.bf16.mxu1 %v7126_v16  ;;  %4464 = vmatpush1.bf16.msra.mxu0 %v7178_v3 }
 0x840   : > { %4465 = vmatprep.subr.bf16.mxu0 %v7183_v51 }
 0x841   : > { %3761 = vmatmul.mubr.bf16.gmra.mrb[20].mxu1 %v3136_v17 }
 0x842   : > { %3776 = vmatpush1.bf16.msra.mxu1 %v7124_v4  ;;  %3803 = vmatprep.mubr.bf16.mxu1 %v7851_v20 }
 0x843   : > { %3777 = vmatprep.subr.bf16.mxu1 %v7129_v5  ;;  %4466 = vmatpush1.bf16.msra.mxu0 %v7181_v6 }
 0x844   : > { %4467 = vmatprep.subr.bf16.mxu0 %v7186_v56 }
 0x846   : > { %3778 = vmatpush1.bf16.msra.mxu1 %v7127_v18 }
 0x847   : > { %3779 = vmatprep.subr.bf16.mxu1 %v7132_v19  ;;  %4468 = vmatpush1.bf16.msra.mxu0 %v7184_v7 }
 0x848   : > { %4469 = vmatprep.subr.bf16.mxu0 %v7189_v8 }
 0x84a   : > { %3780 = vmatpush1.bf16.msra.mxu1 %v7130_v21 }
 0x84b   : > { %3781 = vmatprep.subr.bf16.mxu1 %v7135_v63  ;;  %4470 = vmatpush1.bf16.msra.mxu0 %v7187_v10 }
 0x84c   : > { %4492 = vmatprep.subr.bf16.mxu0 %v7192_v9 }
 0x84e   : > { %3782 = vmatpush1.bf16.msra.mxu1 %v7133_v0 }
 0x84f   : > { %3783 = vmatprep.subr.bf16.mxu1 %v7138_v2 }
 0x852   : > { %3784 = vmatpush1.bf16.msra.mxu1 %v7136_v22 }
 0x853   : > { %3785 = vmatprep.subr.bf16.mxu1 %v7141_v23 }
 0x856   : > { %3786 = vmatpush1.bf16.msra.mxu1 %v7139_v25 }
 0x859   : > { %3804 = vmatmul.mubr.bf16.vlgmr.msra.gmra.mrb[16].mxu1 %v3166_v28 }
 0x85a   : > { %3813 = vmatprep.mubr.bf16.mxu1 %v7851_v20 }
 0x861   : > { %3814 = vmatmul.mubr.bf16.gmra.mrb[20].mxu1 %v3168_v30  ;;  %v3258_v30 = vrot.slane %v3253_v11, %v8252_v58 }
 0x92c   : > { %v3805_v14 = vpop.f32.mrb[16].mxu1 }
 0x92d   : > { %v3807_v15 = vpop.f32.mrb[17].mxu1  ;;  %v6361_v33 = vadd.f32 %v3805_v14, %v3258_v30  ;;  %v7190_v14 = vld [vmem:[#allocation13 + $0xb00] ss:$8 sps:$4 sm:$0xff]  }
 0x92e   : > { %v6362_v16 = vadd.f32 %v3807_v15, %v3262_v12  ;;  %v3809_v54 = vpop.f32.mrb[18].mxu1 }
 0x92f   : > { %v3811_v4 = vpop.f32.mrb[19].mxu1  ;;  %v6363_v34 = vadd.f32 %v3809_v54, %v3258_v30 }
 0x930   : > { %v6112_v5 = vmul.f32 -1.442695, %v6362_v16  ;;  %v6364_v17 = vadd.f32 %v3811_v4, %v3262_v12  ;;  %v7195_v16 = vld [vmem:[#allocation13 + $0xb14] ss:$8 sps:$4 sm:$0xff]  }
 0x932   : > { %7430 = vpow2.f32 %v6112_v5  ;;  %v6113_v18 = vmul.f32 -1.442695, %v6364_v17 }
 0x934   : > { %7432 = vpow2.f32 %v6113_v18  ;;  %v3815_v19 = vpop.f32.mrb[20].mxu1 }
 0x935   : > { %v3817_v21 = vpop.f32.mrb[21].mxu1  ;;  %v6365_v45 = vadd.f32 %v3815_v19, %v3258_v30 }
 0x936   : > { %v6366_v63 = vadd.f32 %v3817_v21, %v3262_v12  ;;  %v3819_v0 = vpop.f32.mrb[22].mxu1  ;;  %v7193_v21 = vld [vmem:[#allocation13 + $0xb10] ss:$8 sps:$4 sm:$0xff]  }
 0x937   : > { %v3821_v2 = vpop.f32.mrb[23].mxu1  ;;  %v6367_v49 = vadd.f32 %v3819_v0, %v3258_v30  ;;  %v7202_v30 = vld [vmem:[#allocation13 + $0xb40] ss:$8 sps:$4 sm:$0xff]  }
 0x938   : > { %v6114_v22 = vmul.f32 -1.442695, %v6366_v63  ;;  %v6368_v23 = vadd.f32 %v3821_v2, %v3262_v12  ;;  %v7198_v2 = vld [vmem:[#allocation13 + $0xb24] ss:$8 sps:$4 sm:$0xff]  }
 0x93a   : > { %7434 = vpow2.f32 %v6114_v22  ;;  %v6115_v24 = vmul.f32 -1.442695, %v6368_v23 }
 0x93c   : > { %v7431_v25 = vpop.eup %7430  ;;  %7436 = vpow2.f32 %v6115_v24 }
 0x93d   : > { %v3836_v26 = vadd.f32 1.0, %v7431_v25  ;;  %v7196_v25 = vld [vmem:[#allocation13 + $0xb20] ss:$8 sps:$4 sm:$0xff]  }
 0x93e   : > { %v7433_v27 = vpop.eup %7432 }
 0x93f   : > { %7438 = vrcp.f32 %v3836_v26  ;;  %v3837_v28 = vadd.f32 1.0, %v7433_v27  ;;  %v7201_v26 = vld [vmem:[#allocation13 + $0xb34] ss:$8 sps:$4 sm:$0xff]  }
 0x941   : > { %7440 = vrcp.f32 %v3837_v28  ;;  %v7199_v28 = vld [vmem:[#allocation13 + $0xb30] ss:$8 sps:$4 sm:$0xff]  }
 0x944   : > { %v7435_v29 = vpop.eup %7434 }
 0x945   : > { %v3838_v31 = vadd.f32 1.0, %v7435_v29  ;;  %v7204_v29 = vld [vmem:[#allocation13 + $0xb44] ss:$8 sps:$4 sm:$0xff]  }
 0x946   : > { %v7437_v32 = vpop.eup %7436 }
 0x947   : > { %7442 = vrcp.f32 %v3838_v31  ;;  %v3839_v13 = vadd.f32 1.0, %v7437_v32  ;;  %v7207_v31 = vld [vmem:[#allocation13 + $0xb54] ss:$8 sps:$4 sm:$0xff]   ;;  %v7205_v32 = vld [vmem:[#allocation13 + $0xb50] ss:$8 sps:$4 sm:$0xff]  }
 0x949   : > { %v7439_v53 = vpop.eup %7438  ;;  %7444 = vrcp.f32 %v3839_v13  ;;  %v7210_v13 = vld [vmem:[#allocation13 + $0xb64] ss:$8 sps:$4 sm:$0xff]  }
 0x94a   : > { %v3848_v62 = vmul.f32 %v7439_v53, %v6361_v33  ;;  %v7208_v33 = vld [vmem:[#allocation13 + $0xb60] ss:$8 sps:$4 sm:$0xff]   ;;  %v7213_v53 = vld [vmem:[#allocation13 + $0xb74] ss:$8 sps:$4 sm:$0xff]  }
 0x94b   : > { %v7441_v59 = vpop.eup %7440 }
 0x94c   : > { %v3852_v35 = vadd.f32 %v3848_v62, %v8363_v39  ;;  %v3849_v36 = vmul.f32 %v7441_v59, %v6363_v34  ;;  %v7211_v62 = vld [vmem:[#allocation13 + $0xb70] ss:$8 sps:$4 sm:$0xff]   ;;  %v7216_v34 = vld [vmem:[#allocation13 + $0xb84] ss:$8 sps:$4 sm:$0xff]   ;;  %v7214_v59 = vld [vmem:[#allocation13 + $0xb80] ss:$8 sps:$4 sm:$0xff]  }
 0x94e   : > { %v3853_v37 = vadd.f32 %v3849_v36, %v8365_v42  ;;  %v8417_v38 = vmul.f32 0.70710677, %v3852_v35  ;;  %v7219_v35 = vld [vmem:[#allocation13 + $0xb94] ss:$8 sps:$4 sm:$0xff]   ;;  %v7217_v36 = vld [vmem:[#allocation13 + $0xb90] ss:$8 sps:$4 sm:$0xff]  }
 0x950   : > { %v8419_v44 = vmul.f32 0.70710677, %v3853_v37  ;;  %v7222_v37 = vld [vmem:[#allocation13 + $0xba4] ss:$8 sps:$4 sm:$0xff]  }
 0x951   : > { %v7443_v46 = vpop.eup %7442 }
 0x952   : > { %v3860_v47 = vpack.c.bf16 %v8419_v44, %v8417_v38  ;;  %v3850_v48 = vmul.f32 %v7443_v46, %v6365_v45  ;;  %v7220_v45 = vld [vmem:[#allocation13 + $0xba0] ss:$8 sps:$4 sm:$0xff]   ;;  %v7225_v46 = vld [vmem:[#allocation13 + $0xbb4] ss:$8 sps:$4 sm:$0xff]  }
 0x953   : > { %v7445_v52 = vpop.eup %7444 }
 0x954   : > { %v3864_v55 = vrot.slane %v3860_v47, 7  ;;  %v3854_v50 = vadd.f32 %v3850_v48, %v8371_v41  ;;  %v3851_v40 = vmul.f32 %v7445_v52, %v6367_v49  ;;  %v7223_v47 = vld [vmem:[#allocation13 + $0xbb0] ss:$8 sps:$4 sm:$0xff]   ;;  %v7228_v48 = vld [vmem:[#allocation13 + $0xbc4] ss:$8 sps:$4 sm:$0xff]  }
 0x955   : > { %v7226_v49 = vld [vmem:[#allocation13 + $0xbc0] ss:$8 sps:$4 sm:$0xff]   ;;  %v7231_v52 = vld [vmem:[#allocation13 + $0xbd4] ss:$8 sps:$4 sm:$0xff]  }
 0x956   : > { %3870 = vst [vmem:[#allocation2] sm:$0xfe] %v3864_v55  ;;  %v3855_v39 = vadd.f32 %v3851_v40, %v8373_v57  ;;  %v8425_v42 = vmul.f32 0.70710677, %v3854_v50  ;;  %v7234_v40 = vld [vmem:[#allocation13 + $0xbe4] ss:$8 sps:$4 sm:$0xff]  }
 0x958   : > { %v8427_v60 = vmul.f32 0.70710677, %v3855_v39 }
 0x95a   : > { %v3861_v61 = vpack.c.bf16 %v8427_v60, %v8425_v42 }
 0x95c   : > { %v3865_v1 = vrot.slane %v3861_v61, 7 }
 0x95d   : > { %v3875_v3 = vld [vmem:[#allocation2] sm:$0xff] }
 0x95e   : > { %v8432_v51 = vsel %vm1541_vm6, %v3864_v55, %v3865_v1  ;;  %3872 = vst [vmem:[#allocation2 + $0x10] sm:$0x1] %v3865_v1  ;;  %v3884_v6 = vshll.u32 %v3875_v3, 16  ;;  %v8434_v56 = vld [vmem:[#allocation2] sm:$0xfe]  ;;  %v3882_v7 = vshrl.u32 %v3875_v3, 16 }
 0x95f   : > { %v3889_v41 = vshll.u32 %v8432_v51, 16  ;;  %v3914_v10 = vshrl.u32 %v8434_v56, 16  ;;  %v3893_v11 = vshrl.u32 %v8432_v51, 16  ;;  %v3917_v12 = vshll.u32 %v8434_v56, 16  ;;  %v7229_v55 = vld [vmem:[#allocation13 + $0xbd0] ss:$8 sps:$4 sm:$0xff]  }
 0x960   : > { %v3886_v57 = vrot.slane %v3884_v6, 1  ;;  %v7232_v1 = vld [vmem:[#allocation13 + $0xbe0] ss:$8 sps:$4 sm:$0xff]  }
 0x961   : > { %v3891_v8 = vrot.slane %v3889_v41, 1  ;;  %v3916_v4 = vrot.slane %v3914_v10, 1  ;;  %v3919_v17 = vrot.slane %v3917_v12, 2  ;;  %v3921_v18 = vrot.slane %v3893_v11, 1  ;;  %v7243_v12 = vld [vmem:[#allocation13 + $0xc14] ss:$8 sps:$4 sm:$0xff]  }
 0x962   : > { %v3887_v9 = vor.u32 %v3886_v57, %v3882_v7  ;;  %v3922_v19 = vrot.slane %v3889_v41, 2  ;;  %v7235_v7 = vld [vmem:[#allocation13 + $0xbf0] ss:$8 sps:$4 sm:$0xff]   ;;  %v7240_v57 = vld [vmem:[#allocation13 + $0xc04] ss:$8 sps:$4 sm:$0xff]   ;;  %v3907_v10 = vrot.slane %v8432_v51, 1 }
 0x963   : > { %v3895_v63 = vor.u32 %v3893_v11, %v3891_v8  ;;  %v3920_v23 = vor.u32 %v3919_v17, %v3916_v4  ;;  %v7238_v11 = vld [vmem:[#allocation13 + $0xc00] ss:$8 sps:$4 sm:$0xff]   ;;  %v7246_v4 = vld [vmem:[#allocation13 + $0xc24] ss:$8 sps:$4 sm:$0xff]   ;;  %v7249_v17 = vld [vmem:[#allocation13 + $0xc34] ss:$8 sps:$4 sm:$0xff]  }
 0x964   : > { %v3892_v15 = vsel %vm688_vm2, %v3887_v9, %v3891_v8  ;;  %v8445_v24 = vor.u32 %v3922_v19, %v3921_v18  ;;  %v3906_v8 = vrot.slane %v8434_v56, 1  ;;  %v7247_v19 = vld [vmem:[#allocation13 + $0xc30] ss:$8 sps:$4 sm:$0xff]  }
 0x965   : > { %4471 = vmatprep.mubr.bf16.mxu0 %v3892_v15  ;;  %v8441_v54 = vld [vmem:[#allocation2 + $0x10] sm:$0x1] }
 0x966   : > { %4472 = vmatmul.mubr.bf16.vlgmr.msra.gmra.mrb[16].mxu0 %v3875_v3  ;;  %v3897_v5 = vshll.u32 %v8441_v54, 16  ;;  %v3924_v27 = vsel %vm709_vm3, %v3920_v23, %v8445_v24  ;;  %v8450_v50 = vld [vmem:[#allocation2 + $0x10] sm:$0x3]  ;;  %v3909_v56 = vrot.slane %v8441_v54, 1  ;;  %v7258_v54 = vld [vmem:[#allocation13 + $0xc64] ss:$8 sps:$4 sm:$0xff]  }
 0x967   : > { %4493 = vmatpush1.bf16.msra.mxu0 %v7190_v14  ;;  %v3926_v39 = vshrl.u32 %v8450_v50, 16  ;;  %v3929_v61 = vshll.u32 %v8450_v50, 16  ;;  %v7237_v3 = vld [vmem:[#allocation13 + $0xbf4] ss:$8 sps:$4 sm:$0xff]   ;;  %v3908_v14 = vsel %vm704_vm4, %v3906_v8, %v3907_v10  ;;  %v7304_v8 = vld [vmem:[#allocation13 + $0xd60] ss:$8 sps:$4 sm:$0xff]  }
 0x968   : > { %v3899_v0 = vrot.slane %v3897_v5, 1  ;;  %4494 = vmatprep.subr.bf16.mxu0 %v7195_v16  ;;  %v7241_v16 = vld [vmem:[#allocation13 + $0xc10] ss:$8 sps:$4 sm:$0xff]   ;;  %v7244_v5 = vld [vmem:[#allocation13 + $0xc20] ss:$8 sps:$4 sm:$0xff]   ;;  %v3910_v18 = vsel %vm704_vm4, %v3907_v10, %v3909_v56 }
 0x969   : > { %v3928_v6 = vrot.slane %v3926_v39, 1  ;;  %v3931_v41 = vrot.slane %v3929_v61, 2  ;;  %v7261_v23 = vld [vmem:[#allocation13 + $0xc74] ss:$8 sps:$4 sm:$0xff]   ;;  %v7292_v39 = vld [vmem:[#allocation13 + $0xd20] ss:$8 sps:$4 sm:$0xff]  }
 0x96a   : > { %v3900_v22 = vsel %vm688_vm2, %v3895_v63, %v3899_v0  ;;  %v7250_v63 = vld [vmem:[#allocation13 + $0xc40] ss:$8 sps:$4 sm:$0xff]   ;;  %v7255_v0 = vld [vmem:[#allocation13 + $0xc54] ss:$8 sps:$4 sm:$0xff]  }
 0x96b   : > { %4481 = vmatprep.mubr.bf16.mxu0 %v3900_v22  ;;  %4495 = vmatpush1.bf16.msra.mxu0 %v7193_v21  ;;  %v3932_v9 = vor.u32 %v3931_v41, %v3928_v6  ;;  %v7252_v21 = vld [vmem:[#allocation13 + $0xc44] ss:$8 sps:$4 sm:$0xff]   ;;  %v7256_v22 = vld [vmem:[#allocation13 + $0xc60] ss:$8 sps:$4 sm:$0xff]   ;;  %v7297_v61 = vld [vmem:[#allocation13 + $0xd34] ss:$8 sps:$4 sm:$0xff]  }
 0x96c   : > { %4496 = vmatprep.subr.bf16.mxu0 %v7198_v2  ;;  %v7253_v2 = vld [vmem:[#allocation13 + $0xc50] ss:$8 sps:$4 sm:$0xff]   ;;  %v7298_v6 = vld [vmem:[#allocation13 + $0xd40] ss:$8 sps:$4 sm:$0xff]   ;;  %v7303_v41 = vld [vmem:[#allocation13 + $0xd54] ss:$8 sps:$4 sm:$0xff]  }
 0x96d   : > { %v3933_v15 = vsel %vm709_vm3, %v8445_v24, %v3932_v9  ;;  %v3880_v24 = vld [vmem:[#allocation2] sm:$0xfc]  ;;  %v7309_v10 = vld [vmem:[#allocation13 + $0xd74] ss:$8 sps:$4 sm:$0xff]  }
 0x96e   : > { %4482 = vmatmul.mubr.bf16.gmra.mrb[20].mxu0 %v8432_v51  ;;  %v7307_v9 = vld [vmem:[#allocation13 + $0xd70] ss:$8 sps:$4 sm:$0xff]  }
 0x96f   : > { %4497 = vmatpush1.bf16.msra.mxu0 %v7196_v25  ;;  %4524 = vmatprep.mubr.bf16.mxu0 %v3924_v27  ;;  %v7259_v25 = vld [vmem:[#allocation13 + $0xc70] ss:$8 sps:$4 sm:$0xff]   ;;  %v3939_v27 = vrot.slane %v8432_v51, 2  ;;  %v7270_v51 = vld [vmem:[#allocation13 + $0xca4] ss:$8 sps:$4 sm:$0xff]  }
 0x970   : > { %4498 = vmatprep.subr.bf16.mxu0 %v7201_v26  ;;  %v3938_v26 = vrot.slane %v3880_v24, 2 }
 0x973   : > { %4499 = vmatpush1.bf16.msra.mxu0 %v7199_v28  ;;  %v3940_v28 = vsel %vm730_vm5, %v3938_v26, %v3939_v27 }
 0x974   : > { %4500 = vmatprep.subr.bf16.mxu0 %v7204_v29  ;;  %v3941_v29 = vrot.slane %v8450_v50, 2  ;;  %v7289_v50 = vld [vmem:[#allocation13 + $0xd10] ss:$8 sps:$4 sm:$0xff]  }
 0x977   : > { %4501 = vmatpush1.bf16.msra.mxu0 %v7202_v30  ;;  %v3942_v30 = vsel %vm730_vm5, %v3939_v27, %v3941_v29 }
 0x978   : > { %4502 = vmatprep.subr.bf16.mxu0 %v7207_v31  ;;  %v7264_v31 = vld [vmem:[#allocation13 + $0xc84] ss:$8 sps:$4 sm:$0xff]  }
 0x979   : > { %5213 = vmatprep.subr.bf16.mxu1 %v7264_v31 }
 0x97b   : > { %4503 = vmatpush1.bf16.msra.mxu0 %v7205_v32  ;;  %v7262_v32 = vld [vmem:[#allocation13 + $0xc80] ss:$8 sps:$4 sm:$0xff]  }
 0x97c   : > { %4504 = vmatprep.subr.bf16.mxu0 %v7210_v13  ;;  %5214 = vmatpush1.bf16.msra.mxu1 %v7262_v32  ;;  %v7267_v13 = vld [vmem:[#allocation13 + $0xc94] ss:$8 sps:$4 sm:$0xff]  }
 0x97d   : > { %5215 = vmatprep.subr.bf16.mxu1 %v7267_v13 }
 0x97f   : > { %4505 = vmatpush1.bf16.msra.mxu0 %v7208_v33  ;;  %v7265_v33 = vld [vmem:[#allocation13 + $0xc90] ss:$8 sps:$4 sm:$0xff]  }
 0x980   : > { %4506 = vmatprep.subr.bf16.mxu0 %v7213_v53  ;;  %5216 = vmatpush1.bf16.msra.mxu1 %v7265_v33  ;;  %v7268_v53 = vld [vmem:[#allocation13 + $0xca0] ss:$8 sps:$4 sm:$0xff]  }
 0x981   : > { %5217 = vmatprep.subr.bf16.mxu1 %v7270_v51 }
 0x983   : > { %4507 = vmatpush1.bf16.msra.mxu0 %v7211_v62  ;;  %v7273_v62 = vld [vmem:[#allocation13 + $0xcb4] ss:$8 sps:$4 sm:$0xff]  }
 0x984   : > { %4508 = vmatprep.subr.bf16.mxu0 %v7216_v34  ;;  %5218 = vmatpush1.bf16.msra.mxu1 %v7268_v53  ;;  %v7271_v34 = vld [vmem:[#allocation13 + $0xcb0] ss:$8 sps:$4 sm:$0xff]  }
 0x985   : > { %5219 = vmatprep.subr.bf16.mxu1 %v7273_v62 }
 0x987   : > { %4509 = vmatpush1.bf16.msra.mxu0 %v7214_v59  ;;  %v7276_v59 = vld [vmem:[#allocation13 + $0xcc4] ss:$8 sps:$4 sm:$0xff]  }
 0x988   : > { %4510 = vmatprep.subr.bf16.mxu0 %v7219_v35  ;;  %5220 = vmatpush1.bf16.msra.mxu1 %v7271_v34  ;;  %v7274_v35 = vld [vmem:[#allocation13 + $0xcc0] ss:$8 sps:$4 sm:$0xff]  }
 0x989   : > { %5221 = vmatprep.subr.bf16.mxu1 %v7276_v59 }
 0x98b   : > { %4511 = vmatpush1.bf16.msra.mxu0 %v7217_v36  ;;  %v7279_v36 = vld [vmem:[#allocation13 + $0xcd4] ss:$8 sps:$4 sm:$0xff]  }
 0x98c   : > { %4512 = vmatprep.subr.bf16.mxu0 %v7222_v37  ;;  %5222 = vmatpush1.bf16.msra.mxu1 %v7274_v35  ;;  %v7277_v37 = vld [vmem:[#allocation13 + $0xcd0] ss:$8 sps:$4 sm:$0xff]  }
 0x98d   : > { %5223 = vmatprep.subr.bf16.mxu1 %v7279_v36 }
 0x98f   : > { %4513 = vmatpush1.bf16.msra.mxu0 %v7220_v45  ;;  %v7282_v45 = vld [vmem:[#allocation13 + $0xce4] ss:$8 sps:$4 sm:$0xff]  }
 0x990   : > { %4514 = vmatprep.subr.bf16.mxu0 %v7225_v46  ;;  %5224 = vmatpush1.bf16.msra.mxu1 %v7277_v37  ;;  %v7280_v46 = vld [vmem:[#allocation13 + $0xce0] ss:$8 sps:$4 sm:$0xff]  }
 0x991   : > { %5225 = vmatprep.subr.bf16.mxu1 %v7282_v45 }
 0x993   : > { %4515 = vmatpush1.bf16.msra.mxu0 %v7223_v47  ;;  %v7285_v47 = vld [vmem:[#allocation13 + $0xcf4] ss:$8 sps:$4 sm:$0xff]  }
 0x994   : > { %4516 = vmatprep.subr.bf16.mxu0 %v7228_v48  ;;  %5226 = vmatpush1.bf16.msra.mxu1 %v7280_v46  ;;  %v7283_v48 = vld [vmem:[#allocation13 + $0xcf0] ss:$8 sps:$4 sm:$0xff]  }
 0x995   : > { %5227 = vmatprep.subr.bf16.mxu1 %v7285_v47 }
 0x997   : > { %4517 = vmatpush1.bf16.msra.mxu0 %v7226_v49  ;;  %v7288_v49 = vld [vmem:[#allocation13 + $0xd04] ss:$8 sps:$4 sm:$0xff]  }
 0x998   : > { %4518 = vmatprep.subr.bf16.mxu0 %v7231_v52  ;;  %5228 = vmatpush1.bf16.msra.mxu1 %v7283_v48  ;;  %v7286_v52 = vld [vmem:[#allocation13 + $0xd00] ss:$8 sps:$4 sm:$0xff]  }
 0x999   : > { %5229 = vmatprep.subr.bf16.mxu1 %v7288_v49 }
 0x99b   : > { %4519 = vmatpush1.bf16.msra.mxu0 %v7229_v55  ;;  %v7291_v55 = vld [vmem:[#allocation13 + $0xd14] ss:$8 sps:$4 sm:$0xff]  }
 0x99c   : > { %4520 = vmatprep.subr.bf16.mxu0 %v7234_v40  ;;  %5230 = vmatpush1.bf16.msra.mxu1 %v7286_v52  ;;  %v7294_v40 = vld [vmem:[#allocation13 + $0xd24] ss:$8 sps:$4 sm:$0xff]  }
 0x99d   : > { %5231 = vmatprep.subr.bf16.mxu1 %v7291_v55 }
 0x99f   : > { %4521 = vmatpush1.bf16.msra.mxu0 %v7232_v1  ;;  %v7295_v1 = vld [vmem:[#allocation13 + $0xd30] ss:$8 sps:$4 sm:$0xff]  }
 0x9a0   : > { %4522 = vmatprep.subr.bf16.mxu0 %v7237_v3  ;;  %5232 = vmatpush1.bf16.msra.mxu1 %v7289_v50  ;;  %v7300_v3 = vld [vmem:[#allocation13 + $0xd44] ss:$8 sps:$4 sm:$0xff]  }
 0x9a1   : > { %5233 = vmatprep.subr.bf16.mxu1 %v7294_v40 }
 0x9a3   : > { %4523 = vmatpush1.bf16.msra.mxu0 %v7235_v7  ;;  %v7301_v7 = vld [vmem:[#allocation13 + $0xd50] ss:$8 sps:$4 sm:$0xff]  }
 0x9a4   : > { %4545 = vmatprep.subr.bf16.mxu0 %v7240_v57  ;;  %5234 = vmatpush1.bf16.msra.mxu1 %v7292_v39  ;;  %v7306_v57 = vld [vmem:[#allocation13 + $0xd64] ss:$8 sps:$4 sm:$0xff]  }
 0x9a5   : > { %5235 = vmatprep.subr.bf16.mxu1 %v7297_v61 }
 0x9a6   : > { %4525 = vmatmul.mubr.bf16.vlgmr.msra.gmra.mrb[16].mxu0 %v3908_v14 }
 0x9a7   : > { %4534 = vmatprep.mubr.bf16.mxu0 %v3933_v15  ;;  %4546 = vmatpush1.bf16.msra.mxu0 %v7238_v11  ;;  %v7312_v11 = vld [vmem:[#allocation13 + $0xd84] ss:$8 sps:$4 sm:$0xff]  }
 0x9a8   : > { %4547 = vmatprep.subr.bf16.mxu0 %v7243_v12  ;;  %5236 = vmatpush1.bf16.msra.mxu1 %v7295_v1  ;;  %v4027_v12 = vld [vmem:[#allocation15 + $0x8] sm:$0x3] }
 0x9a9   : > { %5237 = vmatprep.subr.bf16.mxu1 %v7300_v3  ;;  %v4036_v14 = vrot.slane %v4027_v12, %v8249_v43 }
 0x9ab   : > { %4548 = vmatpush1.bf16.msra.mxu0 %v7241_v16 }
 0x9ac   : > { %4549 = vmatprep.subr.bf16.mxu0 %v7246_v4  ;;  %5238 = vmatpush1.bf16.msra.mxu1 %v7298_v6 }
 0x9ad   : > { %5239 = vmatprep.subr.bf16.mxu1 %v7303_v41 }
 0x9ae   : > { %4535 = vmatmul.mubr.bf16.gmra.mrb[20].mxu0 %v3910_v18 }
 0x9af   : > { %4550 = vmatpush1.bf16.msra.mxu0 %v7244_v5  ;;  %4577 = vmatprep.mubr.bf16.mxu0 %v7851_v20 }
 0x9b0   : > { %4551 = vmatprep.subr.bf16.mxu0 %v7249_v17  ;;  %5240 = vmatpush1.bf16.msra.mxu1 %v7301_v7 }
 0x9b1   : > { %5241 = vmatprep.subr.bf16.mxu1 %v7306_v57 }
 0x9b3   : > { %4552 = vmatpush1.bf16.msra.mxu0 %v7247_v19 }
 0x9b4   : > { %4553 = vmatprep.subr.bf16.mxu0 %v7252_v21  ;;  %5242 = vmatpush1.bf16.msra.mxu1 %v7304_v8 }
 0x9b5   : > { %5243 = vmatprep.subr.bf16.mxu1 %v7309_v10 }
 0x9b7   : > { %4554 = vmatpush1.bf16.msra.mxu0 %v7250_v63 }
 0x9b8   : > { %4555 = vmatprep.subr.bf16.mxu0 %v7255_v0  ;;  %5244 = vmatpush1.bf16.msra.mxu1 %v7307_v9 }
 0x9b9   : > { %5266 = vmatprep.subr.bf16.mxu1 %v7312_v11 }
 0x9bb   : > { %4556 = vmatpush1.bf16.msra.mxu0 %v7253_v2 }
 0x9bc   : > { %4557 = vmatprep.subr.bf16.mxu0 %v7258_v54 }
 0x9bf   : > { %4558 = vmatpush1.bf16.msra.mxu0 %v7256_v22 }
 0x9c0   : > { %4559 = vmatprep.subr.bf16.mxu0 %v7261_v23 }
 0x9c3   : > { %4560 = vmatpush1.bf16.msra.mxu0 %v7259_v25 }
 0x9c6   : > { %4578 = vmatmul.mubr.bf16.vlgmr.msra.gmra.mrb[16].mxu0 %v3940_v28 }
 0x9c7   : > { %4587 = vmatprep.mubr.bf16.mxu0 %v7851_v20 }
 0x9ce   : > { %4588 = vmatmul.mubr.bf16.gmra.mrb[20].mxu0 %v3942_v30  ;;  %v4032_v30 = vrot.slane %v4027_v12, %v8252_v58 }
 0xa99   : > { %v4579_v15 = vpop.f32.mrb[16].mxu0 }
 0xa9a   : > { %v4581_v16 = vpop.f32.mrb[17].mxu0  ;;  %v6369_v33 = vadd.f32 %v4579_v15, %v4032_v30  ;;  %v7310_v15 = vld [vmem:[#allocation13 + $0xd80] ss:$8 sps:$4 sm:$0xff]  }
 0xa9b   : > { %v6370_v4 = vadd.f32 %v4581_v16, %v4036_v14  ;;  %v4583_v56 = vpop.f32.mrb[18].mxu0 }
 0xa9c   : > { %v4585_v5 = vpop.f32.mrb[19].mxu0  ;;  %v6371_v62 = vadd.f32 %v4583_v56, %v4032_v30 }
 0xa9d   : > { %v6196_v17 = vmul.f32 -1.442695, %v6370_v4  ;;  %v6372_v18 = vadd.f32 %v4585_v5, %v4036_v14  ;;  %v7315_v4 = vld [vmem:[#allocation13 + $0xd94] ss:$8 sps:$4 sm:$0xff]  }
 0xa9f   : > { %7446 = vpow2.f32 %v6196_v17  ;;  %v6197_v19 = vmul.f32 -1.442695, %v6372_v18 }
 0xaa1   : > { %7448 = vpow2.f32 %v6197_v19  ;;  %v4589_v21 = vpop.f32.mrb[20].mxu0 }
 0xaa2   : > { %v4591_v63 = vpop.f32.mrb[21].mxu0  ;;  %v6373_v46 = vadd.f32 %v4589_v21, %v4032_v30 }
 0xaa3   : > { %v6374_v0 = vadd.f32 %v4591_v63, %v4036_v14  ;;  %v4593_v2 = vpop.f32.mrb[22].mxu0 }
 0xaa4   : > { %v4595_v54 = vpop.f32.mrb[23].mxu0  ;;  %v6375_v52 = vadd.f32 %v4593_v2, %v4032_v30  ;;  %v7313_v2 = vld [vmem:[#allocation13 + $0xd90] ss:$8 sps:$4 sm:$0xff]  }
 0xaa5   : > { %v6198_v22 = vmul.f32 -1.442695, %v6374_v0  ;;  %v6376_v23 = vadd.f32 %v4595_v54, %v4036_v14 }
 0xaa7   : > { %7450 = vpow2.f32 %v6198_v22  ;;  %v6199_v24 = vmul.f32 -1.442695, %v6376_v23  ;;  %v7318_v23 = vld [vmem:[#allocation13 + $0xda4] ss:$8 sps:$4 sm:$0xff]  }
 0xaa9   : > { %v7447_v25 = vpop.eup %7446  ;;  %7452 = vpow2.f32 %v6199_v24 }
 0xaaa   : > { %v4610_v26 = vadd.f32 1.0, %v7447_v25 }
 0xaab   : > { %v7449_v27 = vpop.eup %7448 }
 0xaac   : > { %7454 = vrcp.f32 %v4610_v26  ;;  %v4611_v28 = vadd.f32 1.0, %v7449_v27 }
 0xaae   : > { %7456 = vrcp.f32 %v4611_v28  ;;  %v7316_v28 = vld [vmem:[#allocation13 + $0xda0] ss:$8 sps:$4 sm:$0xff]  }
 0xab1   : > { %v7451_v29 = vpop.eup %7450 }
 0xab2   : > { %v4612_v31 = vadd.f32 1.0, %v7451_v29  ;;  %v7321_v29 = vld [vmem:[#allocation13 + $0xdb4] ss:$8 sps:$4 sm:$0xff]  }
 0xab3   : > { %v7453_v32 = vpop.eup %7452 }
 0xab4   : > { %7458 = vrcp.f32 %v4612_v31  ;;  %v4613_v13 = vadd.f32 1.0, %v7453_v32  ;;  %v7319_v31 = vld [vmem:[#allocation13 + $0xdb0] ss:$8 sps:$4 sm:$0xff]   ;;  %v7324_v32 = vld [vmem:[#allocation13 + $0xdc4] ss:$8 sps:$4 sm:$0xff]  }
 0xab6   : > { %v7455_v51 = vpop.eup %7454  ;;  %7460 = vrcp.f32 %v4613_v13  ;;  %v7322_v13 = vld [vmem:[#allocation13 + $0xdc0] ss:$8 sps:$4 sm:$0xff]  }
 0xab7   : > { %v4622_v53 = vmul.f32 %v7455_v51, %v6369_v33  ;;  %v7327_v33 = vld [vmem:[#allocation13 + $0xdd4] ss:$8 sps:$4 sm:$0xff]   ;;  %v7325_v51 = vld [vmem:[#allocation13 + $0xdd0] ss:$8 sps:$4 sm:$0xff]  }
 0xab8   : > { %v7457_v34 = vpop.eup %7456 }
 0xab9   : > { %v4626_v59 = vadd.f32 %v4622_v53, %v8417_v38  ;;  %v4623_v35 = vmul.f32 %v7457_v34, %v6371_v62  ;;  %v7330_v53 = vld [vmem:[#allocation13 + $0xde4] ss:$8 sps:$4 sm:$0xff]   ;;  %v7328_v62 = vld [vmem:[#allocation13 + $0xde0] ss:$8 sps:$4 sm:$0xff]   ;;  %v7333_v34 = vld [vmem:[#allocation13 + $0xdf4] ss:$8 sps:$4 sm:$0xff]  }
 0xabb   : > { %v4627_v36 = vadd.f32 %v4623_v35, %v8419_v44  ;;  %v8471_v37 = vmul.f32 0.70710677, %v4626_v59  ;;  %v7331_v59 = vld [vmem:[#allocation13 + $0xdf0] ss:$8 sps:$4 sm:$0xff]   ;;  %v7336_v35 = vld [vmem:[#allocation13 + $0xe04] ss:$8 sps:$4 sm:$0xff]  }
 0xabd   : > { %v8473_v45 = vmul.f32 0.70710677, %v4627_v36  ;;  %v7334_v36 = vld [vmem:[#allocation13 + $0xe00] ss:$8 sps:$4 sm:$0xff]  }
 0xabe   : > { %v7459_v47 = vpop.eup %7458 }
 0xabf   : > { %v4634_v48 = vpack.c.bf16 %v8473_v45, %v8471_v37  ;;  %v4624_v49 = vmul.f32 %v7459_v47, %v6373_v46  ;;  %v7339_v46 = vld [vmem:[#allocation13 + $0xe14] ss:$8 sps:$4 sm:$0xff]   ;;  %v7337_v47 = vld [vmem:[#allocation13 + $0xe10] ss:$8 sps:$4 sm:$0xff]  }
 0xac0   : > { %v7461_v55 = vpop.eup %7460 }
 0xac1   : > { %v4638_v50 = vrot.slane %v4634_v48, 7  ;;  %v4628_v40 = vadd.f32 %v4624_v49, %v8425_v42  ;;  %v4625_v39 = vmul.f32 %v7461_v55, %v6375_v52  ;;  %v7342_v48 = vld [vmem:[#allocation13 + $0xe24] ss:$8 sps:$4 sm:$0xff]   ;;  %v7340_v49 = vld [vmem:[#allocation13 + $0xe20] ss:$8 sps:$4 sm:$0xff]  }
 0xac2   : > { %v7345_v52 = vld [vmem:[#allocation13 + $0xe34] ss:$8 sps:$4 sm:$0xff]   ;;  %v7343_v55 = vld [vmem:[#allocation13 + $0xe30] ss:$8 sps:$4 sm:$0xff]  }
 0xac3   : > { %4644 = vst [vmem:[#allocation2] sm:$0xfe] %v4638_v50  ;;  %v4629_v38 = vadd.f32 %v4625_v39, %v8427_v60  ;;  %v8479_v44 = vmul.f32 0.70710677, %v4628_v40  ;;  %v7346_v40 = vld [vmem:[#allocation13 + $0xe40] ss:$8 sps:$4 sm:$0xff]  }
 0xac4   : > { %v7351_v39 = vld [vmem:[#allocation13 + $0xe54] ss:$8 sps:$4 sm:$0xff]  }
 0xac5   : > { %v8481_v61 = vmul.f32 0.70710677, %v4629_v38  ;;  %v7349_v38 = vld [vmem:[#allocation13 + $0xe50] ss:$8 sps:$4 sm:$0xff]  }
 0xac7   : > { %v4635_v1 = vpack.c.bf16 %v8481_v61, %v8479_v44 }
 0xac9   : > { %v4639_v3 = vrot.slane %v4635_v1, 7 }
 0xaca   : > { %v4649_v6 = vld [vmem:[#allocation2] sm:$0xff] }
 0xacb   : > { %v8486_v41 = vsel %vm1541_vm6, %v4638_v50, %v4639_v3  ;;  %4646 = vst [vmem:[#allocation2 + $0x10] sm:$0x1] %v4639_v3  ;;  %v4658_v7 = vshll.u32 %v4649_v6, 16  ;;  %v8488_v57 = vld [vmem:[#allocation2] sm:$0xfe]  ;;  %v4656_v60 = vshrl.u32 %v4649_v6, 16 }
 0xacc   : > { %4645 = vst [vmem:[#allocation2 + $0x8] sm:$0xff] %v8486_v41  ;;  %v4663_v42 = vshll.u32 %v8486_v41, 16  ;;  %v4688_v9 = vshrl.u32 %v8488_v57, 16  ;;  %v4691_v11 = vshll.u32 %v8488_v57, 16  ;;  %v4667_v14 = vshrl.u32 %v8486_v41, 16 }
 0xacd   : > { %v4660_v8 = vrot.slane %v4658_v7, 1  ;;  %v4681_v18 = vrot.slane %v8486_v41, 1  ;;  %v7348_v50 = vld [vmem:[#allocation13 + $0xe44] ss:$8 sps:$4 sm:$0xff]  }
 0xace   : > { %v4665_v10 = vrot.slane %v4663_v42, 1  ;;  %v4690_v5 = vrot.slane %v4688_v9, 1  ;;  %v4693_v17 = vrot.slane %v4691_v11, 2  ;;  %v4695_v21 = vrot.slane %v4667_v14, 1  ;;  %v7354_v3 = vld [vmem:[#allocation13 + $0xe64] ss:$8 sps:$4 sm:$0xff]  }
 0xacf   : > { %v4661_v12 = vor.u32 %v4660_v8, %v4656_v60  ;;  %v4696_v63 = vrot.slane %v4663_v42, 2  ;;  %v7352_v42 = vld [vmem:[#allocation13 + $0xe60] ss:$8 sps:$4 sm:$0xff]   ;;  %v7357_v60 = vld [vmem:[#allocation13 + $0xe74] ss:$8 sps:$4 sm:$0xff]  }
 0xad0   : > { %v4669_v54 = vor.u32 %v4667_v14, %v4665_v10  ;;  %v4694_v26 = vor.u32 %v4693_v17, %v4690_v5  ;;  %v7355_v9 = vld [vmem:[#allocation13 + $0xe70] ss:$8 sps:$4 sm:$0xff]   ;;  %v7360_v11 = vld [vmem:[#allocation13 + $0xe84] ss:$8 sps:$4 sm:$0xff]  }
 0xad1   : > { %v4666_v16 = vsel %vm688_vm2, %v4661_v12, %v4665_v10  ;;  %v8503_v27 = vor.u32 %v4696_v63, %v4695_v21  ;;  %v4680_v12 = vrot.slane %v8488_v57, 1  ;;  %v7361_v5 = vld [vmem:[#allocation13 + $0xe90] ss:$8 sps:$4 sm:$0xff]   ;;  %v7366_v17 = vld [vmem:[#allocation13 + $0xea4] ss:$8 sps:$4 sm:$0xff]  }
 0xad2   : > { %5245 = vmatprep.mubr.bf16.mxu1 %v4666_v16  ;;  %v4651_v56 = vld [vmem:[#allocation2 + $0x10] sm:$0x1]  ;;  %v7364_v57 = vld [vmem:[#allocation13 + $0xea0] ss:$8 sps:$4 sm:$0xff]   ;;  %v7367_v21 = vld [vmem:[#allocation13 + $0xeb0] ss:$8 sps:$4 sm:$0xff]  }
 0xad3   : > { %5246 = vmatmul.mubr.bf16.vlgmr.msra.gmra.mrb[24].mxu1 %v4649_v6  ;;  %v4671_v19 = vshll.u32 %v4651_v56, 16  ;;  %v4683_v0 = vrot.slane %v4651_v56, 1  ;;  %v4698_v30 = vsel %vm709_vm3, %v4694_v26, %v8503_v27  ;;  %v8508_v1 = vld [vmem:[#allocation2 + $0x10] sm:$0x3]  ;;  %v7370_v63 = vld [vmem:[#allocation13 + $0xec0] ss:$8 sps:$4 sm:$0xff]  }
 0xad4   : > { %5267 = vmatpush1.bf16.msra.mxu1 %v7310_v15  ;;  %v4700_v6 = vshrl.u32 %v8508_v1, 16  ;;  %v4703_v7 = vshll.u32 %v8508_v1, 16  ;;  %v7358_v15 = vld [vmem:[#allocation13 + $0xe80] ss:$8 sps:$4 sm:$0xff]   ;;  %v7363_v16 = vld [vmem:[#allocation13 + $0xe94] ss:$8 sps:$4 sm:$0xff]  }
 0xad5   : > { %v4673_v22 = vrot.slane %v4671_v19, 1  ;;  %5268 = vmatprep.subr.bf16.mxu1 %v7315_v4  ;;  %v8500_v24 = vsel %vm704_vm4, %v4681_v18, %v4683_v0  ;;  %v4682_v4 = vsel %vm704_vm4, %v4680_v12, %v4681_v18  ;;  %v7369_v19 = vld [vmem:[#allocation13 + $0xeb4] ss:$8 sps:$4 sm:$0xff]   ;;  %v7372_v18 = vld [vmem:[#allocation13 + $0xec4] ss:$8 sps:$4 sm:$0xff]  }
 0xad6   : > { %v4702_v8 = vrot.slane %v4700_v6, 1  ;;  %v4705_v10 = vrot.slane %v4703_v7, 2  ;;  %v7375_v0 = vld [vmem:[#allocation13 + $0xed4] ss:$8 sps:$4 sm:$0xff]  }
 0xad7   : > { %v4674_v25 = vsel %vm688_vm2, %v4669_v54, %v4673_v22  ;;  %v7378_v54 = vld [vmem:[#allocation13 + $0xee4] ss:$8 sps:$4 sm:$0xff]   ;;  %v7376_v22 = vld [vmem:[#allocation13 + $0xee0] ss:$8 sps:$4 sm:$0xff]  }
 0xad8   : > { %5255 = vmatprep.mubr.bf16.mxu1 %v4674_v25  ;;  %5269 = vmatpush1.bf16.msra.mxu1 %v7313_v2  ;;  %v4706_v14 = vor.u32 %v4705_v10, %v4702_v8  ;;  %v7373_v2 = vld [vmem:[#allocation13 + $0xed0] ss:$8 sps:$4 sm:$0xff]  }
 0xad9   : > { %5270 = vmatprep.subr.bf16.mxu1 %v7318_v23  ;;  %v7381_v23 = vld [vmem:[#allocation13 + $0xef4] ss:$8 sps:$4 sm:$0xff]   ;;  %v4654_v25 = vld [vmem:[#allocation2] sm:$0xfc] }
 0xada   : > { %v4707_v56 = vsel %vm709_vm3, %v8503_v27, %v4706_v14  ;;  %v4712_v26 = vrot.slane %v4654_v25, 2  ;;  %v4713_v27 = vrot.slane %v8486_v41, 2 }
 0xadb   : > { %5256 = vmatmul.mubr.bf16.gmra.mrb[28].mxu1 %v8486_v41  ;;  %v7385_v41 = vld [vmem:[#allocation16 + $0x18] sm:$0xff]  }
 0xadc   : > { %5271 = vmatpush1.bf16.msra.mxu1 %v7316_v28  ;;  %5298 = vmatprep.mubr.bf16.mxu1 %v4698_v30  ;;  %v4714_v28 = vsel %vm730_vm5, %v4712_v26, %v4713_v27 }
 0xadd   : > { %5272 = vmatprep.subr.bf16.mxu1 %v7321_v29  ;;  %v4715_v29 = vrot.slane %v8508_v1, 2 }
 0xadf   : > { %v4716_v30 = vsel %vm730_vm5, %v4713_v27, %v4715_v29 }
 0xae0   : > { %5273 = vmatpush1.bf16.msra.mxu1 %v7319_v31  ;;  %v7382_v31 = vld [vmem:[#allocation16] sm:$0xff]  }
 0xae1   : > { %5274 = vmatprep.subr.bf16.mxu1 %v7324_v32  ;;  %6321 = vmatprep.subr.bf16.mxu0 %v7382_v31  ;;  %v7383_v32 = vld [vmem:[#allocation16 + $0x8] sm:$0xff]  }
 0xae2   : > { %6322 = vmatpush3.bf16.msra.mxu0 %v7382_v31 }
 0xae3   : > { %6323 = vmatprep.subr.bf16.mxu0 %v7383_v32 }
 0xae4   : > { %5275 = vmatpush1.bf16.msra.mxu1 %v7322_v13  ;;  %v7384_v13 = vld [vmem:[#allocation16 + $0x10] sm:$0xff]  }
 0xae5   : > { %5276 = vmatprep.subr.bf16.mxu1 %v7327_v33  ;;  %v7386_v33 = vld [vmem:[#allocation16 + $0x20] sm:$0xff]  }
 0xae6   : > { %6324 = vmatpush3.bf16.msra.mxu0 %v7383_v32 }
 0xae7   : > { %6325 = vmatprep.subr.bf16.mxu0 %v7384_v13 }
 0xae8   : > { %5277 = vmatpush1.bf16.msra.mxu1 %v7325_v51  ;;  %v7388_v51 = vld [vmem:[#allocation16 + $0x30] sm:$0xff]  }
 0xae9   : > { %5278 = vmatprep.subr.bf16.mxu1 %v7330_v53  ;;  %v7389_v53 = vld [vmem:[#allocation16 + $0x38] sm:$0xff]  }
 0xaea   : > { %6326 = vmatpush3.bf16.msra.mxu0 %v7384_v13 }
 0xaeb   : > { %6327 = vmatprep.subr.bf16.mxu0 %v7385_v41 }
 0xaec   : > { %5279 = vmatpush1.bf16.msra.mxu1 %v7328_v62  ;;  %v4801_v62 = vld [vmem:[#allocation15 + $0xa] sm:$0x3] }
 0xaed   : > { %5280 = vmatprep.subr.bf16.mxu1 %v7333_v34  ;;  %v4810_v34 = vrot.slane %v4801_v62, %v8249_v43  ;;  %v4806_v10 = vrot.slane %v4801_v62, %v8252_v58 }
 0xaee   : > { %6328 = vmatpush3.bf16.msra.mxu0 %v7385_v41 }
 0xaef   : > { %6329 = vmatprep.subr.bf16.mxu0 %v7386_v33 }
 0xaf0   : > { %5281 = vmatpush1.bf16.msra.mxu1 %v7331_v59 }
 0xaf1   : > { %5282 = vmatprep.subr.bf16.mxu1 %v7336_v35 }
 0xaf2   : > { %6330 = vmatpush3.bf16.msra.mxu0 %v7386_v33 }
 0xaf4   : > { %5283 = vmatpush1.bf16.msra.mxu1 %v7334_v36 }
 0xaf5   : > { %5284 = vmatprep.subr.bf16.mxu1 %v7339_v46 }
 0xaf8   : > { %5285 = vmatpush1.bf16.msra.mxu1 %v7337_v47 }
 0xaf9   : > { %5286 = vmatprep.subr.bf16.mxu1 %v7342_v48 }
 0xafc   : > { %5287 = vmatpush1.bf16.msra.mxu1 %v7340_v49 }
 0xafd   : > { %5288 = vmatprep.subr.bf16.mxu1 %v7345_v52 }
 0xb00   : > { %5289 = vmatpush1.bf16.msra.mxu1 %v7343_v55 }
 0xb01   : > { %5290 = vmatprep.subr.bf16.mxu1 %v7348_v50 }
 0xb04   : > { %5291 = vmatpush1.bf16.msra.mxu1 %v7346_v40 }
 0xb05   : > { %5292 = vmatprep.subr.bf16.mxu1 %v7351_v39 }
 0xb08   : > { %5293 = vmatpush1.bf16.msra.mxu1 %v7349_v38 }
 0xb09   : > { %5294 = vmatprep.subr.bf16.mxu1 %v7354_v3 }
 0xb0c   : > { %5295 = vmatpush1.bf16.msra.mxu1 %v7352_v42 }
 0xb0d   : > { %5296 = vmatprep.subr.bf16.mxu1 %v7357_v60 }
 0xb10   : > { %5297 = vmatpush1.bf16.msra.mxu1 %v7355_v9 }
 0xb11   : > { %5319 = vmatprep.subr.bf16.mxu1 %v7360_v11 }
 0xb13   : > { %5299 = vmatmul.mubr.bf16.vlgmr.msra.gmra.mrb[24].mxu1 %v4682_v4 }
 0xb14   : > { %5308 = vmatprep.mubr.bf16.mxu1 %v4707_v56  ;;  %5320 = vmatpush1.bf16.msra.mxu1 %v7358_v15 }
 0xb15   : > { %5321 = vmatprep.subr.bf16.mxu1 %v7363_v16 }
 0xb18   : > { %5322 = vmatpush1.bf16.msra.mxu1 %v7361_v5 }
 0xb19   : > { %5323 = vmatprep.subr.bf16.mxu1 %v7366_v17 }
 0xb1b   : > { %5309 = vmatmul.mubr.bf16.gmra.mrb[28].mxu1 %v8500_v24  ;;  %v7379_v24 = vld [vmem:[#allocation13 + $0xef0] ss:$8 sps:$4 sm:$0xff]  }
 0xb1c   : > { %5324 = vmatpush1.bf16.msra.mxu1 %v7364_v57  ;;  %5351 = vmatprep.mubr.bf16.mxu1 %v7851_v20 }
 0xb1d   : > { %5325 = vmatprep.subr.bf16.mxu1 %v7369_v19 }
 0xb20   : > { %5326 = vmatpush1.bf16.msra.mxu1 %v7367_v21 }
 0xb21   : > { %5327 = vmatprep.subr.bf16.mxu1 %v7372_v18 }
 0xb24   : > { %5328 = vmatpush1.bf16.msra.mxu1 %v7370_v63 }
 0xb25   : > { %5329 = vmatprep.subr.bf16.mxu1 %v7375_v0 }
 0xb28   : > { %5330 = vmatpush1.bf16.msra.mxu1 %v7373_v2 }
 0xb29   : > { %5331 = vmatprep.subr.bf16.mxu1 %v7378_v54 }
 0xb2c   : > { %5332 = vmatpush1.bf16.msra.mxu1 %v7376_v22 }
 0xb2d   : > { %5333 = vmatprep.subr.bf16.mxu1 %v7381_v23 }
 0xb30   : > { %5334 = vmatpush1.bf16.msra.mxu1 %v7379_v24 }
 0xb33   : > { %5352 = vmatmul.mubr.bf16.vlgmr.msra.gmra.mrb[24].mxu1 %v4714_v28 }
 0xb34   : > { %5361 = vmatprep.mubr.bf16.mxu1 %v7851_v20  ;;  %v7387_v20 = vld [vmem:[#allocation16 + $0x28] sm:$0xff]  }
 0xb35   : > { %6331 = vmatprep.subr.bf16.mxu0 %v7387_v20 }
 0xb36   : > { %6332 = vmatpush3.bf16.msra.mxu0 %v7387_v20 }
 0xb37   : > { %6333 = vmatprep.subr.bf16.mxu0 %v7388_v51 }
 0xb3a   : > { %6334 = vmatpush3.bf16.msra.mxu0 %v7388_v51 }
 0xb3b   : > { %5362 = vmatmul.mubr.bf16.gmra.mrb[28].mxu1 %v4716_v30  ;;  %6335 = vmatprep.subr.bf16.mxu0 %v7389_v53 }
 0xb3e   : > { %6336 = vmatpush3.bf16.msra.mxu0 %v7389_v53 }
 0xc06   : > { %v5353_v59 = vpop.f32.mrb[24].mxu1 }
 0xc07   : > { %v5355_v35 = vpop.f32.mrb[25].mxu1  ;;  %v6377_v14 = vadd.f32 %v5353_v59, %v4806_v10 }
 0xc08   : > { %v6378_v36 = vadd.f32 %v5355_v35, %v4810_v34  ;;  %v5357_v46 = vpop.f32.mrb[26].mxu1 }
 0xc09   : > { %v5359_v47 = vpop.f32.mrb[27].mxu1  ;;  %v6379_v16 = vadd.f32 %v5357_v46, %v4806_v10 }
 0xc0a   : > { %v6280_v48 = vmul.f32 -1.442695, %v6378_v36  ;;  %v6380_v49 = vadd.f32 %v5359_v47, %v4810_v34 }
 0xc0c   : > { %7462 = vpow2.f32 %v6280_v48  ;;  %v6281_v52 = vmul.f32 -1.442695, %v6380_v49 }
 0xc0e   : > { %7464 = vpow2.f32 %v6281_v52  ;;  %v5363_v55 = vpop.f32.mrb[28].mxu1 }
 0xc0f   : > { %v5365_v50 = vpop.f32.mrb[29].mxu1  ;;  %v6381_v19 = vadd.f32 %v5363_v55, %v4806_v10 }
 0xc10   : > { %v6382_v40 = vadd.f32 %v5365_v50, %v4810_v34  ;;  %v5367_v39 = vpop.f32.mrb[30].mxu1 }
 0xc11   : > { %v5369_v38 = vpop.f32.mrb[31].mxu1  ;;  %v6383_v0 = vadd.f32 %v5367_v39, %v4806_v10 }
 0xc12   : > { %v6282_v1 = vmul.f32 -1.442695, %v6382_v40  ;;  %v6384_v3 = vadd.f32 %v5369_v38, %v4810_v34 }
 0xc14   : > { %7466 = vpow2.f32 %v6282_v1  ;;  %v6283_v6 = vmul.f32 -1.442695, %v6384_v3 }
 0xc16   : > { %v7463_v43 = vpop.eup %7462  ;;  %7468 = vpow2.f32 %v6283_v6 }
 0xc17   : > { %v5384_v7 = vadd.f32 1.0, %v7463_v43 }
 0xc18   : > { %v7465_v42 = vpop.eup %7464 }
 0xc19   : > { %7470 = vrcp.f32 %v5384_v7  ;;  %v5385_v60 = vadd.f32 1.0, %v7465_v42 }
 0xc1b   : > { %7472 = vrcp.f32 %v5385_v60 }
 0xc1e   : > { %v7467_v8 = vpop.eup %7466 }
 0xc1f   : > { %v5386_v9 = vadd.f32 1.0, %v7467_v8 }
 0xc20   : > { %v7469_v11 = vpop.eup %7468 }
 0xc21   : > { %7474 = vrcp.f32 %v5386_v9  ;;  %v5387_v12 = vadd.f32 1.0, %v7469_v11 }
 0xc23   : > { %v7471_v15 = vpop.eup %7470  ;;  %7476 = vrcp.f32 %v5387_v12 }
 0xc24   : > { %v5396_v4 = vmul.f32 %v7471_v15, %v6377_v14 }
 0xc25   : > { %v7473_v56 = vpop.eup %7472 }
 0xc26   : > { %v5397_v5 = vmul.f32 %v7473_v56, %v6379_v16  ;;  %v5400_v17 = vadd.f32 %v5396_v4, %v8471_v37  ;;  %v6284_v37 = vld [vmem:[#allocation18] ss:$0 sm:$0xff] }
 0xc28   : > { %v5401_v57 = vadd.f32 %v5397_v5, %v8473_v45  ;;  %v5404_v21 = vmul.f32 0.70710677, %v5400_v17 }
 0xc2a   : > { %v5405_v18 = vmul.f32 0.70710677, %v5401_v57 }
 0xc2b   : > { %v7475_v63 = vpop.eup %7474 }
 0xc2c   : > { %v5398_v58 = vmul.f32 %v7475_v63, %v6381_v19  ;;  %v5408_v2 = vpack.c.bf16 %v5405_v18, %v5404_v21 }
 0xc2d   : > { %v7477_v54 = vpop.eup %7476 }
 0xc2e   : > { %v5399_v22 = vmul.f32 %v7477_v54, %v6383_v0  ;;  %6337 = vmatprep.mubr.bf16.mxu0 %v5408_v2  ;;  %v5402_v23 = vadd.f32 %v5398_v58, %v8479_v44 }
 0xc30   : > { %v5403_v25 = vadd.f32 %v5399_v22, %v8481_v61  ;;  %v5406_v24 = vmul.f32 0.70710677, %v5402_v23 }
 0xc32   : > { %v5407_v26 = vmul.f32 0.70710677, %v5403_v25 }
 0xc34   : > { %v5409_v27 = vpack.c.bf16 %v5407_v26, %v5406_v24 }
 0xc36   : > { %6338 = vmatmul.mubr.bf16.vlgmr.msra.gmra.mrb[24].mxu0 %v5409_v27 }
 0xd09   : > { %v6339_v45 = vpop.f32.mrb[24].mxu0 }
 0xd0a   : > { %v5524_v28 = vadd.f32 %v6339_v45, %v6284_v37  ;;  %v5515_v29 = vpop.f32.mrb[25].mxu0 }
 0xd0b   : > { %v5516_v30 = vadd.f32 %v6284_v37, %v5515_v29  ;;  %v6340_v31 = vpop.f32.mrb[26].mxu0 }
 0xd0c   : > { %v6295_v32 = vmul.f32 -1.442695, %v5524_v28  ;;  %v5527_v13 = vadd.f32 %v6340_v31, %v6284_v37  ;;  %v5518_v41 = vpop.f32.mrb[27].mxu0 }
 0xd0d   : > { %v6293_v33 = vmul.f32 -1.442695, %v5516_v30  ;;  %v5519_v20 = vadd.f32 %v6284_v37, %v5518_v41 }
 0xd0e   : > { %7478 = vpow2.f32 %v6295_v32  ;;  %v6296_v51 = vmul.f32 -1.442695, %v5527_v13 }
 0xd0f   : > { %7480 = vpow2.f32 %v6293_v33  ;;  %v6294_v44 = vmul.f32 -1.442695, %v5519_v20 }
 0xd10   : > { %7482 = vpow2.f32 %v6296_v51 }
 0xd11   : > { %7484 = vpow2.f32 %v6294_v44 }
 0xd18   : > { %v7479_v61 = vpop.eup %7478 }
 0xd19   : > { %v7481_v53 = vpop.eup %7480  ;;  %v5544_v62 = vadd.f32 1.0, %v7479_v61 }
 0xd1a   : > { %v7483_v34 = vpop.eup %7482  ;;  %v5542_v59 = vadd.f32 1.0, %v7481_v53 }
 0xd1b   : > { %v7485_v35 = vpop.eup %7484  ;;  %7486 = vrcp.f32 %v5544_v62  ;;  %v5545_v36 = vadd.f32 1.0, %v7483_v34 }
 0xd1c   : > { %7488 = vrcp.f32 %v5542_v59  ;;  %v5543_v46 = vadd.f32 1.0, %v7485_v35 }
 0xd1d   : > { %7490 = vrcp.f32 %v5545_v36 }
 0xd1e   : > { %7492 = vrcp.f32 %v5543_v46 }
 0xd25   : > { %v7487_v47 = vpop.eup %7486 }
 0xd26   : > { %v7489_v48 = vpop.eup %7488  ;;  %5556 = vst [vmem:[%s459_s1 + $0x10] sm:$0xff] %v7487_v47 }
 0xd27   : > { %v7491_v49 = vpop.eup %7490  ;;  %5554 = vst [vmem:[%s459_s1] sm:$0xff] %v7489_v48 }
 0xd28   : > { %v7493_v52 = vpop.eup %7492  ;;  %5557 = vst [vmem:[%s459_s1 + $0x18] sm:$0xff] %v7491_v49 }
 0xd29   : > { %5555 = vst [vmem:[%s459_s1 + $0x8] sm:$0xff] %v7493_v52 }
 0xd2a   : > { %7761 = shalt.err (!%p7758_p9)
}
 0xd2b   : > { %s7762_s22 = scalar_lea.hbm %s8536_s28, 512  ;;  %s7766_s1 = scalar_lea.hbm %s8621_s24, 1024 }
 0xd2c   : > { %p7763_p4 = scmp.ne.s32.totalorder %s8536_s28, %s7762_s22  ;;  %p7767_p2 = scmp.lt.u32.totalorder %s8536_s28, %s8621_s24 }
 0xd2d   : > { %p7768_p6 = scmp.lt.u32.totalorder %s7766_s1, %s7762_s22  ;;  %p7770_p10 = scmp.lt.u32.totalorder %s7762_s22, %s8536_s28 }
 0xd2e   : > { %p7764_p8 = pnand %p7763_p4, %p8622_p1 }
 0xd2f   : > { %p7769_p5 = por %p7768_p6, %p7767_p2 }
 0xd30   : > { %p7765_p0 = pneg %p7764_p8 }
 0xd31   : > { %p7771_p11 = por %p7770_p10, %p7769_p5 }
 0xd33   : > { %p7772_p12 = pnand %p7771_p11, %p7765_p0 }
 0xd35   : > { %7775 = shalt.err (!%p7772_p12)
}
 0xd36   : > { %s7853_s29 = smov 128   ;;  %s7854_s13 = smov 8  }
 0xd37   : > { %6507 = dma.vmem_to_hbm [thread:$0]  (%p8622_p1), %s8538_s23, 512, %s8536_s28, %s5559_s15, %s7853_s29, %s7853_s29, %s7854_s13  }
 0xd38 PF: > { %s5587_s14 = sand.u32 1, %s7818_s30   ;;  %p8623_p13 = scmp.ne.s32.totalorder %s8610_s26, 0 }
 0xd39   : > { %p8624_p3 = scmp.ge.s32.totalorder %s7830_s12, 2  ;;  %s5588_s9 = scalar_lea.sflag [#allocation6], %s5587_s14 }
 0xd3b   : > { %p6539_p7 = pnand %p8624_p3, %p8623_p13 }
 0xd3d   : > { %7813 = dma.done.wait (!%p6539_p7), %s5588_s9, 512  }
 0xd3e   : > { %7815 = vsyncadd (!%p6539_p7), %s5588_s9, 4294966784  ;;  %p26_p9 = scmp.ge.s32.totalorder %s8119_s19, 4   ;;  %s8625_s30 = smov %s7822_s10 }
 0xd3f   : > { %s8626_s10 = smov %s7826_s11  ;;  %s8627_s11 = smov %s8130_s21 }
 0xd40   : > { %s8628_s12 = smov %s8119_s19  ;;  %28 = sbr.rel (!%p26_p9) target bundleno = 12 (0xc), region = 148 }
 0xd47   :  { %5593 = vsyncpa [#allocation5], 1 }
 0xd48   :  { %5595 = vsyncpa [#allocation5 + $0x1], 1 }
 0xd49   :  { %5596 = vsyncpa [#allocation8], 1 }
 0xd4a   :  { %5597 = vsyncpa [#allocation11], 1 }
 0xd4b   :  { %5598 = vsyncpa [#allocation14], 1 }
 0xd4c   :  { %5599 = vsyncpa [#allocation17], 1 }
 0xd4d   :  { %5600 = vsyncpa [#allocation6], 1 }
 0xd4e   :  { %5602 = vsyncpa [#allocation6 + $0x1], 1 }

// kernel: tpu_custom_call.1
= control target key start
LH: loop header
LB: loop body
LE: loop exit
PB: predicated region body
PF: predicated region fallthrough
CT: control target
= control target key end

     0   :  { %s9096_s0 = inlined_call_operand.hbm [shape: f32[2,8,16], index: 0, kind: input, shape index: {}]   ;;  %s9097_s1 = inlined_call_operand.hbm [shape: bf16[16,128], index: 1, kind: input, shape index: {}]   ;;  %s9098_s2 = inlined_call_operand.hbm [shape: f32[1,128], index: 2, kind: input, shape index: {}]   ;;  %s9099_s3 = inlined_call_operand.hbm [shape: bf16[2,128,256], index: 3, kind: input, shape index: {}]   ;;  %s9100_s4 = inlined_call_operand.hbm [shape: f32[2,1,128], index: 4, kind: input, shape index: {}]   ;;  %s9101_s5 = inlined_call_operand.hbm [shape: bf16[6,640,256], index: 5, kind: input, shape index: {}]   ;;  %s9102_s6 = inlined_call_operand.hbm [shape: f32[6,1,256], index: 6, kind: input, shape index: {}]   ;;  %s9103_s7 = inlined_call_operand.hbm [shape: bf16[128,128], index: 7, kind: input, shape index: {}]   ;;  %s9104_s8 = inlined_call_operand.hbm [shape: f32[1,128], index: 8, kind: input, shape index: {}]   ;;  %s9105_s9 = inlined_call_operand.hbm [shape: f32[2,32,128], index: 9, kind: output, shape index: {}]  }
   0x1   :  { %9112 = sst [smem:[#allocation26_spill]] %s9097_s1 }
   0x2   :  { %9113 = sst [smem:[#allocation27_spill]] %s9105_s9 }
   0x3   :  { %14 = vsyncpa [#allocation5], 0 }
   0x4   :  { %16 = vsyncpa [#allocation5 + $0x1], 0 }
   0x5   :  { %17 = vsyncpa [#allocation8], 0 }
   0x6   :  { %18 = vsyncpa [#allocation11], 0 }
   0x7   :  { %19 = vsyncpa [#allocation14], 0 }
   0x8   :  { %20 = vsyncpa [#allocation17], 0 }
   0x9   :  { %21 = vsyncpa [#allocation6], 0 }
   0xa   :  { %23 = vsyncpa [#allocation6 + $0x1], 0  ;;  %s8358_s30 = smov 0   ;;  %s8360_s10 = smov 0  }
   0xb   :  { %s8362_s11 = smov 0   ;;  %s8364_s12 = smov 0  }
   0xc LB: > { %s8285_s13 = smov [#allocation7]   ;;  %s8379_s15 = sadd.s32 4294967295, %s8283_s12   ;;  %s8283_s12 = sphi %s8364_s12, %s9142_s12   ;;  %s8279_s11 = sphi %s8362_s11, %s9141_s11   ;;  %s8275_s10 = sphi %s8360_s10, %s9140_s10   ;;  %s8271_s30 = sphi %s8358_s30, %s9139_s30  }
   0xd   : > { %s266_s14 = sshll.u32 %s8285_s13, 4  ;;  %p6093_p0 = scmp.ge.s32.totalorder %s8283_s12, 1  ;;  %s8384_s14 = int_to_ptr.vmem [resolvable:$true] %s266_s14 }
   0xe   : > { %p9108_p1 = scmp.eq.s32.totalorder %s8379_s15, 0  ;;  %p254_p2 = scmp.lt.s32.totalorder %s8283_s12, 3 }
   0xf   : > { %s8286_s17 = smov [#allocation10]   ;;  %s8287_s20 = smov [#allocation13]  }
  0x10   : > { %p8386_p3 = pnand %p6093_p0, %p254_p2  ;;  %s290_s18 = sshll.u32 %s8286_s17, 4  ;;  %s8399_s18 = int_to_ptr.vmem [resolvable:$true] %s290_s18 }
  0x11   : > { %s8401_s21 = sshll.u32 %s8287_s20, 4  ;;  %s9116_s1 = sld [smem:[#allocation26_spill]]  ;;  %s317_s21 = int_to_ptr.vmem [resolvable:$true] %s8401_s21 }
  0x12   : > { %s9114_s16 = scalar_select %p8386_p3, 1, 0 }
  0x13   : > { %p6962_p5 = pneg %p8386_p3 }
  0x15   : > { %p8395_p6 = pnand %p6962_p5, %p9108_p1 }
  0x17   : > { %s7947_s24 = scalar_lea.hbm %s9116_s1, 128  ;;  %p8411_p8 = pneg %p8395_p6 }
  0x18   : > { %p7948_p7 = scmp.ne.s32.totalorder %s9116_s1, %s7947_s24  ;;  %p7954_p11 = scmp.lt.u32.totalorder %s7947_s24, %s9116_s1 }
  0x1a   : > { %p7950_p9 = pnand %p8411_p8, %p7948_p7 }
  0x1c   : > { %p7951_p10 = pneg %p7950_p9 }
  0x1e   : > { %p7956_p12 = pnand %p7954_p11, %p7951_p10 }
  0x20   : > { %7959 = shalt.err (!%p7956_p12)
}
  0x21   : > { %s7960_s13 = scalar_lea.vmem %s8384_s14, 128  ;;  %p7968_p5 = scmp.lt.s32.totalorder %s8384_s14, %s8384_s14 }
  0x22   : > { %p7961_p13 = scmp.ne.s32.totalorder %s8384_s14, %s7960_s13  ;;  %p7969_p4 = scmp.lt.s32.totalorder %s7960_s13, %s7960_s13 }
  0x24   : > { %p7963_p0 = pnand %p7961_p13, %p8411_p8  ;;  %p7970_p7 = por %p7969_p4, %p7968_p5 }
  0x26   : > { %p7964_p2 = pneg %p7963_p0 }
  0x28   : > { %p7971_p9 = pnand %p7970_p7, %p7964_p2 }
  0x2a   : > { %7974 = shalt.err (!%p7971_p9)
}
  0x2b   : > { %s9107_s17 = smov 64   ;;  %s9110_s20 = smov 4  }
  0x2c   : > { %6965 = dma.hbm_to_vmem [thread:$0]  (!%p8395_p6), %s9116_s1, 128, %s8384_s14, [#allocation8], %s9107_s17, %s9107_s17, %s9110_s20  }
  0x2d   : > { %s7975_s26 = scalar_lea.hbm %s9099_s3, 4096 }
  0x2e   : > { %p7976_p4 = scmp.ne.s32.totalorder %s9099_s3, %s7975_s26  ;;  %p7982_p12 = scmp.lt.u32.totalorder %s7975_s26, %s9099_s3 }
  0x30   : > { %p7978_p10 = pnand %p7976_p4, %p8411_p8 }
  0x32   : > { %p7979_p11 = pneg %p7978_p10 }
  0x34   : > { %p7984_p13 = pnand %p7982_p12, %p7979_p11 }
  0x36   : > { %7987 = shalt.err (!%p7984_p13)
}
  0x37   : > { %s7988_s14 = scalar_lea.vmem %s8399_s18, 4096  ;;  %p7996_p7 = scmp.lt.s32.totalorder %s8399_s18, %s8399_s18 }
  0x38   : > { %p7989_p0 = scmp.ne.s32.totalorder %s8399_s18, %s7988_s14  ;;  %p7997_p9 = scmp.lt.s32.totalorder %s7988_s14, %s7988_s14 }
  0x3a   : > { %p7991_p2 = pnand %p7989_p0, %p8411_p8  ;;  %p7998_p4 = por %p7997_p9, %p7996_p7 }
  0x3c   : > { %p7992_p5 = pneg %p7991_p2 }
  0x3e   : > { %p7999_p10 = pnand %p7998_p4, %p7992_p5 }
  0x40   : > { %8002 = shalt.err (!%p7999_p10)
}
  0x41   : > { %s8290_s22 = smov 128   ;;  %s8291_s9 = smov 8  }
  0x42   : > { %6971 = dma.hbm_to_vmem [thread:$0]  (!%p8395_p6), %s9099_s3, 4096, %s8399_s18, [#allocation11], %s8290_s22, %s8290_s22, %s8291_s9  }
  0x43   : > { %s8003_s28 = scalar_lea.hbm %s9101_s5, 61440 }
  0x44   : > { %p8004_p11 = scmp.ne.s32.totalorder %s9101_s5, %s8003_s28  ;;  %p8010_p0 = scmp.lt.u32.totalorder %s8003_s28, %s9101_s5 }
  0x46   : > { %p8006_p12 = pnand %p8004_p11, %p8411_p8 }
  0x48   : > { %p8007_p13 = pneg %p8006_p12 }
  0x4a   : > { %p8012_p2 = pnand %p8010_p0, %p8007_p13 }
  0x4c   : > { %8015 = shalt.err (!%p8012_p2)
}
  0x4d   : > { %s8016_s23 = scalar_lea.vmem %s317_s21, 61440  ;;  %p8024_p4 = scmp.lt.s32.totalorder %s317_s21, %s317_s21 }
  0x4e   : > { %p8017_p5 = scmp.ne.s32.totalorder %s317_s21, %s8016_s23  ;;  %p8025_p10 = scmp.lt.s32.totalorder %s8016_s23, %s8016_s23 }
  0x50   : > { %p8019_p7 = pnand %p8017_p5, %p8411_p8  ;;  %p8026_p1 = por %p8025_p10, %p8024_p4 }
  0x52   : > { %p8020_p9 = pneg %p8019_p7 }
  0x54   : > { %p8027_p3 = pnand %p8026_p1, %p8020_p9 }
  0x56   : > { %8030 = shalt.err (!%p8027_p3)
}
  0x57   : > { %6977 = dma.hbm_to_vmem [thread:$0]  (!%p8395_p6), %s9101_s5, 61440, %s317_s21, [#allocation14], %s8290_s22, %s8290_s22, %s8291_s9  }
  0x58   : > { %s8292_s17 = smov [#allocation16]   ;;  %s8293_s26 = smov [#allocation9]  }
  0x59   : > { %s342_s25 = sshll.u32 %s8292_s17, 4  ;;  %s280_s28 = sshll.u32 %s8293_s26, 4  ;;  %s343_s25 = int_to_ptr.vmem [resolvable:$true] %s342_s25  ;;  %s281_s28 = int_to_ptr.vmem [resolvable:$true] %s280_s28 }
  0x5a   : > { %s8031_s14 = scalar_lea.hbm %s9103_s7, 1024 }
  0x5b   : > { %p8032_p1 = scmp.ne.s32.totalorder %s9103_s7, %s8031_s14  ;;  %p8038_p12 = scmp.lt.u32.totalorder %s8031_s14, %s9103_s7 }
  0x5d   : > { %p8034_p3 = pnand %p8032_p1, %p8411_p8 }
  0x5f   : > { %p8035_p11 = pneg %p8034_p3 }
  0x61   : > { %p8040_p13 = pnand %p8038_p12, %p8035_p11 }
  0x63   : > { %8043 = shalt.err (!%p8040_p13)
}
  0x64   : > { %s8044_s21 = scalar_lea.vmem %s343_s25, 1024  ;;  %p8052_p7 = scmp.lt.s32.totalorder %s343_s25, %s343_s25 }
  0x65   : > { %p8045_p0 = scmp.ne.s32.totalorder %s343_s25, %s8044_s21  ;;  %p8053_p9 = scmp.lt.s32.totalorder %s8044_s21, %s8044_s21 }
  0x67   : > { %p8047_p2 = pnand %p8045_p0, %p8411_p8  ;;  %p8054_p4 = por %p8053_p9, %p8052_p7 }
  0x69   : > { %p8048_p5 = pneg %p8047_p2 }
  0x6b   : > { %p8055_p10 = pnand %p8054_p4, %p8048_p5 }
  0x6d   : > { %8058 = shalt.err (!%p8055_p10)
}
  0x6e   : > { %s9118_s20 = smov 4   ;;  %s9119_s22 = smov 64  }
  0x6f   : > { %6983 = dma.hbm_to_vmem [thread:$0]  (!%p8395_p6), %s9103_s7, 1024, %s343_s25, [#allocation17], %s9119_s22, %s9119_s22, %s9118_s20  }
  0x70   : > { %s8059_s26 = scalar_lea.hbm %s9098_s2, 16 }
  0x71   : > { %p8060_p1 = scmp.ne.s32.totalorder %s9098_s2, %s8059_s26  ;;  %p8066_p12 = scmp.lt.u32.totalorder %s8059_s26, %s9098_s2 }
  0x73   : > { %p8062_p3 = pnand %p8060_p1, %p8411_p8 }
  0x75   : > { %p8063_p11 = pneg %p8062_p3 }
  0x77   : > { %p8068_p13 = pnand %p8066_p12, %p8063_p11 }
  0x79   : > { %8071 = shalt.err (!%p8068_p13)
}
  0x7a   : > { %s8072_s18 = scalar_lea.vmem %s281_s28, 16  ;;  %s8079_s25 = scalar_lea.vmem %s281_s28, 32 }
  0x7b   : > { %p8073_p0 = scmp.ne.s32.totalorder %s281_s28, %s8072_s18  ;;  %p8080_p7 = scmp.lt.s32.totalorder %s281_s28, %s281_s28 }
  0x7c   : > { %p8081_p9 = scmp.lt.s32.totalorder %s8079_s25, %s8072_s18 }
  0x7d   : > { %p8075_p2 = pnand %p8073_p0, %p8411_p8 }
  0x7e   : > { %p8082_p4 = por %p8081_p9, %p8080_p7 }
  0x7f   : > { %p8076_p5 = pneg %p8075_p2 }
  0x81   : > { %p8083_p10 = pnand %p8082_p4, %p8076_p5 }
  0x83   : > { %8086 = shalt.err (!%p8083_p10)
}
  0x84   : > { %6968 = dma.hbm_to_vmem [thread:$0]  (!%p8395_p6), %s9098_s2, 16, %s281_s28, [#allocation8]  }
  0x85   : > { %s8294_s22 = smov [#allocation12]   ;;  %s8087_s17 = scalar_lea.hbm %s9100_s4, 32 }
  0x86   : > { %s303_s1 = sshll.u32 %s8294_s22, 4  ;;  %p8088_p1 = scmp.ne.s32.totalorder %s9100_s4, %s8087_s17  ;;  %s304_s1 = int_to_ptr.vmem [resolvable:$true] %s303_s1 }
  0x87   : > { %p8094_p12 = scmp.lt.u32.totalorder %s8087_s17, %s9100_s4 }
  0x88   : > { %p8090_p3 = pnand %p8088_p1, %p8411_p8 }
  0x8a   : > { %p8091_p11 = pneg %p8090_p3 }
  0x8c   : > { %p8096_p13 = pnand %p8094_p12, %p8091_p11 }
  0x8e   : > { %8099 = shalt.err (!%p8096_p13)
}
  0x8f   : > { %s8100_s28 = scalar_lea.vmem %s304_s1, 32  ;;  %p8108_p7 = scmp.lt.s32.totalorder %s304_s1, %s304_s1 }
  0x90   : > { %p8101_p0 = scmp.ne.s32.totalorder %s304_s1, %s8100_s28  ;;  %p8109_p9 = scmp.lt.s32.totalorder %s8100_s28, %s8100_s28 }
  0x92   : > { %p8103_p2 = pnand %p8101_p0, %p8411_p8  ;;  %p8110_p4 = por %p8109_p9, %p8108_p7 }
  0x94   : > { %p8104_p5 = pneg %p8103_p2 }
  0x96   : > { %p8111_p10 = pnand %p8110_p4, %p8104_p5 }
  0x98   : > { %8114 = shalt.err (!%p8111_p10)
}
  0x99   : > { %s8295_s23 = smov 16   ;;  %s8296_s18 = smov 1  }
  0x9a   : > { %6974 = dma.hbm_to_vmem [thread:$0]  (!%p8395_p6), %s9100_s4, 32, %s304_s1, [#allocation11], %s8295_s23, %s8295_s23, %s8296_s18  }
  0x9b   : > { %s8297_s20 = smov [#allocation15]   ;;  %s8115_s17 = scalar_lea.hbm %s9102_s6, 192 }
  0x9c   : > { %s329_s22 = sshll.u32 %s8297_s20, 4  ;;  %p8116_p1 = scmp.ne.s32.totalorder %s9102_s6, %s8115_s17  ;;  %s330_s22 = int_to_ptr.vmem [resolvable:$true] %s329_s22 }
  0x9d   : > { %p8122_p12 = scmp.lt.u32.totalorder %s8115_s17, %s9102_s6 }
  0x9e   : > { %p8118_p3 = pnand %p8116_p1, %p8411_p8 }
  0xa0   : > { %p8119_p11 = pneg %p8118_p3 }
  0xa2   : > { %p8124_p13 = pnand %p8122_p12, %p8119_p11 }
  0xa4   : > { %8127 = shalt.err (!%p8124_p13)
}
  0xa5   : > { %s8128_s1 = scalar_lea.vmem %s330_s22, 192  ;;  %p8136_p7 = scmp.lt.s32.totalorder %s330_s22, %s330_s22 }
  0xa6   : > { %p8129_p0 = scmp.ne.s32.totalorder %s330_s22, %s8128_s1  ;;  %p8137_p9 = scmp.lt.s32.totalorder %s8128_s1, %s8128_s1 }
  0xa8   : > { %p8131_p2 = pnand %p8129_p0, %p8411_p8  ;;  %p8138_p4 = por %p8137_p9, %p8136_p7 }
  0xaa   : > { %p8132_p5 = pneg %p8131_p2 }
  0xac   : > { %p8139_p10 = pnand %p8138_p4, %p8132_p5 }
  0xae   : > { %8142 = shalt.err (!%p8139_p10)
}
  0xaf   : > { %s8298_s28 = smov 32   ;;  %s8299_s23 = smov 2  }
  0xb0   : > { %6980 = dma.hbm_to_vmem [thread:$0]  (!%p8395_p6), %s9102_s6, 192, %s330_s22, [#allocation14], %s8298_s28, %s8298_s28, %s8299_s23  }
  0xb1   : > { %s8300_s21 = smov [#allocation18]   ;;  %s8143_s17 = scalar_lea.hbm %s9104_s8, 16 }
  0xb2   : > { %s356_s20 = sshll.u32 %s8300_s21, 4  ;;  %p8144_p1 = scmp.ne.s32.totalorder %s9104_s8, %s8143_s17  ;;  %s357_s20 = int_to_ptr.vmem [resolvable:$true] %s356_s20 }
  0xb3   : > { %p8150_p12 = scmp.lt.u32.totalorder %s8143_s17, %s9104_s8 }
  0xb4   : > { %p8146_p3 = pnand %p8144_p1, %p8411_p8 }
  0xb6   : > { %p8147_p11 = pneg %p8146_p3 }
  0xb8   : > { %p8152_p13 = pnand %p8150_p12, %p8147_p11 }
  0xba   : > { %8155 = shalt.err (!%p8152_p13)
}
  0xbb   : > { %s8156_s22 = scalar_lea.vmem %s357_s20, 16  ;;  %s8163_s1 = scalar_lea.vmem %s357_s20, 32 }
  0xbc   : > { %p8157_p0 = scmp.ne.s32.totalorder %s357_s20, %s8156_s22  ;;  %p8164_p7 = scmp.lt.s32.totalorder %s357_s20, %s357_s20 }
  0xbd   : > { %p8165_p9 = scmp.lt.s32.totalorder %s8163_s1, %s8156_s22 }
  0xbe   : > { %p8159_p2 = pnand %p8157_p0, %p8411_p8 }
  0xbf   : > { %p8166_p4 = por %p8165_p9, %p8164_p7 }
  0xc0   : > { %p8160_p5 = pneg %p8159_p2 }
  0xc2   : > { %p8167_p10 = pnand %p8166_p4, %p8160_p5 }
  0xc4   : > { %8170 = shalt.err (!%p8167_p10)
}
  0xc5   : > { %6986 = dma.hbm_to_vmem [thread:$0]  (!%p8395_p6), %s9104_s8, 16, %s357_s20, [#allocation17]  }
  0xc6   : > { %s6092_s27 = sadd.s32 4294967294, %s8283_s12   ;;  %s8572_s19 = sadd.s32 1, %s8283_s12  }
  0xc7   : > { %s33_s18 = ssub.s32 %s8283_s12, %s8572_s19  ;;  %s36_s25 = sadd.s32 1, %s8279_s11 }
  0xc8   : > { %p34_p8 = scmp.eq.s32.totalorder %s33_s18, 0  ;;  %p43_p1 = scmp.ne.s32.totalorder %s8279_s11, %s8275_s10 }
  0xc9   : > { %p44_p3 = scmp.eq.s32.totalorder %s8283_s12, 0  ;;  %p49_p11 = scmp.ne.s32.totalorder %s8275_s10, %s8271_s30 }
  0xca   : > { %s8583_s21 = scalar_select %p34_p8, %s8279_s11, %s36_s25  }
  0xcb   : > { %p8585_p12 = por %p44_p3, %p43_p1  ;;  %p9121_p13 = scmp.eq.s32.totalorder %s8379_s15, 0 }
  0xcc   : > { %p241_p0 = scmp.eq.s32.totalorder %s8379_s15, 1  ;;  %p247_p2 = scmp.eq.s32.totalorder %s6092_s27, 1 }
  0xcd   : > { %p8591_p6 = por %p9121_p13, %p49_p11  ;;  %p7003_p5 = scmp.lt.s32.totalorder %s8283_s12, 2 }
  0xce   : > { %s367_s24 = sand.u32 1, %s8279_s11   ;;  %p8598_p7 = por %p241_p0, %p43_p1 }
  0xcf   : > { %p8602_p9 = por %p247_p2, %p49_p11  ;;  %s6103_s29 = sshll.u32 %s367_s24, 3 }
  0xd0   : > { %s9123_s17 = scalar_select %p8598_p7, 1, 0 }
  0xd1   : > { %s9124_s26 = scalar_select %p8602_p9, 1, 0 }
  0xd2   : > { %s6104_s13 = sshll.u32 %s8283_s12, 7  ;;  %s371_s28 = scalar_lea.vmem [#allocation4], %s6103_s29 }
  0xd3   : > { %s8610_s1 = scalar_lea.hbm %s9096_s0, %s6104_s13  ;;  %s378_s23 = sshll.u32 %s371_s28, 4  ;;  %s8612_s23 = int_to_ptr.vmem [resolvable:$true] %s378_s23 }
  0xd4   : > { %p8616_p4 = pnand %p7003_p5, %p8585_p12  ;;  %s368_s18 = scalar_lea.sflag [#allocation5], %s367_s24 }
  0xd5   : > { %s8171_s25 = scalar_lea.hbm %s8610_s1, 128  ;;  %s8176_s14 = scalar_lea.hbm %s9096_s0, 256 }
  0xd6   : > { %p8172_p10 = scmp.ne.s32.totalorder %s8610_s1, %s8171_s25  ;;  %p8173_p8 = pneg %p8616_p4 }
  0xd7   : > { %p8177_p11 = scmp.lt.u32.totalorder %s8610_s1, %s9096_s0  ;;  %p8178_p12 = scmp.lt.u32.totalorder %s8176_s14, %s8171_s25 }
  0xd8   : > { %p8174_p1 = pnand %p8173_p8, %p8172_p10  ;;  %p8180_p0 = scmp.lt.u32.totalorder %s8171_s25, %s8610_s1 }
  0xd9   : > { %p8179_p13 = por %p8178_p12, %p8177_p11 }
  0xda   : > { %p8175_p3 = pneg %p8174_p1 }
  0xdb   : > { %p8181_p2 = por %p8180_p0, %p8179_p13 }
  0xdd   : > { %p8182_p5 = pnand %p8181_p2, %p8175_p3 }
  0xdf   : > { %8185 = shalt.err (!%p8182_p5)
}
  0xe0   : > { %s8186_s24 = scalar_lea.vmem %s8612_s23, 128  ;;  %s8301_s28 = smov [#allocation4]  }
  0xe1   : > { %p8187_p10 = scmp.ne.s32.totalorder %s8612_s23, %s8186_s24  ;;  %s8191_s29 = sshll.u32 %s8301_s28, 4  ;;  %s8192_s29 = int_to_ptr.vmem [resolvable:$false] %s8191_s29 }
  0xe2   : > { %s8193_s13 = scalar_lea.vmem %s8192_s29, 256  ;;  %p8194_p7 = scmp.lt.s32.totalorder %s8612_s23, %s8192_s29 }
  0xe3   : > { %p8189_p1 = pnand %p8187_p10, %p8173_p8  ;;  %p8195_p11 = scmp.lt.s32.totalorder %s8193_s13, %s8186_s24 }
  0xe5   : > { %p8190_p9 = pneg %p8189_p1  ;;  %p8196_p12 = por %p8195_p11, %p8194_p7 }
  0xe7   : > { %p8197_p13 = pnand %p8196_p12, %p8190_p9 }
  0xe9   : > { %8200 = shalt.err (!%p8197_p13)
}
  0xea   : > { %6990 = dma.hbm_to_vmem [thread:$0]  (!%p8616_p4), %s8610_s1, 128, %s8612_s23, %s368_s18  }
  0xeb   : > { %p9126_p3 = scmp.ne.s32.totalorder %s9114_s16, 0 }
  0xec   : > { %s8648_s25 = sand.u32 (!%p9126_p3), 1, %s8275_s10  }
  0xed   : > { %387 = sbr.rel (%p9126_p3) target bundleno = 3814 (0xee6), region = 56  ;;  %s6106_s14 = sshll.u32 (!%p9126_p3), %s8648_s25, 3 }
  0xee   : > { %s390_s9 = scalar_lea.sflag (!%p9126_p3), [#allocation5], %s8648_s25  ;;  %s393_s22 = scalar_lea.vmem (!%p9126_p3), [#allocation4], %s6106_s14 }
  0xf4   : > { %8246 = dma.done.wait (%p8591_p6), %s390_s9, 128  }
  0xf5   : > { %8248 = vsyncadd (%p8591_p6), %s390_s9, 4294967168  ;;  %p9127_p7 = scmp.eq.s32.totalorder %s8379_s15, 0 }
  0xf7   : > { %8250 = dma.done.wait (%p9127_p7), [#allocation8], 144   ;;  %p9128_p9 = pmov %p9127_p7 }
  0xf8   : > { %p9129_p4 = pmov %p9127_p7 }
  0xf9   : > { %8252 = vsyncadd (%p9128_p9), [#allocation8], 4294967152 }
  0xfa   : > { %8254 = dma.done.wait (%p9129_p4), [#allocation11], 4128   ;;  %p9130_p8 = pmov %p9129_p4 }
  0xfb   : > { %p9131_p0 = pmov %p9129_p4 }
  0xfc   : > { %8256 = vsyncadd (%p9130_p8), [#allocation11], 4294963168 }
  0xfd   : > { %8258 = dma.done.wait (%p9131_p0), [#allocation14], 61632   ;;  %p9132_p2 = pmov %p9131_p0 }
  0xfe   : > { %p9133_p6 = pmov %p9131_p0 }
  0xff   : > { %8260 = vsyncadd (%p9132_p2), [#allocation14], 4294905664 }
 0x100   : > { %8262 = dma.done.wait (%p9133_p6), [#allocation17], 1040   ;;  %p9134_p5 = pmov %p9131_p0 }
 0x101   : > { %v8302_v0 = vmov 0.0   ;;  %vm8303_vm0 = vmmov 0   ;;  %v7066_v1 = vld [vmem:[#allocation7] sm:$0xff]   ;;  %v464_v2 = vld [vmem:[%s393_s22] sm:$0xff]  ;;  %vm481_vm1 = vcmask 130048   ;;  %v8304_v20 = vmov 0  }
 0x102   : > { %8264 = vsyncadd (%p9134_p5), [#allocation17], 4294966256  ;;  %6724 = vmatprep.subr.bf16.mxu1 %v8302_v0  ;;  %6726 = vmatprep.mubr.msk.bf16.mxu1 %vm8303_vm0, %v8302_v0  ;;  %v465_v3 = vpack.c.bf16 %v464_v2, %v464_v2  ;;  %v7067_v4 = vld [vmem:[#allocation10 + $0x4] ss:$8 sps:$4 sm:$0xff]   ;;  %v7069_v5 = vld [vmem:[#allocation10] ss:$8 sps:$4 sm:$0xff]   ;;  %v672_v28 = vlaneseq }
 0x103   : > { %6725 = vmatpush3.bf16.msra.mxu1 %v7066_v1  ;;  %v7070_v6 = vld [vmem:[#allocation10 + $0x14] ss:$8 sps:$4 sm:$0xff]   ;;  %622 = vmatprep.subr.bf16.mxu0 %v7067_v4  ;;  %v7072_v7 = vld [vmem:[#allocation10 + $0x10] ss:$8 sps:$4 sm:$0xff]   ;;  %v7073_v8 = vld [vmem:[#allocation10 + $0x24] ss:$8 sps:$4 sm:$0xff]  }
 0x104   : > { %623 = vmatpush1.bf16.msra.mxu0 %v7069_v5  ;;  %v7075_v9 = vld [vmem:[#allocation10 + $0x20] ss:$8 sps:$4 sm:$0xff]   ;;  %v7076_v10 = vld [vmem:[#allocation10 + $0x34] ss:$8 sps:$4 sm:$0xff]   ;;  %v7078_v11 = vld [vmem:[#allocation10 + $0x30] ss:$8 sps:$4 sm:$0xff]   ;;  %654 = vmatprep.mubr.bf16.mxu0 %v8304_v20 }
 0x105   : > { %624 = vmatprep.subr.bf16.mxu0 %v7070_v6  ;;  %v7079_v12 = vld [vmem:[#allocation10 + $0x44] ss:$8 sps:$4 sm:$0xff]   ;;  %v7081_v13 = vld [vmem:[#allocation10 + $0x40] ss:$8 sps:$4 sm:$0xff]   ;;  %v7082_v14 = vld [vmem:[#allocation10 + $0x54] ss:$8 sps:$4 sm:$0xff]  }
 0x106   : > { %6727 = vmatmul.mubr.msk.bf16.vlgmr.msra.gmra.mrb[0].mxu1 %vm481_vm1, %v465_v3  ;;  %v7084_v15 = vld [vmem:[#allocation10 + $0x50] ss:$8 sps:$4 sm:$0xff]   ;;  %v7085_v16 = vld [vmem:[#allocation10 + $0x64] ss:$8 sps:$4 sm:$0xff]   ;;  %v7087_v17 = vld [vmem:[#allocation10 + $0x60] ss:$8 sps:$4 sm:$0xff]  }
 0x107   : > { %v7088_v18 = vld [vmem:[#allocation10 + $0x74] ss:$8 sps:$4 sm:$0xff]   ;;  %v7090_v19 = vld [vmem:[#allocation10 + $0x70] ss:$8 sps:$4 sm:$0xff]   ;;  %461 = vst [vmem:[#allocation2] sm:$0x1] %v8304_v20 }
 0x108   : > { %625 = vmatpush1.bf16.msra.mxu0 %v7072_v7  ;;  %462 = vst [vmem:[#allocation2 + $0x8] sm:$0x2] %v8304_v20  ;;  %463 = vst [vmem:[#allocation2 + $0x10] sm:$0x2] %v8304_v20  ;;  %v6116_v21 = vld [vmem:[#allocation9] ss:$0 sm:$0xff] }
 0x109   : > { %626 = vmatprep.subr.bf16.mxu0 %v7073_v8  ;;  %v676_v29 = vand.u32 127, %v672_v28  ;;  %v8679_v30 = vshrl.u32 %v672_v28, 7  ;;  %vm691_vm4 = vcmask 64512   ;;  %v6135_v36 = vld [vmem:[#allocation12] ss:$0 sm:$0xff]  ;;  %vm881_vm9 = vcmask 1046528  }
 0x10a   : > { %v7093_v43 = vld [vmem:[#allocation13 + $0x4] ss:$8 sps:$4 sm:$0xff]   ;;  %v7091_v46 = vld [vmem:[#allocation13] ss:$8 sps:$4 sm:$0xff]   ;;  %v7096_v47 = vld [vmem:[#allocation13 + $0x14] ss:$8 sps:$4 sm:$0xff]  }
 0x10b   : > { %v8681_v31 = vmul.u32 2, %v676_v29  ;;  %v674_v35 = vadd.s32 8, %v8679_v30  ;;  %v7094_v48 = vld [vmem:[#allocation13 + $0x10] ss:$8 sps:$4 sm:$0xff]   ;;  %v7099_v49 = vld [vmem:[#allocation13 + $0x24] ss:$8 sps:$4 sm:$0xff]  }
 0x10c   : > { %627 = vmatpush1.bf16.msra.mxu0 %v7075_v9  ;;  %v7097_v50 = vld [vmem:[#allocation13 + $0x20] ss:$8 sps:$4 sm:$0xff]   ;;  %v7102_v51 = vld [vmem:[#allocation13 + $0x34] ss:$8 sps:$4 sm:$0xff]   ;;  %v7100_v52 = vld [vmem:[#allocation13 + $0x30] ss:$8 sps:$4 sm:$0xff]  }
 0x10d   : > { %628 = vmatprep.subr.bf16.mxu0 %v7076_v10  ;;  %v8684_v32 = vadd.s32 1, %v8681_v31  ;;  %vm678_vm2 = vcmp.eq.s32.totalorder %v8679_v30, %v8681_v31  ;;  %vm679_vm5 = vcmp.eq.s32.totalorder %v674_v35, %v8681_v31  ;;  %v7105_v53 = vld [vmem:[#allocation13 + $0x44] ss:$8 sps:$4 sm:$0xff]   ;;  %v7103_v54 = vld [vmem:[#allocation13 + $0x40] ss:$8 sps:$4 sm:$0xff]   ;;  %vm907_vm10 = vcmask 1045504  }
 0x10e   : > { %v8691_v33 = vsel %vm678_vm2, 1.0, %v8302_v0  ;;  %v8704_v42 = vsel %vm679_vm5, 1.0, %v8302_v0  ;;  %v7108_v55 = vld [vmem:[#allocation13 + $0x54] ss:$8 sps:$4 sm:$0xff]   ;;  %v7106_v56 = vld [vmem:[#allocation13 + $0x50] ss:$8 sps:$4 sm:$0xff]  }
 0x10f   : > { %vm685_vm3 = vcmp.eq.s32.totalorder %v8679_v30, %v8684_v32  ;;  %vm686_vm6 = vcmp.eq.s32.totalorder %v674_v35, %v8684_v32  ;;  %v7111_v57 = vld [vmem:[#allocation13 + $0x64] ss:$8 sps:$4 sm:$0xff]   ;;  %v7109_v58 = vld [vmem:[#allocation13 + $0x60] ss:$8 sps:$4 sm:$0xff]   ;;  %v7114_v59 = vld [vmem:[#allocation13 + $0x74] ss:$8 sps:$4 sm:$0xff]  }
 0x110   : > { %629 = vmatpush1.bf16.msra.mxu0 %v7078_v11  ;;  %v8694_v34 = vsel %vm685_vm3, 1.0, %v8302_v0  ;;  %v8707_v45 = vsel %vm686_vm6, 1.0, %v8302_v0  ;;  %v7112_v60 = vld [vmem:[#allocation13 + $0x70] ss:$8 sps:$4 sm:$0xff]   ;;  %v7117_v61 = vld [vmem:[#allocation13 + $0x84] ss:$8 sps:$4 sm:$0xff]  }
 0x111   : > { %630 = vmatprep.subr.bf16.mxu0 %v7079_v12  ;;  %6732 = vmatprep.mubr.msk.f32.mxu1 %vm691_vm4, %v8694_v34  ;;  %v7115_v62 = vld [vmem:[#allocation13 + $0x80] ss:$8 sps:$4 sm:$0xff]   ;;  %v7120_v63 = vld [vmem:[#allocation13 + $0x94] ss:$8 sps:$4 sm:$0xff]   ;;  %v7118_v1 = vld [vmem:[#allocation13 + $0x90] ss:$8 sps:$4 sm:$0xff]  }
 0x112   : > { %v7123_v2 = vld [vmem:[#allocation13 + $0xa4] ss:$8 sps:$4 sm:$0xff]   ;;  %v7121_v3 = vld [vmem:[#allocation13 + $0xa0] ss:$8 sps:$4 sm:$0xff]   ;;  %v7126_v4 = vld [vmem:[#allocation13 + $0xb4] ss:$8 sps:$4 sm:$0xff]  }
 0x113   : > { %v7124_v5 = vld [vmem:[#allocation13 + $0xb0] ss:$8 sps:$4 sm:$0xff]   ;;  %v7129_v6 = vld [vmem:[#allocation13 + $0xc4] ss:$8 sps:$4 sm:$0xff]   ;;  %v7127_v7 = vld [vmem:[#allocation13 + $0xc0] ss:$8 sps:$4 sm:$0xff]  }
 0x114   : > { %631 = vmatpush1.bf16.msra.mxu0 %v7081_v13  ;;  %v7130_v8 = vld [vmem:[#allocation13 + $0xd0] ss:$8 sps:$4 sm:$0xff]   ;;  %v7132_v9 = vld [vmem:[#allocation13 + $0xd4] ss:$8 sps:$4 sm:$0xff]   ;;  %v7135_v10 = vld [vmem:[#allocation13 + $0xe4] ss:$8 sps:$4 sm:$0xff]  }
 0x115   : > { %632 = vmatprep.subr.bf16.mxu0 %v7082_v14  ;;  %v7133_v11 = vld [vmem:[#allocation13 + $0xe0] ss:$8 sps:$4 sm:$0xff]   ;;  %v7138_v12 = vld [vmem:[#allocation13 + $0xf4] ss:$8 sps:$4 sm:$0xff]   ;;  %v7136_v13 = vld [vmem:[#allocation13 + $0xf0] ss:$8 sps:$4 sm:$0xff]  }
 0x116   : > { %v7141_v14 = vld [vmem:[#allocation13 + $0x104] ss:$8 sps:$4 sm:$0xff]   ;;  %vm865_vm7 = vsmask.f32 7424  ;;  %vm886_vm8 = vsmask.f32 6400 }
 0x117   : > { %vm1912_vm15 = vcmask 1040384   ;;  %s6115_s16 = sshll.u32 %s8648_s25, 5  ;;  %s6693_s20 = sshll.u32 %s8379_s15, 9 }
 0x118   : > { %633 = vmatpush1.bf16.msra.mxu0 %v7084_v15  ;;  %s459_s1 = scalar_lea.vmem [#allocation19], %s6115_s16  ;;  %s9135_s24 = sld [smem:[#allocation27_spill]] }
 0x119   : > { %634 = vmatprep.subr.bf16.mxu0 %v7085_v16  ;;  %s5943_s23 = sshll.u32 %s459_s1, 4  ;;  %s5930_s15 = scalar_lea.sflag [#allocation6], %s8648_s25  ;;  %s9052_s23 = int_to_ptr.vmem [resolvable:$true] %s5943_s23 }
 0x11a   : > { %s8201_s29 = scalar_lea.vmem %s9052_s23, 512  ;;  %p9136_p1 = scmp.ne.s32.totalorder %s9123_s17, 0 }
 0x11b   : > { %p8202_p10 = scmp.ne.s32.totalorder %s9052_s23, %s8201_s29  ;;  %s8305_s13 = smov [#allocation19]  }
 0x11c   : > { %635 = vmatpush1.bf16.msra.mxu0 %v7087_v17  ;;  %s8205_s14 = sshll.u32 %s8305_s13, 4  ;;  %s8206_s14 = int_to_ptr.vmem [resolvable:$false] %s8205_s14 }
 0x11d   : > { %636 = vmatprep.subr.bf16.mxu0 %v7088_v18  ;;  %p8203_p11 = pnand %p8202_p10, %p9136_p1  ;;  %s8207_s9 = scalar_lea.vmem %s8206_s14, 1024 }
 0x11e   : > { %s9050_s28 = scalar_lea.hbm %s9135_s24, %s6693_s20  ;;  %p8208_p13 = scmp.lt.s32.totalorder %s9052_s23, %s8206_s14 }
 0x11f   : > { %p8204_p12 = pneg %p8203_p11  ;;  %p8209_p3 = scmp.lt.s32.totalorder %s8207_s9, %s8201_s29 }
 0x120   : > { %637 = vmatpush1.bf16.msra.mxu0 %v7090_v19 }
 0x121   : > { %p8210_p7 = por %p8209_p3, %p8208_p13 }
 0x123   : > { %p8211_p9 = pnand %p8210_p7, %p8204_p12 }
 0x1d9   : > { %v519_v22 = vpop.f32.mrb[0].mxu1 }
 0x1da   : > { %v520_v23 = vadd.f32 %v6116_v21, %v519_v22  ;;  %v6728_v24 = vpop.f32.mrb[1].mxu1 }
 0x1db   : > { %v522_v25 = vpop.f32.mrb[2].mxu1 }
 0x1dc   : > { %v525_v26 = vpack.c.bf16 %v520_v23, %v520_v23  ;;  %v6729_v27 = vpop.f32.mrb[3].mxu1 }
 0x1de   : > { %655 = vmatmul.mubr.bf16.vlgmr.msra.gmra.mrb[0].mxu0 %v525_v26 }
 0x1df   : > { %6737 = vmatprep.mubr.msk.f32.mxu0 %vm691_vm4, %v8691_v33 }
 0x2b1   : > { %v656_v37 = vpop.f32.mrb[0].mxu0 }
 0x2b2   : > { %v670_v38 = vadd.f32 %v6135_v36, %v656_v37  ;;  %v658_v39 = vpop.f32.mrb[1].mxu0 }
 0x2b3   : > { %v671_v40 = vadd.f32 %v6135_v36, %v658_v39  ;;  %v660_v41 = vpop.f32.mrb[2].mxu0 }
 0x2b4   : > { %v661_v44 = vpop.f32.mrb[3].mxu0  ;;  %6735 = vmatprep.subr.mxu0 %v670_v38 }
 0x2b5   : > { %6730 = vmatprep.subr.mxu1 %v671_v40  ;;  %6736 = vmatpush3.msra.mxu0 %v670_v38 }
 0x2b6   : > { %6731 = vmatpush3.msra.mxu1 %v671_v40  ;;  %6738 = vmatmul.mubr.msk.f32.vlgmr.msra.gmra.mrb[4].mxu0 %vm691_vm4, %v8704_v42 }
 0x2b7   : > { %6733 = vmatmul.mubr.msk.f32.vlgmr.msra.gmra.mrb[4].mxu1 %vm691_vm4, %v8707_v45  ;;  %1404 = vmatprep.subr.bf16.mxu0 %v7093_v43 }
 0x2b8   : > { %1405 = vmatpush1.bf16.msra.mxu0 %v7091_v46  ;;  %1681 = vmatprep.mubr.bf16.mxu1 %v8304_v20 }
 0x2b9   : > { %1406 = vmatprep.subr.bf16.mxu0 %v7096_v47 }
 0x2bc   : > { %1407 = vmatpush1.bf16.msra.mxu0 %v7094_v48 }
 0x2bd   : > { %1408 = vmatprep.subr.bf16.mxu0 %v7099_v49  ;;  %v7139_v49 = vld [vmem:[#allocation13 + $0x100] ss:$8 sps:$4 sm:$0xff]  }
 0x2c0   : > { %1409 = vmatpush1.bf16.msra.mxu0 %v7097_v50 }
 0x2c1   : > { %1410 = vmatprep.subr.bf16.mxu0 %v7102_v51 }
 0x2c4   : > { %1411 = vmatpush1.bf16.msra.mxu0 %v7100_v52 }
 0x2c5   : > { %1412 = vmatprep.subr.bf16.mxu0 %v7105_v53  ;;  %v7144_v53 = vld [vmem:[#allocation13 + $0x114] ss:$8 sps:$4 sm:$0xff]  }
 0x2c8   : > { %1413 = vmatpush1.bf16.msra.mxu0 %v7103_v54 }
 0x2c9   : > { %1414 = vmatprep.subr.bf16.mxu0 %v7108_v55  ;;  %v7142_v55 = vld [vmem:[#allocation13 + $0x110] ss:$8 sps:$4 sm:$0xff]  }
 0x2cc   : > { %1415 = vmatpush1.bf16.msra.mxu0 %v7106_v56  ;;  %v7147_v56 = vld [vmem:[#allocation13 + $0x124] ss:$8 sps:$4 sm:$0xff]  }
 0x2cd   : > { %1416 = vmatprep.subr.bf16.mxu0 %v7111_v57  ;;  %v7145_v57 = vld [vmem:[#allocation13 + $0x120] ss:$8 sps:$4 sm:$0xff]  }
 0x2d0   : > { %1417 = vmatpush1.bf16.msra.mxu0 %v7109_v58  ;;  %v7150_v58 = vld [vmem:[#allocation13 + $0x134] ss:$8 sps:$4 sm:$0xff]  }
 0x2d1   : > { %1418 = vmatprep.subr.bf16.mxu0 %v7114_v59  ;;  %v7148_v59 = vld [vmem:[#allocation13 + $0x130] ss:$8 sps:$4 sm:$0xff]  }
 0x2d4   : > { %1419 = vmatpush1.bf16.msra.mxu0 %v7112_v60  ;;  %v7153_v60 = vld [vmem:[#allocation13 + $0x144] ss:$8 sps:$4 sm:$0xff]  }
 0x2d5   : > { %1420 = vmatprep.subr.bf16.mxu0 %v7117_v61  ;;  %v7151_v61 = vld [vmem:[#allocation13 + $0x140] ss:$8 sps:$4 sm:$0xff]  }
 0x2d8   : > { %1421 = vmatpush1.bf16.msra.mxu0 %v7115_v62  ;;  %v7156_v62 = vld [vmem:[#allocation13 + $0x154] ss:$8 sps:$4 sm:$0xff]  }
 0x2d9   : > { %1422 = vmatprep.subr.bf16.mxu0 %v7120_v63  ;;  %v7154_v63 = vld [vmem:[#allocation13 + $0x150] ss:$8 sps:$4 sm:$0xff]  }
 0x2dc   : > { %1423 = vmatpush1.bf16.msra.mxu0 %v7118_v1  ;;  %v7159_v1 = vld [vmem:[#allocation13 + $0x164] ss:$8 sps:$4 sm:$0xff]  }
 0x2dd   : > { %1424 = vmatprep.subr.bf16.mxu0 %v7123_v2  ;;  %v7157_v2 = vld [vmem:[#allocation13 + $0x160] ss:$8 sps:$4 sm:$0xff]  }
 0x2e0   : > { %1425 = vmatpush1.bf16.msra.mxu0 %v7121_v3  ;;  %v7162_v3 = vld [vmem:[#allocation13 + $0x174] ss:$8 sps:$4 sm:$0xff]  }
 0x2e1   : > { %1426 = vmatprep.subr.bf16.mxu0 %v7126_v4  ;;  %v7160_v4 = vld [vmem:[#allocation13 + $0x170] ss:$8 sps:$4 sm:$0xff]  }
 0x2e4   : > { %1427 = vmatpush1.bf16.msra.mxu0 %v7124_v5  ;;  %v7165_v5 = vld [vmem:[#allocation13 + $0x184] ss:$8 sps:$4 sm:$0xff]  }
 0x2e5   : > { %1428 = vmatprep.subr.bf16.mxu0 %v7129_v6  ;;  %v7163_v6 = vld [vmem:[#allocation13 + $0x180] ss:$8 sps:$4 sm:$0xff]  }
 0x2e8   : > { %1429 = vmatpush1.bf16.msra.mxu0 %v7127_v7  ;;  %v7168_v7 = vld [vmem:[#allocation13 + $0x194] ss:$8 sps:$4 sm:$0xff]  }
 0x2e9   : > { %1430 = vmatprep.subr.bf16.mxu0 %v7132_v9  ;;  %v7171_v9 = vld [vmem:[#allocation13 + $0x1a4] ss:$8 sps:$4 sm:$0xff]  }
 0x2ec   : > { %1431 = vmatpush1.bf16.msra.mxu0 %v7130_v8  ;;  %v7166_v8 = vld [vmem:[#allocation13 + $0x190] ss:$8 sps:$4 sm:$0xff]  }
 0x2ed   : > { %1432 = vmatprep.subr.bf16.mxu0 %v7135_v10  ;;  %v7169_v10 = vld [vmem:[#allocation13 + $0x1a0] ss:$8 sps:$4 sm:$0xff]  }
 0x2f0   : > { %1433 = vmatpush1.bf16.msra.mxu0 %v7133_v11  ;;  %v7174_v11 = vld [vmem:[#allocation13 + $0x1b4] ss:$8 sps:$4 sm:$0xff]  }
 0x2f1   : > { %1434 = vmatprep.subr.bf16.mxu0 %v7138_v12  ;;  %v7172_v12 = vld [vmem:[#allocation13 + $0x1b0] ss:$8 sps:$4 sm:$0xff]  }
 0x2f4   : > { %1435 = vmatpush1.bf16.msra.mxu0 %v7136_v13  ;;  %v7177_v13 = vld [vmem:[#allocation13 + $0x1c4] ss:$8 sps:$4 sm:$0xff]  }
 0x2f5   : > { %1447 = vmatprep.subr.bf16.mxu0 %v7141_v14  ;;  %v7175_v14 = vld [vmem:[#allocation13 + $0x1c0] ss:$8 sps:$4 sm:$0xff]  }
 0x389   : > { %v6739_v15 = vpop.f32.mrb[4].mxu0 }
 0x38a   : > { %v6734_v16 = vpop.f32.mrb[4].mxu1  ;;  %v845_v17 = vpop.f32.mrb[5].mxu0 }
 0x38b   : > { %v8714_v18 = vadd.f32 %v6739_v15, %v6734_v16  ;;  %v764_v19 = vpop.f32.mrb[5].mxu1  ;;  %v7180_v15 = vld [vmem:[#allocation13 + $0x1d4] ss:$8 sps:$4 sm:$0xff]   ;;  %v7178_v16 = vld [vmem:[#allocation13 + $0x1d0] ss:$8 sps:$4 sm:$0xff]  }
 0x38c   : > { %v8716_v21 = vadd.f32 %v845_v17, %v764_v19  ;;  %v7183_v17 = vld [vmem:[#allocation13 + $0x1e4] ss:$8 sps:$4 sm:$0xff]   ;;  %v7181_v19 = vld [vmem:[#allocation13 + $0x1e0] ss:$8 sps:$4 sm:$0xff]  }
 0x38e   : > { %v854_v22 = vpack.c.bf16 %v8714_v18, %v8716_v21 }
 0x390   : > { %v856_v23 = vrot.slane %v854_v22, 7  ;;  %v7186_v22 = vld [vmem:[#allocation13 + $0x1f4] ss:$8 sps:$4 sm:$0xff]  }
 0x392   : > { %858 = vst [vmem:[#allocation2] sm:$0xfe] %v856_v23  ;;  %859 = vst [vmem:[#allocation2 + $0x8] sm:$0x1] %v856_v23  ;;  %v7184_v23 = vld [vmem:[#allocation13 + $0x1f0] ss:$8 sps:$4 sm:$0xff]  }
 0x399   : > { %v860_v24 = vld [vmem:[#allocation2] sm:$0xff]  ;;  %v8720_v25 = vld [vmem:[#allocation2 + $0x8] sm:$0x1] }
 0x39a   : > { %v8722_v26 = vld [vmem:[#allocation2] sm:$0xfe]  ;;  %v869_v27 = vshll.u32 %v860_v24, 16  ;;  %v874_v28 = vshll.u32 %v8720_v25, 16  ;;  %v8725_v29 = vld [vmem:[#allocation2 + $0x8] sm:$0x3] }
 0x39b   : > { %v888_v35 = vshrl.u32 %v8722_v26, 16  ;;  %v891_v36 = vshll.u32 %v8722_v26, 16  ;;  %v896_v37 = vshrl.u32 %v8725_v29, 16  ;;  %v899_v38 = vshll.u32 %v8725_v29, 16 }
 0x39c   : > { %v867_v39 = vshrl.u32 %v860_v24, 16  ;;  %v871_v40 = vrot.slane %v869_v27, 1  ;;  %v876_v48 = vrot.slane %v874_v28, 1  ;;  %v882_v27 = vrot.slane %v8722_v26, 1  ;;  %v7198_v26 = vld [vmem:[#allocation13 + $0x234] ss:$8 sps:$4 sm:$0xff]  }
 0x39d   : > { %v890_v41 = vrot.slane %v888_v35, 1  ;;  %v893_v43 = vrot.slane %v891_v36, 2  ;;  %v898_v44 = vrot.slane %v896_v37, 1  ;;  %v901_v46 = vrot.slane %v899_v38, 2  ;;  %v7187_v35 = vld [vmem:[#allocation13 + $0x200] ss:$8 sps:$4 sm:$0xff]  }
 0x39e   : > { %v872_v47 = vor.u32 %v871_v40, %v867_v39  ;;  %v883_v28 = vrot.slane %v8720_v25, 1  ;;  %v7192_v36 = vld [vmem:[#allocation13 + $0x214] ss:$8 sps:$4 sm:$0xff]   ;;  %v7190_v38 = vld [vmem:[#allocation13 + $0x210] ss:$8 sps:$4 sm:$0xff]  }
 0x39f   : > { %v894_v50 = vor.u32 %v893_v43, %v890_v41  ;;  %v902_v51 = vor.u32 %v901_v46, %v898_v44  ;;  %v7195_v39 = vld [vmem:[#allocation13 + $0x224] ss:$8 sps:$4 sm:$0xff]   ;;  %v7193_v40 = vld [vmem:[#allocation13 + $0x220] ss:$8 sps:$4 sm:$0xff]   ;;  %v7196_v25 = vld [vmem:[#allocation13 + $0x230] ss:$8 sps:$4 sm:$0xff]  }
 0x3a0   : > { %v877_v52 = vsel %vm865_vm7, %v872_v47, %v876_v48  ;;  %v884_v37 = vsel %vm881_vm9, %v882_v27, %v883_v28  ;;  %v7201_v41 = vld [vmem:[#allocation13 + $0x244] ss:$8 sps:$4 sm:$0xff]   ;;  %v7199_v43 = vld [vmem:[#allocation13 + $0x240] ss:$8 sps:$4 sm:$0xff]   ;;  %v7204_v44 = vld [vmem:[#allocation13 + $0x254] ss:$8 sps:$4 sm:$0xff]  }
 0x3a1   : > { %1436 = vmatprep.mubr.bf16.mxu0 %v877_v52  ;;  %v903_v54 = vsel %vm886_vm8, %v894_v50, %v902_v51  ;;  %v7202_v46 = vld [vmem:[#allocation13 + $0x250] ss:$8 sps:$4 sm:$0xff]   ;;  %v7207_v47 = vld [vmem:[#allocation13 + $0x264] ss:$8 sps:$4 sm:$0xff]   ;;  %v7205_v48 = vld [vmem:[#allocation13 + $0x260] ss:$8 sps:$4 sm:$0xff]  }
 0x3a2   : > { %1437 = vmatmul.mubr.bf16.vlgmr.msra.gmra.mrb[8].mxu0 %v860_v24  ;;  %v7189_v24 = vld [vmem:[#allocation13 + $0x204] ss:$8 sps:$4 sm:$0xff]   ;;  %v7208_v51 = vld [vmem:[#allocation13 + $0x270] ss:$8 sps:$4 sm:$0xff]   ;;  %v8744_v27 = vsub.s32 0, %v8679_v30 }
 0x3a3   : > { %1448 = vmatpush1.bf16.msra.mxu0 %v7139_v49  ;;  %1479 = vmatprep.mubr.bf16.mxu0 %v903_v54  ;;  %v7210_v49 = vld [vmem:[#allocation13 + $0x274] ss:$8 sps:$4 sm:$0xff]   ;;  %v864_v50 = vld [vmem:[#allocation2] sm:$0xfc] }
 0x3a4   : > { %1449 = vmatprep.subr.bf16.mxu0 %v7144_v53  ;;  %v908_v52 = vrot.slane %v864_v50, 2  ;;  %v909_v53 = vrot.slane %v8725_v29, 2  ;;  %v7225_v29 = vld [vmem:[#allocation10 + $0xc4] ss:$8 sps:$4 sm:$0xff]  }
 0x3a6   : > { %v910_v54 = vsel %vm907_vm10, %v908_v52, %v909_v53  ;;  %v1704_v53 = vadd.s32 16, %v8679_v30 }
 0x3a7   : > { %1450 = vmatpush1.bf16.msra.mxu0 %v7142_v55  ;;  %v7213_v55 = vld [vmem:[#allocation10 + $0x84] ss:$8 sps:$4 sm:$0xff]  }
 0x3a8   : > { %1451 = vmatprep.subr.bf16.mxu0 %v7147_v56  ;;  %v7211_v56 = vld [vmem:[#allocation10 + $0x80] ss:$8 sps:$4 sm:$0xff]   ;;  %1649 = vmatprep.subr.bf16.mxu1 %v7213_v55  ;;  %vm1712_vm11 = vcmp.eq.s32.totalorder %v1704_v53, %v8684_v32  ;;  %vm1706_vm13 = vcmp.eq.s32.totalorder %v1704_v53, %v8681_v31 }
 0x3a9   : > { %1650 = vmatpush1.bf16.msra.mxu1 %v7211_v56  ;;  %v1705_v56 = vadd.s32 24, %v8679_v30 }
 0x3ab   : > { %1452 = vmatpush1.bf16.msra.mxu0 %v7145_v57  ;;  %v7216_v57 = vld [vmem:[#allocation10 + $0x94] ss:$8 sps:$4 sm:$0xff]   ;;  %vm1713_vm12 = vcmp.eq.s32.totalorder %v1705_v56, %v8684_v32  ;;  %v6243_v32 = vsel %vm1706_vm13, 1.0, %v8302_v0  ;;  %vm1707_vm14 = vcmp.eq.s32.totalorder %v1705_v56, %v8681_v31 }
 0x3ac   : > { %1453 = vmatprep.subr.bf16.mxu0 %v7150_v58  ;;  %v7214_v58 = vld [vmem:[#allocation10 + $0x90] ss:$8 sps:$4 sm:$0xff]   ;;  %1651 = vmatprep.subr.bf16.mxu1 %v7216_v57 }
 0x3ad   : > { %1652 = vmatpush1.bf16.msra.mxu1 %v7214_v58  ;;  %v7237_v57 = vld [vmem:[#allocation13 + $0x284] ss:$8 sps:$4 sm:$0xff]   ;;  %v6246_v58 = vsel %vm1713_vm12, 1.0, %v8302_v0  ;;  %v7244_v31 = vld [vmem:[#allocation13 + $0x2b0] ss:$8 sps:$4 sm:$0xff]  }
 0x3af   : > { %1454 = vmatpush1.bf16.msra.mxu0 %v7148_v59  ;;  %v7219_v59 = vld [vmem:[#allocation10 + $0xa4] ss:$8 sps:$4 sm:$0xff]  }
 0x3b0   : > { %1455 = vmatprep.subr.bf16.mxu0 %v7153_v60  ;;  %v7217_v60 = vld [vmem:[#allocation10 + $0xa0] ss:$8 sps:$4 sm:$0xff]   ;;  %1653 = vmatprep.subr.bf16.mxu1 %v7219_v59 }
 0x3b1   : > { %1654 = vmatpush1.bf16.msra.mxu1 %v7217_v60  ;;  %v7240_v59 = vld [vmem:[#allocation13 + $0x294] ss:$8 sps:$4 sm:$0xff]   ;;  %v7238_v60 = vld [vmem:[#allocation13 + $0x290] ss:$8 sps:$4 sm:$0xff]  }
 0x3b3   : > { %1456 = vmatpush1.bf16.msra.mxu0 %v7151_v61  ;;  %v7220_v61 = vld [vmem:[#allocation10 + $0xb0] ss:$8 sps:$4 sm:$0xff]  }
 0x3b4   : > { %1457 = vmatprep.subr.bf16.mxu0 %v7156_v62  ;;  %v7222_v62 = vld [vmem:[#allocation10 + $0xb4] ss:$8 sps:$4 sm:$0xff]  }
 0x3b5   : > { %1655 = vmatprep.subr.bf16.mxu1 %v7222_v62  ;;  %v7246_v62 = vld [vmem:[#allocation13 + $0x2b4] ss:$8 sps:$4 sm:$0xff]  }
 0x3b6   : > { %1656 = vmatpush1.bf16.msra.mxu1 %v7220_v61  ;;  %v7243_v61 = vld [vmem:[#allocation13 + $0x2a4] ss:$8 sps:$4 sm:$0xff]  }
 0x3b7   : > { %1458 = vmatpush1.bf16.msra.mxu0 %v7154_v63  ;;  %v7223_v63 = vld [vmem:[#allocation10 + $0xc0] ss:$8 sps:$4 sm:$0xff]   ;;  %1657 = vmatprep.subr.bf16.mxu1 %v7225_v29 }
 0x3b8   : > { %1459 = vmatprep.subr.bf16.mxu0 %v7159_v1  ;;  %v7228_v1 = vld [vmem:[#allocation10 + $0xd4] ss:$8 sps:$4 sm:$0xff]   ;;  %v7249_v29 = vld [vmem:[#allocation13 + $0x2c4] ss:$8 sps:$4 sm:$0xff]  }
 0x3ba   : > { %1658 = vmatpush1.bf16.msra.mxu1 %v7223_v63  ;;  %v7252_v63 = vld [vmem:[#allocation13 + $0x2d4] ss:$8 sps:$4 sm:$0xff]  }
 0x3bb   : > { %1460 = vmatpush1.bf16.msra.mxu0 %v7157_v2  ;;  %v7226_v2 = vld [vmem:[#allocation10 + $0xd0] ss:$8 sps:$4 sm:$0xff]   ;;  %1659 = vmatprep.subr.bf16.mxu1 %v7228_v1 }
 0x3bc   : > { %1461 = vmatprep.subr.bf16.mxu0 %v7162_v3  ;;  %v7231_v3 = vld [vmem:[#allocation10 + $0xe4] ss:$8 sps:$4 sm:$0xff]  }
 0x3bd   : > { %v7255_v1 = vld [vmem:[#allocation13 + $0x2e4] ss:$8 sps:$4 sm:$0xff]  }
 0x3be   : > { %1660 = vmatpush1.bf16.msra.mxu1 %v7226_v2  ;;  %v7253_v2 = vld [vmem:[#allocation13 + $0x2e0] ss:$8 sps:$4 sm:$0xff]  }
 0x3bf   : > { %1462 = vmatpush1.bf16.msra.mxu0 %v7160_v4  ;;  %v7229_v4 = vld [vmem:[#allocation10 + $0xe0] ss:$8 sps:$4 sm:$0xff]   ;;  %1661 = vmatprep.subr.bf16.mxu1 %v7231_v3 }
 0x3c0   : > { %1463 = vmatprep.subr.bf16.mxu0 %v7165_v5  ;;  %v7234_v5 = vld [vmem:[#allocation10 + $0xf4] ss:$8 sps:$4 sm:$0xff]  }
 0x3c1   : > { %v7258_v3 = vld [vmem:[#allocation13 + $0x2f4] ss:$8 sps:$4 sm:$0xff]  }
 0x3c2   : > { %1662 = vmatpush1.bf16.msra.mxu1 %v7229_v4  ;;  %v7256_v4 = vld [vmem:[#allocation13 + $0x2f0] ss:$8 sps:$4 sm:$0xff]  }
 0x3c3   : > { %1464 = vmatpush1.bf16.msra.mxu0 %v7163_v6  ;;  %v7232_v6 = vld [vmem:[#allocation10 + $0xf0] ss:$8 sps:$4 sm:$0xff]   ;;  %1663 = vmatprep.subr.bf16.mxu1 %v7234_v5 }
 0x3c4   : > { %1465 = vmatprep.subr.bf16.mxu0 %v7168_v7  ;;  %v8740_v7 = vsub.s32 1, %v8679_v30  ;;  %v7235_v30 = vld [vmem:[#allocation13 + $0x280] ss:$8 sps:$4 sm:$0xff]   ;;  %v7261_v5 = vld [vmem:[#allocation13 + $0x304] ss:$8 sps:$4 sm:$0xff]  }
 0x3c6   : > { %1664 = vmatpush1.bf16.msra.mxu1 %v7232_v6  ;;  %v7259_v6 = vld [vmem:[#allocation13 + $0x300] ss:$8 sps:$4 sm:$0xff]  }
 0x3c7   : > { %1466 = vmatpush1.bf16.msra.mxu0 %v7166_v8  ;;  %v992_v8 = vld [vmem:[#allocation15] sm:$0x3] }
 0x3c8   : > { %1467 = vmatprep.subr.bf16.mxu0 %v7171_v9  ;;  %v1001_v9 = vrot.slane %v992_v8, %v8740_v7  ;;  %v997_v28 = vrot.slane %v992_v8, %v8744_v27  ;;  %v7264_v8 = vld [vmem:[#allocation13 + $0x314] ss:$8 sps:$4 sm:$0xff]  }
 0x3cb   : > { %1468 = vmatpush1.bf16.msra.mxu0 %v7169_v10 }
 0x3cc   : > { %1469 = vmatprep.subr.bf16.mxu0 %v7174_v11 }
 0x3cf   : > { %1470 = vmatpush1.bf16.msra.mxu0 %v7172_v12 }
 0x3d0   : > { %1471 = vmatprep.subr.bf16.mxu0 %v7177_v13 }
 0x3d3   : > { %1472 = vmatpush1.bf16.msra.mxu0 %v7175_v14 }
 0x3d4   : > { %1473 = vmatprep.subr.bf16.mxu0 %v7180_v15 }
 0x3d7   : > { %1474 = vmatpush1.bf16.msra.mxu0 %v7178_v16 }
 0x3d8   : > { %1475 = vmatprep.subr.bf16.mxu0 %v7183_v17 }
 0x3db   : > { %1476 = vmatpush1.bf16.msra.mxu0 %v7181_v19 }
 0x3dc   : > { %1477 = vmatprep.subr.bf16.mxu0 %v7186_v22 }
 0x3df   : > { %1478 = vmatpush1.bf16.msra.mxu0 %v7184_v23 }
 0x3e0   : > { %1490 = vmatprep.subr.bf16.mxu0 %v7189_v24 }
 0x3e2   : > { %1480 = vmatmul.mubr.bf16.vlgmr.msra.gmra.mrb[8].mxu0 %v884_v37 }
 0x3e3   : > { %1491 = vmatpush1.bf16.msra.mxu0 %v7187_v35  ;;  %1522 = vmatprep.mubr.bf16.mxu0 %v8304_v20 }
 0x3e4   : > { %1492 = vmatprep.subr.bf16.mxu0 %v7192_v36 }
 0x3e7   : > { %1493 = vmatpush1.bf16.msra.mxu0 %v7190_v38 }
 0x3e8   : > { %1494 = vmatprep.subr.bf16.mxu0 %v7195_v39 }
 0x3eb   : > { %1495 = vmatpush1.bf16.msra.mxu0 %v7193_v40 }
 0x3ec   : > { %1496 = vmatprep.subr.bf16.mxu0 %v7198_v26 }
 0x3ef   : > { %1497 = vmatpush1.bf16.msra.mxu0 %v7196_v25 }
 0x3f0   : > { %1498 = vmatprep.subr.bf16.mxu0 %v7201_v41 }
 0x3f3   : > { %1499 = vmatpush1.bf16.msra.mxu0 %v7199_v43 }
 0x3f4   : > { %1500 = vmatprep.subr.bf16.mxu0 %v7204_v44 }
 0x3f7   : > { %1501 = vmatpush1.bf16.msra.mxu0 %v7202_v46 }
 0x3f8   : > { %1502 = vmatprep.subr.bf16.mxu0 %v7207_v47  ;;  %v6242_v47 = vld [vmem:[#allocation12 + $0x1] ss:$0 sm:$0xff] }
 0x3fb   : > { %1503 = vmatpush1.bf16.msra.mxu0 %v7205_v48 }
 0x3fc   : > { %1504 = vmatprep.subr.bf16.mxu0 %v7210_v49 }
 0x3ff   : > { %1505 = vmatpush1.bf16.msra.mxu0 %v7208_v51 }
 0x402   : > { %1523 = vmatmul.mubr.bf16.vlgmr.msra.gmra.mrb[8].mxu0 %v910_v54 }
 0x4d5   : > { %v1524_v10 = vpop.f32.mrb[8].mxu0 }
 0x4d6   : > { %v1526_v11 = vpop.f32.mrb[9].mxu0  ;;  %v6790_v35 = vadd.f32 %v1524_v10, %v997_v28  ;;  %v7267_v10 = vld [vmem:[#allocation13 + $0x324] ss:$8 sps:$4 sm:$0xff]  }
 0x4d7   : > { %v6791_v12 = vadd.f32 %v1526_v11, %v1001_v9  ;;  %v1528_v13 = vpop.f32.mrb[10].mxu0  ;;  %v7265_v11 = vld [vmem:[#allocation13 + $0x320] ss:$8 sps:$4 sm:$0xff]  }
 0x4d8   : > { %v1530_v14 = vpop.f32.mrb[11].mxu0  ;;  %v6792_v37 = vadd.f32 %v1528_v13, %v997_v28  ;;  %v7268_v13 = vld [vmem:[#allocation13 + $0x330] ss:$8 sps:$4 sm:$0xff]   ;;  %v7285_v28 = vld [vmem:[#allocation13 + $0x384] ss:$8 sps:$4 sm:$0xff]  }
 0x4d9   : > { %v6224_v15 = vmul.f32 -1.442695, %v6791_v12  ;;  %v6793_v16 = vadd.f32 %v1530_v14, %v1001_v9  ;;  %v7262_v9 = vld [vmem:[#allocation13 + $0x310] ss:$8 sps:$4 sm:$0xff]   ;;  %v7270_v12 = vld [vmem:[#allocation13 + $0x334] ss:$8 sps:$4 sm:$0xff]  }
 0x4da   : > { %v7273_v14 = vld [vmem:[#allocation13 + $0x344] ss:$8 sps:$4 sm:$0xff]  }
 0x4db   : > { %7843 = vpow2.f32 %v6224_v15  ;;  %v6225_v17 = vmul.f32 -1.442695, %v6793_v16  ;;  %v7271_v15 = vld [vmem:[#allocation13 + $0x340] ss:$8 sps:$4 sm:$0xff]   ;;  %v7274_v16 = vld [vmem:[#allocation13 + $0x350] ss:$8 sps:$4 sm:$0xff]  }
 0x4dd   : > { %7845 = vpow2.f32 %v6225_v17  ;;  %v7276_v17 = vld [vmem:[#allocation13 + $0x354] ss:$8 sps:$4 sm:$0xff]  }
 0x4e5   : > { %v7844_v19 = vpop.eup %7843 }
 0x4e6   : > { %v1539_v22 = vadd.f32 1.0, %v7844_v19  ;;  %v7279_v19 = vld [vmem:[#allocation13 + $0x364] ss:$8 sps:$4 sm:$0xff]  }
 0x4e7   : > { %v7846_v23 = vpop.eup %7845 }
 0x4e8   : > { %7847 = vrcp.f32 %v1539_v22  ;;  %v1540_v24 = vadd.f32 1.0, %v7846_v23  ;;  %v7277_v22 = vld [vmem:[#allocation13 + $0x360] ss:$8 sps:$4 sm:$0xff]   ;;  %v7282_v23 = vld [vmem:[#allocation13 + $0x374] ss:$8 sps:$4 sm:$0xff]  }
 0x4ea   : > { %7849 = vrcp.f32 %v1540_v24  ;;  %v7280_v24 = vld [vmem:[#allocation13 + $0x370] ss:$8 sps:$4 sm:$0xff]  }
 0x4f2   : > { %v7848_v36 = vpop.eup %7847 }
 0x4f3   : > { %v1545_v38 = vmul.f32 %v7848_v36, %v6790_v35 }
 0x4f4   : > { %v7850_v39 = vpop.eup %7849 }
 0x4f5   : > { %v1546_v40 = vmul.f32 %v7850_v39, %v6792_v37  ;;  %v1547_v26 = vadd.f32 %v1545_v38, %v8716_v21 }
 0x4f7   : > { %v1548_v25 = vadd.f32 %v1546_v40, %v8714_v18  ;;  %v1549_v41 = vmul.f32 0.70710677, %v1547_v26 }
 0x4f9   : > { %v1550_v43 = vmul.f32 0.70710677, %v1548_v25 }
 0x4fb   : > { %v1551_v44 = vpack.c.bf16 %v1550_v43, %v1549_v41 }
 0x4fd   : > { %1682 = vmatmul.mubr.bf16.vlgmr.msra.gmra.mrb[8].mxu1 %v1551_v44 }
 0x4fe   : > { %6744 = vmatprep.mubr.msk.f32.mxu1 %vm481_vm1, %v8694_v34  ;;  %v6245_v34 = vsel %vm1712_vm11, 1.0, %v8302_v0 }
 0x5d0   : > { %v1683_v46 = vpop.f32.mrb[8].mxu1 }
 0x5d1   : > { %v1685_v48 = vpop.f32.mrb[9].mxu1  ;;  %v1700_v50 = vadd.f32 %v6242_v47, %v1683_v46 }
 0x5d2   : > { %v1687_v49 = vpop.f32.mrb[10].mxu1  ;;  %v1702_v54 = vadd.f32 %v6242_v47, %v1685_v48 }
 0x5d3   : > { %v1701_v51 = vadd.f32 %v6242_v47, %v1687_v49  ;;  %v1689_v52 = vpop.f32.mrb[11].mxu1 }
 0x5d4   : > { %v1703_v21 = vadd.f32 %v6242_v47, %v1689_v52 }
 0x5d5   : > { %v6784_v55 = vpack.c.bf16 %v1701_v51, %v1700_v50 }
 0x5d6   : > { %v6780_v18 = vpack.c.bf16 %v1703_v21, %v1702_v54 }
 0x5d8   : > { %6781 = vmatprep.subr.bf16.mxu1 %v6780_v18 }
 0x5d9   : > { %6783 = vmatpush3.bf16.msra.mxu1 %v6780_v18  ;;  %v7283_v18 = vld [vmem:[#allocation13 + $0x380] ss:$8 sps:$4 sm:$0xff]  }
 0x5da   : > { %6785 = vmatprep.subr.bf16.mxu1 %v6784_v55 }
 0x5dc   : > { %6745 = vmatmul.mubr.msk.f32.vlgmr.msra.gmra.mrb[6].mxu1 %vm481_vm1, %v8707_v45  ;;  %v6244_v45 = vsel %vm1707_vm14, 1.0, %v8302_v0  ;;  %v7250_v0 = vld [vmem:[#allocation13 + $0x2d0] ss:$8 sps:$4 sm:$0xff]  }
 0x5dd   : > { %6787 = vmatpush3.bf16.msra.mxu1 %v6784_v55  ;;  %6747 = vmatprep.mubr.msk.f32.mxu1 %vm481_vm1, %v6245_v34 }
 0x5de   : > { %2488 = vmatprep.subr.bf16.mxu1 %v7237_v57 }
 0x5e0   : > { %6748 = vmatmul.mubr.msk.f32.gmra.mrb[12].mxu1 %vm481_vm1, %v6246_v58  ;;  %v7288_v58 = vld [vmem:[#allocation13 + $0x394] ss:$8 sps:$4 sm:$0xff]  }
 0x5e1   : > { %6754 = vmatprep.mubr.msk.f32.mxu1 %vm481_vm1, %v8691_v33  ;;  %v7241_v33 = vld [vmem:[#allocation13 + $0x2a0] ss:$8 sps:$4 sm:$0xff]  }
 0x5e4   : > { %6755 = vmatmul.mubr.msk.f32.vlgmr.msra.gmra.mrb[6].mxu1 %vm481_vm1, %v8704_v42  ;;  %v7247_v42 = vld [vmem:[#allocation13 + $0x2c0] ss:$8 sps:$4 sm:$0xff]  }
 0x5e5   : > { %6757 = vmatprep.mubr.msk.f32.mxu1 %vm481_vm1, %v6243_v32  ;;  %2489 = vmatpush1.bf16.msra.mxu1 %v7235_v30 }
 0x5e6   : > { %2490 = vmatprep.subr.bf16.mxu1 %v7240_v59 }
 0x5e8   : > { %6758 = vmatmul.mubr.msk.f32.gmra.mrb[12].mxu1 %vm481_vm1, %v6244_v45  ;;  %v7286_v45 = vld [vmem:[#allocation13 + $0x390] ss:$8 sps:$4 sm:$0xff]  }
 0x5e9   : > { %2491 = vmatpush1.bf16.msra.mxu1 %v7238_v60  ;;  %v7291_v60 = vld [vmem:[#allocation13 + $0x3a4] ss:$8 sps:$4 sm:$0xff]  }
 0x5ea   : > { %2492 = vmatprep.subr.bf16.mxu1 %v7243_v61 }
 0x5ed   : > { %2493 = vmatpush1.bf16.msra.mxu1 %v7241_v33 }
 0x5ee   : > { %2494 = vmatprep.subr.bf16.mxu1 %v7246_v62 }
 0x5f1   : > { %2495 = vmatpush1.bf16.msra.mxu1 %v7244_v31  ;;  %v7289_v31 = vld [vmem:[#allocation13 + $0x3a0] ss:$8 sps:$4 sm:$0xff]  }
 0x5f2   : > { %2496 = vmatprep.subr.bf16.mxu1 %v7249_v29 }
 0x5f5   : > { %2497 = vmatpush1.bf16.msra.mxu1 %v7247_v42  ;;  %v7294_v42 = vld [vmem:[#allocation13 + $0x3b4] ss:$8 sps:$4 sm:$0xff]  }
 0x5f6   : > { %2498 = vmatprep.subr.bf16.mxu1 %v7252_v63 }
 0x5f9   : > { %2499 = vmatpush1.bf16.msra.mxu1 %v7250_v0  ;;  %v7292_v0 = vld [vmem:[#allocation13 + $0x3b0] ss:$8 sps:$4 sm:$0xff]  }
 0x5fa   : > { %2500 = vmatprep.subr.bf16.mxu1 %v7255_v1  ;;  %v7297_v1 = vld [vmem:[#allocation13 + $0x3c4] ss:$8 sps:$4 sm:$0xff]  }
 0x5fd   : > { %2501 = vmatpush1.bf16.msra.mxu1 %v7253_v2  ;;  %v7295_v2 = vld [vmem:[#allocation13 + $0x3c0] ss:$8 sps:$4 sm:$0xff]  }
 0x5fe   : > { %2502 = vmatprep.subr.bf16.mxu1 %v7258_v3  ;;  %v7300_v3 = vld [vmem:[#allocation13 + $0x3d4] ss:$8 sps:$4 sm:$0xff]  }
 0x601   : > { %2503 = vmatpush1.bf16.msra.mxu1 %v7256_v4  ;;  %v7298_v4 = vld [vmem:[#allocation13 + $0x3d0] ss:$8 sps:$4 sm:$0xff]  }
 0x602   : > { %2504 = vmatprep.subr.bf16.mxu1 %v7261_v5  ;;  %v7303_v5 = vld [vmem:[#allocation13 + $0x3e4] ss:$8 sps:$4 sm:$0xff]  }
 0x605   : > { %2505 = vmatpush1.bf16.msra.mxu1 %v7259_v6  ;;  %v7301_v6 = vld [vmem:[#allocation13 + $0x3e0] ss:$8 sps:$4 sm:$0xff]  }
 0x606   : > { %2506 = vmatprep.subr.bf16.mxu1 %v7264_v8  ;;  %v7306_v8 = vld [vmem:[#allocation13 + $0x3f4] ss:$8 sps:$4 sm:$0xff]  }
 0x609   : > { %2507 = vmatpush1.bf16.msra.mxu1 %v7262_v9  ;;  %v7304_v9 = vld [vmem:[#allocation13 + $0x3f0] ss:$8 sps:$4 sm:$0xff]  }
 0x60a   : > { %2508 = vmatprep.subr.bf16.mxu1 %v7267_v10  ;;  %v7309_v10 = vld [vmem:[#allocation13 + $0x404] ss:$8 sps:$4 sm:$0xff]  }
 0x60d   : > { %2509 = vmatpush1.bf16.msra.mxu1 %v7265_v11  ;;  %v7307_v11 = vld [vmem:[#allocation13 + $0x400] ss:$8 sps:$4 sm:$0xff]  }
 0x60e   : > { %2510 = vmatprep.subr.bf16.mxu1 %v7270_v12  ;;  %v7312_v12 = vld [vmem:[#allocation13 + $0x414] ss:$8 sps:$4 sm:$0xff]  }
 0x611   : > { %2511 = vmatpush1.bf16.msra.mxu1 %v7268_v13  ;;  %v7310_v13 = vld [vmem:[#allocation13 + $0x410] ss:$8 sps:$4 sm:$0xff]  }
 0x612   : > { %2512 = vmatprep.subr.bf16.mxu1 %v7273_v14  ;;  %v7315_v14 = vld [vmem:[#allocation13 + $0x424] ss:$8 sps:$4 sm:$0xff]  }
 0x615   : > { %2513 = vmatpush1.bf16.msra.mxu1 %v7271_v15  ;;  %v7313_v15 = vld [vmem:[#allocation13 + $0x420] ss:$8 sps:$4 sm:$0xff]  }
 0x616   : > { %2514 = vmatprep.subr.bf16.mxu1 %v7276_v17  ;;  %v7316_v17 = vld [vmem:[#allocation13 + $0x430] ss:$8 sps:$4 sm:$0xff]  }
 0x619   : > { %2515 = vmatpush1.bf16.msra.mxu1 %v7274_v16  ;;  %v7318_v16 = vld [vmem:[#allocation13 + $0x434] ss:$8 sps:$4 sm:$0xff]  }
 0x61a   : > { %2516 = vmatprep.subr.bf16.mxu1 %v7279_v19  ;;  %v7321_v19 = vld [vmem:[#allocation13 + $0x444] ss:$8 sps:$4 sm:$0xff]  }
 0x61d   : > { %2517 = vmatpush1.bf16.msra.mxu1 %v7277_v22  ;;  %v7319_v22 = vld [vmem:[#allocation13 + $0x440] ss:$8 sps:$4 sm:$0xff]  }
 0x61e   : > { %2518 = vmatprep.subr.bf16.mxu1 %v7282_v23  ;;  %v7324_v23 = vld [vmem:[#allocation13 + $0x454] ss:$8 sps:$4 sm:$0xff]  }
 0x621   : > { %2519 = vmatpush1.bf16.msra.mxu1 %v7280_v24  ;;  %v7322_v24 = vld [vmem:[#allocation13 + $0x450] ss:$8 sps:$4 sm:$0xff]  }
 0x622   : > { %2541 = vmatprep.subr.bf16.mxu1 %v7285_v28 }
 0x6b7   : > { %v8771_v35 = vpop.f32.mrb[6].mxu1 }
 0x6b8   : > { %v8773_v36 = vpop.f32.mrb[7].mxu1 }
 0x6b9   : > { %v1908_v37 = vpack.c.bf16 %v8771_v35, %v8773_v36 }
 0x6bb   : > { %v1913_v38 = vrot.slane %v1908_v37, 7  ;;  %v8777_v39 = vpop.f32.mrb[12].mxu1  ;;  %v7327_v37 = vld [vmem:[#allocation13 + $0x464] ss:$8 sps:$4 sm:$0xff]  }
 0x6bc   : > { %v8779_v40 = vpop.f32.mrb[13].mxu1 }
 0x6bd   : > { %1919 = vst [vmem:[#allocation2] sm:$0xfe] %v1913_v38  ;;  %v1909_v26 = vpack.c.bf16 %v8777_v39, %v8779_v40 }
 0x6bf   : > { %v1914_v25 = vrot.slane %v1909_v26, 7 }
 0x6c1   : > { %v8784_v41 = vsel %vm1912_vm15, %v1913_v38, %v1914_v25  ;;  %1921 = vst [vmem:[#allocation2 + $0x10] sm:$0x1] %v1914_v25  ;;  %v7325_v25 = vld [vmem:[#allocation13 + $0x460] ss:$8 sps:$4 sm:$0xff]  }
 0x6c2   : > { %v1938_v43 = vshll.u32 %v8784_v41, 16  ;;  %v1942_v52 = vshrl.u32 %v8784_v41, 16 }
 0x6c4   : > { %v1924_v44 = vld [vmem:[#allocation2] sm:$0xff]  ;;  %v1940_v50 = vrot.slane %v1938_v43, 1  ;;  %v1970_v61 = vrot.slane %v1942_v52, 1  ;;  %v1971_v33 = vrot.slane %v1938_v43, 2  ;;  %v7330_v43 = vld [vmem:[#allocation13 + $0x474] ss:$8 sps:$4 sm:$0xff]  }
 0x6c5   : > { %v1933_v46 = vshll.u32 %v1924_v44, 16  ;;  %v8787_v47 = vld [vmem:[#allocation2] sm:$0xfe]  ;;  %v1931_v48 = vshrl.u32 %v1924_v44, 16 }
 0x6c6   : > { %v1963_v21 = vshrl.u32 %v8787_v47, 16  ;;  %v1966_v55 = vshll.u32 %v8787_v47, 16  ;;  %v1944_v34 = vor.u32 %v1942_v52, %v1940_v50  ;;  %v8797_v29 = vor.u32 %v1971_v33, %v1970_v61  ;;  %v7346_v61 = vld [vmem:[#allocation13 + $0x4d0] ss:$8 sps:$4 sm:$0xff]   ;;  %v7349_v33 = vld [vmem:[#allocation13 + $0x4e0] ss:$8 sps:$4 sm:$0xff]  }
 0x6c7   : > { %v1935_v49 = vrot.slane %v1933_v46, 1 }
 0x6c8   : > { %v8789_v51 = vld [vmem:[#allocation2 + $0x10] sm:$0x1]  ;;  %v1965_v32 = vrot.slane %v1963_v21, 1  ;;  %v1968_v59 = vrot.slane %v1966_v55, 2 }
 0x6c9   : > { %v1936_v53 = vor.u32 %v1935_v49, %v1931_v48  ;;  %v1946_v54 = vshll.u32 %v8789_v51, 16  ;;  %v8802_v28 = vld [vmem:[#allocation2 + $0x10] sm:$0x3]  ;;  %v7328_v48 = vld [vmem:[#allocation13 + $0x470] ss:$8 sps:$4 sm:$0xff]  }
 0x6ca   : > { %v1969_v62 = vor.u32 %v1968_v59, %v1965_v32  ;;  %v1975_v38 = vshrl.u32 %v8802_v28, 16  ;;  %v1978_v26 = vshll.u32 %v8802_v28, 16  ;;  %v7333_v49 = vld [vmem:[#allocation13 + $0x484] ss:$8 sps:$4 sm:$0xff]   ;;  %v7336_v21 = vld [vmem:[#allocation13 + $0x494] ss:$8 sps:$4 sm:$0xff]  }
 0x6cb   : > { %v1941_v56 = vsel %vm865_vm7, %v1936_v53, %v1940_v50  ;;  %v1948_v57 = vrot.slane %v1946_v54, 1  ;;  %v1955_v50 = vrot.slane %v8787_v47, 1  ;;  %v1956_v53 = vrot.slane %v8784_v41, 1  ;;  %v7331_v54 = vld [vmem:[#allocation13 + $0x480] ss:$8 sps:$4 sm:$0xff]  }
 0x6cc   : > { %2520 = vmatprep.mubr.bf16.mxu1 %v1941_v56  ;;  %v1973_v63 = vsel %vm886_vm8, %v1969_v62, %v8797_v29  ;;  %v1980_v46 = vrot.slane %v1978_v26, 2  ;;  %v7334_v56 = vld [vmem:[#allocation13 + $0x490] ss:$8 sps:$4 sm:$0xff]   ;;  %v1958_v47 = vrot.slane %v8789_v51, 1  ;;  %v7345_v59 = vld [vmem:[#allocation13 + $0x4c4] ss:$8 sps:$4 sm:$0xff]  }
 0x6cd   : > { %2521 = vmatmul.mubr.bf16.vlgmr.msra.gmra.mrb[16].mxu1 %v1924_v44  ;;  %v1949_v30 = vsel %vm865_vm7, %v1944_v34, %v1948_v57  ;;  %v1977_v44 = vrot.slane %v1975_v38, 1  ;;  %v1957_v55 = vsel %vm881_vm9, %v1955_v50, %v1956_v53  ;;  %v7339_v34 = vld [vmem:[#allocation13 + $0x4a4] ss:$8 sps:$4 sm:$0xff]   ;;  %v7337_v57 = vld [vmem:[#allocation13 + $0x4a0] ss:$8 sps:$4 sm:$0xff]  }
 0x6ce   : > { %2542 = vmatpush1.bf16.msra.mxu1 %v7283_v18  ;;  %2530 = vmatprep.mubr.bf16.mxu1 %v1949_v30  ;;  %v1959_v30 = vsel %vm881_vm9, %v1956_v53, %v1958_v47  ;;  %v7340_v32 = vld [vmem:[#allocation13 + $0x4b0] ss:$8 sps:$4 sm:$0xff]   ;;  %v7351_v51 = vld [vmem:[#allocation13 + $0x4e4] ss:$8 sps:$4 sm:$0xff]   ;;  %v7354_v62 = vld [vmem:[#allocation13 + $0x4f4] ss:$8 sps:$4 sm:$0xff]  }
 0x6cf   : > { %2543 = vmatprep.subr.bf16.mxu1 %v7288_v58  ;;  %v1981_v52 = vor.u32 %v1980_v46, %v1977_v44  ;;  %v7342_v58 = vld [vmem:[#allocation13 + $0x4b4] ss:$8 sps:$4 sm:$0xff]   ;;  %v7385_v38 = vld [vmem:[#allocation13 + $0x5a0] ss:$8 sps:$4 sm:$0xff]   ;;  %v7400_v53 = vld [vmem:[#allocation13 + $0x5f0] ss:$8 sps:$4 sm:$0xff]  }
 0x6d0   : > { %v7390_v26 = vld [vmem:[#allocation13 + $0x5b4] ss:$8 sps:$4 sm:$0xff]   ;;  %v7391_v44 = vld [vmem:[#allocation13 + $0x5c0] ss:$8 sps:$4 sm:$0xff]  }
 0x6d1   : > { %v1982_v18 = vsel %vm886_vm8, %v8797_v29, %v1981_v52  ;;  %v7352_v29 = vld [vmem:[#allocation13 + $0x4f0] ss:$8 sps:$4 sm:$0xff]   ;;  %v7396_v46 = vld [vmem:[#allocation13 + $0x5d4] ss:$8 sps:$4 sm:$0xff]   ;;  %v7397_v50 = vld [vmem:[#allocation13 + $0x5e0] ss:$8 sps:$4 sm:$0xff]  }
 0x6d2   : > { %2544 = vmatpush1.bf16.msra.mxu1 %v7286_v45  ;;  %v7343_v45 = vld [vmem:[#allocation13 + $0x4c0] ss:$8 sps:$4 sm:$0xff]   ;;  %v7402_v52 = vld [vmem:[#allocation13 + $0x5f4] ss:$8 sps:$4 sm:$0xff]  }
 0x6d3   : > { %2545 = vmatprep.subr.bf16.mxu1 %v7291_v60  ;;  %v7348_v60 = vld [vmem:[#allocation13 + $0x4d4] ss:$8 sps:$4 sm:$0xff]  }
 0x6d5   : > { %2531 = vmatmul.mubr.bf16.gmra.mrb[20].mxu1 %v8784_v41 }
 0x6d6   : > { %2546 = vmatpush1.bf16.msra.mxu1 %v7289_v31  ;;  %2573 = vmatprep.mubr.bf16.mxu1 %v1973_v63  ;;  %v1929_v31 = vld [vmem:[#allocation2] sm:$0xfc]  ;;  %v1988_v63 = vrot.slane %v8784_v41, 2  ;;  %v7361_v41 = vld [vmem:[#allocation13 + $0x520] ss:$8 sps:$4 sm:$0xff]  }
 0x6d7   : > { %2547 = vmatprep.subr.bf16.mxu1 %v7294_v42  ;;  %v1987_v42 = vrot.slane %v1929_v31, 2 }
 0x6da   : > { %2548 = vmatpush1.bf16.msra.mxu1 %v7292_v0  ;;  %v1989_v0 = vsel %vm907_vm10, %v1987_v42, %v1988_v63 }
 0x6db   : > { %2549 = vmatprep.subr.bf16.mxu1 %v7297_v1  ;;  %v1990_v1 = vrot.slane %v8802_v28, 2  ;;  %v7382_v28 = vld [vmem:[#allocation13 + $0x590] ss:$8 sps:$4 sm:$0xff]  }
 0x6de   : > { %2550 = vmatpush1.bf16.msra.mxu1 %v7295_v2  ;;  %v1991_v2 = vsel %vm907_vm10, %v1988_v63, %v1990_v1 }
 0x6df   : > { %2551 = vmatprep.subr.bf16.mxu1 %v7300_v3  ;;  %v7357_v3 = vld [vmem:[#allocation13 + $0x504] ss:$8 sps:$4 sm:$0xff]  }
 0x6e0   : > { %3262 = vmatprep.subr.bf16.mxu0 %v7357_v3 }
 0x6e2   : > { %2552 = vmatpush1.bf16.msra.mxu1 %v7298_v4  ;;  %v7355_v4 = vld [vmem:[#allocation13 + $0x500] ss:$8 sps:$4 sm:$0xff]  }
 0x6e3   : > { %2553 = vmatprep.subr.bf16.mxu1 %v7303_v5  ;;  %3263 = vmatpush1.bf16.msra.mxu0 %v7355_v4  ;;  %v7360_v5 = vld [vmem:[#allocation13 + $0x514] ss:$8 sps:$4 sm:$0xff]  }
 0x6e4   : > { %3264 = vmatprep.subr.bf16.mxu0 %v7360_v5 }
 0x6e6   : > { %2554 = vmatpush1.bf16.msra.mxu1 %v7301_v6  ;;  %v7358_v6 = vld [vmem:[#allocation13 + $0x510] ss:$8 sps:$4 sm:$0xff]  }
 0x6e7   : > { %2555 = vmatprep.subr.bf16.mxu1 %v7306_v8  ;;  %3265 = vmatpush1.bf16.msra.mxu0 %v7358_v6  ;;  %v7363_v8 = vld [vmem:[#allocation13 + $0x524] ss:$8 sps:$4 sm:$0xff]  }
 0x6e8   : > { %3266 = vmatprep.subr.bf16.mxu0 %v7363_v8 }
 0x6ea   : > { %2556 = vmatpush1.bf16.msra.mxu1 %v7304_v9  ;;  %v7366_v9 = vld [vmem:[#allocation13 + $0x534] ss:$8 sps:$4 sm:$0xff]  }
 0x6eb   : > { %2557 = vmatprep.subr.bf16.mxu1 %v7309_v10  ;;  %3267 = vmatpush1.bf16.msra.mxu0 %v7361_v41  ;;  %v7364_v10 = vld [vmem:[#allocation13 + $0x530] ss:$8 sps:$4 sm:$0xff]  }
 0x6ec   : > { %3268 = vmatprep.subr.bf16.mxu0 %v7366_v9 }
 0x6ee   : > { %2558 = vmatpush1.bf16.msra.mxu1 %v7307_v11  ;;  %v7369_v11 = vld [vmem:[#allocation13 + $0x544] ss:$8 sps:$4 sm:$0xff]  }
 0x6ef   : > { %2559 = vmatprep.subr.bf16.mxu1 %v7312_v12  ;;  %3269 = vmatpush1.bf16.msra.mxu0 %v7364_v10  ;;  %v7367_v12 = vld [vmem:[#allocation13 + $0x540] ss:$8 sps:$4 sm:$0xff]  }
 0x6f0   : > { %3270 = vmatprep.subr.bf16.mxu0 %v7369_v11 }
 0x6f2   : > { %2560 = vmatpush1.bf16.msra.mxu1 %v7310_v13  ;;  %v7372_v13 = vld [vmem:[#allocation13 + $0x554] ss:$8 sps:$4 sm:$0xff]  }
 0x6f3   : > { %2561 = vmatprep.subr.bf16.mxu1 %v7315_v14  ;;  %3271 = vmatpush1.bf16.msra.mxu0 %v7367_v12  ;;  %v7370_v14 = vld [vmem:[#allocation13 + $0x550] ss:$8 sps:$4 sm:$0xff]  }
 0x6f4   : > { %3272 = vmatprep.subr.bf16.mxu0 %v7372_v13 }
 0x6f6   : > { %2562 = vmatpush1.bf16.msra.mxu1 %v7313_v15  ;;  %v7375_v15 = vld [vmem:[#allocation13 + $0x564] ss:$8 sps:$4 sm:$0xff]  }
 0x6f7   : > { %2563 = vmatprep.subr.bf16.mxu1 %v7318_v16  ;;  %3273 = vmatpush1.bf16.msra.mxu0 %v7370_v14  ;;  %v7373_v16 = vld [vmem:[#allocation13 + $0x560] ss:$8 sps:$4 sm:$0xff]  }
 0x6f8   : > { %3274 = vmatprep.subr.bf16.mxu0 %v7375_v15 }
 0x6fa   : > { %2564 = vmatpush1.bf16.msra.mxu1 %v7316_v17  ;;  %v7378_v17 = vld [vmem:[#allocation13 + $0x574] ss:$8 sps:$4 sm:$0xff]  }
 0x6fb   : > { %2565 = vmatprep.subr.bf16.mxu1 %v7321_v19  ;;  %3275 = vmatpush1.bf16.msra.mxu0 %v7373_v16  ;;  %v7376_v19 = vld [vmem:[#allocation13 + $0x570] ss:$8 sps:$4 sm:$0xff]  }
 0x6fc   : > { %3276 = vmatprep.subr.bf16.mxu0 %v7378_v17 }
 0x6fe   : > { %2566 = vmatpush1.bf16.msra.mxu1 %v7319_v22  ;;  %v7381_v22 = vld [vmem:[#allocation13 + $0x584] ss:$8 sps:$4 sm:$0xff]  }
 0x6ff   : > { %2567 = vmatprep.subr.bf16.mxu1 %v7324_v23  ;;  %3277 = vmatpush1.bf16.msra.mxu0 %v7376_v19  ;;  %v7379_v23 = vld [vmem:[#allocation13 + $0x580] ss:$8 sps:$4 sm:$0xff]  }
 0x700   : > { %3278 = vmatprep.subr.bf16.mxu0 %v7381_v22 }
 0x702   : > { %2568 = vmatpush1.bf16.msra.mxu1 %v7322_v24  ;;  %v7384_v24 = vld [vmem:[#allocation13 + $0x594] ss:$8 sps:$4 sm:$0xff]  }
 0x703   : > { %2569 = vmatprep.subr.bf16.mxu1 %v7327_v37  ;;  %3279 = vmatpush1.bf16.msra.mxu0 %v7379_v23  ;;  %v7387_v37 = vld [vmem:[#allocation13 + $0x5a4] ss:$8 sps:$4 sm:$0xff]  }
 0x704   : > { %3280 = vmatprep.subr.bf16.mxu0 %v7384_v24 }
 0x706   : > { %2570 = vmatpush1.bf16.msra.mxu1 %v7325_v25  ;;  %v7388_v25 = vld [vmem:[#allocation13 + $0x5b0] ss:$8 sps:$4 sm:$0xff]  }
 0x707   : > { %2571 = vmatprep.subr.bf16.mxu1 %v7330_v43  ;;  %3281 = vmatpush1.bf16.msra.mxu0 %v7382_v28  ;;  %v7393_v43 = vld [vmem:[#allocation13 + $0x5c4] ss:$8 sps:$4 sm:$0xff]  }
 0x708   : > { %3282 = vmatprep.subr.bf16.mxu0 %v7387_v37 }
 0x70a   : > { %2572 = vmatpush1.bf16.msra.mxu1 %v7328_v48  ;;  %v7394_v48 = vld [vmem:[#allocation13 + $0x5d0] ss:$8 sps:$4 sm:$0xff]  }
 0x70b   : > { %2594 = vmatprep.subr.bf16.mxu1 %v7333_v49  ;;  %3283 = vmatpush1.bf16.msra.mxu0 %v7385_v38  ;;  %v7399_v49 = vld [vmem:[#allocation13 + $0x5e4] ss:$8 sps:$4 sm:$0xff]  }
 0x70c   : > { %3284 = vmatprep.subr.bf16.mxu0 %v7390_v26 }
 0x70d   : > { %2574 = vmatmul.mubr.bf16.vlgmr.msra.gmra.mrb[16].mxu1 %v1957_v55 }
 0x70e   : > { %2583 = vmatprep.mubr.bf16.mxu1 %v1982_v18  ;;  %2595 = vmatpush1.bf16.msra.mxu1 %v7331_v54  ;;  %v7405_v54 = vld [vmem:[#allocation13 + $0x604] ss:$8 sps:$4 sm:$0xff]  }
 0x70f   : > { %2596 = vmatprep.subr.bf16.mxu1 %v7336_v21  ;;  %3285 = vmatpush1.bf16.msra.mxu0 %v7388_v25  ;;  %v2076_v21 = vld [vmem:[#allocation15 + $0x2] sm:$0x3] }
 0x710   : > { %3286 = vmatprep.subr.bf16.mxu0 %v7393_v43  ;;  %v2085_v55 = vrot.slane %v2076_v21, %v8740_v7 }
 0x712   : > { %2597 = vmatpush1.bf16.msra.mxu1 %v7334_v56 }
 0x713   : > { %2598 = vmatprep.subr.bf16.mxu1 %v7339_v34  ;;  %3287 = vmatpush1.bf16.msra.mxu0 %v7391_v44 }
 0x714   : > { %3288 = vmatprep.subr.bf16.mxu0 %v7396_v46 }
 0x715   : > { %2584 = vmatmul.mubr.bf16.gmra.mrb[20].mxu1 %v1959_v30 }
 0x716   : > { %2599 = vmatpush1.bf16.msra.mxu1 %v7337_v57  ;;  %2626 = vmatprep.mubr.bf16.mxu1 %v8304_v20 }
 0x717   : > { %2600 = vmatprep.subr.bf16.mxu1 %v7342_v58  ;;  %3289 = vmatpush1.bf16.msra.mxu0 %v7394_v48 }
 0x718   : > { %3290 = vmatprep.subr.bf16.mxu0 %v7399_v49 }
 0x71a   : > { %2601 = vmatpush1.bf16.msra.mxu1 %v7340_v32 }
 0x71b   : > { %2602 = vmatprep.subr.bf16.mxu1 %v7345_v59  ;;  %3291 = vmatpush1.bf16.msra.mxu0 %v7397_v50 }
 0x71c   : > { %3292 = vmatprep.subr.bf16.mxu0 %v7402_v52 }
 0x71e   : > { %2603 = vmatpush1.bf16.msra.mxu1 %v7343_v45 }
 0x71f   : > { %2604 = vmatprep.subr.bf16.mxu1 %v7348_v60  ;;  %3293 = vmatpush1.bf16.msra.mxu0 %v7400_v53 }
 0x720   : > { %3315 = vmatprep.subr.bf16.mxu0 %v7405_v54 }
 0x722   : > { %2605 = vmatpush1.bf16.msra.mxu1 %v7346_v61 }
 0x723   : > { %2606 = vmatprep.subr.bf16.mxu1 %v7351_v51 }
 0x726   : > { %2607 = vmatpush1.bf16.msra.mxu1 %v7349_v33 }
 0x727   : > { %2608 = vmatprep.subr.bf16.mxu1 %v7354_v62 }
 0x72a   : > { %2609 = vmatpush1.bf16.msra.mxu1 %v7352_v29 }
 0x72d   : > { %2627 = vmatmul.mubr.bf16.vlgmr.msra.gmra.mrb[16].mxu1 %v1989_v0 }
 0x72e   : > { %2636 = vmatprep.mubr.bf16.mxu1 %v8304_v20 }
 0x735   : > { %2637 = vmatmul.mubr.bf16.gmra.mrb[20].mxu1 %v1991_v2  ;;  %v2081_v2 = vrot.slane %v2076_v21, %v8744_v27 }
 0x800   : > { %v2628_v18 = vpop.f32.mrb[16].mxu1 }
 0x801   : > { %v2630_v56 = vpop.f32.mrb[17].mxu1  ;;  %v6794_v6 = vadd.f32 %v2628_v18, %v2081_v2  ;;  %v7403_v18 = vld [vmem:[#allocation13 + $0x600] ss:$8 sps:$4 sm:$0xff]  }
 0x802   : > { %v6795_v34 = vadd.f32 %v2630_v56, %v2085_v55  ;;  %v2632_v47 = vpop.f32.mrb[18].mxu1 }
 0x803   : > { %v2634_v57 = vpop.f32.mrb[19].mxu1  ;;  %v6796_v9 = vadd.f32 %v2632_v47, %v2081_v2 }
 0x804   : > { %v6335_v58 = vmul.f32 -1.442695, %v6795_v34  ;;  %v6797_v30 = vadd.f32 %v2634_v57, %v2085_v55  ;;  %v7408_v34 = vld [vmem:[#allocation13 + $0x614] ss:$8 sps:$4 sm:$0xff]  }
 0x806   : > { %7851 = vpow2.f32 %v6335_v58  ;;  %v6336_v32 = vmul.f32 -1.442695, %v6797_v30 }
 0x808   : > { %7853 = vpow2.f32 %v6336_v32  ;;  %v2638_v59 = vpop.f32.mrb[20].mxu1 }
 0x809   : > { %v2640_v45 = vpop.f32.mrb[21].mxu1  ;;  %v6798_v16 = vadd.f32 %v2638_v59, %v2081_v2 }
 0x80a   : > { %v6799_v60 = vadd.f32 %v2640_v45, %v2085_v55  ;;  %v2642_v61 = vpop.f32.mrb[22].mxu1  ;;  %v7406_v45 = vld [vmem:[#allocation13 + $0x610] ss:$8 sps:$4 sm:$0xff]  }
 0x80b   : > { %v2644_v51 = vpop.f32.mrb[23].mxu1  ;;  %v6800_v23 = vadd.f32 %v2642_v61, %v2081_v2  ;;  %v7415_v2 = vld [vmem:[#allocation13 + $0x640] ss:$8 sps:$4 sm:$0xff]  }
 0x80c   : > { %v6337_v33 = vmul.f32 -1.442695, %v6799_v60  ;;  %v6801_v62 = vadd.f32 %v2644_v51, %v2085_v55  ;;  %v7411_v51 = vld [vmem:[#allocation13 + $0x624] ss:$8 sps:$4 sm:$0xff]  }
 0x80e   : > { %7855 = vpow2.f32 %v6337_v33  ;;  %v6338_v31 = vmul.f32 -1.442695, %v6801_v62 }
 0x810   : > { %v7852_v29 = vpop.eup %7851  ;;  %7857 = vpow2.f32 %v6338_v31 }
 0x811   : > { %v2659_v42 = vadd.f32 1.0, %v7852_v29  ;;  %v7409_v29 = vld [vmem:[#allocation13 + $0x620] ss:$8 sps:$4 sm:$0xff]  }
 0x812   : > { %v7854_v63 = vpop.eup %7853 }
 0x813   : > { %7859 = vrcp.f32 %v2659_v42  ;;  %v2660_v0 = vadd.f32 1.0, %v7854_v63  ;;  %v7414_v42 = vld [vmem:[#allocation13 + $0x634] ss:$8 sps:$4 sm:$0xff]  }
 0x815   : > { %7861 = vrcp.f32 %v2660_v0  ;;  %v7412_v0 = vld [vmem:[#allocation13 + $0x630] ss:$8 sps:$4 sm:$0xff]  }
 0x818   : > { %v7856_v1 = vpop.eup %7855 }
 0x819   : > { %v2661_v3 = vadd.f32 1.0, %v7856_v1  ;;  %v7417_v1 = vld [vmem:[#allocation13 + $0x644] ss:$8 sps:$4 sm:$0xff]  }
 0x81a   : > { %v7858_v4 = vpop.eup %7857 }
 0x81b   : > { %7863 = vrcp.f32 %v2661_v3  ;;  %v2662_v5 = vadd.f32 1.0, %v7858_v4  ;;  %v7420_v3 = vld [vmem:[#allocation13 + $0x654] ss:$8 sps:$4 sm:$0xff]   ;;  %v7418_v4 = vld [vmem:[#allocation13 + $0x650] ss:$8 sps:$4 sm:$0xff]  }
 0x81d   : > { %v7860_v8 = vpop.eup %7859  ;;  %7865 = vrcp.f32 %v2662_v5  ;;  %v7423_v5 = vld [vmem:[#allocation13 + $0x664] ss:$8 sps:$4 sm:$0xff]  }
 0x81e   : > { %v2671_v41 = vmul.f32 %v7860_v8, %v6794_v6  ;;  %v7421_v6 = vld [vmem:[#allocation13 + $0x660] ss:$8 sps:$4 sm:$0xff]   ;;  %v7426_v8 = vld [vmem:[#allocation13 + $0x674] ss:$8 sps:$4 sm:$0xff]  }
 0x81f   : > { %v7862_v10 = vpop.eup %7861 }
 0x820   : > { %v2675_v11 = vadd.f32 %v2671_v41, %v8773_v36  ;;  %v2672_v12 = vmul.f32 %v7862_v10, %v6796_v9  ;;  %v7424_v41 = vld [vmem:[#allocation13 + $0x670] ss:$8 sps:$4 sm:$0xff]   ;;  %v7429_v9 = vld [vmem:[#allocation13 + $0x684] ss:$8 sps:$4 sm:$0xff]   ;;  %v7427_v10 = vld [vmem:[#allocation13 + $0x680] ss:$8 sps:$4 sm:$0xff]  }
 0x822   : > { %v2676_v13 = vadd.f32 %v8771_v35, %v2672_v12  ;;  %v8823_v14 = vmul.f32 0.70710677, %v2675_v11  ;;  %v7432_v11 = vld [vmem:[#allocation13 + $0x694] ss:$8 sps:$4 sm:$0xff]   ;;  %v7430_v12 = vld [vmem:[#allocation13 + $0x690] ss:$8 sps:$4 sm:$0xff]  }
 0x824   : > { %v8825_v15 = vmul.f32 0.70710677, %v2676_v13  ;;  %v7435_v13 = vld [vmem:[#allocation13 + $0x6a4] ss:$8 sps:$4 sm:$0xff]  }
 0x825   : > { %v7864_v17 = vpop.eup %7863 }
 0x826   : > { %v2683_v19 = vpack.c.bf16 %v8825_v15, %v8823_v14  ;;  %v2673_v22 = vmul.f32 %v7864_v17, %v6798_v16  ;;  %v7433_v16 = vld [vmem:[#allocation13 + $0x6a0] ss:$8 sps:$4 sm:$0xff]   ;;  %v7438_v17 = vld [vmem:[#allocation13 + $0x6b4] ss:$8 sps:$4 sm:$0xff]  }
 0x827   : > { %v7866_v24 = vpop.eup %7865 }
 0x828   : > { %v2687_v28 = vrot.slane %v2683_v19, 7  ;;  %v2677_v37 = vadd.f32 %v2673_v22, %v8779_v40  ;;  %v2674_v38 = vmul.f32 %v7866_v24, %v6800_v23  ;;  %v7436_v19 = vld [vmem:[#allocation13 + $0x6b0] ss:$8 sps:$4 sm:$0xff]   ;;  %v7441_v22 = vld [vmem:[#allocation13 + $0x6c4] ss:$8 sps:$4 sm:$0xff]  }
 0x829   : > { %v7439_v23 = vld [vmem:[#allocation13 + $0x6c0] ss:$8 sps:$4 sm:$0xff]   ;;  %v7444_v24 = vld [vmem:[#allocation13 + $0x6d4] ss:$8 sps:$4 sm:$0xff]  }
 0x82a   : > { %2693 = vst [vmem:[#allocation2] sm:$0xfe] %v2687_v28  ;;  %v2678_v36 = vadd.f32 %v8777_v39, %v2674_v38  ;;  %v8831_v35 = vmul.f32 0.70710677, %v2677_v37  ;;  %v7447_v38 = vld [vmem:[#allocation13 + $0x6e4] ss:$8 sps:$4 sm:$0xff]  }
 0x82c   : > { %v8833_v26 = vmul.f32 0.70710677, %v2678_v36 }
 0x82e   : > { %v2684_v25 = vpack.c.bf16 %v8833_v26, %v8831_v35 }
 0x830   : > { %v2688_v43 = vrot.slane %v2684_v25, 7 }
 0x831   : > { %v2698_v44 = vld [vmem:[#allocation2] sm:$0xff] }
 0x832   : > { %v8838_v46 = vsel %vm1912_vm15, %v2687_v28, %v2688_v43  ;;  %2695 = vst [vmem:[#allocation2 + $0x10] sm:$0x1] %v2688_v43  ;;  %v2707_v48 = vshll.u32 %v2698_v44, 16  ;;  %v8840_v49 = vld [vmem:[#allocation2] sm:$0xfe]  ;;  %v2705_v50 = vshrl.u32 %v2698_v44, 16 }
 0x833   : > { %v2712_v40 = vshll.u32 %v8838_v46, 16  ;;  %v2737_v53 = vshrl.u32 %v8840_v49, 16  ;;  %v2716_v21 = vshrl.u32 %v8838_v46, 16  ;;  %v2740_v55 = vshll.u32 %v8840_v49, 16  ;;  %v7442_v28 = vld [vmem:[#allocation13 + $0x6d0] ss:$8 sps:$4 sm:$0xff]  }
 0x834   : > { %v2709_v39 = vrot.slane %v2707_v48, 1  ;;  %v7445_v43 = vld [vmem:[#allocation13 + $0x6e0] ss:$8 sps:$4 sm:$0xff]  }
 0x835   : > { %v2714_v52 = vrot.slane %v2712_v40, 1  ;;  %v2739_v57 = vrot.slane %v2737_v53, 1  ;;  %v2742_v30 = vrot.slane %v2740_v55, 2  ;;  %v2744_v32 = vrot.slane %v2716_v21, 1  ;;  %v7456_v55 = vld [vmem:[#allocation13 + $0x714] ss:$8 sps:$4 sm:$0xff]  }
 0x836   : > { %v2710_v54 = vor.u32 %v2709_v39, %v2705_v50  ;;  %v2745_v59 = vrot.slane %v2712_v40, 2  ;;  %v7448_v50 = vld [vmem:[#allocation13 + $0x6f0] ss:$8 sps:$4 sm:$0xff]   ;;  %v7453_v39 = vld [vmem:[#allocation13 + $0x704] ss:$8 sps:$4 sm:$0xff]   ;;  %v2730_v53 = vrot.slane %v8838_v46, 1 }
 0x837   : > { %v2718_v60 = vor.u32 %v2716_v21, %v2714_v52  ;;  %v2743_v62 = vor.u32 %v2742_v30, %v2739_v57  ;;  %v7451_v21 = vld [vmem:[#allocation13 + $0x700] ss:$8 sps:$4 sm:$0xff]   ;;  %v7459_v57 = vld [vmem:[#allocation13 + $0x724] ss:$8 sps:$4 sm:$0xff]   ;;  %v7462_v30 = vld [vmem:[#allocation13 + $0x734] ss:$8 sps:$4 sm:$0xff]  }
 0x838   : > { %v2715_v56 = vsel %vm865_vm7, %v2710_v54, %v2714_v52  ;;  %v8851_v31 = vor.u32 %v2745_v59, %v2744_v32  ;;  %v2729_v52 = vrot.slane %v8840_v49, 1  ;;  %v7460_v59 = vld [vmem:[#allocation13 + $0x730] ss:$8 sps:$4 sm:$0xff]  }
 0x839   : > { %3294 = vmatprep.mubr.bf16.mxu0 %v2715_v56  ;;  %v8847_v47 = vld [vmem:[#allocation2 + $0x10] sm:$0x1] }
 0x83a   : > { %3295 = vmatmul.mubr.bf16.vlgmr.msra.gmra.mrb[12].mxu0 %v2698_v44  ;;  %v2720_v58 = vshll.u32 %v8847_v47, 16  ;;  %v2747_v63 = vsel %vm886_vm8, %v2743_v62, %v8851_v31  ;;  %v8856_v37 = vld [vmem:[#allocation2 + $0x10] sm:$0x3]  ;;  %v2732_v49 = vrot.slane %v8847_v47, 1  ;;  %v7471_v47 = vld [vmem:[#allocation13 + $0x764] ss:$8 sps:$4 sm:$0xff]  }
 0x83b   : > { %3316 = vmatpush1.bf16.msra.mxu0 %v7403_v18  ;;  %v2749_v36 = vshrl.u32 %v8856_v37, 16  ;;  %v2752_v25 = vshll.u32 %v8856_v37, 16  ;;  %v7450_v44 = vld [vmem:[#allocation13 + $0x6f4] ss:$8 sps:$4 sm:$0xff]   ;;  %v2731_v18 = vsel %vm881_vm9, %v2729_v52, %v2730_v53  ;;  %v7517_v52 = vld [vmem:[#allocation13 + $0x860] ss:$8 sps:$4 sm:$0xff]  }
 0x83c   : > { %v2722_v61 = vrot.slane %v2720_v58, 1  ;;  %3317 = vmatprep.subr.bf16.mxu0 %v7408_v34  ;;  %v7454_v34 = vld [vmem:[#allocation13 + $0x710] ss:$8 sps:$4 sm:$0xff]   ;;  %v7457_v58 = vld [vmem:[#allocation13 + $0x720] ss:$8 sps:$4 sm:$0xff]   ;;  %v2733_v32 = vsel %vm881_vm9, %v2730_v53, %v2732_v49 }
 0x83d   : > { %v2751_v48 = vrot.slane %v2749_v36, 1  ;;  %v2754_v40 = vrot.slane %v2752_v25, 2  ;;  %v7474_v62 = vld [vmem:[#allocation13 + $0x774] ss:$8 sps:$4 sm:$0xff]   ;;  %v7505_v36 = vld [vmem:[#allocation13 + $0x820] ss:$8 sps:$4 sm:$0xff]  }
 0x83e   : > { %v2723_v33 = vsel %vm865_vm7, %v2718_v60, %v2722_v61  ;;  %v7463_v60 = vld [vmem:[#allocation13 + $0x740] ss:$8 sps:$4 sm:$0xff]   ;;  %v7468_v61 = vld [vmem:[#allocation13 + $0x754] ss:$8 sps:$4 sm:$0xff]  }
 0x83f   : > { %3304 = vmatprep.mubr.bf16.mxu0 %v2723_v33  ;;  %3318 = vmatpush1.bf16.msra.mxu0 %v7406_v45  ;;  %v2755_v54 = vor.u32 %v2754_v40, %v2751_v48  ;;  %v7465_v45 = vld [vmem:[#allocation13 + $0x744] ss:$8 sps:$4 sm:$0xff]   ;;  %v7469_v33 = vld [vmem:[#allocation13 + $0x760] ss:$8 sps:$4 sm:$0xff]   ;;  %v7510_v25 = vld [vmem:[#allocation13 + $0x834] ss:$8 sps:$4 sm:$0xff]  }
 0x840   : > { %3319 = vmatprep.subr.bf16.mxu0 %v7411_v51  ;;  %v7466_v51 = vld [vmem:[#allocation13 + $0x750] ss:$8 sps:$4 sm:$0xff]   ;;  %v7511_v48 = vld [vmem:[#allocation13 + $0x840] ss:$8 sps:$4 sm:$0xff]   ;;  %v7516_v40 = vld [vmem:[#allocation13 + $0x854] ss:$8 sps:$4 sm:$0xff]  }
 0x841   : > { %v2756_v56 = vsel %vm886_vm8, %v8851_v31, %v2755_v54  ;;  %v2703_v31 = vld [vmem:[#allocation2] sm:$0xfc]  ;;  %v7522_v53 = vld [vmem:[#allocation13 + $0x874] ss:$8 sps:$4 sm:$0xff]  }
 0x842   : > { %3305 = vmatmul.mubr.bf16.gmra.mrb[16].mxu0 %v8838_v46  ;;  %v7520_v54 = vld [vmem:[#allocation13 + $0x870] ss:$8 sps:$4 sm:$0xff]  }
 0x843   : > { %3320 = vmatpush1.bf16.msra.mxu0 %v7409_v29  ;;  %3347 = vmatprep.mubr.bf16.mxu0 %v2747_v63  ;;  %v7472_v29 = vld [vmem:[#allocation13 + $0x770] ss:$8 sps:$4 sm:$0xff]   ;;  %v2762_v63 = vrot.slane %v8838_v46, 2  ;;  %v7483_v46 = vld [vmem:[#allocation13 + $0x7a4] ss:$8 sps:$4 sm:$0xff]  }
 0x844   : > { %3321 = vmatprep.subr.bf16.mxu0 %v7414_v42  ;;  %v2761_v42 = vrot.slane %v2703_v31, 2 }
 0x847   : > { %3322 = vmatpush1.bf16.msra.mxu0 %v7412_v0  ;;  %v2763_v0 = vsel %vm907_vm10, %v2761_v42, %v2762_v63 }
 0x848   : > { %3323 = vmatprep.subr.bf16.mxu0 %v7417_v1  ;;  %v2764_v1 = vrot.slane %v8856_v37, 2  ;;  %v7502_v37 = vld [vmem:[#allocation13 + $0x810] ss:$8 sps:$4 sm:$0xff]  }
 0x84b   : > { %3324 = vmatpush1.bf16.msra.mxu0 %v7415_v2  ;;  %v2765_v2 = vsel %vm907_vm10, %v2762_v63, %v2764_v1 }
 0x84c   : > { %3325 = vmatprep.subr.bf16.mxu0 %v7420_v3  ;;  %v7477_v3 = vld [vmem:[#allocation13 + $0x784] ss:$8 sps:$4 sm:$0xff]  }
 0x84d   : > { %4036 = vmatprep.subr.bf16.mxu1 %v7477_v3 }
 0x84f   : > { %3326 = vmatpush1.bf16.msra.mxu0 %v7418_v4  ;;  %v7475_v4 = vld [vmem:[#allocation13 + $0x780] ss:$8 sps:$4 sm:$0xff]  }
 0x850   : > { %3327 = vmatprep.subr.bf16.mxu0 %v7423_v5  ;;  %4037 = vmatpush1.bf16.msra.mxu1 %v7475_v4  ;;  %v7480_v5 = vld [vmem:[#allocation13 + $0x794] ss:$8 sps:$4 sm:$0xff]  }
 0x851   : > { %4038 = vmatprep.subr.bf16.mxu1 %v7480_v5 }
 0x853   : > { %3328 = vmatpush1.bf16.msra.mxu0 %v7421_v6  ;;  %v7478_v6 = vld [vmem:[#allocation13 + $0x790] ss:$8 sps:$4 sm:$0xff]  }
 0x854   : > { %3329 = vmatprep.subr.bf16.mxu0 %v7426_v8  ;;  %4039 = vmatpush1.bf16.msra.mxu1 %v7478_v6  ;;  %v7481_v8 = vld [vmem:[#allocation13 + $0x7a0] ss:$8 sps:$4 sm:$0xff]  }
 0x855   : > { %4040 = vmatprep.subr.bf16.mxu1 %v7483_v46 }
 0x857   : > { %3330 = vmatpush1.bf16.msra.mxu0 %v7424_v41  ;;  %v7486_v41 = vld [vmem:[#allocation13 + $0x7b4] ss:$8 sps:$4 sm:$0xff]  }
 0x858   : > { %3331 = vmatprep.subr.bf16.mxu0 %v7429_v9  ;;  %4041 = vmatpush1.bf16.msra.mxu1 %v7481_v8  ;;  %v7484_v9 = vld [vmem:[#allocation13 + $0x7b0] ss:$8 sps:$4 sm:$0xff]  }
 0x859   : > { %4042 = vmatprep.subr.bf16.mxu1 %v7486_v41 }
 0x85b   : > { %3332 = vmatpush1.bf16.msra.mxu0 %v7427_v10  ;;  %v7489_v10 = vld [vmem:[#allocation13 + $0x7c4] ss:$8 sps:$4 sm:$0xff]  }
 0x85c   : > { %3333 = vmatprep.subr.bf16.mxu0 %v7432_v11  ;;  %4043 = vmatpush1.bf16.msra.mxu1 %v7484_v9  ;;  %v7487_v11 = vld [vmem:[#allocation13 + $0x7c0] ss:$8 sps:$4 sm:$0xff]  }
 0x85d   : > { %4044 = vmatprep.subr.bf16.mxu1 %v7489_v10 }
 0x85f   : > { %3334 = vmatpush1.bf16.msra.mxu0 %v7430_v12  ;;  %v7492_v12 = vld [vmem:[#allocation13 + $0x7d4] ss:$8 sps:$4 sm:$0xff]  }
 0x860   : > { %3335 = vmatprep.subr.bf16.mxu0 %v7435_v13  ;;  %4045 = vmatpush1.bf16.msra.mxu1 %v7487_v11  ;;  %v7490_v13 = vld [vmem:[#allocation13 + $0x7d0] ss:$8 sps:$4 sm:$0xff]  }
 0x861   : > { %4046 = vmatprep.subr.bf16.mxu1 %v7492_v12 }
 0x863   : > { %3336 = vmatpush1.bf16.msra.mxu0 %v7433_v16  ;;  %v7495_v16 = vld [vmem:[#allocation13 + $0x7e4] ss:$8 sps:$4 sm:$0xff]  }
 0x864   : > { %3337 = vmatprep.subr.bf16.mxu0 %v7438_v17  ;;  %4047 = vmatpush1.bf16.msra.mxu1 %v7490_v13  ;;  %v7493_v17 = vld [vmem:[#allocation13 + $0x7e0] ss:$8 sps:$4 sm:$0xff]  }
 0x865   : > { %4048 = vmatprep.subr.bf16.mxu1 %v7495_v16 }
 0x867   : > { %3338 = vmatpush1.bf16.msra.mxu0 %v7436_v19  ;;  %v7498_v19 = vld [vmem:[#allocation13 + $0x7f4] ss:$8 sps:$4 sm:$0xff]  }
 0x868   : > { %3339 = vmatprep.subr.bf16.mxu0 %v7441_v22  ;;  %4049 = vmatpush1.bf16.msra.mxu1 %v7493_v17  ;;  %v7496_v22 = vld [vmem:[#allocation13 + $0x7f0] ss:$8 sps:$4 sm:$0xff]  }
 0x869   : > { %4050 = vmatprep.subr.bf16.mxu1 %v7498_v19 }
 0x86b   : > { %3340 = vmatpush1.bf16.msra.mxu0 %v7439_v23  ;;  %v7501_v23 = vld [vmem:[#allocation13 + $0x804] ss:$8 sps:$4 sm:$0xff]  }
 0x86c   : > { %3341 = vmatprep.subr.bf16.mxu0 %v7444_v24  ;;  %4051 = vmatpush1.bf16.msra.mxu1 %v7496_v22  ;;  %v7499_v24 = vld [vmem:[#allocation13 + $0x800] ss:$8 sps:$4 sm:$0xff]  }
 0x86d   : > { %4052 = vmatprep.subr.bf16.mxu1 %v7501_v23 }
 0x86f   : > { %3342 = vmatpush1.bf16.msra.mxu0 %v7442_v28  ;;  %v7504_v28 = vld [vmem:[#allocation13 + $0x814] ss:$8 sps:$4 sm:$0xff]  }
 0x870   : > { %3343 = vmatprep.subr.bf16.mxu0 %v7447_v38  ;;  %4053 = vmatpush1.bf16.msra.mxu1 %v7499_v24  ;;  %v7507_v38 = vld [vmem:[#allocation13 + $0x824] ss:$8 sps:$4 sm:$0xff]  }
 0x871   : > { %4054 = vmatprep.subr.bf16.mxu1 %v7504_v28 }
 0x873   : > { %3344 = vmatpush1.bf16.msra.mxu0 %v7445_v43  ;;  %v7508_v43 = vld [vmem:[#allocation13 + $0x830] ss:$8 sps:$4 sm:$0xff]  }
 0x874   : > { %3345 = vmatprep.subr.bf16.mxu0 %v7450_v44  ;;  %4055 = vmatpush1.bf16.msra.mxu1 %v7502_v37  ;;  %v7513_v44 = vld [vmem:[#allocation13 + $0x844] ss:$8 sps:$4 sm:$0xff]  }
 0x875   : > { %4056 = vmatprep.subr.bf16.mxu1 %v7507_v38 }
 0x877   : > { %3346 = vmatpush1.bf16.msra.mxu0 %v7448_v50  ;;  %v7514_v50 = vld [vmem:[#allocation13 + $0x850] ss:$8 sps:$4 sm:$0xff]  }
 0x878   : > { %3368 = vmatprep.subr.bf16.mxu0 %v7453_v39  ;;  %4057 = vmatpush1.bf16.msra.mxu1 %v7505_v36  ;;  %v7519_v39 = vld [vmem:[#allocation13 + $0x864] ss:$8 sps:$4 sm:$0xff]  }
 0x879   : > { %4058 = vmatprep.subr.bf16.mxu1 %v7510_v25 }
 0x87a   : > { %3348 = vmatmul.mubr.bf16.vlgmr.msra.gmra.mrb[12].mxu0 %v2731_v18 }
 0x87b   : > { %3357 = vmatprep.mubr.bf16.mxu0 %v2756_v56  ;;  %3369 = vmatpush1.bf16.msra.mxu0 %v7451_v21  ;;  %v7525_v21 = vld [vmem:[#allocation13 + $0x884] ss:$8 sps:$4 sm:$0xff]  }
 0x87c   : > { %3370 = vmatprep.subr.bf16.mxu0 %v7456_v55  ;;  %4059 = vmatpush1.bf16.msra.mxu1 %v7508_v43  ;;  %v2850_v55 = vld [vmem:[#allocation15 + $0x4] sm:$0x3] }
 0x87d   : > { %4060 = vmatprep.subr.bf16.mxu1 %v7513_v44  ;;  %v2859_v18 = vrot.slane %v2850_v55, %v8740_v7 }
 0x87f   : > { %3371 = vmatpush1.bf16.msra.mxu0 %v7454_v34 }
 0x880   : > { %3372 = vmatprep.subr.bf16.mxu0 %v7459_v57  ;;  %4061 = vmatpush1.bf16.msra.mxu1 %v7511_v48 }
 0x881   : > { %4062 = vmatprep.subr.bf16.mxu1 %v7516_v40 }
 0x882   : > { %3358 = vmatmul.mubr.bf16.gmra.mrb[16].mxu0 %v2733_v32 }
 0x883   : > { %3373 = vmatpush1.bf16.msra.mxu0 %v7457_v58  ;;  %3400 = vmatprep.mubr.bf16.mxu0 %v8304_v20 }
 0x884   : > { %3374 = vmatprep.subr.bf16.mxu0 %v7462_v30  ;;  %4063 = vmatpush1.bf16.msra.mxu1 %v7514_v50 }
 0x885   : > { %4064 = vmatprep.subr.bf16.mxu1 %v7519_v39 }
 0x887   : > { %3375 = vmatpush1.bf16.msra.mxu0 %v7460_v59 }
 0x888   : > { %3376 = vmatprep.subr.bf16.mxu0 %v7465_v45  ;;  %4065 = vmatpush1.bf16.msra.mxu1 %v7517_v52 }
 0x889   : > { %4066 = vmatprep.subr.bf16.mxu1 %v7522_v53 }
 0x88b   : > { %3377 = vmatpush1.bf16.msra.mxu0 %v7463_v60 }
 0x88c   : > { %3378 = vmatprep.subr.bf16.mxu0 %v7468_v61  ;;  %4067 = vmatpush1.bf16.msra.mxu1 %v7520_v54 }
 0x88d   : > { %4089 = vmatprep.subr.bf16.mxu1 %v7525_v21 }
 0x88f   : > { %3379 = vmatpush1.bf16.msra.mxu0 %v7466_v51 }
 0x890   : > { %3380 = vmatprep.subr.bf16.mxu0 %v7471_v47 }
 0x893   : > { %3381 = vmatpush1.bf16.msra.mxu0 %v7469_v33 }
 0x894   : > { %3382 = vmatprep.subr.bf16.mxu0 %v7474_v62 }
 0x897   : > { %3383 = vmatpush1.bf16.msra.mxu0 %v7472_v29 }
 0x89a   : > { %3401 = vmatmul.mubr.bf16.vlgmr.msra.gmra.mrb[12].mxu0 %v2763_v0 }
 0x89b   : > { %3410 = vmatprep.mubr.bf16.mxu0 %v8304_v20 }
 0x8a2   : > { %3411 = vmatmul.mubr.bf16.gmra.mrb[16].mxu0 %v2765_v2  ;;  %v2855_v2 = vrot.slane %v2850_v55, %v8744_v27 }
 0x96d   : > { %v3402_v56 = vpop.f32.mrb[12].mxu0 }
 0x96e   : > { %v3404_v34 = vpop.f32.mrb[13].mxu0  ;;  %v6802_v6 = vadd.f32 %v3402_v56, %v2855_v2  ;;  %v7523_v56 = vld [vmem:[#allocation13 + $0x880] ss:$8 sps:$4 sm:$0xff]  }
 0x96f   : > { %v6803_v57 = vadd.f32 %v3404_v34, %v2859_v18  ;;  %v3406_v49 = vpop.f32.mrb[14].mxu0 }
 0x970   : > { %v3408_v58 = vpop.f32.mrb[15].mxu0  ;;  %v6804_v41 = vadd.f32 %v3406_v49, %v2855_v2 }
 0x971   : > { %v6419_v30 = vmul.f32 -1.442695, %v6803_v57  ;;  %v6805_v32 = vadd.f32 %v3408_v58, %v2859_v18  ;;  %v7528_v57 = vld [vmem:[#allocation13 + $0x894] ss:$8 sps:$4 sm:$0xff]  }
 0x973   : > { %7867 = vpow2.f32 %v6419_v30  ;;  %v6420_v59 = vmul.f32 -1.442695, %v6805_v32 }
 0x975   : > { %7869 = vpow2.f32 %v6420_v59  ;;  %v3412_v45 = vpop.f32.mrb[16].mxu0 }
 0x976   : > { %v3414_v60 = vpop.f32.mrb[17].mxu0  ;;  %v6806_v17 = vadd.f32 %v3412_v45, %v2855_v2 }
 0x977   : > { %v6807_v61 = vadd.f32 %v3414_v60, %v2859_v18  ;;  %v3416_v51 = vpop.f32.mrb[18].mxu0  ;;  %v7526_v60 = vld [vmem:[#allocation13 + $0x890] ss:$8 sps:$4 sm:$0xff]  }
 0x978   : > { %v3418_v47 = vpop.f32.mrb[19].mxu0  ;;  %v6808_v24 = vadd.f32 %v3416_v51, %v2855_v2  ;;  %v7535_v2 = vld [vmem:[#allocation13 + $0x8c0] ss:$8 sps:$4 sm:$0xff]  }
 0x979   : > { %v6421_v33 = vmul.f32 -1.442695, %v6807_v61  ;;  %v6809_v62 = vadd.f32 %v3418_v47, %v2859_v18  ;;  %v7531_v47 = vld [vmem:[#allocation13 + $0x8a4] ss:$8 sps:$4 sm:$0xff]  }
 0x97b   : > { %7871 = vpow2.f32 %v6421_v33  ;;  %v6422_v31 = vmul.f32 -1.442695, %v6809_v62 }
 0x97d   : > { %v7868_v29 = vpop.eup %7867  ;;  %7873 = vpow2.f32 %v6422_v31 }
 0x97e   : > { %v3433_v42 = vadd.f32 1.0, %v7868_v29  ;;  %v7529_v29 = vld [vmem:[#allocation13 + $0x8a0] ss:$8 sps:$4 sm:$0xff]  }
 0x97f   : > { %v7870_v63 = vpop.eup %7869 }
 0x980   : > { %7875 = vrcp.f32 %v3433_v42  ;;  %v3434_v0 = vadd.f32 1.0, %v7870_v63  ;;  %v7534_v42 = vld [vmem:[#allocation13 + $0x8b4] ss:$8 sps:$4 sm:$0xff]  }
 0x982   : > { %7877 = vrcp.f32 %v3434_v0  ;;  %v7532_v0 = vld [vmem:[#allocation13 + $0x8b0] ss:$8 sps:$4 sm:$0xff]  }
 0x985   : > { %v7872_v1 = vpop.eup %7871 }
 0x986   : > { %v3435_v3 = vadd.f32 1.0, %v7872_v1  ;;  %v7537_v1 = vld [vmem:[#allocation13 + $0x8c4] ss:$8 sps:$4 sm:$0xff]  }
 0x987   : > { %v7874_v4 = vpop.eup %7873 }
 0x988   : > { %7879 = vrcp.f32 %v3435_v3  ;;  %v3436_v5 = vadd.f32 1.0, %v7874_v4  ;;  %v7540_v3 = vld [vmem:[#allocation13 + $0x8d4] ss:$8 sps:$4 sm:$0xff]   ;;  %v7538_v4 = vld [vmem:[#allocation13 + $0x8d0] ss:$8 sps:$4 sm:$0xff]  }
 0x98a   : > { %v7876_v46 = vpop.eup %7875  ;;  %7881 = vrcp.f32 %v3436_v5  ;;  %v7543_v5 = vld [vmem:[#allocation13 + $0x8e4] ss:$8 sps:$4 sm:$0xff]  }
 0x98b   : > { %v3445_v8 = vmul.f32 %v7876_v46, %v6802_v6  ;;  %v7541_v6 = vld [vmem:[#allocation13 + $0x8e0] ss:$8 sps:$4 sm:$0xff]   ;;  %v7546_v46 = vld [vmem:[#allocation13 + $0x8f4] ss:$8 sps:$4 sm:$0xff]  }
 0x98c   : > { %v7878_v9 = vpop.eup %7877 }
 0x98d   : > { %v3449_v10 = vadd.f32 %v3445_v8, %v8823_v14  ;;  %v3446_v11 = vmul.f32 %v7878_v9, %v6804_v41  ;;  %v7544_v8 = vld [vmem:[#allocation13 + $0x8f0] ss:$8 sps:$4 sm:$0xff]   ;;  %v7549_v41 = vld [vmem:[#allocation13 + $0x904] ss:$8 sps:$4 sm:$0xff]   ;;  %v7547_v9 = vld [vmem:[#allocation13 + $0x900] ss:$8 sps:$4 sm:$0xff]  }
 0x98f   : > { %v3450_v12 = vadd.f32 %v3446_v11, %v8825_v15  ;;  %v8877_v13 = vmul.f32 0.70710677, %v3449_v10  ;;  %v7552_v10 = vld [vmem:[#allocation13 + $0x914] ss:$8 sps:$4 sm:$0xff]   ;;  %v7550_v11 = vld [vmem:[#allocation13 + $0x910] ss:$8 sps:$4 sm:$0xff]  }
 0x991   : > { %v8879_v16 = vmul.f32 0.70710677, %v3450_v12  ;;  %v7555_v12 = vld [vmem:[#allocation13 + $0x924] ss:$8 sps:$4 sm:$0xff]  }
 0x992   : > { %v7880_v19 = vpop.eup %7879 }
 0x993   : > { %v3457_v22 = vpack.c.bf16 %v8879_v16, %v8877_v13  ;;  %v3447_v23 = vmul.f32 %v7880_v19, %v6806_v17  ;;  %v7553_v17 = vld [vmem:[#allocation13 + $0x920] ss:$8 sps:$4 sm:$0xff]   ;;  %v7558_v19 = vld [vmem:[#allocation13 + $0x934] ss:$8 sps:$4 sm:$0xff]  }
 0x994   : > { %v7882_v28 = vpop.eup %7881 }
 0x995   : > { %v3461_v37 = vrot.slane %v3457_v22, 7  ;;  %v3451_v38 = vadd.f32 %v3447_v23, %v8831_v35  ;;  %v3448_v36 = vmul.f32 %v7882_v28, %v6808_v24  ;;  %v7556_v22 = vld [vmem:[#allocation13 + $0x930] ss:$8 sps:$4 sm:$0xff]   ;;  %v7561_v23 = vld [vmem:[#allocation13 + $0x944] ss:$8 sps:$4 sm:$0xff]  }
 0x996   : > { %v7559_v24 = vld [vmem:[#allocation13 + $0x940] ss:$8 sps:$4 sm:$0xff]   ;;  %v7564_v28 = vld [vmem:[#allocation13 + $0x954] ss:$8 sps:$4 sm:$0xff]  }
 0x997   : > { %3467 = vst [vmem:[#allocation2] sm:$0xfe] %v3461_v37  ;;  %v3452_v14 = vadd.f32 %v3448_v36, %v8833_v26  ;;  %v8885_v15 = vmul.f32 0.70710677, %v3451_v38  ;;  %v7567_v36 = vld [vmem:[#allocation13 + $0x964] ss:$8 sps:$4 sm:$0xff]  }
 0x999   : > { %v8887_v25 = vmul.f32 0.70710677, %v3452_v14 }
 0x99b   : > { %v3458_v43 = vpack.c.bf16 %v8887_v25, %v8885_v15 }
 0x99d   : > { %v3462_v44 = vrot.slane %v3458_v43, 7 }
 0x99e   : > { %v3472_v48 = vld [vmem:[#allocation2] sm:$0xff] }
 0x99f   : > { %v8892_v40 = vsel %vm1912_vm15, %v3461_v37, %v3462_v44  ;;  %3469 = vst [vmem:[#allocation2 + $0x10] sm:$0x1] %v3462_v44  ;;  %v3481_v50 = vshll.u32 %v3472_v48, 16  ;;  %v8894_v39 = vld [vmem:[#allocation2] sm:$0xfe]  ;;  %v3479_v52 = vshrl.u32 %v3472_v48, 16 }
 0x9a0   : > { %v3486_v35 = vshll.u32 %v8892_v40, 16  ;;  %v3511_v54 = vshrl.u32 %v8894_v39, 16  ;;  %v3490_v55 = vshrl.u32 %v8892_v40, 16  ;;  %v3514_v18 = vshll.u32 %v8894_v39, 16  ;;  %v7562_v37 = vld [vmem:[#allocation13 + $0x950] ss:$8 sps:$4 sm:$0xff]  }
 0x9a1   : > { %v3483_v26 = vrot.slane %v3481_v50, 1  ;;  %v7565_v44 = vld [vmem:[#allocation13 + $0x960] ss:$8 sps:$4 sm:$0xff]  }
 0x9a2   : > { %v3488_v53 = vrot.slane %v3486_v35, 1  ;;  %v3513_v58 = vrot.slane %v3511_v54, 1  ;;  %v3516_v32 = vrot.slane %v3514_v18, 2  ;;  %v3518_v59 = vrot.slane %v3490_v55, 1  ;;  %v7576_v18 = vld [vmem:[#allocation13 + $0x994] ss:$8 sps:$4 sm:$0xff]  }
 0x9a3   : > { %v3484_v21 = vor.u32 %v3483_v26, %v3479_v52  ;;  %v3519_v45 = vrot.slane %v3486_v35, 2  ;;  %v7568_v52 = vld [vmem:[#allocation13 + $0x970] ss:$8 sps:$4 sm:$0xff]   ;;  %v7573_v26 = vld [vmem:[#allocation13 + $0x984] ss:$8 sps:$4 sm:$0xff]   ;;  %v3504_v54 = vrot.slane %v8892_v40, 1 }
 0x9a4   : > { %v3492_v61 = vor.u32 %v3490_v55, %v3488_v53  ;;  %v3517_v62 = vor.u32 %v3516_v32, %v3513_v58  ;;  %v7571_v55 = vld [vmem:[#allocation13 + $0x980] ss:$8 sps:$4 sm:$0xff]   ;;  %v7579_v58 = vld [vmem:[#allocation13 + $0x9a4] ss:$8 sps:$4 sm:$0xff]   ;;  %v7582_v32 = vld [vmem:[#allocation13 + $0x9b4] ss:$8 sps:$4 sm:$0xff]  }
 0x9a5   : > { %v3489_v34 = vsel %vm865_vm7, %v3484_v21, %v3488_v53  ;;  %v8905_v31 = vor.u32 %v3519_v45, %v3518_v59  ;;  %v3503_v53 = vrot.slane %v8894_v39, 1  ;;  %v7580_v45 = vld [vmem:[#allocation13 + $0x9b0] ss:$8 sps:$4 sm:$0xff]  }
 0x9a6   : > { %4068 = vmatprep.mubr.bf16.mxu1 %v3489_v34  ;;  %v8901_v49 = vld [vmem:[#allocation2 + $0x10] sm:$0x1] }
 0x9a7   : > { %4069 = vmatmul.mubr.bf16.vlgmr.msra.gmra.mrb[24].mxu1 %v3472_v48  ;;  %v3494_v30 = vshll.u32 %v8901_v49, 16  ;;  %v3521_v63 = vsel %vm886_vm8, %v3517_v62, %v8905_v31  ;;  %v8910_v38 = vld [vmem:[#allocation2 + $0x10] sm:$0x3]  ;;  %v3506_v39 = vrot.slane %v8901_v49, 1  ;;  %v7591_v49 = vld [vmem:[#allocation13 + $0x9e4] ss:$8 sps:$4 sm:$0xff]  }
 0x9a8   : > { %4090 = vmatpush1.bf16.msra.mxu1 %v7523_v56  ;;  %v3523_v14 = vshrl.u32 %v8910_v38, 16  ;;  %v3526_v43 = vshll.u32 %v8910_v38, 16  ;;  %v7570_v48 = vld [vmem:[#allocation13 + $0x974] ss:$8 sps:$4 sm:$0xff]   ;;  %v3505_v56 = vsel %vm881_vm9, %v3503_v53, %v3504_v54  ;;  %v7637_v53 = vld [vmem:[#allocation13 + $0xae0] ss:$8 sps:$4 sm:$0xff]  }
 0x9a9   : > { %v3496_v51 = vrot.slane %v3494_v30, 1  ;;  %4091 = vmatprep.subr.bf16.mxu1 %v7528_v57  ;;  %v7574_v57 = vld [vmem:[#allocation13 + $0x990] ss:$8 sps:$4 sm:$0xff]   ;;  %v7577_v30 = vld [vmem:[#allocation13 + $0x9a0] ss:$8 sps:$4 sm:$0xff]   ;;  %v3507_v59 = vsel %vm881_vm9, %v3504_v54, %v3506_v39 }
 0x9aa   : > { %v3525_v50 = vrot.slane %v3523_v14, 1  ;;  %v3528_v35 = vrot.slane %v3526_v43, 2  ;;  %v7594_v62 = vld [vmem:[#allocation13 + $0x9f4] ss:$8 sps:$4 sm:$0xff]   ;;  %v7625_v14 = vld [vmem:[#allocation13 + $0xaa0] ss:$8 sps:$4 sm:$0xff]  }
 0x9ab   : > { %v3497_v33 = vsel %vm865_vm7, %v3492_v61, %v3496_v51  ;;  %v7583_v61 = vld [vmem:[#allocation13 + $0x9c0] ss:$8 sps:$4 sm:$0xff]   ;;  %v7588_v51 = vld [vmem:[#allocation13 + $0x9d4] ss:$8 sps:$4 sm:$0xff]  }
 0x9ac   : > { %4078 = vmatprep.mubr.bf16.mxu1 %v3497_v33  ;;  %4092 = vmatpush1.bf16.msra.mxu1 %v7526_v60  ;;  %v3529_v21 = vor.u32 %v3528_v35, %v3525_v50  ;;  %v7585_v60 = vld [vmem:[#allocation13 + $0x9c4] ss:$8 sps:$4 sm:$0xff]   ;;  %v7589_v33 = vld [vmem:[#allocation13 + $0x9e0] ss:$8 sps:$4 sm:$0xff]   ;;  %v7630_v43 = vld [vmem:[#allocation13 + $0xab4] ss:$8 sps:$4 sm:$0xff]  }
 0x9ad   : > { %4093 = vmatprep.subr.bf16.mxu1 %v7531_v47  ;;  %v7586_v47 = vld [vmem:[#allocation13 + $0x9d0] ss:$8 sps:$4 sm:$0xff]   ;;  %v7631_v50 = vld [vmem:[#allocation13 + $0xac0] ss:$8 sps:$4 sm:$0xff]   ;;  %v7636_v35 = vld [vmem:[#allocation13 + $0xad4] ss:$8 sps:$4 sm:$0xff]  }
 0x9ae   : > { %v3530_v34 = vsel %vm886_vm8, %v8905_v31, %v3529_v21  ;;  %v3477_v31 = vld [vmem:[#allocation2] sm:$0xfc]  ;;  %v7642_v54 = vld [vmem:[#allocation13 + $0xaf4] ss:$8 sps:$4 sm:$0xff]  }
 0x9af   : > { %4079 = vmatmul.mubr.bf16.gmra.mrb[28].mxu1 %v8892_v40  ;;  %v7640_v21 = vld [vmem:[#allocation13 + $0xaf0] ss:$8 sps:$4 sm:$0xff]  }
 0x9b0   : > { %4094 = vmatpush1.bf16.msra.mxu1 %v7529_v29  ;;  %4121 = vmatprep.mubr.bf16.mxu1 %v3521_v63  ;;  %v7592_v29 = vld [vmem:[#allocation13 + $0x9f0] ss:$8 sps:$4 sm:$0xff]   ;;  %v3536_v63 = vrot.slane %v8892_v40, 2  ;;  %v7603_v40 = vld [vmem:[#allocation13 + $0xa24] ss:$8 sps:$4 sm:$0xff]  }
 0x9b1   : > { %4095 = vmatprep.subr.bf16.mxu1 %v7534_v42  ;;  %v3535_v42 = vrot.slane %v3477_v31, 2 }
 0x9b4   : > { %4096 = vmatpush1.bf16.msra.mxu1 %v7532_v0  ;;  %v3537_v0 = vsel %vm907_vm10, %v3535_v42, %v3536_v63 }
 0x9b5   : > { %4097 = vmatprep.subr.bf16.mxu1 %v7537_v1  ;;  %v3538_v1 = vrot.slane %v8910_v38, 2  ;;  %v7622_v38 = vld [vmem:[#allocation13 + $0xa90] ss:$8 sps:$4 sm:$0xff]  }
 0x9b8   : > { %4098 = vmatpush1.bf16.msra.mxu1 %v7535_v2  ;;  %v3539_v2 = vsel %vm907_vm10, %v3536_v63, %v3538_v1 }
 0x9b9   : > { %4099 = vmatprep.subr.bf16.mxu1 %v7540_v3  ;;  %v7597_v3 = vld [vmem:[#allocation13 + $0xa04] ss:$8 sps:$4 sm:$0xff]  }
 0x9ba   : > { %4810 = vmatprep.subr.bf16.mxu0 %v7597_v3 }
 0x9bc   : > { %4100 = vmatpush1.bf16.msra.mxu1 %v7538_v4  ;;  %v7595_v4 = vld [vmem:[#allocation13 + $0xa00] ss:$8 sps:$4 sm:$0xff]  }
 0x9bd   : > { %4101 = vmatprep.subr.bf16.mxu1 %v7543_v5  ;;  %4811 = vmatpush1.bf16.msra.mxu0 %v7595_v4  ;;  %v7600_v5 = vld [vmem:[#allocation13 + $0xa14] ss:$8 sps:$4 sm:$0xff]  }
 0x9be   : > { %4812 = vmatprep.subr.bf16.mxu0 %v7600_v5 }
 0x9c0   : > { %4102 = vmatpush1.bf16.msra.mxu1 %v7541_v6  ;;  %v7598_v6 = vld [vmem:[#allocation13 + $0xa10] ss:$8 sps:$4 sm:$0xff]  }
 0x9c1   : > { %4103 = vmatprep.subr.bf16.mxu1 %v7546_v46  ;;  %4813 = vmatpush1.bf16.msra.mxu0 %v7598_v6  ;;  %v7601_v46 = vld [vmem:[#allocation13 + $0xa20] ss:$8 sps:$4 sm:$0xff]  }
 0x9c2   : > { %4814 = vmatprep.subr.bf16.mxu0 %v7603_v40 }
 0x9c4   : > { %4104 = vmatpush1.bf16.msra.mxu1 %v7544_v8  ;;  %v7606_v8 = vld [vmem:[#allocation13 + $0xa34] ss:$8 sps:$4 sm:$0xff]  }
 0x9c5   : > { %4105 = vmatprep.subr.bf16.mxu1 %v7549_v41  ;;  %4815 = vmatpush1.bf16.msra.mxu0 %v7601_v46  ;;  %v7604_v41 = vld [vmem:[#allocation13 + $0xa30] ss:$8 sps:$4 sm:$0xff]  }
 0x9c6   : > { %4816 = vmatprep.subr.bf16.mxu0 %v7606_v8 }
 0x9c8   : > { %4106 = vmatpush1.bf16.msra.mxu1 %v7547_v9  ;;  %v7609_v9 = vld [vmem:[#allocation13 + $0xa44] ss:$8 sps:$4 sm:$0xff]  }
 0x9c9   : > { %4107 = vmatprep.subr.bf16.mxu1 %v7552_v10  ;;  %4817 = vmatpush1.bf16.msra.mxu0 %v7604_v41  ;;  %v7607_v10 = vld [vmem:[#allocation13 + $0xa40] ss:$8 sps:$4 sm:$0xff]  }
 0x9ca   : > { %4818 = vmatprep.subr.bf16.mxu0 %v7609_v9 }
 0x9cc   : > { %4108 = vmatpush1.bf16.msra.mxu1 %v7550_v11  ;;  %v7612_v11 = vld [vmem:[#allocation13 + $0xa54] ss:$8 sps:$4 sm:$0xff]  }
 0x9cd   : > { %4109 = vmatprep.subr.bf16.mxu1 %v7555_v12  ;;  %4819 = vmatpush1.bf16.msra.mxu0 %v7607_v10  ;;  %v7610_v12 = vld [vmem:[#allocation13 + $0xa50] ss:$8 sps:$4 sm:$0xff]  }
 0x9ce   : > { %4820 = vmatprep.subr.bf16.mxu0 %v7612_v11 }
 0x9d0   : > { %4110 = vmatpush1.bf16.msra.mxu1 %v7553_v17  ;;  %v7615_v17 = vld [vmem:[#allocation13 + $0xa64] ss:$8 sps:$4 sm:$0xff]  }
 0x9d1   : > { %4111 = vmatprep.subr.bf16.mxu1 %v7558_v19  ;;  %4821 = vmatpush1.bf16.msra.mxu0 %v7610_v12  ;;  %v7613_v19 = vld [vmem:[#allocation13 + $0xa60] ss:$8 sps:$4 sm:$0xff]  }
 0x9d2   : > { %4822 = vmatprep.subr.bf16.mxu0 %v7615_v17 }
 0x9d4   : > { %4112 = vmatpush1.bf16.msra.mxu1 %v7556_v22  ;;  %v7618_v22 = vld [vmem:[#allocation13 + $0xa74] ss:$8 sps:$4 sm:$0xff]  }
 0x9d5   : > { %4113 = vmatprep.subr.bf16.mxu1 %v7561_v23  ;;  %4823 = vmatpush1.bf16.msra.mxu0 %v7613_v19  ;;  %v7616_v23 = vld [vmem:[#allocation13 + $0xa70] ss:$8 sps:$4 sm:$0xff]  }
 0x9d6   : > { %4824 = vmatprep.subr.bf16.mxu0 %v7618_v22 }
 0x9d8   : > { %4114 = vmatpush1.bf16.msra.mxu1 %v7559_v24  ;;  %v7621_v24 = vld [vmem:[#allocation13 + $0xa84] ss:$8 sps:$4 sm:$0xff]  }
 0x9d9   : > { %4115 = vmatprep.subr.bf16.mxu1 %v7564_v28  ;;  %4825 = vmatpush1.bf16.msra.mxu0 %v7616_v23  ;;  %v7619_v28 = vld [vmem:[#allocation13 + $0xa80] ss:$8 sps:$4 sm:$0xff]  }
 0x9da   : > { %4826 = vmatprep.subr.bf16.mxu0 %v7621_v24 }
 0x9dc   : > { %4116 = vmatpush1.bf16.msra.mxu1 %v7562_v37  ;;  %v7624_v37 = vld [vmem:[#allocation13 + $0xa94] ss:$8 sps:$4 sm:$0xff]  }
 0x9dd   : > { %4117 = vmatprep.subr.bf16.mxu1 %v7567_v36  ;;  %4827 = vmatpush1.bf16.msra.mxu0 %v7619_v28  ;;  %v7627_v36 = vld [vmem:[#allocation13 + $0xaa4] ss:$8 sps:$4 sm:$0xff]  }
 0x9de   : > { %4828 = vmatprep.subr.bf16.mxu0 %v7624_v37 }
 0x9e0   : > { %4118 = vmatpush1.bf16.msra.mxu1 %v7565_v44  ;;  %v7628_v44 = vld [vmem:[#allocation13 + $0xab0] ss:$8 sps:$4 sm:$0xff]  }
 0x9e1   : > { %4119 = vmatprep.subr.bf16.mxu1 %v7570_v48  ;;  %4829 = vmatpush1.bf16.msra.mxu0 %v7622_v38  ;;  %v7633_v48 = vld [vmem:[#allocation13 + $0xac4] ss:$8 sps:$4 sm:$0xff]  }
 0x9e2   : > { %4830 = vmatprep.subr.bf16.mxu0 %v7627_v36 }
 0x9e4   : > { %4120 = vmatpush1.bf16.msra.mxu1 %v7568_v52  ;;  %v7634_v52 = vld [vmem:[#allocation13 + $0xad0] ss:$8 sps:$4 sm:$0xff]  }
 0x9e5   : > { %4142 = vmatprep.subr.bf16.mxu1 %v7573_v26  ;;  %4831 = vmatpush1.bf16.msra.mxu0 %v7625_v14  ;;  %v7639_v26 = vld [vmem:[#allocation13 + $0xae4] ss:$8 sps:$4 sm:$0xff]  }
 0x9e6   : > { %4832 = vmatprep.subr.bf16.mxu0 %v7630_v43 }
 0x9e7   : > { %4122 = vmatmul.mubr.bf16.vlgmr.msra.gmra.mrb[24].mxu1 %v3505_v56 }
 0x9e8   : > { %4131 = vmatprep.mubr.bf16.mxu1 %v3530_v34  ;;  %4143 = vmatpush1.bf16.msra.mxu1 %v7571_v55  ;;  %v7645_v55 = vld [vmem:[#allocation13 + $0xb04] ss:$8 sps:$4 sm:$0xff]  }
 0x9e9   : > { %4144 = vmatprep.subr.bf16.mxu1 %v7576_v18  ;;  %4833 = vmatpush1.bf16.msra.mxu0 %v7628_v44  ;;  %v3624_v18 = vld [vmem:[#allocation15 + $0x6] sm:$0x3] }
 0x9ea   : > { %4834 = vmatprep.subr.bf16.mxu0 %v7633_v48  ;;  %v3633_v56 = vrot.slane %v3624_v18, %v8740_v7 }
 0x9ec   : > { %4145 = vmatpush1.bf16.msra.mxu1 %v7574_v57 }
 0x9ed   : > { %4146 = vmatprep.subr.bf16.mxu1 %v7579_v58  ;;  %4835 = vmatpush1.bf16.msra.mxu0 %v7631_v50 }
 0x9ee   : > { %4836 = vmatprep.subr.bf16.mxu0 %v7636_v35 }
 0x9ef   : > { %4132 = vmatmul.mubr.bf16.gmra.mrb[28].mxu1 %v3507_v59 }
 0x9f0   : > { %4147 = vmatpush1.bf16.msra.mxu1 %v7577_v30  ;;  %4174 = vmatprep.mubr.bf16.mxu1 %v8304_v20 }
 0x9f1   : > { %4148 = vmatprep.subr.bf16.mxu1 %v7582_v32  ;;  %4837 = vmatpush1.bf16.msra.mxu0 %v7634_v52 }
 0x9f2   : > { %4838 = vmatprep.subr.bf16.mxu0 %v7639_v26 }
 0x9f4   : > { %4149 = vmatpush1.bf16.msra.mxu1 %v7580_v45 }
 0x9f5   : > { %4150 = vmatprep.subr.bf16.mxu1 %v7585_v60  ;;  %4839 = vmatpush1.bf16.msra.mxu0 %v7637_v53 }
 0x9f6   : > { %4840 = vmatprep.subr.bf16.mxu0 %v7642_v54 }
 0x9f8   : > { %4151 = vmatpush1.bf16.msra.mxu1 %v7583_v61 }
 0x9f9   : > { %4152 = vmatprep.subr.bf16.mxu1 %v7588_v51  ;;  %4841 = vmatpush1.bf16.msra.mxu0 %v7640_v21 }
 0x9fa   : > { %4863 = vmatprep.subr.bf16.mxu0 %v7645_v55 }
 0x9fc   : > { %4153 = vmatpush1.bf16.msra.mxu1 %v7586_v47 }
 0x9fd   : > { %4154 = vmatprep.subr.bf16.mxu1 %v7591_v49 }
 0xa00   : > { %4155 = vmatpush1.bf16.msra.mxu1 %v7589_v33 }
 0xa01   : > { %4156 = vmatprep.subr.bf16.mxu1 %v7594_v62 }
 0xa04   : > { %4157 = vmatpush1.bf16.msra.mxu1 %v7592_v29 }
 0xa07   : > { %4175 = vmatmul.mubr.bf16.vlgmr.msra.gmra.mrb[24].mxu1 %v3537_v0 }
 0xa08   : > { %4184 = vmatprep.mubr.bf16.mxu1 %v8304_v20 }
 0xa0f   : > { %4185 = vmatmul.mubr.bf16.gmra.mrb[28].mxu1 %v3539_v2  ;;  %v3629_v2 = vrot.slane %v3624_v18, %v8744_v27 }
 0xada   : > { %v4176_v34 = vpop.f32.mrb[24].mxu1 }
 0xadb   : > { %v4178_v57 = vpop.f32.mrb[25].mxu1  ;;  %v6810_v6 = vadd.f32 %v4176_v34, %v3629_v2  ;;  %v7643_v34 = vld [vmem:[#allocation13 + $0xb00] ss:$8 sps:$4 sm:$0xff]  }
 0xadc   : > { %v6811_v58 = vadd.f32 %v4178_v57, %v3633_v56  ;;  %v4180_v39 = vpop.f32.mrb[26].mxu1 }
 0xadd   : > { %v4182_v30 = vpop.f32.mrb[27].mxu1  ;;  %v6812_v8 = vadd.f32 %v4180_v39, %v3629_v2 }
 0xade   : > { %v6503_v32 = vmul.f32 -1.442695, %v6811_v58  ;;  %v6813_v59 = vadd.f32 %v4182_v30, %v3633_v56  ;;  %v7648_v58 = vld [vmem:[#allocation13 + $0xb14] ss:$8 sps:$4 sm:$0xff]  }
 0xae0   : > { %7883 = vpow2.f32 %v6503_v32  ;;  %v6504_v45 = vmul.f32 -1.442695, %v6813_v59 }
 0xae2   : > { %7885 = vpow2.f32 %v6504_v45  ;;  %v4186_v60 = vpop.f32.mrb[28].mxu1 }
 0xae3   : > { %v4188_v61 = vpop.f32.mrb[29].mxu1  ;;  %v6814_v19 = vadd.f32 %v4186_v60, %v3629_v2 }
 0xae4   : > { %v6815_v51 = vadd.f32 %v4188_v61, %v3633_v56  ;;  %v4190_v47 = vpop.f32.mrb[30].mxu1  ;;  %v7646_v61 = vld [vmem:[#allocation13 + $0xb10] ss:$8 sps:$4 sm:$0xff]  }
 0xae5   : > { %v4192_v49 = vpop.f32.mrb[31].mxu1  ;;  %v6816_v28 = vadd.f32 %v4190_v47, %v3629_v2  ;;  %v7655_v2 = vld [vmem:[#allocation13 + $0xb40] ss:$8 sps:$4 sm:$0xff]  }
 0xae6   : > { %v6505_v33 = vmul.f32 -1.442695, %v6815_v51  ;;  %v6817_v62 = vadd.f32 %v4192_v49, %v3633_v56  ;;  %v7651_v49 = vld [vmem:[#allocation13 + $0xb24] ss:$8 sps:$4 sm:$0xff]  }
 0xae8   : > { %7887 = vpow2.f32 %v6505_v33  ;;  %v6506_v31 = vmul.f32 -1.442695, %v6817_v62 }
 0xaea   : > { %v7884_v29 = vpop.eup %7883  ;;  %7889 = vpow2.f32 %v6506_v31 }
 0xaeb   : > { %v4207_v42 = vadd.f32 1.0, %v7884_v29  ;;  %v7649_v29 = vld [vmem:[#allocation13 + $0xb20] ss:$8 sps:$4 sm:$0xff]  }
 0xaec   : > { %v7886_v63 = vpop.eup %7885 }
 0xaed   : > { %7891 = vrcp.f32 %v4207_v42  ;;  %v4208_v0 = vadd.f32 1.0, %v7886_v63  ;;  %v7654_v42 = vld [vmem:[#allocation13 + $0xb34] ss:$8 sps:$4 sm:$0xff]  }
 0xaef   : > { %7893 = vrcp.f32 %v4208_v0  ;;  %v7652_v0 = vld [vmem:[#allocation13 + $0xb30] ss:$8 sps:$4 sm:$0xff]  }
 0xaf2   : > { %v7888_v1 = vpop.eup %7887 }
 0xaf3   : > { %v4209_v3 = vadd.f32 1.0, %v7888_v1  ;;  %v7657_v1 = vld [vmem:[#allocation13 + $0xb44] ss:$8 sps:$4 sm:$0xff]  }
 0xaf4   : > { %v7890_v4 = vpop.eup %7889 }
 0xaf5   : > { %7895 = vrcp.f32 %v4209_v3  ;;  %v4210_v5 = vadd.f32 1.0, %v7890_v4  ;;  %v7660_v3 = vld [vmem:[#allocation13 + $0xb54] ss:$8 sps:$4 sm:$0xff]   ;;  %v7658_v4 = vld [vmem:[#allocation13 + $0xb50] ss:$8 sps:$4 sm:$0xff]  }
 0xaf7   : > { %v7892_v40 = vpop.eup %7891  ;;  %7897 = vrcp.f32 %v4210_v5  ;;  %v7663_v5 = vld [vmem:[#allocation13 + $0xb64] ss:$8 sps:$4 sm:$0xff]  }
 0xaf8   : > { %v4219_v46 = vmul.f32 %v7892_v40, %v6810_v6  ;;  %v7661_v6 = vld [vmem:[#allocation13 + $0xb60] ss:$8 sps:$4 sm:$0xff]   ;;  %v7666_v40 = vld [vmem:[#allocation13 + $0xb74] ss:$8 sps:$4 sm:$0xff]  }
 0xaf9   : > { %v7894_v41 = vpop.eup %7893 }
 0xafa   : > { %v4223_v9 = vadd.f32 %v4219_v46, %v8877_v13  ;;  %v4220_v10 = vmul.f32 %v7894_v41, %v6812_v8  ;;  %v7664_v46 = vld [vmem:[#allocation13 + $0xb70] ss:$8 sps:$4 sm:$0xff]   ;;  %v7669_v8 = vld [vmem:[#allocation13 + $0xb84] ss:$8 sps:$4 sm:$0xff]   ;;  %v7667_v41 = vld [vmem:[#allocation13 + $0xb80] ss:$8 sps:$4 sm:$0xff]  }
 0xafc   : > { %v4224_v11 = vadd.f32 %v4220_v10, %v8879_v16  ;;  %v8931_v12 = vmul.f32 0.70710677, %v4223_v9  ;;  %v7672_v9 = vld [vmem:[#allocation13 + $0xb94] ss:$8 sps:$4 sm:$0xff]   ;;  %v7670_v10 = vld [vmem:[#allocation13 + $0xb90] ss:$8 sps:$4 sm:$0xff]  }
 0xafe   : > { %v8933_v17 = vmul.f32 0.70710677, %v4224_v11  ;;  %v7675_v11 = vld [vmem:[#allocation13 + $0xba4] ss:$8 sps:$4 sm:$0xff]  }
 0xaff   : > { %v7896_v22 = vpop.eup %7895 }
 0xb00   : > { %v4231_v23 = vpack.c.bf16 %v8933_v17, %v8931_v12  ;;  %v4221_v24 = vmul.f32 %v7896_v22, %v6814_v19  ;;  %v7673_v19 = vld [vmem:[#allocation13 + $0xba0] ss:$8 sps:$4 sm:$0xff]   ;;  %v7678_v22 = vld [vmem:[#allocation13 + $0xbb4] ss:$8 sps:$4 sm:$0xff]  }
 0xb01   : > { %v7898_v37 = vpop.eup %7897 }
 0xb02   : > { %v4235_v38 = vrot.slane %v4231_v23, 7  ;;  %v4225_v36 = vadd.f32 %v4221_v24, %v8885_v15  ;;  %v4222_v14 = vmul.f32 %v7898_v37, %v6816_v28  ;;  %v7676_v23 = vld [vmem:[#allocation13 + $0xbb0] ss:$8 sps:$4 sm:$0xff]   ;;  %v7681_v24 = vld [vmem:[#allocation13 + $0xbc4] ss:$8 sps:$4 sm:$0xff]  }
 0xb03   : > { %v7679_v28 = vld [vmem:[#allocation13 + $0xbc0] ss:$8 sps:$4 sm:$0xff]   ;;  %v7684_v37 = vld [vmem:[#allocation13 + $0xbd4] ss:$8 sps:$4 sm:$0xff]  }
 0xb04   : > { %4241 = vst [vmem:[#allocation2] sm:$0xfe] %v4235_v38  ;;  %v4226_v13 = vadd.f32 %v4222_v14, %v8887_v25  ;;  %v8939_v16 = vmul.f32 0.70710677, %v4225_v36  ;;  %v7687_v14 = vld [vmem:[#allocation13 + $0xbe4] ss:$8 sps:$4 sm:$0xff]  }
 0xb06   : > { %v8941_v43 = vmul.f32 0.70710677, %v4226_v13 }
 0xb08   : > { %v4232_v44 = vpack.c.bf16 %v8941_v43, %v8939_v16 }
 0xb0a   : > { %v4236_v48 = vrot.slane %v4232_v44, 7 }
 0xb0b   : > { %v4246_v50 = vld [vmem:[#allocation2] sm:$0xff] }
 0xb0c   : > { %v8946_v35 = vsel %vm1912_vm15, %v4235_v38, %v4236_v48  ;;  %4243 = vst [vmem:[#allocation2 + $0x10] sm:$0x1] %v4236_v48  ;;  %v4255_v52 = vshll.u32 %v4246_v50, 16  ;;  %v8948_v26 = vld [vmem:[#allocation2] sm:$0xfe]  ;;  %v4253_v53 = vshrl.u32 %v4246_v50, 16 }
 0xb0d   : > { %v4260_v15 = vshll.u32 %v8946_v35, 16  ;;  %v4285_v21 = vshrl.u32 %v8948_v26, 16  ;;  %v4264_v18 = vshrl.u32 %v8946_v35, 16  ;;  %v4288_v56 = vshll.u32 %v8948_v26, 16  ;;  %v7682_v38 = vld [vmem:[#allocation13 + $0xbd0] ss:$8 sps:$4 sm:$0xff]  }
 0xb0e   : > { %v4257_v25 = vrot.slane %v4255_v52, 1  ;;  %v7685_v48 = vld [vmem:[#allocation13 + $0xbe0] ss:$8 sps:$4 sm:$0xff]  }
 0xb0f   : > { %v4262_v54 = vrot.slane %v4260_v15, 1  ;;  %v4287_v30 = vrot.slane %v4285_v21, 1  ;;  %v4290_v59 = vrot.slane %v4288_v56, 2  ;;  %v4292_v45 = vrot.slane %v4264_v18, 1  ;;  %v7696_v56 = vld [vmem:[#allocation13 + $0xc14] ss:$8 sps:$4 sm:$0xff]  }
 0xb10   : > { %v4258_v55 = vor.u32 %v4257_v25, %v4253_v53  ;;  %v4293_v60 = vrot.slane %v4260_v15, 2  ;;  %v7688_v53 = vld [vmem:[#allocation13 + $0xbf0] ss:$8 sps:$4 sm:$0xff]   ;;  %v7693_v25 = vld [vmem:[#allocation13 + $0xc04] ss:$8 sps:$4 sm:$0xff]   ;;  %v4278_v21 = vrot.slane %v8946_v35, 1 }
 0xb11   : > { %v4266_v51 = vor.u32 %v4264_v18, %v4262_v54  ;;  %v4291_v62 = vor.u32 %v4290_v59, %v4287_v30  ;;  %v7691_v18 = vld [vmem:[#allocation13 + $0xc00] ss:$8 sps:$4 sm:$0xff]   ;;  %v7699_v30 = vld [vmem:[#allocation13 + $0xc24] ss:$8 sps:$4 sm:$0xff]   ;;  %v7702_v59 = vld [vmem:[#allocation13 + $0xc34] ss:$8 sps:$4 sm:$0xff]  }
 0xb12   : > { %v4263_v57 = vsel %vm865_vm7, %v4258_v55, %v4262_v54  ;;  %v8959_v31 = vor.u32 %v4293_v60, %v4292_v45  ;;  %v4277_v54 = vrot.slane %v8948_v26, 1  ;;  %v7700_v60 = vld [vmem:[#allocation13 + $0xc30] ss:$8 sps:$4 sm:$0xff]  }
 0xb13   : > { %4842 = vmatprep.mubr.bf16.mxu0 %v4263_v57  ;;  %v8955_v39 = vld [vmem:[#allocation2 + $0x10] sm:$0x1] }
 0xb14   : > { %4843 = vmatmul.mubr.bf16.vlgmr.msra.gmra.mrb[20].mxu0 %v4246_v50  ;;  %v4268_v32 = vshll.u32 %v8955_v39, 16  ;;  %v4295_v63 = vsel %vm886_vm8, %v4291_v62, %v8959_v31  ;;  %v8964_v36 = vld [vmem:[#allocation2 + $0x10] sm:$0x3]  ;;  %v4280_v26 = vrot.slane %v8955_v39, 1  ;;  %v7711_v39 = vld [vmem:[#allocation13 + $0xc64] ss:$8 sps:$4 sm:$0xff]  }
 0xb15   : > { %4864 = vmatpush1.bf16.msra.mxu0 %v7643_v34  ;;  %v4297_v13 = vshrl.u32 %v8964_v36, 16  ;;  %v4300_v44 = vshll.u32 %v8964_v36, 16  ;;  %v7690_v50 = vld [vmem:[#allocation13 + $0xbf4] ss:$8 sps:$4 sm:$0xff]   ;;  %v4279_v34 = vsel %vm881_vm9, %v4277_v54, %v4278_v21  ;;  %v7757_v54 = vld [vmem:[#allocation13 + $0xd60] ss:$8 sps:$4 sm:$0xff]  }
 0xb16   : > { %v4270_v47 = vrot.slane %v4268_v32, 1  ;;  %4865 = vmatprep.subr.bf16.mxu0 %v7648_v58  ;;  %v7694_v58 = vld [vmem:[#allocation13 + $0xc10] ss:$8 sps:$4 sm:$0xff]   ;;  %v7697_v32 = vld [vmem:[#allocation13 + $0xc20] ss:$8 sps:$4 sm:$0xff]   ;;  %v4281_v45 = vsel %vm881_vm9, %v4278_v21, %v4280_v26 }
 0xb17   : > { %v4299_v52 = vrot.slane %v4297_v13, 1  ;;  %v4302_v15 = vrot.slane %v4300_v44, 2  ;;  %v7714_v62 = vld [vmem:[#allocation13 + $0xc74] ss:$8 sps:$4 sm:$0xff]   ;;  %v7745_v13 = vld [vmem:[#allocation13 + $0xd20] ss:$8 sps:$4 sm:$0xff]  }
 0xb18   : > { %v4271_v33 = vsel %vm865_vm7, %v4266_v51, %v4270_v47  ;;  %v7703_v51 = vld [vmem:[#allocation13 + $0xc40] ss:$8 sps:$4 sm:$0xff]   ;;  %v7708_v47 = vld [vmem:[#allocation13 + $0xc54] ss:$8 sps:$4 sm:$0xff]  }
 0xb19   : > { %4852 = vmatprep.mubr.bf16.mxu0 %v4271_v33  ;;  %4866 = vmatpush1.bf16.msra.mxu0 %v7646_v61  ;;  %v4303_v55 = vor.u32 %v4302_v15, %v4299_v52  ;;  %v7705_v61 = vld [vmem:[#allocation13 + $0xc44] ss:$8 sps:$4 sm:$0xff]   ;;  %v7709_v33 = vld [vmem:[#allocation13 + $0xc60] ss:$8 sps:$4 sm:$0xff]   ;;  %v7750_v44 = vld [vmem:[#allocation13 + $0xd34] ss:$8 sps:$4 sm:$0xff]  }
 0xb1a   : > { %4867 = vmatprep.subr.bf16.mxu0 %v7651_v49  ;;  %v7706_v49 = vld [vmem:[#allocation13 + $0xc50] ss:$8 sps:$4 sm:$0xff]   ;;  %v7751_v52 = vld [vmem:[#allocation13 + $0xd40] ss:$8 sps:$4 sm:$0xff]   ;;  %v7756_v15 = vld [vmem:[#allocation13 + $0xd54] ss:$8 sps:$4 sm:$0xff]  }
 0xb1b   : > { %v4304_v57 = vsel %vm886_vm8, %v8959_v31, %v4303_v55  ;;  %v4251_v31 = vld [vmem:[#allocation2] sm:$0xfc]  ;;  %v7762_v21 = vld [vmem:[#allocation13 + $0xd74] ss:$8 sps:$4 sm:$0xff]  }
 0xb1c   : > { %4853 = vmatmul.mubr.bf16.gmra.mrb[24].mxu0 %v8946_v35  ;;  %v7760_v55 = vld [vmem:[#allocation13 + $0xd70] ss:$8 sps:$4 sm:$0xff]  }
 0xb1d   : > { %4868 = vmatpush1.bf16.msra.mxu0 %v7649_v29  ;;  %4895 = vmatprep.mubr.bf16.mxu0 %v4295_v63  ;;  %v7712_v29 = vld [vmem:[#allocation13 + $0xc70] ss:$8 sps:$4 sm:$0xff]   ;;  %v4310_v63 = vrot.slane %v8946_v35, 2  ;;  %v7723_v35 = vld [vmem:[#allocation13 + $0xca4] ss:$8 sps:$4 sm:$0xff]  }
 0xb1e   : > { %4869 = vmatprep.subr.bf16.mxu0 %v7654_v42  ;;  %v4309_v42 = vrot.slane %v4251_v31, 2 }
 0xb21   : > { %4870 = vmatpush1.bf16.msra.mxu0 %v7652_v0  ;;  %v4311_v0 = vsel %vm907_vm10, %v4309_v42, %v4310_v63 }
 0xb22   : > { %4871 = vmatprep.subr.bf16.mxu0 %v7657_v1  ;;  %v4312_v1 = vrot.slane %v8964_v36, 2  ;;  %v7742_v36 = vld [vmem:[#allocation13 + $0xd10] ss:$8 sps:$4 sm:$0xff]  }
 0xb25   : > { %4872 = vmatpush1.bf16.msra.mxu0 %v7655_v2  ;;  %v4313_v2 = vsel %vm907_vm10, %v4310_v63, %v4312_v1 }
 0xb26   : > { %4873 = vmatprep.subr.bf16.mxu0 %v7660_v3  ;;  %v7717_v3 = vld [vmem:[#allocation13 + $0xc84] ss:$8 sps:$4 sm:$0xff]  }
 0xb27   : > { %5584 = vmatprep.subr.bf16.mxu1 %v7717_v3 }
 0xb29   : > { %4874 = vmatpush1.bf16.msra.mxu0 %v7658_v4  ;;  %v7715_v4 = vld [vmem:[#allocation13 + $0xc80] ss:$8 sps:$4 sm:$0xff]  }
 0xb2a   : > { %4875 = vmatprep.subr.bf16.mxu0 %v7663_v5  ;;  %5585 = vmatpush1.bf16.msra.mxu1 %v7715_v4  ;;  %v7720_v5 = vld [vmem:[#allocation13 + $0xc94] ss:$8 sps:$4 sm:$0xff]  }
 0xb2b   : > { %5586 = vmatprep.subr.bf16.mxu1 %v7720_v5 }
 0xb2d   : > { %4876 = vmatpush1.bf16.msra.mxu0 %v7661_v6  ;;  %v7718_v6 = vld [vmem:[#allocation13 + $0xc90] ss:$8 sps:$4 sm:$0xff]  }
 0xb2e   : > { %4877 = vmatprep.subr.bf16.mxu0 %v7666_v40  ;;  %5587 = vmatpush1.bf16.msra.mxu1 %v7718_v6  ;;  %v7721_v40 = vld [vmem:[#allocation13 + $0xca0] ss:$8 sps:$4 sm:$0xff]  }
 0xb2f   : > { %5588 = vmatprep.subr.bf16.mxu1 %v7723_v35 }
 0xb31   : > { %4878 = vmatpush1.bf16.msra.mxu0 %v7664_v46  ;;  %v7726_v46 = vld [vmem:[#allocation13 + $0xcb4] ss:$8 sps:$4 sm:$0xff]  }
 0xb32   : > { %4879 = vmatprep.subr.bf16.mxu0 %v7669_v8  ;;  %5589 = vmatpush1.bf16.msra.mxu1 %v7721_v40  ;;  %v7724_v8 = vld [vmem:[#allocation13 + $0xcb0] ss:$8 sps:$4 sm:$0xff]  }
 0xb33   : > { %5590 = vmatprep.subr.bf16.mxu1 %v7726_v46 }
 0xb35   : > { %4880 = vmatpush1.bf16.msra.mxu0 %v7667_v41  ;;  %v7729_v41 = vld [vmem:[#allocation13 + $0xcc4] ss:$8 sps:$4 sm:$0xff]  }
 0xb36   : > { %4881 = vmatprep.subr.bf16.mxu0 %v7672_v9  ;;  %5591 = vmatpush1.bf16.msra.mxu1 %v7724_v8  ;;  %v7727_v9 = vld [vmem:[#allocation13 + $0xcc0] ss:$8 sps:$4 sm:$0xff]  }
 0xb37   : > { %5592 = vmatprep.subr.bf16.mxu1 %v7729_v41 }
 0xb39   : > { %4882 = vmatpush1.bf16.msra.mxu0 %v7670_v10  ;;  %v7732_v10 = vld [vmem:[#allocation13 + $0xcd4] ss:$8 sps:$4 sm:$0xff]  }
 0xb3a   : > { %4883 = vmatprep.subr.bf16.mxu0 %v7675_v11  ;;  %5593 = vmatpush1.bf16.msra.mxu1 %v7727_v9  ;;  %v7730_v11 = vld [vmem:[#allocation13 + $0xcd0] ss:$8 sps:$4 sm:$0xff]  }
 0xb3b   : > { %5594 = vmatprep.subr.bf16.mxu1 %v7732_v10 }
 0xb3d   : > { %4884 = vmatpush1.bf16.msra.mxu0 %v7673_v19  ;;  %v7735_v19 = vld [vmem:[#allocation13 + $0xce4] ss:$8 sps:$4 sm:$0xff]  }
 0xb3e   : > { %4885 = vmatprep.subr.bf16.mxu0 %v7678_v22  ;;  %5595 = vmatpush1.bf16.msra.mxu1 %v7730_v11  ;;  %v7733_v22 = vld [vmem:[#allocation13 + $0xce0] ss:$8 sps:$4 sm:$0xff]  }
 0xb3f   : > { %5596 = vmatprep.subr.bf16.mxu1 %v7735_v19 }
 0xb41   : > { %4886 = vmatpush1.bf16.msra.mxu0 %v7676_v23  ;;  %v7738_v23 = vld [vmem:[#allocation13 + $0xcf4] ss:$8 sps:$4 sm:$0xff]  }
 0xb42   : > { %4887 = vmatprep.subr.bf16.mxu0 %v7681_v24  ;;  %5597 = vmatpush1.bf16.msra.mxu1 %v7733_v22  ;;  %v7736_v24 = vld [vmem:[#allocation13 + $0xcf0] ss:$8 sps:$4 sm:$0xff]  }
 0xb43   : > { %5598 = vmatprep.subr.bf16.mxu1 %v7738_v23 }
 0xb45   : > { %4888 = vmatpush1.bf16.msra.mxu0 %v7679_v28  ;;  %v7741_v28 = vld [vmem:[#allocation13 + $0xd04] ss:$8 sps:$4 sm:$0xff]  }
 0xb46   : > { %4889 = vmatprep.subr.bf16.mxu0 %v7684_v37  ;;  %5599 = vmatpush1.bf16.msra.mxu1 %v7736_v24  ;;  %v7739_v37 = vld [vmem:[#allocation13 + $0xd00] ss:$8 sps:$4 sm:$0xff]  }
 0xb47   : > { %5600 = vmatprep.subr.bf16.mxu1 %v7741_v28 }
 0xb49   : > { %4890 = vmatpush1.bf16.msra.mxu0 %v7682_v38  ;;  %v7744_v38 = vld [vmem:[#allocation13 + $0xd14] ss:$8 sps:$4 sm:$0xff]  }
 0xb4a   : > { %4891 = vmatprep.subr.bf16.mxu0 %v7687_v14  ;;  %5601 = vmatpush1.bf16.msra.mxu1 %v7739_v37  ;;  %v7747_v14 = vld [vmem:[#allocation13 + $0xd24] ss:$8 sps:$4 sm:$0xff]  }
 0xb4b   : > { %5602 = vmatprep.subr.bf16.mxu1 %v7744_v38 }
 0xb4d   : > { %4892 = vmatpush1.bf16.msra.mxu0 %v7685_v48  ;;  %v7748_v48 = vld [vmem:[#allocation13 + $0xd30] ss:$8 sps:$4 sm:$0xff]  }
 0xb4e   : > { %4893 = vmatprep.subr.bf16.mxu0 %v7690_v50  ;;  %5603 = vmatpush1.bf16.msra.mxu1 %v7742_v36  ;;  %v7753_v50 = vld [vmem:[#allocation13 + $0xd44] ss:$8 sps:$4 sm:$0xff]  }
 0xb4f   : > { %5604 = vmatprep.subr.bf16.mxu1 %v7747_v14 }
 0xb51   : > { %4894 = vmatpush1.bf16.msra.mxu0 %v7688_v53  ;;  %v7754_v53 = vld [vmem:[#allocation13 + $0xd50] ss:$8 sps:$4 sm:$0xff]  }
 0xb52   : > { %4916 = vmatprep.subr.bf16.mxu0 %v7693_v25  ;;  %5605 = vmatpush1.bf16.msra.mxu1 %v7745_v13  ;;  %v7759_v25 = vld [vmem:[#allocation13 + $0xd64] ss:$8 sps:$4 sm:$0xff]  }
 0xb53   : > { %5606 = vmatprep.subr.bf16.mxu1 %v7750_v44 }
 0xb54   : > { %4896 = vmatmul.mubr.bf16.vlgmr.msra.gmra.mrb[20].mxu0 %v4279_v34 }
 0xb55   : > { %4905 = vmatprep.mubr.bf16.mxu0 %v4304_v57  ;;  %4917 = vmatpush1.bf16.msra.mxu0 %v7691_v18  ;;  %v7765_v18 = vld [vmem:[#allocation13 + $0xd84] ss:$8 sps:$4 sm:$0xff]  }
 0xb56   : > { %4918 = vmatprep.subr.bf16.mxu0 %v7696_v56  ;;  %5607 = vmatpush1.bf16.msra.mxu1 %v7748_v48  ;;  %v4398_v56 = vld [vmem:[#allocation15 + $0x8] sm:$0x3] }
 0xb57   : > { %5608 = vmatprep.subr.bf16.mxu1 %v7753_v50  ;;  %v4407_v34 = vrot.slane %v4398_v56, %v8740_v7 }
 0xb59   : > { %4919 = vmatpush1.bf16.msra.mxu0 %v7694_v58 }
 0xb5a   : > { %4920 = vmatprep.subr.bf16.mxu0 %v7699_v30  ;;  %5609 = vmatpush1.bf16.msra.mxu1 %v7751_v52 }
 0xb5b   : > { %5610 = vmatprep.subr.bf16.mxu1 %v7756_v15 }
 0xb5c   : > { %4906 = vmatmul.mubr.bf16.gmra.mrb[24].mxu0 %v4281_v45 }
 0xb5d   : > { %4921 = vmatpush1.bf16.msra.mxu0 %v7697_v32  ;;  %4948 = vmatprep.mubr.bf16.mxu0 %v8304_v20 }
 0xb5e   : > { %4922 = vmatprep.subr.bf16.mxu0 %v7702_v59  ;;  %5611 = vmatpush1.bf16.msra.mxu1 %v7754_v53 }
 0xb5f   : > { %5612 = vmatprep.subr.bf16.mxu1 %v7759_v25 }
 0xb61   : > { %4923 = vmatpush1.bf16.msra.mxu0 %v7700_v60 }
 0xb62   : > { %4924 = vmatprep.subr.bf16.mxu0 %v7705_v61  ;;  %5613 = vmatpush1.bf16.msra.mxu1 %v7757_v54 }
 0xb63   : > { %5614 = vmatprep.subr.bf16.mxu1 %v7762_v21 }
 0xb65   : > { %4925 = vmatpush1.bf16.msra.mxu0 %v7703_v51 }
 0xb66   : > { %4926 = vmatprep.subr.bf16.mxu0 %v7708_v47  ;;  %5615 = vmatpush1.bf16.msra.mxu1 %v7760_v55 }
 0xb67   : > { %5637 = vmatprep.subr.bf16.mxu1 %v7765_v18 }
 0xb69   : > { %4927 = vmatpush1.bf16.msra.mxu0 %v7706_v49 }
 0xb6a   : > { %4928 = vmatprep.subr.bf16.mxu0 %v7711_v39 }
 0xb6d   : > { %4929 = vmatpush1.bf16.msra.mxu0 %v7709_v33 }
 0xb6e   : > { %4930 = vmatprep.subr.bf16.mxu0 %v7714_v62 }
 0xb71   : > { %4931 = vmatpush1.bf16.msra.mxu0 %v7712_v29 }
 0xb74   : > { %4949 = vmatmul.mubr.bf16.vlgmr.msra.gmra.mrb[20].mxu0 %v4311_v0 }
 0xb75   : > { %4958 = vmatprep.mubr.bf16.mxu0 %v8304_v20 }
 0xb7c   : > { %4959 = vmatmul.mubr.bf16.gmra.mrb[24].mxu0 %v4313_v2  ;;  %v4403_v2 = vrot.slane %v4398_v56, %v8744_v27 }
 0xc47   : > { %v4950_v57 = vpop.f32.mrb[20].mxu0 }
 0xc48   : > { %v4952_v58 = vpop.f32.mrb[21].mxu0  ;;  %v6818_v6 = vadd.f32 %v4950_v57, %v4403_v2  ;;  %v7763_v57 = vld [vmem:[#allocation13 + $0xd80] ss:$8 sps:$4 sm:$0xff]  }
 0xc49   : > { %v6819_v30 = vadd.f32 %v4952_v58, %v4407_v34  ;;  %v4954_v26 = vpop.f32.mrb[22].mxu0 }
 0xc4a   : > { %v4956_v32 = vpop.f32.mrb[23].mxu0  ;;  %v6820_v46 = vadd.f32 %v4954_v26, %v4403_v2 }
 0xc4b   : > { %v6587_v59 = vmul.f32 -1.442695, %v6819_v30  ;;  %v6821_v45 = vadd.f32 %v4956_v32, %v4407_v34  ;;  %v7768_v30 = vld [vmem:[#allocation13 + $0xd94] ss:$8 sps:$4 sm:$0xff]  }
 0xc4d   : > { %7899 = vpow2.f32 %v6587_v59  ;;  %v6588_v60 = vmul.f32 -1.442695, %v6821_v45 }
 0xc4f   : > { %7901 = vpow2.f32 %v6588_v60  ;;  %v4960_v61 = vpop.f32.mrb[24].mxu0 }
 0xc50   : > { %v4962_v51 = vpop.f32.mrb[25].mxu0  ;;  %v6822_v22 = vadd.f32 %v4960_v61, %v4403_v2 }
 0xc51   : > { %v6823_v47 = vadd.f32 %v4962_v51, %v4407_v34  ;;  %v4964_v49 = vpop.f32.mrb[26].mxu0 }
 0xc52   : > { %v4966_v39 = vpop.f32.mrb[27].mxu0  ;;  %v6824_v37 = vadd.f32 %v4964_v49, %v4403_v2  ;;  %v7766_v49 = vld [vmem:[#allocation13 + $0xd90] ss:$8 sps:$4 sm:$0xff]  }
 0xc53   : > { %v6589_v33 = vmul.f32 -1.442695, %v6823_v47  ;;  %v6825_v62 = vadd.f32 %v4966_v39, %v4407_v34 }
 0xc55   : > { %7903 = vpow2.f32 %v6589_v33  ;;  %v6590_v31 = vmul.f32 -1.442695, %v6825_v62  ;;  %v7771_v62 = vld [vmem:[#allocation13 + $0xda4] ss:$8 sps:$4 sm:$0xff]  }
 0xc57   : > { %v7900_v29 = vpop.eup %7899  ;;  %7905 = vpow2.f32 %v6590_v31 }
 0xc58   : > { %v4981_v42 = vadd.f32 1.0, %v7900_v29 }
 0xc59   : > { %v7902_v63 = vpop.eup %7901 }
 0xc5a   : > { %7907 = vrcp.f32 %v4981_v42  ;;  %v4982_v0 = vadd.f32 1.0, %v7902_v63 }
 0xc5c   : > { %7909 = vrcp.f32 %v4982_v0  ;;  %v7769_v0 = vld [vmem:[#allocation13 + $0xda0] ss:$8 sps:$4 sm:$0xff]  }
 0xc5f   : > { %v7904_v1 = vpop.eup %7903 }
 0xc60   : > { %v4983_v3 = vadd.f32 1.0, %v7904_v1  ;;  %v7774_v1 = vld [vmem:[#allocation13 + $0xdb4] ss:$8 sps:$4 sm:$0xff]  }
 0xc61   : > { %v7906_v4 = vpop.eup %7905 }
 0xc62   : > { %7911 = vrcp.f32 %v4983_v3  ;;  %v4984_v5 = vadd.f32 1.0, %v7906_v4  ;;  %v7772_v3 = vld [vmem:[#allocation13 + $0xdb0] ss:$8 sps:$4 sm:$0xff]   ;;  %v7777_v4 = vld [vmem:[#allocation13 + $0xdc4] ss:$8 sps:$4 sm:$0xff]  }
 0xc64   : > { %v7908_v35 = vpop.eup %7907  ;;  %7913 = vrcp.f32 %v4984_v5  ;;  %v7775_v5 = vld [vmem:[#allocation13 + $0xdc0] ss:$8 sps:$4 sm:$0xff]  }
 0xc65   : > { %v4993_v40 = vmul.f32 %v7908_v35, %v6818_v6  ;;  %v7780_v6 = vld [vmem:[#allocation13 + $0xdd4] ss:$8 sps:$4 sm:$0xff]   ;;  %v7778_v35 = vld [vmem:[#allocation13 + $0xdd0] ss:$8 sps:$4 sm:$0xff]  }
 0xc66   : > { %v7910_v8 = vpop.eup %7909 }
 0xc67   : > { %v4997_v41 = vadd.f32 %v4993_v40, %v8931_v12  ;;  %v4994_v9 = vmul.f32 %v7910_v8, %v6820_v46  ;;  %v7783_v40 = vld [vmem:[#allocation13 + $0xde4] ss:$8 sps:$4 sm:$0xff]   ;;  %v7781_v46 = vld [vmem:[#allocation13 + $0xde0] ss:$8 sps:$4 sm:$0xff]   ;;  %v7786_v8 = vld [vmem:[#allocation13 + $0xdf4] ss:$8 sps:$4 sm:$0xff]  }
 0xc69   : > { %v4998_v10 = vadd.f32 %v4994_v9, %v8933_v17  ;;  %v8985_v11 = vmul.f32 0.70710677, %v4997_v41  ;;  %v7784_v41 = vld [vmem:[#allocation13 + $0xdf0] ss:$8 sps:$4 sm:$0xff]   ;;  %v7789_v9 = vld [vmem:[#allocation13 + $0xe04] ss:$8 sps:$4 sm:$0xff]  }
 0xc6b   : > { %v8987_v19 = vmul.f32 0.70710677, %v4998_v10  ;;  %v7787_v10 = vld [vmem:[#allocation13 + $0xe00] ss:$8 sps:$4 sm:$0xff]  }
 0xc6c   : > { %v7912_v23 = vpop.eup %7911 }
 0xc6d   : > { %v5005_v24 = vpack.c.bf16 %v8987_v19, %v8985_v11  ;;  %v4995_v28 = vmul.f32 %v7912_v23, %v6822_v22  ;;  %v7792_v22 = vld [vmem:[#allocation13 + $0xe14] ss:$8 sps:$4 sm:$0xff]   ;;  %v7790_v23 = vld [vmem:[#allocation13 + $0xe10] ss:$8 sps:$4 sm:$0xff]  }
 0xc6e   : > { %v7914_v38 = vpop.eup %7913 }
 0xc6f   : > { %v5009_v36 = vrot.slane %v5005_v24, 7  ;;  %v4999_v14 = vadd.f32 %v4995_v28, %v8939_v16  ;;  %v4996_v13 = vmul.f32 %v7914_v38, %v6824_v37  ;;  %v7795_v24 = vld [vmem:[#allocation13 + $0xe24] ss:$8 sps:$4 sm:$0xff]   ;;  %v7793_v28 = vld [vmem:[#allocation13 + $0xe20] ss:$8 sps:$4 sm:$0xff]  }
 0xc70   : > { %v7798_v37 = vld [vmem:[#allocation13 + $0xe34] ss:$8 sps:$4 sm:$0xff]   ;;  %v7796_v38 = vld [vmem:[#allocation13 + $0xe30] ss:$8 sps:$4 sm:$0xff]  }
 0xc71   : > { %5015 = vst [vmem:[#allocation2] sm:$0xfe] %v5009_v36  ;;  %v5000_v12 = vadd.f32 %v4996_v13, %v8941_v43  ;;  %v8993_v17 = vmul.f32 0.70710677, %v4999_v14  ;;  %v7799_v14 = vld [vmem:[#allocation13 + $0xe40] ss:$8 sps:$4 sm:$0xff]  }
 0xc72   : > { %v7804_v13 = vld [vmem:[#allocation13 + $0xe54] ss:$8 sps:$4 sm:$0xff]  }
 0xc73   : > { %v8995_v44 = vmul.f32 0.70710677, %v5000_v12  ;;  %v7802_v12 = vld [vmem:[#allocation13 + $0xe50] ss:$8 sps:$4 sm:$0xff]  }
 0xc75   : > { %v5006_v48 = vpack.c.bf16 %v8995_v44, %v8993_v17 }
 0xc77   : > { %v5010_v50 = vrot.slane %v5006_v48, 7 }
 0xc78   : > { %v5020_v52 = vld [vmem:[#allocation2] sm:$0xff] }
 0xc79   : > { %v9000_v15 = vsel %vm1912_vm15, %v5009_v36, %v5010_v50  ;;  %5017 = vst [vmem:[#allocation2 + $0x10] sm:$0x1] %v5010_v50  ;;  %v5029_v53 = vshll.u32 %v5020_v52, 16  ;;  %v9002_v25 = vld [vmem:[#allocation2] sm:$0xfe]  ;;  %v5027_v43 = vshrl.u32 %v5020_v52, 16 }
 0xc7a   : > { %5016 = vst [vmem:[#allocation2 + $0x8] sm:$0xff] %v9000_v15  ;;  %v5034_v16 = vshll.u32 %v9000_v15, 16  ;;  %v5059_v55 = vshrl.u32 %v9002_v25, 16  ;;  %v5062_v18 = vshll.u32 %v9002_v25, 16  ;;  %v5038_v34 = vshrl.u32 %v9000_v15, 16 }
 0xc7b   : > { %v5031_v54 = vrot.slane %v5029_v53, 1  ;;  %v5052_v45 = vrot.slane %v9000_v15, 1  ;;  %v7801_v36 = vld [vmem:[#allocation13 + $0xe44] ss:$8 sps:$4 sm:$0xff]  }
 0xc7c   : > { %v5036_v21 = vrot.slane %v5034_v16, 1  ;;  %v5061_v32 = vrot.slane %v5059_v55, 1  ;;  %v5064_v59 = vrot.slane %v5062_v18, 2  ;;  %v5066_v61 = vrot.slane %v5038_v34, 1  ;;  %v7807_v50 = vld [vmem:[#allocation13 + $0xe64] ss:$8 sps:$4 sm:$0xff]  }
 0xc7d   : > { %v5032_v56 = vor.u32 %v5031_v54, %v5027_v43  ;;  %v5067_v51 = vrot.slane %v5034_v16, 2  ;;  %v7805_v16 = vld [vmem:[#allocation13 + $0xe60] ss:$8 sps:$4 sm:$0xff]   ;;  %v7810_v43 = vld [vmem:[#allocation13 + $0xe74] ss:$8 sps:$4 sm:$0xff]  }
 0xc7e   : > { %v5040_v39 = vor.u32 %v5038_v34, %v5036_v21  ;;  %v5065_v42 = vor.u32 %v5064_v59, %v5061_v32  ;;  %v7808_v55 = vld [vmem:[#allocation13 + $0xe70] ss:$8 sps:$4 sm:$0xff]   ;;  %v7813_v18 = vld [vmem:[#allocation13 + $0xe84] ss:$8 sps:$4 sm:$0xff]  }
 0xc7f   : > { %v5037_v58 = vsel %vm865_vm7, %v5032_v56, %v5036_v21  ;;  %v9017_v63 = vor.u32 %v5067_v51, %v5066_v61  ;;  %v5051_v56 = vrot.slane %v9002_v25, 1  ;;  %v7814_v32 = vld [vmem:[#allocation13 + $0xe90] ss:$8 sps:$4 sm:$0xff]   ;;  %v7819_v59 = vld [vmem:[#allocation13 + $0xea4] ss:$8 sps:$4 sm:$0xff]  }
 0xc80   : > { %5616 = vmatprep.mubr.bf16.mxu1 %v5037_v58  ;;  %v5022_v26 = vld [vmem:[#allocation2 + $0x10] sm:$0x1]  ;;  %v7817_v25 = vld [vmem:[#allocation13 + $0xea0] ss:$8 sps:$4 sm:$0xff]   ;;  %v7820_v61 = vld [vmem:[#allocation13 + $0xeb0] ss:$8 sps:$4 sm:$0xff]  }
 0xc81   : > { %5617 = vmatmul.mubr.bf16.vlgmr.msra.gmra.mrb[32].mxu1 %v5020_v52  ;;  %v5042_v60 = vshll.u32 %v5022_v26, 16  ;;  %v5054_v47 = vrot.slane %v5022_v26, 1  ;;  %v5069_v2 = vsel %vm886_vm8, %v5065_v42, %v9017_v63  ;;  %v9022_v48 = vld [vmem:[#allocation2 + $0x10] sm:$0x3]  ;;  %v7823_v51 = vld [vmem:[#allocation13 + $0xec0] ss:$8 sps:$4 sm:$0xff]  }
 0xc82   : > { %5638 = vmatpush1.bf16.msra.mxu1 %v7763_v57  ;;  %v5071_v52 = vshrl.u32 %v9022_v48, 16  ;;  %v5074_v53 = vshll.u32 %v9022_v48, 16  ;;  %v7811_v57 = vld [vmem:[#allocation13 + $0xe80] ss:$8 sps:$4 sm:$0xff]   ;;  %v7816_v58 = vld [vmem:[#allocation13 + $0xe94] ss:$8 sps:$4 sm:$0xff]  }
 0xc83   : > { %v5044_v33 = vrot.slane %v5042_v60, 1  ;;  %5639 = vmatprep.subr.bf16.mxu1 %v7768_v30  ;;  %v9014_v31 = vsel %vm881_vm9, %v5052_v45, %v5054_v47  ;;  %v5053_v30 = vsel %vm881_vm9, %v5051_v56, %v5052_v45  ;;  %v7822_v60 = vld [vmem:[#allocation13 + $0xeb4] ss:$8 sps:$4 sm:$0xff]   ;;  %v7825_v45 = vld [vmem:[#allocation13 + $0xec4] ss:$8 sps:$4 sm:$0xff]  }
 0xc84   : > { %v5073_v54 = vrot.slane %v5071_v52, 1  ;;  %v5076_v21 = vrot.slane %v5074_v53, 2  ;;  %v7828_v47 = vld [vmem:[#allocation13 + $0xed4] ss:$8 sps:$4 sm:$0xff]  }
 0xc85   : > { %v5045_v29 = vsel %vm865_vm7, %v5040_v39, %v5044_v33  ;;  %v7831_v39 = vld [vmem:[#allocation13 + $0xee4] ss:$8 sps:$4 sm:$0xff]   ;;  %v7829_v33 = vld [vmem:[#allocation13 + $0xee0] ss:$8 sps:$4 sm:$0xff]  }
 0xc86   : > { %5626 = vmatprep.mubr.bf16.mxu1 %v5045_v29  ;;  %5640 = vmatpush1.bf16.msra.mxu1 %v7766_v49  ;;  %v5077_v34 = vor.u32 %v5076_v21, %v5073_v54  ;;  %v7826_v49 = vld [vmem:[#allocation13 + $0xed0] ss:$8 sps:$4 sm:$0xff]  }
 0xc87   : > { %5641 = vmatprep.subr.bf16.mxu1 %v7771_v62  ;;  %v7834_v62 = vld [vmem:[#allocation13 + $0xef4] ss:$8 sps:$4 sm:$0xff]   ;;  %v5025_v29 = vld [vmem:[#allocation2] sm:$0xfc] }
 0xc88   : > { %v5078_v26 = vsel %vm886_vm8, %v9017_v63, %v5077_v34  ;;  %v5083_v42 = vrot.slane %v5025_v29, 2  ;;  %v5084_v63 = vrot.slane %v9000_v15, 2 }
 0xc89   : > { %5627 = vmatmul.mubr.bf16.gmra.mrb[36].mxu1 %v9000_v15  ;;  %v7838_v15 = vld [vmem:[#allocation16 + $0x18] sm:$0xff]  }
 0xc8a   : > { %5642 = vmatpush1.bf16.msra.mxu1 %v7769_v0  ;;  %5669 = vmatprep.mubr.bf16.mxu1 %v5069_v2  ;;  %v5085_v0 = vsel %vm907_vm10, %v5083_v42, %v5084_v63 }
 0xc8b   : > { %5643 = vmatprep.subr.bf16.mxu1 %v7774_v1  ;;  %v5086_v1 = vrot.slane %v9022_v48, 2 }
 0xc8d   : > { %v5087_v2 = vsel %vm907_vm10, %v5084_v63, %v5086_v1 }
 0xc8e   : > { %5644 = vmatpush1.bf16.msra.mxu1 %v7772_v3  ;;  %v7835_v3 = vld [vmem:[#allocation16] sm:$0xff]  }
 0xc8f   : > { %5645 = vmatprep.subr.bf16.mxu1 %v7777_v4  ;;  %6760 = vmatprep.subr.bf16.mxu0 %v7835_v3  ;;  %v7836_v4 = vld [vmem:[#allocation16 + $0x8] sm:$0xff]  }
 0xc90   : > { %6761 = vmatpush3.bf16.msra.mxu0 %v7835_v3 }
 0xc91   : > { %6762 = vmatprep.subr.bf16.mxu0 %v7836_v4 }
 0xc92   : > { %5646 = vmatpush1.bf16.msra.mxu1 %v7775_v5  ;;  %v7837_v5 = vld [vmem:[#allocation16 + $0x10] sm:$0xff]  }
 0xc93   : > { %5647 = vmatprep.subr.bf16.mxu1 %v7780_v6  ;;  %v7839_v6 = vld [vmem:[#allocation16 + $0x20] sm:$0xff]  }
 0xc94   : > { %6763 = vmatpush3.bf16.msra.mxu0 %v7836_v4 }
 0xc95   : > { %6764 = vmatprep.subr.bf16.mxu0 %v7837_v5 }
 0xc96   : > { %5648 = vmatpush1.bf16.msra.mxu1 %v7778_v35  ;;  %v7841_v35 = vld [vmem:[#allocation16 + $0x30] sm:$0xff]  }
 0xc97   : > { %5649 = vmatprep.subr.bf16.mxu1 %v7783_v40  ;;  %v7842_v40 = vld [vmem:[#allocation16 + $0x38] sm:$0xff]  }
 0xc98   : > { %6765 = vmatpush3.bf16.msra.mxu0 %v7837_v5 }
 0xc99   : > { %6766 = vmatprep.subr.bf16.mxu0 %v7838_v15 }
 0xc9a   : > { %5650 = vmatpush1.bf16.msra.mxu1 %v7781_v46  ;;  %v5172_v46 = vld [vmem:[#allocation15 + $0xa] sm:$0x3] }
 0xc9b   : > { %5651 = vmatprep.subr.bf16.mxu1 %v7786_v8  ;;  %v5181_v8 = vrot.slane %v5172_v46, %v8740_v7  ;;  %v5177_v21 = vrot.slane %v5172_v46, %v8744_v27 }
 0xc9c   : > { %6767 = vmatpush3.bf16.msra.mxu0 %v7838_v15 }
 0xc9d   : > { %6768 = vmatprep.subr.bf16.mxu0 %v7839_v6 }
 0xc9e   : > { %5652 = vmatpush1.bf16.msra.mxu1 %v7784_v41 }
 0xc9f   : > { %5653 = vmatprep.subr.bf16.mxu1 %v7789_v9 }
 0xca0   : > { %6769 = vmatpush3.bf16.msra.mxu0 %v7839_v6 }
 0xca2   : > { %5654 = vmatpush1.bf16.msra.mxu1 %v7787_v10 }
 0xca3   : > { %5655 = vmatprep.subr.bf16.mxu1 %v7792_v22 }
 0xca6   : > { %5656 = vmatpush1.bf16.msra.mxu1 %v7790_v23 }
 0xca7   : > { %5657 = vmatprep.subr.bf16.mxu1 %v7795_v24 }
 0xcaa   : > { %5658 = vmatpush1.bf16.msra.mxu1 %v7793_v28 }
 0xcab   : > { %5659 = vmatprep.subr.bf16.mxu1 %v7798_v37 }
 0xcae   : > { %5660 = vmatpush1.bf16.msra.mxu1 %v7796_v38 }
 0xcaf   : > { %5661 = vmatprep.subr.bf16.mxu1 %v7801_v36 }
 0xcb2   : > { %5662 = vmatpush1.bf16.msra.mxu1 %v7799_v14 }
 0xcb3   : > { %5663 = vmatprep.subr.bf16.mxu1 %v7804_v13 }
 0xcb6   : > { %5664 = vmatpush1.bf16.msra.mxu1 %v7802_v12 }
 0xcb7   : > { %5665 = vmatprep.subr.bf16.mxu1 %v7807_v50 }
 0xcba   : > { %5666 = vmatpush1.bf16.msra.mxu1 %v7805_v16 }
 0xcbb   : > { %5667 = vmatprep.subr.bf16.mxu1 %v7810_v43 }
 0xcbe   : > { %5668 = vmatpush1.bf16.msra.mxu1 %v7808_v55 }
 0xcbf   : > { %5690 = vmatprep.subr.bf16.mxu1 %v7813_v18 }
 0xcc1   : > { %5670 = vmatmul.mubr.bf16.vlgmr.msra.gmra.mrb[32].mxu1 %v5053_v30 }
 0xcc2   : > { %5679 = vmatprep.mubr.bf16.mxu1 %v5078_v26  ;;  %5691 = vmatpush1.bf16.msra.mxu1 %v7811_v57 }
 0xcc3   : > { %5692 = vmatprep.subr.bf16.mxu1 %v7816_v58 }
 0xcc6   : > { %5693 = vmatpush1.bf16.msra.mxu1 %v7814_v32 }
 0xcc7   : > { %5694 = vmatprep.subr.bf16.mxu1 %v7819_v59 }
 0xcc9   : > { %5680 = vmatmul.mubr.bf16.gmra.mrb[36].mxu1 %v9014_v31  ;;  %v7832_v31 = vld [vmem:[#allocation13 + $0xef0] ss:$8 sps:$4 sm:$0xff]  }
 0xcca   : > { %5695 = vmatpush1.bf16.msra.mxu1 %v7817_v25  ;;  %5722 = vmatprep.mubr.bf16.mxu1 %v8304_v20 }
 0xccb   : > { %5696 = vmatprep.subr.bf16.mxu1 %v7822_v60 }
 0xcce   : > { %5697 = vmatpush1.bf16.msra.mxu1 %v7820_v61 }
 0xccf   : > { %5698 = vmatprep.subr.bf16.mxu1 %v7825_v45 }
 0xcd2   : > { %5699 = vmatpush1.bf16.msra.mxu1 %v7823_v51 }
 0xcd3   : > { %5700 = vmatprep.subr.bf16.mxu1 %v7828_v47 }
 0xcd6   : > { %5701 = vmatpush1.bf16.msra.mxu1 %v7826_v49 }
 0xcd7   : > { %5702 = vmatprep.subr.bf16.mxu1 %v7831_v39 }
 0xcda   : > { %5703 = vmatpush1.bf16.msra.mxu1 %v7829_v33 }
 0xcdb   : > { %5704 = vmatprep.subr.bf16.mxu1 %v7834_v62 }
 0xcde   : > { %5705 = vmatpush1.bf16.msra.mxu1 %v7832_v31 }
 0xce1   : > { %5723 = vmatmul.mubr.bf16.vlgmr.msra.gmra.mrb[32].mxu1 %v5085_v0 }
 0xce2   : > { %5732 = vmatprep.mubr.bf16.mxu1 %v8304_v20  ;;  %v7840_v20 = vld [vmem:[#allocation16 + $0x28] sm:$0xff]  }
 0xce3   : > { %6770 = vmatprep.subr.bf16.mxu0 %v7840_v20 }
 0xce4   : > { %6771 = vmatpush3.bf16.msra.mxu0 %v7840_v20 }
 0xce5   : > { %6772 = vmatprep.subr.bf16.mxu0 %v7841_v35 }
 0xce8   : > { %6773 = vmatpush3.bf16.msra.mxu0 %v7841_v35 }
 0xce9   : > { %5733 = vmatmul.mubr.bf16.gmra.mrb[36].mxu1 %v5087_v2  ;;  %6774 = vmatprep.subr.bf16.mxu0 %v7842_v40 }
 0xcec   : > { %6775 = vmatpush3.bf16.msra.mxu0 %v7842_v40 }
 0xdb4   : > { %v5724_v41 = vpop.f32.mrb[32].mxu1 }
 0xdb5   : > { %v5726_v9 = vpop.f32.mrb[33].mxu1  ;;  %v6826_v34 = vadd.f32 %v5724_v41, %v5177_v21 }
 0xdb6   : > { %v6827_v10 = vadd.f32 %v5726_v9, %v5181_v8  ;;  %v5728_v22 = vpop.f32.mrb[34].mxu1 }
 0xdb7   : > { %v5730_v23 = vpop.f32.mrb[35].mxu1  ;;  %v6828_v58 = vadd.f32 %v5728_v22, %v5177_v21 }
 0xdb8   : > { %v6671_v24 = vmul.f32 -1.442695, %v6827_v10  ;;  %v6829_v28 = vadd.f32 %v5730_v23, %v5181_v8 }
 0xdba   : > { %7915 = vpow2.f32 %v6671_v24  ;;  %v6672_v37 = vmul.f32 -1.442695, %v6829_v28 }
 0xdbc   : > { %7917 = vpow2.f32 %v6672_v37  ;;  %v5734_v38 = vpop.f32.mrb[36].mxu1 }
 0xdbd   : > { %v5736_v36 = vpop.f32.mrb[37].mxu1  ;;  %v6830_v60 = vadd.f32 %v5734_v38, %v5177_v21 }
 0xdbe   : > { %v6831_v14 = vadd.f32 %v5736_v36, %v5181_v8  ;;  %v5738_v13 = vpop.f32.mrb[38].mxu1 }
 0xdbf   : > { %v5740_v12 = vpop.f32.mrb[39].mxu1  ;;  %v6832_v47 = vadd.f32 %v5738_v13, %v5177_v21 }
 0xdc0   : > { %v6673_v48 = vmul.f32 -1.442695, %v6831_v14  ;;  %v6833_v50 = vadd.f32 %v5740_v12, %v5181_v8 }
 0xdc2   : > { %7919 = vpow2.f32 %v6673_v48  ;;  %v6674_v52 = vmul.f32 -1.442695, %v6833_v50 }
 0xdc4   : > { %v7916_v7 = vpop.eup %7915  ;;  %7921 = vpow2.f32 %v6674_v52 }
 0xdc5   : > { %v5755_v53 = vadd.f32 1.0, %v7916_v7 }
 0xdc6   : > { %v7918_v16 = vpop.eup %7917 }
 0xdc7   : > { %7923 = vrcp.f32 %v5755_v53  ;;  %v5756_v43 = vadd.f32 1.0, %v7918_v16 }
 0xdc9   : > { %7925 = vrcp.f32 %v5756_v43 }
 0xdcc   : > { %v7920_v54 = vpop.eup %7919 }
 0xdcd   : > { %v5757_v55 = vadd.f32 1.0, %v7920_v54 }
 0xdce   : > { %v7922_v18 = vpop.eup %7921 }
 0xdcf   : > { %7927 = vrcp.f32 %v5757_v55  ;;  %v5758_v56 = vadd.f32 1.0, %v7922_v18 }
 0xdd1   : > { %v7924_v57 = vpop.eup %7923  ;;  %7929 = vrcp.f32 %v5758_v56 }
 0xdd2   : > { %v5767_v30 = vmul.f32 %v7924_v57, %v6826_v34 }
 0xdd3   : > { %v7926_v26 = vpop.eup %7925 }
 0xdd4   : > { %v5768_v32 = vmul.f32 %v7926_v26, %v6828_v58  ;;  %v5771_v59 = vadd.f32 %v5767_v30, %v8985_v11  ;;  %v6675_v11 = vld [vmem:[#allocation18] ss:$0 sm:$0xff] }
 0xdd6   : > { %v5772_v25 = vadd.f32 %v5768_v32, %v8987_v19  ;;  %v5775_v61 = vmul.f32 0.70710677, %v5771_v59 }
 0xdd8   : > { %v5776_v45 = vmul.f32 0.70710677, %v5772_v25 }
 0xdd9   : > { %v7928_v51 = vpop.eup %7927 }
 0xdda   : > { %v5769_v27 = vmul.f32 %v7928_v51, %v6830_v60  ;;  %v5779_v49 = vpack.c.bf16 %v5776_v45, %v5775_v61 }
 0xddb   : > { %v7930_v39 = vpop.eup %7929 }
 0xddc   : > { %v5770_v33 = vmul.f32 %v7930_v39, %v6832_v47  ;;  %6776 = vmatprep.mubr.bf16.mxu0 %v5779_v49  ;;  %v5773_v62 = vadd.f32 %v5769_v27, %v8993_v17 }
 0xdde   : > { %v5774_v29 = vadd.f32 %v5770_v33, %v8995_v44  ;;  %v5777_v31 = vmul.f32 0.70710677, %v5773_v62 }
 0xde0   : > { %v5778_v42 = vmul.f32 0.70710677, %v5774_v29 }
 0xde2   : > { %v5780_v63 = vpack.c.bf16 %v5778_v42, %v5777_v31 }
 0xde4   : > { %6777 = vmatmul.mubr.bf16.vlgmr.msra.gmra.mrb[28].mxu0 %v5780_v63 }
 0xeb7   : > { %v6778_v19 = vpop.f32.mrb[28].mxu0 }
 0xeb8   : > { %v5895_v0 = vadd.f32 %v6778_v19, %v6675_v11  ;;  %v5886_v1 = vpop.f32.mrb[29].mxu0 }
 0xeb9   : > { %v5887_v2 = vadd.f32 %v6675_v11, %v5886_v1  ;;  %v6779_v3 = vpop.f32.mrb[30].mxu0 }
 0xeba   : > { %v6686_v4 = vmul.f32 -1.442695, %v5895_v0  ;;  %v5898_v5 = vadd.f32 %v6779_v3, %v6675_v11  ;;  %v5889_v15 = vpop.f32.mrb[31].mxu0 }
 0xebb   : > { %v6684_v6 = vmul.f32 -1.442695, %v5887_v2  ;;  %v5890_v20 = vadd.f32 %v6675_v11, %v5889_v15 }
 0xebc   : > { %7931 = vpow2.f32 %v6686_v4  ;;  %v6687_v35 = vmul.f32 -1.442695, %v5898_v5 }
 0xebd   : > { %7933 = vpow2.f32 %v6684_v6  ;;  %v6685_v17 = vmul.f32 -1.442695, %v5890_v20 }
 0xebe   : > { %7935 = vpow2.f32 %v6687_v35 }
 0xebf   : > { %7937 = vpow2.f32 %v6685_v17 }
 0xec6   : > { %v7932_v44 = vpop.eup %7931 }
 0xec7   : > { %v7934_v40 = vpop.eup %7933  ;;  %v5915_v46 = vadd.f32 1.0, %v7932_v44 }
 0xec8   : > { %v7936_v8 = vpop.eup %7935  ;;  %v5913_v41 = vadd.f32 1.0, %v7934_v40 }
 0xec9   : > { %v7938_v9 = vpop.eup %7937  ;;  %7939 = vrcp.f32 %v5915_v46  ;;  %v5916_v10 = vadd.f32 1.0, %v7936_v8 }
 0xeca   : > { %7941 = vrcp.f32 %v5913_v41  ;;  %v5914_v22 = vadd.f32 1.0, %v7938_v9 }
 0xecb   : > { %7943 = vrcp.f32 %v5916_v10 }
 0xecc   : > { %7945 = vrcp.f32 %v5914_v22 }
 0xed3   : > { %v7940_v23 = vpop.eup %7939 }
 0xed4   : > { %v7942_v24 = vpop.eup %7941  ;;  %5927 = vst [vmem:[%s459_s1 + $0x10] sm:$0xff] %v7940_v23 }
 0xed5   : > { %v7944_v28 = vpop.eup %7943  ;;  %5925 = vst [vmem:[%s459_s1] sm:$0xff] %v7942_v24 }
 0xed6   : > { %v7946_v37 = vpop.eup %7945  ;;  %5928 = vst [vmem:[%s459_s1 + $0x18] sm:$0xff] %v7944_v28 }
 0xed7   : > { %5926 = vst [vmem:[%s459_s1 + $0x8] sm:$0xff] %v7946_v37 }
 0xed8   : > { %8214 = shalt.err (!%p8211_p9)
}
 0xed9   : > { %s8215_s22 = scalar_lea.hbm %s9050_s28, 512  ;;  %s8219_s1 = scalar_lea.hbm %s9135_s24, 1024 }
 0xeda   : > { %p8216_p4 = scmp.ne.s32.totalorder %s9050_s28, %s8215_s22  ;;  %p8220_p2 = scmp.lt.u32.totalorder %s9050_s28, %s9135_s24 }
 0xedb   : > { %p8221_p6 = scmp.lt.u32.totalorder %s8219_s1, %s8215_s22  ;;  %p8223_p10 = scmp.lt.u32.totalorder %s8215_s22, %s9050_s28 }
 0xedc   : > { %p8217_p8 = pnand %p8216_p4, %p9136_p1 }
 0xedd   : > { %p8222_p5 = por %p8221_p6, %p8220_p2 }
 0xede   : > { %p8218_p0 = pneg %p8217_p8 }
 0xedf   : > { %p8224_p11 = por %p8223_p10, %p8222_p5 }
 0xee1   : > { %p8225_p12 = pnand %p8224_p11, %p8218_p0 }
 0xee3   : > { %8228 = shalt.err (!%p8225_p12)
}
 0xee4   : > { %s8306_s29 = smov 128   ;;  %s8307_s13 = smov 8  }
 0xee5   : > { %6960 = dma.vmem_to_hbm [thread:$0]  (%p9136_p1), %s9052_s23, 512, %s9050_s28, %s5930_s15, %s8306_s29, %s8306_s29, %s8307_s13  }
 0xee6 PF: > { %s5958_s14 = sand.u32 1, %s8271_s30   ;;  %p9137_p13 = scmp.ne.s32.totalorder %s9124_s26, 0 }
 0xee7   : > { %p9138_p3 = scmp.ge.s32.totalorder %s8283_s12, 2  ;;  %s5959_s9 = scalar_lea.sflag [#allocation6], %s5958_s14 }
 0xee9   : > { %p6992_p7 = pnand %p9138_p3, %p9137_p13 }
 0xeeb   : > { %8266 = dma.done.wait (!%p6992_p7), %s5959_s9, 512  }
 0xeec   : > { %8268 = vsyncadd (!%p6992_p7), %s5959_s9, 4294966784  ;;  %p26_p9 = scmp.ge.s32.totalorder %s8572_s19, 4   ;;  %s9139_s30 = smov %s8275_s10 }
 0xeed   : > { %s9140_s10 = smov %s8279_s11  ;;  %s9141_s11 = smov %s8583_s21 }
 0xeee   : > { %s9142_s12 = smov %s8572_s19  ;;  %28 = sbr.rel (!%p26_p9) target bundleno = 12 (0xc), region = 145 }
 0xef5   :  { %5964 = vsyncpa [#allocation5], 1 }
 0xef6   :  { %5966 = vsyncpa [#allocation5 + $0x1], 1 }
 0xef7   :  { %5967 = vsyncpa [#allocation8], 1 }
 0xef8   :  { %5968 = vsyncpa [#allocation11], 1 }
 0xef9   :  { %5969 = vsyncpa [#allocation14], 1 }
 0xefa   :  { %5970 = vsyncpa [#allocation17], 1 }
 0xefb   :  { %5971 = vsyncpa [#allocation6], 1 }
 0xefc   :  { %5973 = vsyncpa [#allocation6 + $0x1], 1 }

</bundles_post_ra>
